<compile_context>
chip_gen: v7x
topology: tpu7x:2x2x1
jax: 0.10.0
libtpu: 0.0.40
codegen_flags: <defaults>
</compile_context>

<pallas_src>
import functools

import jax
import jax.numpy as jnp
from jax import lax
from jax.experimental import pallas as pl
from jax.experimental.pallas import tpu as pltpu

LANE = 128


def _rup(x, m=LANE):
    return ((x + m - 1) // m) * m


# ----------------------------- Pallas kernels ------------------------------

def _make_conv_kernel(H, W, with_v2):
    """Fused: 3x3 'same' conv (in-kernel im2col over 9 taps) + bias + ReLU +
    2x2 maxpool (+ optional lane-packed 1x1 lateral with ReLU, added into
    dedicated output lanes). Operates on one batch image per grid step."""

    def kernel(*refs):
        if with_v2:
            xp_ref, w_ref, b_ref, wv_ref, bv_ref, o_ref, scr_ref = refs
        else:
            xp_ref, w_ref, b_ref, o_ref, scr_ref = refs
            wv_ref = bv_ref = None
        CO = o_ref.shape[-1]

        # conv: accumulate 9 shifted-window matmuls (K = CI, N = CO).
        acc = jnp.zeros((H * W, CO), jnp.float32)
        for kh in range(3):
            for kw in range(3):
                tap = xp_ref[0, kh:kh + H, kw:kw + W, :]          # (H, W, CI)
                tap2 = tap.reshape(H * W, tap.shape[-1])          # (H*W, CI)
                acc = acc + jnp.dot(tap2, w_ref[kh * 3 + kw],
                                    preferred_element_type=jnp.float32)
        acc = jnp.maximum(acc + b_ref[...], 0.0)                  # bias + ReLU

        # 2x2 max pool.  H direction first (aligned sublane slices) ...
        a3 = acc.reshape(H // 2, 2 * W, CO)
        hp = jnp.maximum(a3[:, :W, :], a3[:, W:, :])              # (H/2, W, CO)
        scr_ref[...] = hp.reshape((H // 2) * W, CO)
        # ... then W direction via stride-2 VMEM reads.
        npool = (H // 2) * (W // 2)
        ev = scr_ref[pl.ds(0, npool, stride=2), :]
        od = scr_ref[pl.ds(1, npool, stride=2), :]
        pooled = jnp.maximum(ev, od)                              # (H*W/4, CO)

        if with_v2:
            v2 = jnp.dot(pooled, wv_ref[...],
                         preferred_element_type=jnp.float32) + bv_ref[...]
            pooled = pooled + jnp.maximum(v2, 0.0)                # disjoint lanes

        o_ref[0] = pooled

    return kernel


def conv3x3_relu_pool(xp, w, b, wv=None, bv=None):
    """xp: (B, H+2, W+2, CI) padded NHWC.  w: (9, CI, CO). b/bv: (1, CO).
    Returns (B, (H/2)*(W/2), CO) pooled, lane-packed activations."""
    B, Hp2, Wp2, CI = xp.shape
    H, W = Hp2 - 2, Wp2 - 2
    CO = w.shape[-1]
    npool = (H // 2) * (W // 2)
    with_v2 = wv is not None

    in_specs = [
        pl.BlockSpec((1, Hp2, Wp2, CI), lambda i: (i, 0, 0, 0)),
        pl.BlockSpec((9, CI, CO), lambda i: (0, 0, 0)),
        pl.BlockSpec((1, CO), lambda i: (0, 0)),
    ]
    args = [xp, w, b]
    if with_v2:
        in_specs += [pl.BlockSpec((CO, CO), lambda i: (0, 0)),
                     pl.BlockSpec((1, CO), lambda i: (0, 0))]
        args += [wv, bv]

    return pl.pallas_call(
        _make_conv_kernel(H, W, with_v2),
        out_shape=jax.ShapeDtypeStruct((B, npool, CO), jnp.float32),
        grid=(B,),
        in_specs=in_specs,
        out_specs=pl.BlockSpec((1, npool, CO), lambda i: (i, 0, 0)),
        scratch_shapes=[pltpu.VMEM(((H // 2) * W, CO), jnp.float32)],
        compiler_params=pltpu.CompilerParams(
            dimension_semantics=("parallel",),
            vmem_limit_bytes=32 * 1024 * 1024),
    )(*args)


def _make_fc_kernel(has_lat, has_hl):
    """Whole FC stack: packed fc1, Vf1/Uf1 lateral, packed heads, Vfl/Ufl
    head laterals -- all as in-register matmuls on one (B, 16*C) input."""

    def kernel(*refs):
        it = iter(refs)
        xf = next(it); wfc = next(it); bfc = next(it)
        if has_lat:
            wvf1 = next(it); bvf1 = next(it); wuf1 = next(it); buf1 = next(it)
        wlast = next(it); blast = next(it)
        if has_hl:
            wvfl = next(it); bvfl = next(it); wufl = next(it); bufl = next(it)
        o_ref = next(it)

        x = xf[...]
        z1 = jnp.dot(x, wfc[...], preferred_element_type=jnp.float32) + bfc[...]
        if has_lat:
            vf = jnp.maximum(
                jnp.dot(x, wvf1[...], preferred_element_type=jnp.float32)
                + bvf1[...], 0.0)
            z1 = z1 + jnp.dot(vf, wuf1[...],
                              preferred_element_type=jnp.float32) + buf1[...]
        hpost = jnp.maximum(z1, 0.0)          # packs hf_prev1[0..t-1] and h
        y = jnp.dot(hpost, wlast[...],
                    preferred_element_type=jnp.float32) + blast[...]
        if has_hl:
            vfl = jnp.dot(hpost, wvfl[...],
                          preferred_element_type=jnp.float32) + bvfl[...]
            y = y + jnp.dot(vfl, wufl[...],
                            preferred_element_type=jnp.float32) + bufl[...]
        o_ref[...] = y

    return kernel


def fc_stack(xf, pk, t):
    has_lat = t > 0
    has_hl = t > 1
    args = [xf, pk["wfc"], pk["bfc"]]
    if has_lat:
        args += [pk["wvf1"], pk["bvf1"], pk["wuf1"], pk["buf1"]]
    args += [pk["wlast"], pk["blast"]]
    if has_hl:
        args += [pk["wvfl"], pk["bvfl"], pk["wufl"], pk["bufl"]]
    B = xf.shape[0]
    NY = pk["wlast"].shape[-1]
    return pl.pallas_call(
        _make_fc_kernel(has_lat, has_hl),
        out_shape=jax.ShapeDtypeStruct((B, NY), jnp.float32),
        compiler_params=pltpu.CompilerParams(
            vmem_limit_bytes=32 * 1024 * 1024),
    )(*args)


# ----------------------------- parameters -----------------------------------

def init_params(key, inputsize, taskcla):
    ncha, size, _ = inputsize
    ntasks = len(taskcla)
    expand_factor = 1.117
    sizec1 = int(expand_factor * 16 / ntasks)
    sizec2 = int(expand_factor * 32 / ntasks)
    sizefc1 = int(expand_factor * 100 / ntasks)
    s = (size // 2) // 2
    fcin = sizec2 * s * s

    keys = iter(jax.random.split(key, 512))

    def rnd(shape, scale=0.1):
        return scale * jax.random.normal(next(keys), shape, dtype=jnp.float32)

    P = {"sizec1": sizec1, "sizec2": sizec2, "sizefc1": sizefc1, "fcin": fcin}
    P["conv1"] = [(rnd((sizec1, ncha, 3, 3)), rnd((sizec1,))) for _ in range(ntasks)]
    P["conv2"] = [(rnd((sizec2, sizec1, 3, 3)), rnd((sizec2,))) for _ in range(ntasks)]
    P["fc1"] = [(rnd((sizefc1, fcin)), rnd((sizefc1,))) for _ in range(ntasks)]
    P["last"] = [(rnd((n, sizefc1)), rnd((n,))) for _, n in taskcla]
    for name in ("V2scale", "V2x1", "U2", "Vf1scale", "Vf1", "Uf1",
                 "Vflscale", "Vfl", "Ufl"):
        P[name] = []
    for tt, n in taskcla:
        if tt > 0:
            P["V2scale"].append(rnd((1, tt)))
            P["V2x1"].append((rnd((sizec1, tt * sizec1, 1, 1)), rnd((sizec1,))))
            P["U2"].append((rnd((sizec2, sizec1, 3, 3)), rnd((sizec2,))))
            P["Vf1scale"].append(rnd((1, tt)))
            P["Vf1"].append((rnd((fcin, tt * fcin)), rnd((fcin,))))
            P["Uf1"].append((rnd((sizefc1, fcin)), rnd((sizefc1,))))
            P["Vflscale"].append(rnd((1, tt)))
            P["Vfl"].append((rnd((sizefc1, tt * sizefc1)), rnd((sizefc1,))))
            P["Ufl"].append((rnd((n, sizefc1)), rnd((n,))))
    return P


# ---------------------- weight packing (free, one-time) ---------------------

def prepare_packed(P, taskcla, t, inputsize):
    ncha, size, _ = inputsize
    c1, c2, f1, fcin = P["sizec1"], P["sizec2"], P["sizefc1"], P["fcin"]
    s = (size // 2) // 2
    sp = s * s
    CI1 = _rup(ncha)
    n1 = (t + 1) * c1
    v2off = n1
    NP1 = _rup(n1 + (c1 if t > 0 else 0))
    NP2 = _rup((t + 1) * c2)
    NPF = _rup((t + 1) * f1)
    KF = sp * NP2

    pk = {"CI1": CI1, "NP1": NP1, "NP2": NP2, "NPF": NPF, "v2off": v2off}

    # --- conv1 of all task columns, lane-packed ---
    wc1 = jnp.zeros((9, CI1, NP1), jnp.float32)
    bc1 = jnp.zeros((1, NP1), jnp.float32)
    for j in range(t + 1):
        w, b = P["conv1"][j]                                   # (c1, ncha, 3, 3)
        wp = jnp.transpose(w, (2, 3, 1, 0)).reshape(9, ncha, c1)
        wc1 = wc1.at[:, :ncha, j * c1:(j + 1) * c1].set(wp)
        bc1 = bc1.at[0, j * c1:(j + 1) * c1].set(b)
    pk["wc1"], pk["bc1"] = wc1, bc1

    # --- V2x1 1x1 lateral; Embedding scale folded into its columns ---
    if t > 0:
        wv2 = jnp.zeros((NP1, NP1), jnp.float32)
        bv2 = jnp.zeros((1, NP1), jnp.float32)
        wv, bv = P["V2x1"][t - 1]                              # (c1, t*c1, 1, 1)
        sc = P["V2scale"][t - 1][0]
        for j in range(t):
            blk = wv[:, j * c1:(j + 1) * c1, 0, 0]             # (co, ci)
            wv2 = wv2.at[j * c1:(j + 1) * c1,
                         v2off:v2off + c1].set(sc[j] * blk.T)
        bv2 = bv2.at[0, v2off:v2off + c1].set(bv)
        pk["wv2"], pk["bv2"] = wv2, bv2

    # --- conv2 of all columns + U2 folded into task-t output columns ---
    wc2 = jnp.zeros((9, NP1, NP2), jnp.float32)
    bc2 = jnp.zeros((1, NP2), jnp.float32)
    for j in range(t + 1):
        w, b = P["conv2"][j]                                   # (c2, c1, 3, 3)
        wp = jnp.transpose(w, (2, 3, 1, 0)).reshape(9, c1, c2)
        wc2 = wc2.at[:, j * c1:(j + 1) * c1, j * c2:(j + 1) * c2].set(wp)
        bc2 = bc2.at[0, j * c2:(j + 1) * c2].set(b)
    if t > 0:
        wu, bu = P["U2"][t - 1]
        wp = jnp.transpose(wu, (2, 3, 1, 0)).reshape(9, c1, c2)
        wc2 = wc2.at[:, v2off:v2off + c1, t * c2:(t + 1) * c2].set(wp)
        bc2 = bc2.at[0, t * c2:(t + 1) * c2].add(bu)
    pk["wc2"], pk["bc2"] = wc2, bc2

    # --- fc1 of all columns; torch NCHW flatten folded into the rows ---
    wfc3 = jnp.zeros((sp, NP2, NPF), jnp.float32)
    bfc = jnp.zeros((1, NPF), jnp.float32)
    for j in range(t + 1):
        w, b = P["fc1"][j]                                     # (f1, c2*sp)
        wr = jnp.transpose(w.reshape(f1, c2, sp), (2, 1, 0))   # (sp, c2, f1)
        wfc3 = wfc3.at[:, j * c2:(j + 1) * c2, j * f1:(j + 1) * f1].set(wr)
        bfc = bfc.at[0, j * f1:(j + 1) * f1].set(b)
    pk["wfc"], pk["bfc"] = wfc3.reshape(KF, NPF), bfc

    # --- Vf1 / Uf1 lateral (scales folded, output lands in task-t columns) ---
    if t > 0:
        NVF = _rup(fcin)
        wvf3 = jnp.zeros((sp, NP2, NVF), jnp.float32)
        bvf1 = jnp.zeros((1, NVF), jnp.float32)
        wv, bv = P["Vf1"][t - 1]                               # (fcin, t*fcin)
        sc = P["Vf1scale"][t - 1][0]
        for j in range(t):
            blk = wv[:, j * fcin:(j + 1) * fcin]               # (fcin, fcin)
            blk = jnp.transpose(blk.reshape(fcin, c2, sp), (2, 1, 0))
            wvf3 = wvf3.at[:, j * c2:(j + 1) * c2, :fcin].set(sc[j] * blk)
        bvf1 = bvf1.at[0, :fcin].set(bv)
        wu, bu = P["Uf1"][t - 1]                               # (f1, fcin)
        wuf1 = jnp.zeros((NVF, NPF), jnp.float32)
        wuf1 = wuf1.at[:fcin, t * f1:(t + 1) * f1].set(wu.T)
        buf1 = jnp.zeros((1, NPF), jnp.float32)
        buf1 = buf1.at[0, t * f1:(t + 1) * f1].set(bu)
        pk["wvf1"], pk["bvf1"] = wvf3.reshape(KF, NVF), bvf1
        pk["wuf1"], pk["buf1"] = wuf1, buf1

    # --- all `last` heads lane-packed ---
    ns = [n for _, n in taskcla]
    offs = [0]
    for n in ns[:-1]:
        offs.append(offs[-1] + n)
    NY = _rup(sum(ns))
    wlast = jnp.zeros((NPF, NY), jnp.float32)
    blast = jnp.zeros((1, NY), jnp.float32)
    for tid, n in taskcla:
        w, b = P["last"][tid]                                  # (n, f1)
        src = tid if (t > 0 and tid < t) else t
        wlast = wlast.at[src * f1:(src + 1) * f1,
                         offs[tid]:offs[tid] + n].set(w.T)
        blast = blast.at[0, offs[tid]:offs[tid] + n].set(b)
    pk["wlast"], pk["blast"], pk["offs"], pk["NY"] = wlast, blast, offs, NY

    # --- Vfl / Ufl head laterals for 0 < tid < t ---
    if t > 1:
        NVFL = _rup((t - 1) * f1)
        wvfl = jnp.zeros((NPF, NVFL), jnp.float32)
        bvfl = jnp.zeros((1, NVFL), jnp.float32)
        wufl = jnp.zeros((NVFL, NY), jnp.float32)
        bufl = jnp.zeros((1, NY), jnp.float32)
        for tid in range(1, t):
            n = ns[tid]
            col0 = (tid - 1) * f1
            wv, bv = P["Vfl"][tid - 1]                         # (f1, tid*f1)
            sc = P["Vflscale"][tid - 1][0]
            for j in range(tid):
                wvfl = wvfl.at[j * f1:(j + 1) * f1, col0:col0 + f1].set(
                    sc[j] * wv[:, j * f1:(j + 1) * f1].T)
            bvfl = bvfl.at[0, col0:col0 + f1].set(bv)
            wu, bu = P["Ufl"][tid - 1]                         # (n, f1)
            wufl = wufl.at[col0:col0 + f1, offs[tid]:offs[tid] + n].set(wu.T)
            bufl = bufl.at[0, offs[tid]:offs[tid] + n].set(bu)
        pk["wvfl"], pk["bvfl"], pk["wufl"], pk["bufl"] = wvfl, bvfl, wufl, bufl

    return pk


# ------------------------------- forward -------------------------------------

def forward(pk, x_nchw, *, t, inputsize, taskcla):
    ncha, size, _ = inputsize
    B = x_nchw.shape[0]
    x = jnp.transpose(x_nchw, (0, 2, 3, 1)).astype(jnp.float32)   # NCHW -> NHWC
    xp = jnp.pad(x, ((0, 0), (1, 1), (1, 1), (0, pk["CI1"] - ncha)))

    if t > 0:
        h1 = conv3x3_relu_pool(xp, pk["wc1"], pk["bc1"], pk["wv2"], pk["bv2"])
    else:
        h1 = conv3x3_relu_pool(xp, pk["wc1"], pk["bc1"])
    hq = size // 2
    h1 = h1.reshape(B, hq, hq, pk["NP1"])
    xp2 = jnp.pad(h1, ((0, 0), (1, 1), (1, 1), (0, 0)))

    h2 = conv3x3_relu_pool(xp2, pk["wc2"], pk["bc2"])             # (B, sp, NP2)
    xf = h2.reshape(B, -1)                                        # (B, sp*NP2)

    yp = fc_stack(xf, pk, t)                                      # (B, NY)
    return [yp[:, pk["offs"][tid]:pk["offs"][tid] + n] for tid, n in taskcla]


# -------------------------- pure-JAX reference -------------------------------

def _ref_conv3x3(x, w, b):
    out = lax.conv_general_dilated(x, w, (1, 1), ((1, 1), (1, 1)),
                                   dimension_numbers=("NCHW", "OIHW", "NCHW"))
    return out + b[None, :, None, None]


def _ref_pool(x):
    B, C, H, W = x.shape
    return x.reshape(B, C, H // 2, 2, W // 2, 2).max(axis=(3, 5))


def ref_forward(P, taskcla, x, t):
    relu = lambda v: jnp.maximum(v, 0.0)
    B = x.shape[0]
    h = _ref_pool(relu(_ref_conv3x3(x, *P["conv1"][t])))
    if t > 0:
        h_prev1 = [_ref_pool(relu(_ref_conv3x3(x, *P["conv1"][j])))
                   for j in range(t)]
    h_pre = _ref_conv3x3(h, *P["conv2"][t])
    if t > 0:
        h_prev2 = [_ref_pool(relu(_ref_conv3x3(h_prev1[j], *P["conv2"][j])))
                   .reshape(B, -1) for j in range(t)]
        sc = P["V2scale"][t - 1][0]
        cat = jnp.concatenate([sc[j] * h_prev1[j] for j in range(t)], axis=1)
        wv, bv = P["V2x1"][t - 1]
        v = relu(jnp.einsum("oc,bchw->bohw", wv[:, :, 0, 0], cat)
                 + bv[None, :, None, None])
        h_pre = h_pre + _ref_conv3x3(v, *P["U2"][t - 1])
    h = _ref_pool(relu(h_pre)).reshape(B, -1)
    w, b = P["fc1"][t]
    h_pre = h @ w.T + b
    if t > 0:
        hf = [relu(h_prev2[j] @ P["fc1"][j][0].T + P["fc1"][j][1])
              for j in range(t)]
        sc = P["Vf1scale"][t - 1][0]
        catf = jnp.concatenate([sc[j] * h_prev2[j] for j in range(t)], axis=1)
        wv, bv = P["Vf1"][t - 1]
        wu, bu = P["Uf1"][t - 1]
        h_pre = h_pre + (relu(catf @ wv.T + bv) @ wu.T + bu)
    hcur = relu(h_pre)
    y = []
    for tid, n in taskcla:
        wl, bl = P["last"][tid]
        if t > 0 and tid < t:
            out = hf[tid] @ wl.T + bl
            if tid > 0:
                sc = P["Vflscale"][tid - 1][0]
                catl = jnp.concatenate([sc[j] * hf[j] for j in range(tid)], axis=1)
                wv, bv = P["Vfl"][tid - 1]
                wu, bu = P["Ufl"][tid - 1]
                out = out + ((catl @ wv.T + bv) @ wu.T + bu)
            y.append(out)
        else:
            y.append(hcur @ wl.T + bl)
    return y


# --------------------------------- main ---------------------------------------

if __name__ == "__main__":
    inputsize = (4, 16, 16)              # (ncha, size, size)
    taskcla = [(0, 5), (1, 6), (2, 7)]   # 3 tasks -> sizec1=5, sizec2=11, sizefc1=37

    key = jax.random.PRNGKey(0)
    pkey, xkey = jax.random.split(key)
    P = init_params(pkey, inputsize, taskcla)
    x = jax.random.normal(xkey, (2, 4, 16, 16), dtype=jnp.float32)  # NCHW

    for t in (2, 1, 0):                  # t=2 exercises every lateral module
        pk = prepare_packed(P, taskcla, t, inputsize)
        fwd = jax.jit(functools.partial(forward, pk, t=t,
                                        inputsize=inputsize, taskcla=taskcla))
        y = jax.block_until_ready(fwd(x))

        expected = [(2, n) for _, n in taskcla]
        assert [tuple(o.shape) for o in y] == expected, [o.shape for o in y]
        assert all(bool(jnp.all(jnp.isfinite(o))) for o in y)

        yref = ref_forward(P, taskcla, x, t)
        for oi, (a, b) in enumerate(zip(y, yref)):
            maxdiff = float(jnp.max(jnp.abs(a - b)))
            assert jnp.allclose(a, b, atol=2e-2, rtol=2e-2), \
                f"t={t} head {oi} maxdiff={maxdiff}"

    print("KERNEL_OK")
</pallas_src>

<mosaic_0001>
module attributes {stable_mosaic.version = 11 : i64} {
  func.func @kernel(%arg0: i32, %arg1: memref<1x18x18x128xf32, #tpu.memory_space<vmem>>, %arg2: memref<9x128x128xf32, #tpu.memory_space<vmem>>, %arg3: memref<1x128xf32, #tpu.memory_space<vmem>>, %arg4: memref<128x128xf32, #tpu.memory_space<vmem>>, %arg5: memref<1x128xf32, #tpu.memory_space<vmem>>, %arg6: memref<1x64x128xf32, #tpu.memory_space<vmem>>, %arg7: memref<128x128xf32, #tpu.memory_space<vmem>>) attributes {dimension_semantics = [#tpu.dimension_semantics<parallel>], iteration_bounds = array<i64: 2>, scalar_prefetch = 0 : i64, scratch_operands = 1 : i64, tpu.core_type = #tpu.core_type<tc>, window_params = [{transform_indices = @transform_0, window_bounds = array<i64: 1, 18, 18, 128>}, {pipeline_mode = #tpu.pipeline_mode<synchronous>, transform_indices = @transform_1, window_bounds = array<i64: 9, 128, 128>}, {pipeline_mode = #tpu.pipeline_mode<synchronous>, transform_indices = @transform_2, window_bounds = array<i64: 1, 128>}, {pipeline_mode = #tpu.pipeline_mode<synchronous>, transform_indices = @transform_3, window_bounds = array<i64: 128, 128>}, {pipeline_mode = #tpu.pipeline_mode<synchronous>, transform_indices = @transform_4, window_bounds = array<i64: 1, 128>}, {transform_indices = @transform_5, window_bounds = array<i64: 1, 64, 128>}]} {
    %cst = arith.constant 0.000000e+00 : f32
    %0 = vector.broadcast %cst : f32 to vector<256x128xf32>
    %c0 = arith.constant 0 : index
    %c0_0 = arith.constant 0 : index
    %c0_1 = arith.constant 0 : index
    %c0_2 = arith.constant 0 : index
    %1 = vector.load %arg1[%c0, %c0_0, %c0_1, %c0_2] : memref<1x18x18x128xf32, #tpu.memory_space<vmem>>, vector<1x16x16x128xf32>
    %2 = vector.shape_cast %1 : vector<1x16x16x128xf32> to vector<16x16x128xf32>
    %3 = vector.shape_cast %2 : vector<16x16x128xf32> to vector<256x128xf32>
    %c0_3 = arith.constant 0 : index
    %c0_4 = arith.constant 0 : index
    %c0_5 = arith.constant 0 : index
    %4 = vector.load %arg2[%c0_3, %c0_4, %c0_5] : memref<9x128x128xf32, #tpu.memory_space<vmem>>, vector<1x128x128xf32>
    %5 = vector.shape_cast %4 : vector<1x128x128xf32> to vector<128x128xf32>
    %cst_6 = arith.constant dense<0.000000e+00> : vector<256x128xf32>
    %6 = tpu.matmul %3, %5, %cst_6 {dimension_numbers = #tpu.dot_dimension_numbers<[1], [0], [0], [1], [0, 0, 1, 1], [], []>} : vector<256x128xf32>, vector<128x128xf32>, vector<256x128xf32> -> vector<256x128xf32>
    %7 = arith.addf %0, %6 : vector<256x128xf32>
    %c0_7 = arith.constant 0 : index
    %c0_8 = arith.constant 0 : index
    %c1 = arith.constant 1 : index
    %c0_9 = arith.constant 0 : index
    %8 = vector.load %arg1[%c0_7, %c0_8, %c1, %c0_9] : memref<1x18x18x128xf32, #tpu.memory_space<vmem>>, vector<1x16x16x128xf32>
    %9 = vector.shape_cast %8 : vector<1x16x16x128xf32> to vector<16x16x128xf32>
    %10 = vector.shape_cast %9 : vector<16x16x128xf32> to vector<256x128xf32>
    %c1_10 = arith.constant 1 : index
    %c0_11 = arith.constant 0 : index
    %c0_12 = arith.constant 0 : index
    %11 = vector.load %arg2[%c1_10, %c0_11, %c0_12] : memref<9x128x128xf32, #tpu.memory_space<vmem>>, vector<1x128x128xf32>
    %12 = vector.shape_cast %11 : vector<1x128x128xf32> to vector<128x128xf32>
    %cst_13 = arith.constant dense<0.000000e+00> : vector<256x128xf32>
    %13 = tpu.matmul %10, %12, %cst_13 {dimension_numbers = #tpu.dot_dimension_numbers<[1], [0], [0], [1], [0, 0, 1, 1], [], []>} : vector<256x128xf32>, vector<128x128xf32>, vector<256x128xf32> -> vector<256x128xf32>
    %14 = arith.addf %7, %13 : vector<256x128xf32>
    %c0_14 = arith.constant 0 : index
    %c0_15 = arith.constant 0 : index
    %c2 = arith.constant 2 : index
    %c0_16 = arith.constant 0 : index
    %15 = vector.load %arg1[%c0_14, %c0_15, %c2, %c0_16] : memref<1x18x18x128xf32, #tpu.memory_space<vmem>>, vector<1x16x16x128xf32>
    %16 = vector.shape_cast %15 : vector<1x16x16x128xf32> to vector<16x16x128xf32>
    %17 = vector.shape_cast %16 : vector<16x16x128xf32> to vector<256x128xf32>
    %c2_17 = arith.constant 2 : index
    %c0_18 = arith.constant 0 : index
    %c0_19 = arith.constant 0 : index
    %18 = vector.load %arg2[%c2_17, %c0_18, %c0_19] : memref<9x128x128xf32, #tpu.memory_space<vmem>>, vector<1x128x128xf32>
    %19 = vector.shape_cast %18 : vector<1x128x128xf32> to vector<128x128xf32>
    %cst_20 = arith.constant dense<0.000000e+00> : vector<256x128xf32>
    %20 = tpu.matmul %17, %19, %cst_20 {dimension_numbers = #tpu.dot_dimension_numbers<[1], [0], [0], [1], [0, 0, 1, 1], [], []>} : vector<256x128xf32>, vector<128x128xf32>, vector<256x128xf32> -> vector<256x128xf32>
    %21 = arith.addf %14, %20 : vector<256x128xf32>
    %c0_21 = arith.constant 0 : index
    %c1_22 = arith.constant 1 : index
    %c0_23 = arith.constant 0 : index
    %c0_24 = arith.constant 0 : index
    %22 = vector.load %arg1[%c0_21, %c1_22, %c0_23, %c0_24] : memref<1x18x18x128xf32, #tpu.memory_space<vmem>>, vector<1x16x16x128xf32>
    %23 = vector.shape_cast %22 : vector<1x16x16x128xf32> to vector<16x16x128xf32>
    %24 = vector.shape_cast %23 : vector<16x16x128xf32> to vector<256x128xf32>
    %c3 = arith.constant 3 : index
    %c0_25 = arith.constant 0 : index
    %c0_26 = arith.constant 0 : index
    %25 = vector.load %arg2[%c3, %c0_25, %c0_26] : memref<9x128x128xf32, #tpu.memory_space<vmem>>, vector<1x128x128xf32>
    %26 = vector.shape_cast %25 : vector<1x128x128xf32> to vector<128x128xf32>
    %cst_27 = arith.constant dense<0.000000e+00> : vector<256x128xf32>
    %27 = tpu.matmul %24, %26, %cst_27 {dimension_numbers = #tpu.dot_dimension_numbers<[1], [0], [0], [1], [0, 0, 1, 1], [], []>} : vector<256x128xf32>, vector<128x128xf32>, vector<256x128xf32> -> vector<256x128xf32>
    %28 = arith.addf %21, %27 : vector<256x128xf32>
    %c0_28 = arith.constant 0 : index
    %c1_29 = arith.constant 1 : index
    %c1_30 = arith.constant 1 : index
    %c0_31 = arith.constant 0 : index
    %29 = vector.load %arg1[%c0_28, %c1_29, %c1_30, %c0_31] : memref<1x18x18x128xf32, #tpu.memory_space<vmem>>, vector<1x16x16x128xf32>
    %30 = vector.shape_cast %29 : vector<1x16x16x128xf32> to vector<16x16x128xf32>
    %31 = vector.shape_cast %30 : vector<16x16x128xf32> to vector<256x128xf32>
    %c4 = arith.constant 4 : index
    %c0_32 = arith.constant 0 : index
    %c0_33 = arith.constant 0 : index
    %32 = vector.load %arg2[%c4, %c0_32, %c0_33] : memref<9x128x128xf32, #tpu.memory_space<vmem>>, vector<1x128x128xf32>
    %33 = vector.shape_cast %32 : vector<1x128x128xf32> to vector<128x128xf32>
    %cst_34 = arith.constant dense<0.000000e+00> : vector<256x128xf32>
    %34 = tpu.matmul %31, %33, %cst_34 {dimension_numbers = #tpu.dot_dimension_numbers<[1], [0], [0], [1], [0, 0, 1, 1], [], []>} : vector<256x128xf32>, vector<128x128xf32>, vector<256x128xf32> -> vector<256x128xf32>
    %35 = arith.addf %28, %34 : vector<256x128xf32>
    %c0_35 = arith.constant 0 : index
    %c1_36 = arith.constant 1 : index
    %c2_37 = arith.constant 2 : index
    %c0_38 = arith.constant 0 : index
    %36 = vector.load %arg1[%c0_35, %c1_36, %c2_37, %c0_38] : memref<1x18x18x128xf32, #tpu.memory_space<vmem>>, vector<1x16x16x128xf32>
    %37 = vector.shape_cast %36 : vector<1x16x16x128xf32> to vector<16x16x128xf32>
    %38 = vector.shape_cast %37 : vector<16x16x128xf32> to vector<256x128xf32>
    %c5 = arith.constant 5 : index
    %c0_39 = arith.constant 0 : index
    %c0_40 = arith.constant 0 : index
    %39 = vector.load %arg2[%c5, %c0_39, %c0_40] : memref<9x128x128xf32, #tpu.memory_space<vmem>>, vector<1x128x128xf32>
    %40 = vector.shape_cast %39 : vector<1x128x128xf32> to vector<128x128xf32>
    %cst_41 = arith.constant dense<0.000000e+00> : vector<256x128xf32>
    %41 = tpu.matmul %38, %40, %cst_41 {dimension_numbers = #tpu.dot_dimension_numbers<[1], [0], [0], [1], [0, 0, 1, 1], [], []>} : vector<256x128xf32>, vector<128x128xf32>, vector<256x128xf32> -> vector<256x128xf32>
    %42 = arith.addf %35, %41 : vector<256x128xf32>
    %c0_42 = arith.constant 0 : index
    %c2_43 = arith.constant 2 : index
    %c0_44 = arith.constant 0 : index
    %c0_45 = arith.constant 0 : index
    %43 = vector.load %arg1[%c0_42, %c2_43, %c0_44, %c0_45] : memref<1x18x18x128xf32, #tpu.memory_space<vmem>>, vector<1x16x16x128xf32>
    %44 = vector.shape_cast %43 : vector<1x16x16x128xf32> to vector<16x16x128xf32>
    %45 = vector.shape_cast %44 : vector<16x16x128xf32> to vector<256x128xf32>
    %c6 = arith.constant 6 : index
    %c0_46 = arith.constant 0 : index
    %c0_47 = arith.constant 0 : index
    %46 = vector.load %arg2[%c6, %c0_46, %c0_47] : memref<9x128x128xf32, #tpu.memory_space<vmem>>, vector<1x128x128xf32>
    %47 = vector.shape_cast %46 : vector<1x128x128xf32> to vector<128x128xf32>
    %cst_48 = arith.constant dense<0.000000e+00> : vector<256x128xf32>
    %48 = tpu.matmul %45, %47, %cst_48 {dimension_numbers = #tpu.dot_dimension_numbers<[1], [0], [0], [1], [0, 0, 1, 1], [], []>} : vector<256x128xf32>, vector<128x128xf32>, vector<256x128xf32> -> vector<256x128xf32>
    %49 = arith.addf %42, %48 : vector<256x128xf32>
    %c0_49 = arith.constant 0 : index
    %c2_50 = arith.constant 2 : index
    %c1_51 = arith.constant 1 : index
    %c0_52 = arith.constant 0 : index
    %50 = vector.load %arg1[%c0_49, %c2_50, %c1_51, %c0_52] : memref<1x18x18x128xf32, #tpu.memory_space<vmem>>, vector<1x16x16x128xf32>
    %51 = vector.shape_cast %50 : vector<1x16x16x128xf32> to vector<16x16x128xf32>
    %52 = vector.shape_cast %51 : vector<16x16x128xf32> to vector<256x128xf32>
    %c7 = arith.constant 7 : index
    %c0_53 = arith.constant 0 : index
    %c0_54 = arith.constant 0 : index
    %53 = vector.load %arg2[%c7, %c0_53, %c0_54] : memref<9x128x128xf32, #tpu.memory_space<vmem>>, vector<1x128x128xf32>
    %54 = vector.shape_cast %53 : vector<1x128x128xf32> to vector<128x128xf32>
    %cst_55 = arith.constant dense<0.000000e+00> : vector<256x128xf32>
    %55 = tpu.matmul %52, %54, %cst_55 {dimension_numbers = #tpu.dot_dimension_numbers<[1], [0], [0], [1], [0, 0, 1, 1], [], []>} : vector<256x128xf32>, vector<128x128xf32>, vector<256x128xf32> -> vector<256x128xf32>
    %56 = arith.addf %49, %55 : vector<256x128xf32>
    %c0_56 = arith.constant 0 : index
    %c2_57 = arith.constant 2 : index
    %c2_58 = arith.constant 2 : index
    %c0_59 = arith.constant 0 : index
    %57 = vector.load %arg1[%c0_56, %c2_57, %c2_58, %c0_59] : memref<1x18x18x128xf32, #tpu.memory_space<vmem>>, vector<1x16x16x128xf32>
    %58 = vector.shape_cast %57 : vector<1x16x16x128xf32> to vector<16x16x128xf32>
    %59 = vector.shape_cast %58 : vector<16x16x128xf32> to vector<256x128xf32>
    %c8 = arith.constant 8 : index
    %c0_60 = arith.constant 0 : index
    %c0_61 = arith.constant 0 : index
    %60 = vector.load %arg2[%c8, %c0_60, %c0_61] : memref<9x128x128xf32, #tpu.memory_space<vmem>>, vector<1x128x128xf32>
    %61 = vector.shape_cast %60 : vector<1x128x128xf32> to vector<128x128xf32>
    %cst_62 = arith.constant dense<0.000000e+00> : vector<256x128xf32>
    %62 = tpu.matmul %59, %61, %cst_62 {dimension_numbers = #tpu.dot_dimension_numbers<[1], [0], [0], [1], [0, 0, 1, 1], [], []>} : vector<256x128xf32>, vector<128x128xf32>, vector<256x128xf32> -> vector<256x128xf32>
    %63 = arith.addf %56, %62 : vector<256x128xf32>
    %c0_63 = arith.constant 0 : index
    %c0_64 = arith.constant 0 : index
    %64 = vector.load %arg3[%c0_63, %c0_64] : memref<1x128xf32, #tpu.memory_space<vmem>>, vector<1x128xf32>
    %65 = vector.broadcast %64 : vector<1x128xf32> to vector<256x128xf32>
    %66 = arith.addf %63, %65 : vector<256x128xf32>
    %cst_65 = arith.constant 0.000000e+00 : f32
    %67 = vector.broadcast %cst_65 : f32 to vector<256x128xf32>
    %68 = arith.maximumf %66, %67 : vector<256x128xf32>
    %69 = vector.shape_cast %68 : vector<256x128xf32> to vector<8x32x128xf32>
    %70 = vector.extract_strided_slice %69 {offsets = [0, 0, 0], sizes = [8, 16, 128], strides = [1, 1, 1]} : vector<8x32x128xf32> to vector<8x16x128xf32>
    %71 = vector.extract_strided_slice %69 {offsets = [0, 16, 0], sizes = [8, 16, 128], strides = [1, 1, 1]} : vector<8x32x128xf32> to vector<8x16x128xf32>
    %72 = arith.maximumf %70, %71 : vector<8x16x128xf32>
    %73 = vector.shape_cast %72 : vector<8x16x128xf32> to vector<128x128xf32>
    %c0_66 = arith.constant 0 : index
    %c0_67 = arith.constant 0 : index
    %74 = vector.load %arg7[%c0_66, %c0_67] : memref<128x128xf32, #tpu.memory_space<vmem>>, vector<128x128xf32>
    tpu.vector_store %arg7[%c0_66, %c0_67], %73 {strides = array<i32>} : memref<128x128xf32, #tpu.memory_space<vmem>>, vector<128x128xf32>,
    %c0_68 = arith.constant 0 : index
    %c0_69 = arith.constant 0 : index
    %75 = tpu.strided_load %arg7[%c0_68, %c0_69] {strides = array<i32: 2, 1>} : memref<128x128xf32, #tpu.memory_space<vmem>>, vector<64x128xf32>
    %c1_70 = arith.constant 1 : index
    %c0_71 = arith.constant 0 : index
    %76 = tpu.strided_load %arg7[%c1_70, %c0_71] {strides = array<i32: 2, 1>} : memref<128x128xf32, #tpu.memory_space<vmem>>, vector<64x128xf32>
    %77 = arith.maximumf %75, %76 : vector<64x128xf32>
    %c0_72 = arith.constant 0 : index
    %c0_73 = arith.constant 0 : index
    %78 = vector.load %arg4[%c0_72, %c0_73] : memref<128x128xf32, #tpu.memory_space<vmem>>, vector<128x128xf32>
    %cst_74 = arith.constant dense<0.000000e+00> : vector<64x128xf32>
    %79 = tpu.matmul %77, %78, %cst_74 {dimension_numbers = #tpu.dot_dimension_numbers<[1], [0], [0], [1], [0, 0, 1, 1], [], []>} : vector<64x128xf32>, vector<128x128xf32>, vector<64x128xf32> -> vector<64x128xf32>
    %c0_75 = arith.constant 0 : index
    %c0_76 = arith.constant 0 : index
    %80 = vector.load %arg5[%c0_75, %c0_76] : memref<1x128xf32, #tpu.memory_space<vmem>>, vector<1x128xf32>
    %81 = vector.broadcast %80 : vector<1x128xf32> to vector<64x128xf32>
    %82 = arith.addf %79, %81 : vector<64x128xf32>
    %cst_77 = arith.constant 0.000000e+00 : f32
    %83 = vector.broadcast %cst_77 : f32 to vector<64x128xf32>
    %84 = arith.maximumf %82, %83 : vector<64x128xf32>
    %85 = arith.addf %77, %84 : vector<64x128xf32>
    %c0_78 = arith.constant 0 : index
    %c0_79 = arith.constant 0 : index
    %c0_80 = arith.constant 0 : index
    %86 = vector.load %arg6[%c0_78, %c0_79, %c0_80] : memref<1x64x128xf32, #tpu.memory_space<vmem>>, vector<1x64x128xf32>
    %87 = vector.shape_cast %86 : vector<1x64x128xf32> to vector<64x128xf32>
    %88 = vector.shape_cast %85 : vector<64x128xf32> to vector<1x64x128xf32>
    tpu.vector_store %arg6[%c0_78, %c0_79, %c0_80], %88 {strides = array<i32>} : memref<1x64x128xf32, #tpu.memory_space<vmem>>, vector<1x64x128xf32>,
    return
  }
  func.func @transform_0(%arg0: i32) -> (i32, i32, i32, i32) {
    %c0_i32 = arith.constant 0 : i32
    %c0_i32_0 = arith.constant 0 : i32
    %c0_i32_1 = arith.constant 0 : i32
    %c0_i32_2 = arith.constant 0 : i32
    return %arg0, %c0_i32, %c0_i32_0, %c0_i32_1 : i32, i32, i32, i32
  }
  func.func @transform_1(%arg0: i32) -> (i32, i32, i32) {
    %c0_i32 = arith.constant 0 : i32
    %c0_i32_0 = arith.constant 0 : i32
    %c0_i32_1 = arith.constant 0 : i32
    %c0_i32_2 = arith.constant 0 : i32
    return %c0_i32, %c0_i32_0, %c0_i32_1 : i32, i32, i32
  }
  func.func @transform_2(%arg0: i32) -> (i32, i32) {
    %c0_i32 = arith.constant 0 : i32
    %c0_i32_0 = arith.constant 0 : i32
    %c0_i32_1 = arith.constant 0 : i32
    return %c0_i32, %c0_i32_0 : i32, i32
  }
  func.func @transform_3(%arg0: i32) -> (i32, i32) {
    %c0_i32 = arith.constant 0 : i32
    %c0_i32_0 = arith.constant 0 : i32
    %c0_i32_1 = arith.constant 0 : i32
    return %c0_i32, %c0_i32_0 : i32, i32
  }
  func.func @transform_4(%arg0: i32) -> (i32, i32) {
    %c0_i32 = arith.constant 0 : i32
    %c0_i32_0 = arith.constant 0 : i32
    %c0_i32_1 = arith.constant 0 : i32
    return %c0_i32, %c0_i32_0 : i32, i32
  }
  func.func @transform_5(%arg0: i32) -> (i32, i32, i32) {
    %c0_i32 = arith.constant 0 : i32
    %c0_i32_0 = arith.constant 0 : i32
    %c0_i32_1 = arith.constant 0 : i32
    return %arg0, %c0_i32, %c0_i32_0 : i32, i32, i32
  }
}

module attributes {stable_mosaic.version = 11 : i64} {
  func.func @kernel(%arg0: i32, %arg1: memref<1x10x10x128xf32, #tpu.memory_space<vmem>>, %arg2: memref<9x128x128xf32, #tpu.memory_space<vmem>>, %arg3: memref<1x128xf32, #tpu.memory_space<vmem>>, %arg4: memref<1x16x128xf32, #tpu.memory_space<vmem>>, %arg5: memref<32x128xf32, #tpu.memory_space<vmem>>) attributes {dimension_semantics = [#tpu.dimension_semantics<parallel>], iteration_bounds = array<i64: 2>, scalar_prefetch = 0 : i64, scratch_operands = 1 : i64, tpu.core_type = #tpu.core_type<tc>, window_params = [{transform_indices = @transform_0, window_bounds = array<i64: 1, 10, 10, 128>}, {pipeline_mode = #tpu.pipeline_mode<synchronous>, transform_indices = @transform_1, window_bounds = array<i64: 9, 128, 128>}, {pipeline_mode = #tpu.pipeline_mode<synchronous>, transform_indices = @transform_2, window_bounds = array<i64: 1, 128>}, {transform_indices = @transform_3, window_bounds = array<i64: 1, 16, 128>}]} {
    %cst = arith.constant 0.000000e+00 : f32
    %0 = vector.broadcast %cst : f32 to vector<64x128xf32>
    %c0 = arith.constant 0 : index
    %c0_0 = arith.constant 0 : index
    %c0_1 = arith.constant 0 : index
    %c0_2 = arith.constant 0 : index
    %1 = vector.load %arg1[%c0, %c0_0, %c0_1, %c0_2] : memref<1x10x10x128xf32, #tpu.memory_space<vmem>>, vector<1x8x8x128xf32>
    %2 = vector.shape_cast %1 : vector<1x8x8x128xf32> to vector<8x8x128xf32>
    %3 = vector.shape_cast %2 : vector<8x8x128xf32> to vector<64x128xf32>
    %c0_3 = arith.constant 0 : index
    %c0_4 = arith.constant 0 : index
    %c0_5 = arith.constant 0 : index
    %4 = vector.load %arg2[%c0_3, %c0_4, %c0_5] : memref<9x128x128xf32, #tpu.memory_space<vmem>>, vector<1x128x128xf32>
    %5 = vector.shape_cast %4 : vector<1x128x128xf32> to vector<128x128xf32>
    %cst_6 = arith.constant dense<0.000000e+00> : vector<64x128xf32>
    %6 = tpu.matmul %3, %5, %cst_6 {dimension_numbers = #tpu.dot_dimension_numbers<[1], [0], [0], [1], [0, 0, 1, 1], [], []>} : vector<64x128xf32>, vector<128x128xf32>, vector<64x128xf32> -> vector<64x128xf32>
    %7 = arith.addf %0, %6 : vector<64x128xf32>
    %c0_7 = arith.constant 0 : index
    %c0_8 = arith.constant 0 : index
    %c1 = arith.constant 1 : index
    %c0_9 = arith.constant 0 : index
    %8 = vector.load %arg1[%c0_7, %c0_8, %c1, %c0_9] : memref<1x10x10x128xf32, #tpu.memory_space<vmem>>, vector<1x8x8x128xf32>
    %9 = vector.shape_cast %8 : vector<1x8x8x128xf32> to vector<8x8x128xf32>
    %10 = vector.shape_cast %9 : vector<8x8x128xf32> to vector<64x128xf32>
    %c1_10 = arith.constant 1 : index
    %c0_11 = arith.constant 0 : index
    %c0_12 = arith.constant 0 : index
    %11 = vector.load %arg2[%c1_10, %c0_11, %c0_12] : memref<9x128x128xf32, #tpu.memory_space<vmem>>, vector<1x128x128xf32>
    %12 = vector.shape_cast %11 : vector<1x128x128xf32> to vector<128x128xf32>
    %cst_13 = arith.constant dense<0.000000e+00> : vector<64x128xf32>
    %13 = tpu.matmul %10, %12, %cst_13 {dimension_numbers = #tpu.dot_dimension_numbers<[1], [0], [0], [1], [0, 0, 1, 1], [], []>} : vector<64x128xf32>, vector<128x128xf32>, vector<64x128xf32> -> vector<64x128xf32>
    %14 = arith.addf %7, %13 : vector<64x128xf32>
    %c0_14 = arith.constant 0 : index
    %c0_15 = arith.constant 0 : index
    %c2 = arith.constant 2 : index
    %c0_16 = arith.constant 0 : index
    %15 = vector.load %arg1[%c0_14, %c0_15, %c2, %c0_16] : memref<1x10x10x128xf32, #tpu.memory_space<vmem>>, vector<1x8x8x128xf32>
    %16 = vector.shape_cast %15 : vector<1x8x8x128xf32> to vector<8x8x128xf32>
    %17 = vector.shape_cast %16 : vector<8x8x128xf32> to vector<64x128xf32>
    %c2_17 = arith.constant 2 : index
    %c0_18 = arith.constant 0 : index
    %c0_19 = arith.constant 0 : index
    %18 = vector.load %arg2[%c2_17, %c0_18, %c0_19] : memref<9x128x128xf32, #tpu.memory_space<vmem>>, vector<1x128x128xf32>
    %19 = vector.shape_cast %18 : vector<1x128x128xf32> to vector<128x128xf32>
    %cst_20 = arith.constant dense<0.000000e+00> : vector<64x128xf32>
    %20 = tpu.matmul %17, %19, %cst_20 {dimension_numbers = #tpu.dot_dimension_numbers<[1], [0], [0], [1], [0, 0, 1, 1], [], []>} : vector<64x128xf32>, vector<128x128xf32>, vector<64x128xf32> -> vector<64x128xf32>
    %21 = arith.addf %14, %20 : vector<64x128xf32>
    %c0_21 = arith.constant 0 : index
    %c1_22 = arith.constant 1 : index
    %c0_23 = arith.constant 0 : index
    %c0_24 = arith.constant 0 : index
    %22 = vector.load %arg1[%c0_21, %c1_22, %c0_23, %c0_24] : memref<1x10x10x128xf32, #tpu.memory_space<vmem>>, vector<1x8x8x128xf32>
    %23 = vector.shape_cast %22 : vector<1x8x8x128xf32> to vector<8x8x128xf32>
    %24 = vector.shape_cast %23 : vector<8x8x128xf32> to vector<64x128xf32>
    %c3 = arith.constant 3 : index
    %c0_25 = arith.constant 0 : index
    %c0_26 = arith.constant 0 : index
    %25 = vector.load %arg2[%c3, %c0_25, %c0_26] : memref<9x128x128xf32, #tpu.memory_space<vmem>>, vector<1x128x128xf32>
    %26 = vector.shape_cast %25 : vector<1x128x128xf32> to vector<128x128xf32>
    %cst_27 = arith.constant dense<0.000000e+00> : vector<64x128xf32>
    %27 = tpu.matmul %24, %26, %cst_27 {dimension_numbers = #tpu.dot_dimension_numbers<[1], [0], [0], [1], [0, 0, 1, 1], [], []>} : vector<64x128xf32>, vector<128x128xf32>, vector<64x128xf32> -> vector<64x128xf32>
    %28 = arith.addf %21, %27 : vector<64x128xf32>
    %c0_28 = arith.constant 0 : index
    %c1_29 = arith.constant 1 : index
    %c1_30 = arith.constant 1 : index
    %c0_31 = arith.constant 0 : index
    %29 = vector.load %arg1[%c0_28, %c1_29, %c1_30, %c0_31] : memref<1x10x10x128xf32, #tpu.memory_space<vmem>>, vector<1x8x8x128xf32>
    %30 = vector.shape_cast %29 : vector<1x8x8x128xf32> to vector<8x8x128xf32>
    %31 = vector.shape_cast %30 : vector<8x8x128xf32> to vector<64x128xf32>
    %c4 = arith.constant 4 : index
    %c0_32 = arith.constant 0 : index
    %c0_33 = arith.constant 0 : index
    %32 = vector.load %arg2[%c4, %c0_32, %c0_33] : memref<9x128x128xf32, #tpu.memory_space<vmem>>, vector<1x128x128xf32>
    %33 = vector.shape_cast %32 : vector<1x128x128xf32> to vector<128x128xf32>
    %cst_34 = arith.constant dense<0.000000e+00> : vector<64x128xf32>
    %34 = tpu.matmul %31, %33, %cst_34 {dimension_numbers = #tpu.dot_dimension_numbers<[1], [0], [0], [1], [0, 0, 1, 1], [], []>} : vector<64x128xf32>, vector<128x128xf32>, vector<64x128xf32> -> vector<64x128xf32>
    %35 = arith.addf %28, %34 : vector<64x128xf32>
    %c0_35 = arith.constant 0 : index
    %c1_36 = arith.constant 1 : index
    %c2_37 = arith.constant 2 : index
    %c0_38 = arith.constant 0 : index
    %36 = vector.load %arg1[%c0_35, %c1_36, %c2_37, %c0_38] : memref<1x10x10x128xf32, #tpu.memory_space<vmem>>, vector<1x8x8x128xf32>
    %37 = vector.shape_cast %36 : vector<1x8x8x128xf32> to vector<8x8x128xf32>
    %38 = vector.shape_cast %37 : vector<8x8x128xf32> to vector<64x128xf32>
    %c5 = arith.constant 5 : index
    %c0_39 = arith.constant 0 : index
    %c0_40 = arith.constant 0 : index
    %39 = vector.load %arg2[%c5, %c0_39, %c0_40] : memref<9x128x128xf32, #tpu.memory_space<vmem>>, vector<1x128x128xf32>
    %40 = vector.shape_cast %39 : vector<1x128x128xf32> to vector<128x128xf32>
    %cst_41 = arith.constant dense<0.000000e+00> : vector<64x128xf32>
    %41 = tpu.matmul %38, %40, %cst_41 {dimension_numbers = #tpu.dot_dimension_numbers<[1], [0], [0], [1], [0, 0, 1, 1], [], []>} : vector<64x128xf32>, vector<128x128xf32>, vector<64x128xf32> -> vector<64x128xf32>
    %42 = arith.addf %35, %41 : vector<64x128xf32>
    %c0_42 = arith.constant 0 : index
    %c2_43 = arith.constant 2 : index
    %c0_44 = arith.constant 0 : index
    %c0_45 = arith.constant 0 : index
    %43 = vector.load %arg1[%c0_42, %c2_43, %c0_44, %c0_45] : memref<1x10x10x128xf32, #tpu.memory_space<vmem>>, vector<1x8x8x128xf32>
    %44 = vector.shape_cast %43 : vector<1x8x8x128xf32> to vector<8x8x128xf32>
    %45 = vector.shape_cast %44 : vector<8x8x128xf32> to vector<64x128xf32>
    %c6 = arith.constant 6 : index
    %c0_46 = arith.constant 0 : index
    %c0_47 = arith.constant 0 : index
    %46 = vector.load %arg2[%c6, %c0_46, %c0_47] : memref<9x128x128xf32, #tpu.memory_space<vmem>>, vector<1x128x128xf32>
    %47 = vector.shape_cast %46 : vector<1x128x128xf32> to vector<128x128xf32>
    %cst_48 = arith.constant dense<0.000000e+00> : vector<64x128xf32>
    %48 = tpu.matmul %45, %47, %cst_48 {dimension_numbers = #tpu.dot_dimension_numbers<[1], [0], [0], [1], [0, 0, 1, 1], [], []>} : vector<64x128xf32>, vector<128x128xf32>, vector<64x128xf32> -> vector<64x128xf32>
    %49 = arith.addf %42, %48 : vector<64x128xf32>
    %c0_49 = arith.constant 0 : index
    %c2_50 = arith.constant 2 : index
    %c1_51 = arith.constant 1 : index
    %c0_52 = arith.constant 0 : index
    %50 = vector.load %arg1[%c0_49, %c2_50, %c1_51, %c0_52] : memref<1x10x10x128xf32, #tpu.memory_space<vmem>>, vector<1x8x8x128xf32>
    %51 = vector.shape_cast %50 : vector<1x8x8x128xf32> to vector<8x8x128xf32>
    %52 = vector.shape_cast %51 : vector<8x8x128xf32> to vector<64x128xf32>
    %c7 = arith.constant 7 : index
    %c0_53 = arith.constant 0 : index
    %c0_54 = arith.constant 0 : index
    %53 = vector.load %arg2[%c7, %c0_53, %c0_54] : memref<9x128x128xf32, #tpu.memory_space<vmem>>, vector<1x128x128xf32>
    %54 = vector.shape_cast %53 : vector<1x128x128xf32> to vector<128x128xf32>
    %cst_55 = arith.constant dense<0.000000e+00> : vector<64x128xf32>
    %55 = tpu.matmul %52, %54, %cst_55 {dimension_numbers = #tpu.dot_dimension_numbers<[1], [0], [0], [1], [0, 0, 1, 1], [], []>} : vector<64x128xf32>, vector<128x128xf32>, vector<64x128xf32> -> vector<64x128xf32>
    %56 = arith.addf %49, %55 : vector<64x128xf32>
    %c0_56 = arith.constant 0 : index
    %c2_57 = arith.constant 2 : index
    %c2_58 = arith.constant 2 : index
    %c0_59 = arith.constant 0 : index
    %57 = vector.load %arg1[%c0_56, %c2_57, %c2_58, %c0_59] : memref<1x10x10x128xf32, #tpu.memory_space<vmem>>, vector<1x8x8x128xf32>
    %58 = vector.shape_cast %57 : vector<1x8x8x128xf32> to vector<8x8x128xf32>
    %59 = vector.shape_cast %58 : vector<8x8x128xf32> to vector<64x128xf32>
    %c8 = arith.constant 8 : index
    %c0_60 = arith.constant 0 : index
    %c0_61 = arith.constant 0 : index
    %60 = vector.load %arg2[%c8, %c0_60, %c0_61] : memref<9x128x128xf32, #tpu.memory_space<vmem>>, vector<1x128x128xf32>
    %61 = vector.shape_cast %60 : vector<1x128x128xf32> to vector<128x128xf32>
    %cst_62 = arith.constant dense<0.000000e+00> : vector<64x128xf32>
    %62 = tpu.matmul %59, %61, %cst_62 {dimension_numbers = #tpu.dot_dimension_numbers<[1], [0], [0], [1], [0, 0, 1, 1], [], []>} : vector<64x128xf32>, vector<128x128xf32>, vector<64x128xf32> -> vector<64x128xf32>
    %63 = arith.addf %56, %62 : vector<64x128xf32>
    %c0_63 = arith.constant 0 : index
    %c0_64 = arith.constant 0 : index
    %64 = vector.load %arg3[%c0_63, %c0_64] : memref<1x128xf32, #tpu.memory_space<vmem>>, vector<1x128xf32>
    %65 = vector.broadcast %64 : vector<1x128xf32> to vector<64x128xf32>
    %66 = arith.addf %63, %65 : vector<64x128xf32>
    %cst_65 = arith.constant 0.000000e+00 : f32
    %67 = vector.broadcast %cst_65 : f32 to vector<64x128xf32>
    %68 = arith.maximumf %66, %67 : vector<64x128xf32>
    %69 = vector.shape_cast %68 : vector<64x128xf32> to vector<4x16x128xf32>
    %70 = vector.extract_strided_slice %69 {offsets = [0, 0, 0], sizes = [4, 8, 128], strides = [1, 1, 1]} : vector<4x16x128xf32> to vector<4x8x128xf32>
    %71 = vector.extract_strided_slice %69 {offsets = [0, 8, 0], sizes = [4, 8, 128], strides = [1, 1, 1]} : vector<4x16x128xf32> to vector<4x8x128xf32>
    %72 = arith.maximumf %70, %71 : vector<4x8x128xf32>
    %73 = vector.shape_cast %72 : vector<4x8x128xf32> to vector<32x128xf32>
    %c0_66 = arith.constant 0 : index
    %c0_67 = arith.constant 0 : index
    %74 = vector.load %arg5[%c0_66, %c0_67] : memref<32x128xf32, #tpu.memory_space<vmem>>, vector<32x128xf32>
    tpu.vector_store %arg5[%c0_66, %c0_67], %73 {strides = array<i32>} : memref<32x128xf32, #tpu.memory_space<vmem>>, vector<32x128xf32>,
    %c0_68 = arith.constant 0 : index
    %c0_69 = arith.constant 0 : index
    %75 = tpu.strided_load %arg5[%c0_68, %c0_69] {strides = array<i32: 2, 1>} : memref<32x128xf32, #tpu.memory_space<vmem>>, vector<16x128xf32>
    %c1_70 = arith.constant 1 : index
    %c0_71 = arith.constant 0 : index
    %76 = tpu.strided_load %arg5[%c1_70, %c0_71] {strides = array<i32: 2, 1>} : memref<32x128xf32, #tpu.memory_space<vmem>>, vector<16x128xf32>
    %77 = arith.maximumf %75, %76 : vector<16x128xf32>
    %c0_72 = arith.constant 0 : index
    %c0_73 = arith.constant 0 : index
    %c0_74 = arith.constant 0 : index
    %78 = vector.load %arg4[%c0_72, %c0_73, %c0_74] : memref<1x16x128xf32, #tpu.memory_space<vmem>>, vector<1x16x128xf32>
    %79 = vector.shape_cast %78 : vector<1x16x128xf32> to vector<16x128xf32>
    %80 = vector.shape_cast %77 : vector<16x128xf32> to vector<1x16x128xf32>
    tpu.vector_store %arg4[%c0_72, %c0_73, %c0_74], %80 {strides = array<i32>} : memref<1x16x128xf32, #tpu.memory_space<vmem>>, vector<1x16x128xf32>,
    return
  }
  func.func @transform_0(%arg0: i32) -> (i32, i32, i32, i32) {
    %c0_i32 = arith.constant 0 : i32
    %c0_i32_0 = arith.constant 0 : i32
    %c0_i32_1 = arith.constant 0 : i32
    %c0_i32_2 = arith.constant 0 : i32
    return %arg0, %c0_i32, %c0_i32_0, %c0_i32_1 : i32, i32, i32, i32
  }
  func.func @transform_1(%arg0: i32) -> (i32, i32, i32) {
    %c0_i32 = arith.constant 0 : i32
    %c0_i32_0 = arith.constant 0 : i32
    %c0_i32_1 = arith.constant 0 : i32
    %c0_i32_2 = arith.constant 0 : i32
    return %c0_i32, %c0_i32_0, %c0_i32_1 : i32, i32, i32
  }
  func.func @transform_2(%arg0: i32) -> (i32, i32) {
    %c0_i32 = arith.constant 0 : i32
    %c0_i32_0 = arith.constant 0 : i32
    %c0_i32_1 = arith.constant 0 : i32
    return %c0_i32, %c0_i32_0 : i32, i32
  }
  func.func @transform_3(%arg0: i32) -> (i32, i32, i32) {
    %c0_i32 = arith.constant 0 : i32
    %c0_i32_0 = arith.constant 0 : i32
    %c0_i32_1 = arith.constant 0 : i32
    return %arg0, %c0_i32, %c0_i32_0 : i32, i32, i32
  }
}

module attributes {stable_mosaic.version = 11 : i64} {
  func.func @kernel(%arg0: memref<2x2048xf32, #tpu.memory_space<vmem>>, %arg1: memref<2048x128xf32, #tpu.memory_space<vmem>>, %arg2: memref<1x128xf32, #tpu.memory_space<vmem>>, %arg3: memref<2048x256xf32, #tpu.memory_space<vmem>>, %arg4: memref<1x256xf32, #tpu.memory_space<vmem>>, %arg5: memref<256x128xf32, #tpu.memory_space<vmem>>, %arg6: memref<1x128xf32, #tpu.memory_space<vmem>>, %arg7: memref<128x128xf32, #tpu.memory_space<vmem>>, %arg8: memref<1x128xf32, #tpu.memory_space<vmem>>, %arg9: memref<128x128xf32, #tpu.memory_space<vmem>>, %arg10: memref<1x128xf32, #tpu.memory_space<vmem>>, %arg11: memref<128x128xf32, #tpu.memory_space<vmem>>, %arg12: memref<1x128xf32, #tpu.memory_space<vmem>>, %arg13: memref<2x128xf32, #tpu.memory_space<vmem>>) attributes {dimension_semantics = [], scalar_prefetch = 0 : i64, scratch_operands = 0 : i64, tpu.core_type = #tpu.core_type<tc>} {
    %c0 = arith.constant 0 : index
    %c0_0 = arith.constant 0 : index
    %0 = vector.load %arg0[%c0, %c0_0] : memref<2x2048xf32, #tpu.memory_space<vmem>>, vector<2x2048xf32>
    %c0_1 = arith.constant 0 : index
    %c0_2 = arith.constant 0 : index
    %1 = vector.load %arg1[%c0_1, %c0_2] : memref<2048x128xf32, #tpu.memory_space<vmem>>, vector<2048x128xf32>
    %cst = arith.constant dense<0.000000e+00> : vector<2x128xf32>
    %2 = tpu.matmul %0, %1, %cst {dimension_numbers = #tpu.dot_dimension_numbers<[1], [0], [0], [1], [0, 0, 1, 1], [], []>} : vector<2x2048xf32>, vector<2048x128xf32>, vector<2x128xf32> -> vector<2x128xf32>
    %c0_3 = arith.constant 0 : index
    %c0_4 = arith.constant 0 : index
    %3 = vector.load %arg2[%c0_3, %c0_4] : memref<1x128xf32, #tpu.memory_space<vmem>>, vector<1x128xf32>
    %4 = vector.broadcast %3 : vector<1x128xf32> to vector<2x128xf32>
    %5 = arith.addf %2, %4 : vector<2x128xf32>
    %c0_5 = arith.constant 0 : index
    %c0_6 = arith.constant 0 : index
    %6 = vector.load %arg3[%c0_5, %c0_6] : memref<2048x256xf32, #tpu.memory_space<vmem>>, vector<2048x256xf32>
    %cst_7 = arith.constant dense<0.000000e+00> : vector<2x256xf32>
    %7 = tpu.matmul %0, %6, %cst_7 {dimension_numbers = #tpu.dot_dimension_numbers<[1], [0], [0], [1], [0, 0, 1, 1], [], []>} : vector<2x2048xf32>, vector<2048x256xf32>, vector<2x256xf32> -> vector<2x256xf32>
    %c0_8 = arith.constant 0 : index
    %c0_9 = arith.constant 0 : index
    %8 = vector.load %arg4[%c0_8, %c0_9] : memref<1x256xf32, #tpu.memory_space<vmem>>, vector<1x256xf32>
    %9 = vector.broadcast %8 : vector<1x256xf32> to vector<2x256xf32>
    %10 = arith.addf %7, %9 : vector<2x256xf32>
    %cst_10 = arith.constant 0.000000e+00 : f32
    %11 = vector.broadcast %cst_10 : f32 to vector<2x256xf32>
    %12 = arith.maximumf %10, %11 : vector<2x256xf32>
    %c0_11 = arith.constant 0 : index
    %c0_12 = arith.constant 0 : index
    %13 = vector.load %arg5[%c0_11, %c0_12] : memref<256x128xf32, #tpu.memory_space<vmem>>, vector<256x128xf32>
    %cst_13 = arith.constant dense<0.000000e+00> : vector<2x128xf32>
    %14 = tpu.matmul %12, %13, %cst_13 {dimension_numbers = #tpu.dot_dimension_numbers<[1], [0], [0], [1], [0, 0, 1, 1], [], []>} : vector<2x256xf32>, vector<256x128xf32>, vector<2x128xf32> -> vector<2x128xf32>
    %15 = arith.addf %5, %14 : vector<2x128xf32>
    %c0_14 = arith.constant 0 : index
    %c0_15 = arith.constant 0 : index
    %16 = vector.load %arg6[%c0_14, %c0_15] : memref<1x128xf32, #tpu.memory_space<vmem>>, vector<1x128xf32>
    %17 = vector.broadcast %16 : vector<1x128xf32> to vector<2x128xf32>
    %18 = arith.addf %15, %17 : vector<2x128xf32>
    %cst_16 = arith.constant 0.000000e+00 : f32
    %19 = vector.broadcast %cst_16 : f32 to vector<2x128xf32>
    %20 = arith.maximumf %18, %19 : vector<2x128xf32>
    %c0_17 = arith.constant 0 : index
    %c0_18 = arith.constant 0 : index
    %21 = vector.load %arg7[%c0_17, %c0_18] : memref<128x128xf32, #tpu.memory_space<vmem>>, vector<128x128xf32>
    %cst_19 = arith.constant dense<0.000000e+00> : vector<2x128xf32>
    %22 = tpu.matmul %20, %21, %cst_19 {dimension_numbers = #tpu.dot_dimension_numbers<[1], [0], [0], [1], [0, 0, 1, 1], [], []>} : vector<2x128xf32>, vector<128x128xf32>, vector<2x128xf32> -> vector<2x128xf32>
    %c0_20 = arith.constant 0 : index
    %c0_21 = arith.constant 0 : index
    %23 = vector.load %arg8[%c0_20, %c0_21] : memref<1x128xf32, #tpu.memory_space<vmem>>, vector<1x128xf32>
    %24 = vector.broadcast %23 : vector<1x128xf32> to vector<2x128xf32>
    %25 = arith.addf %22, %24 : vector<2x128xf32>
    %c0_22 = arith.constant 0 : index
    %c0_23 = arith.constant 0 : index
    %26 = vector.load %arg9[%c0_22, %c0_23] : memref<128x128xf32, #tpu.memory_space<vmem>>, vector<128x128xf32>
    %cst_24 = arith.constant dense<0.000000e+00> : vector<2x128xf32>
    %27 = tpu.matmul %20, %26, %cst_24 {dimension_numbers = #tpu.dot_dimension_numbers<[1], [0], [0], [1], [0, 0, 1, 1], [], []>} : vector<2x128xf32>, vector<128x128xf32>, vector<2x128xf32> -> vector<2x128xf32>
    %c0_25 = arith.constant 0 : index
    %c0_26 = arith.constant 0 : index
    %28 = vector.load %arg10[%c0_25, %c0_26] : memref<1x128xf32, #tpu.memory_space<vmem>>, vector<1x128xf32>
    %29 = vector.broadcast %28 : vector<1x128xf32> to vector<2x128xf32>
    %30 = arith.addf %27, %29 : vector<2x128xf32>
    %c0_27 = arith.constant 0 : index
    %c0_28 = arith.constant 0 : index
    %31 = vector.load %arg11[%c0_27, %c0_28] : memref<128x128xf32, #tpu.memory_space<vmem>>, vector<128x128xf32>
    %cst_29 = arith.constant dense<0.000000e+00> : vector<2x128xf32>
    %32 = tpu.matmul %30, %31, %cst_29 {dimension_numbers = #tpu.dot_dimension_numbers<[1], [0], [0], [1], [0, 0, 1, 1], [], []>} : vector<2x128xf32>, vector<128x128xf32>, vector<2x128xf32> -> vector<2x128xf32>
    %33 = arith.addf %25, %32 : vector<2x128xf32>
    %c0_30 = arith.constant 0 : index
    %c0_31 = arith.constant 0 : index
    %34 = vector.load %arg12[%c0_30, %c0_31] : memref<1x128xf32, #tpu.memory_space<vmem>>, vector<1x128xf32>
    %35 = vector.broadcast %34 : vector<1x128xf32> to vector<2x128xf32>
    %36 = arith.addf %33, %35 : vector<2x128xf32>
    %c0_32 = arith.constant 0 : index
    %c0_33 = arith.constant 0 : index
    %37 = vector.load %arg13[%c0_32, %c0_33] : memref<2x128xf32, #tpu.memory_space<vmem>>, vector<2x128xf32>
    tpu.vector_store %arg13[%c0_32, %c0_33], %36 {strides = array<i32>} : memref<2x128xf32, #tpu.memory_space<vmem>>, vector<2x128xf32>,
    return
  }
}

</mosaic_0001>

<bundles_post_ra>
// kernel: forward.4
= control target key start
LH: loop header
LB: loop body
LE: loop exit
PB: predicated region body
PF: predicated region fallthrough
CT: control target
= control target key end

     0   :  { %8 = vsyncpa [#allocation4], 0  ;;  %s2649_s12 = smov 0   ;;  %s2854_s0 = inlined_call_operand.vmem [shape: f32[2,10,10,128], index: 0, kind: input, shape index: {}]   ;;  %s2855_s1 = inlined_call_operand.hbm [shape: f32[9,128,128], index: 1, kind: input, shape index: {}]   ;;  %s2856_s2 = inlined_call_operand.vmem [shape: f32[1,128], index: 2, kind: input, shape index: {}]   ;;  %s2857_s3 = inlined_call_operand.vmem [shape: f32[2,16,128], index: 3, kind: output, shape index: {}]  }
   0x1 LB: > { %s2655_s13 = sadd.s32 4294967295, %s2624_s12   ;;  %p1524_p0 = scmp.ge.s32.totalorder %s2624_s12, 1  ;;  %s2624_s12 = sphi %s2649_s12, %s14_s12  }
   0x2   : > { %p113_p1 = scmp.lt.s32.totalorder %s2624_s12, 3  ;;  %s2626_s14 = smov [#allocation3]  }
   0x3   : > { %s125_s15 = sshll.u32 %s2626_s14, 4  ;;  %p2858_p3 = scmp.eq.s32.totalorder %s2655_s13, 0  ;;  %s126_s15 = int_to_ptr.vmem [resolvable:$true] %s125_s15 }
   0x4   : > { %p2659_p2 = pnand %p1524_p0, %p113_p1  ;;  %s2586_s20 = scalar_lea.hbm %s2855_s1, 18432 }
   0x5   : > { %p2587_p6 = scmp.ne.s32.totalorder %s2855_s1, %s2586_s20  ;;  %p2593_p10 = scmp.lt.u32.totalorder %s2586_s20, %s2855_s1 }
   0x6   : > { %s2860_s16 = scalar_select %p2659_p2, 1, 0 }
   0x7   : > { %p2569_p4 = pneg %p2659_p2 }
   0x9   : > { %p2668_p5 = pnand %p2858_p3, %p2569_p4 }
   0xb   : > { %p2588_p7 = pneg %p2668_p5 }
   0xd   : > { %p2589_p8 = pnand %p2588_p7, %p2587_p6 }
   0xf   : > { %p2590_p9 = pneg %p2589_p8 }
  0x11   : > { %p2595_p11 = pnand %p2593_p10, %p2590_p9 }
  0x13   : > { %2598 = shalt.err (!%p2595_p11)
}
  0x14   : > { %s2599_s25 = scalar_lea.vmem %s126_s15, 18432  ;;  %p2607_p1 = scmp.lt.s32.totalorder %s126_s15, %s126_s15 }
  0x15   : > { %p2600_p12 = scmp.ne.s32.totalorder %s126_s15, %s2599_s25  ;;  %p2608_p4 = scmp.lt.s32.totalorder %s2599_s25, %s2599_s25 }
  0x17   : > { %p2602_p13 = pnand %p2600_p12, %p2588_p7  ;;  %p2609_p3 = por %p2608_p4, %p2607_p1 }
  0x19   : > { %p2603_p0 = pneg %p2602_p13 }
  0x1b   : > { %p2610_p2 = pnand %p2609_p3, %p2603_p0 }
  0x1d   : > { %2613 = shalt.err (!%p2610_p2)
}
  0x1e   : > { %s2627_s26 = smov 128   ;;  %s2628_s27 = smov 8  }
  0x1f   : > { %2572 = dma.hbm_to_vmem [thread:$0]  (!%p2668_p5), %s2855_s1, 18432, %s126_s15, [#allocation4], %s2627_s26, %s2627_s26, %s2628_s27  }
  0x20   : > { %p2862_p6 = scmp.ne.s32.totalorder %s2860_s16, 0 }
  0x21   : > { %p2863_p8 = scmp.eq.s32.totalorder (!%p2862_p6), %s2655_s13, 0 }
  0x22   : > { %152 = sbr.rel (%p2862_p6) target bundleno = 442 (0x1ba), region = 32 }
  0x29   : > { %2619 = dma.done.wait (%p2863_p8), [#allocation4], 18432   ;;  %p2864_p7 = pmov %p2863_p8 }
  0x2a   : > { %p176_p2 = scmp.lt.s32.totalorder %s2655_s13, 1  ;;  %v219_v0 = vld [vmem:[#allocation3 + $0x80] sm:$0xff]  ;;  %v220_v1 = vld [vmem:[#allocation3 + $0x88] sm:$0xff]  ;;  %v221_v5 = vld [vmem:[#allocation3 + $0x90] sm:$0xff] }
  0x2b   : > { %2621 = vsyncadd (%p2864_p7), [#allocation4], 4294948864  ;;  %v731_v2 = vld [vmem:[#allocation3 + $0x200] sm:$0xff]  ;;  %v2196_v3 = vpack.c.bf16 %v220_v1, %v219_v0  ;;  %v732_v4 = vld [vmem:[#allocation3 + $0x208] sm:$0xff] }
  0x2c   : > { %s2866_s13 = smov (!%p176_p2, %s2655_s13), 1  ;;  %v222_v6 = vld [vmem:[#allocation3 + $0x98] sm:$0xff]  ;;  %v2324_v7 = vpack.c.bf16 %v732_v4, %v731_v2  ;;  %v733_v9 = vld [vmem:[#allocation3 + $0x210] sm:$0xff]  ;;  %v223_v11 = vld [vmem:[#allocation3 + $0xa0] sm:$0xff] }
  0x2d   : > { %v2200_v8 = vpack.c.bf16 %v222_v6, %v221_v5  ;;  %v734_v10 = vld [vmem:[#allocation3 + $0x218] sm:$0xff]  ;;  %2197 = vmatprep.subr.bf16.mxu1 %v2196_v3  ;;  %v224_v13 = vld [vmem:[#allocation3 + $0xa8] sm:$0xff]  ;;  %v735_v14 = vld [vmem:[#allocation3 + $0x220] sm:$0xff]  ;;  %s2564_s30 = smul.u32 160, %s2866_s13  ;;  %s1583_s9 = sshll.u32 %s2866_s13, 4 }
  0x2e   : > { %v2328_v12 = vpack.c.bf16 %v734_v10, %v733_v9  ;;  %v736_v15 = vld [vmem:[#allocation3 + $0x228] sm:$0xff]  ;;  %2325 = vmatprep.subr.bf16.mxu0 %v2324_v7  ;;  %2199 = vmatpush3.bf16.msra.mxu1 %v2196_v3  ;;  %v2204_v16 = vpack.c.bf16 %v224_v13, %v223_v11  ;;  %v225_v18 = vld [vmem:[#allocation3 + $0xb0] sm:$0xff]  ;;  %v226_v19 = vld [vmem:[#allocation3 + $0xb8] sm:$0xff]  ;;  %s185_s14 = scalar_lea.vmem %s2857_s3, %s1583_s9 }
  0x2f   : > { %2327 = vmatpush3.bf16.msra.mxu0 %v2324_v7  ;;  %2201 = vmatprep.subr.bf16.mxu1 %v2200_v8  ;;  %v2332_v17 = vpack.c.bf16 %v736_v15, %v735_v14  ;;  %v737_v20 = vld [vmem:[#allocation3 + $0x230] sm:$0xff]  ;;  %v738_v21 = vld [vmem:[#allocation3 + $0x238] sm:$0xff]  ;;  %s2702_s6 = scalar_lea.vmem %s2854_s0, %s2564_s30  ;;  %v2208_v22 = vpack.c.bf16 %v226_v19, %v225_v18  ;;  %v227_v24 = vld [vmem:[#allocation3 + $0xc0] sm:$0xff] }
  0x30   : > { %2329 = vmatprep.subr.bf16.mxu0 %v2328_v12  ;;  %v2336_v23 = vpack.c.bf16 %v738_v21, %v737_v20  ;;  %v228_v25 = vld [vmem:[#allocation3 + $0xc8] sm:$0xff]  ;;  %v739_v27 = vld [vmem:[#allocation3 + $0x240] sm:$0xff]  ;;  %v1540_v29 = vld [vmem:[%s2702_s6 + $0x11] sm:$0xff] }
  0x31   : > { %v210_v26 = vld [vmem:[%s2702_s6 + $0x1] sm:$0xff]  ;;  %2008 = vmatprep.mubr.f32.mxu0 %v1540_v29  ;;  %v2212_v30 = vpack.c.bf16 %v228_v25, %v227_v24  ;;  %v229_v32 = vld [vmem:[#allocation3 + $0xd0] sm:$0xff]  ;;  %v230_v33 = vld [vmem:[#allocation3 + $0xd8] sm:$0xff] }
  0x32   : > { %2203 = vmatpush3.bf16.msra.mxu1 %v2200_v8  ;;  %v740_v28 = vld [vmem:[#allocation3 + $0x248] sm:$0xff]  ;;  %1832 = vmatprep.mubr.f32.mxu1 %v210_v26  ;;  %v741_v34 = vld [vmem:[#allocation3 + $0x250] sm:$0xff]  ;;  %v742_v35 = vld [vmem:[#allocation3 + $0x258] sm:$0xff]  ;;  %v2216_v36 = vpack.c.bf16 %v230_v33, %v229_v32 }
  0x33   : > { %2331 = vmatpush3.bf16.msra.mxu0 %v2328_v12  ;;  %2205 = vmatprep.subr.bf16.mxu1 %v2204_v16  ;;  %v2340_v31 = vpack.c.bf16 %v740_v28, %v739_v27  ;;  %v2344_v37 = vpack.c.bf16 %v742_v35, %v741_v34  ;;  %v231_v38 = vld [vmem:[#allocation3 + $0xe0] sm:$0xff]  ;;  %v232_v39 = vld [vmem:[#allocation3 + $0xe8] sm:$0xff]  ;;  %v233_v44 = vld [vmem:[#allocation3 + $0xf0] sm:$0xff] }
  0x34   : > { %2333 = vmatprep.subr.bf16.mxu0 %v2332_v17  ;;  %v743_v40 = vld [vmem:[#allocation3 + $0x260] sm:$0xff]  ;;  %v744_v41 = vld [vmem:[#allocation3 + $0x268] sm:$0xff]  ;;  %v2220_v42 = vpack.c.bf16 %v232_v39, %v231_v38  ;;  %v234_v45 = vld [vmem:[#allocation3 + $0xf8] sm:$0xff] }
  0x35   : > { %v2348_v43 = vpack.c.bf16 %v744_v41, %v743_v40  ;;  %v745_v46 = vld [vmem:[#allocation3 + $0x270] sm:$0xff]  ;;  %v746_v47 = vld [vmem:[#allocation3 + $0x278] sm:$0xff]  ;;  %v2224_v48 = vpack.c.bf16 %v234_v45, %v233_v44  ;;  %v194_v50 = vld [vmem:[#allocation3] sm:$0xff] }
  0x36   : > { %2207 = vmatpush3.bf16.msra.mxu1 %v2204_v16  ;;  %v2352_v49 = vpack.c.bf16 %v746_v47, %v745_v46  ;;  %v195_v51 = vld [vmem:[#allocation3 + $0x8] sm:$0xff]  ;;  %v869_v52 = vld [vmem:[#allocation3 + $0x280] sm:$0xff]  ;;  %v196_v56 = vld [vmem:[#allocation3 + $0x10] sm:$0xff] }
  0x37   : > { %2335 = vmatpush3.bf16.msra.mxu0 %v2332_v17  ;;  %2209 = vmatprep.subr.bf16.mxu1 %v2208_v22  ;;  %v870_v53 = vld [vmem:[#allocation3 + $0x288] sm:$0xff]  ;;  %v2228_v54 = vpack.c.bf16 %v195_v51, %v194_v50  ;;  %v197_v57 = vld [vmem:[#allocation3 + $0x18] sm:$0xff]  ;;  %v871_v58 = vld [vmem:[#allocation3 + $0x290] sm:$0xff] }
  0x38   : > { %2337 = vmatprep.subr.bf16.mxu0 %v2336_v23  ;;  %v2356_v55 = vpack.c.bf16 %v870_v53, %v869_v52  ;;  %v872_v59 = vld [vmem:[#allocation3 + $0x298] sm:$0xff]  ;;  %v2707_v60 = vld [vmem:[%s2702_s6 + $0x21] sm:$0xff]  ;;  %v2232_v61 = vpack.c.bf16 %v197_v57, %v196_v56  ;;  %v200_v7 = vld [vmem:[#allocation3 + $0x30] sm:$0xff] }
  0x39   : > { %v2360_v62 = vpack.c.bf16 %v872_v59, %v871_v58  ;;  %v198_v63 = vld [vmem:[#allocation3 + $0x20] sm:$0xff]  ;;  %v199_v0 = vld [vmem:[#allocation3 + $0x28] sm:$0xff]  ;;  %v2711_v3 = vld [vmem:[%s2702_s6 + $0x31] sm:$0xff] }
  0x3a   : > { %2211 = vmatpush3.bf16.msra.mxu1 %v2208_v22  ;;  %v873_v1 = vld [vmem:[#allocation3 + $0x2a0] sm:$0xff]  ;;  %v874_v2 = vld [vmem:[#allocation3 + $0x2a8] sm:$0xff]  ;;  %v2236_v4 = vpack.c.bf16 %v199_v0, %v198_v63  ;;  %v201_v8 = vld [vmem:[#allocation3 + $0x38] sm:$0xff] }
  0x3b   : > { %2339 = vmatpush3.bf16.msra.mxu0 %v2336_v23  ;;  %2213 = vmatprep.subr.bf16.mxu1 %v2212_v30  ;;  %v2714_v5 = vld [vmem:[%s2702_s6 + $0x41] sm:$0xff]  ;;  %v2364_v6 = vpack.c.bf16 %v874_v2, %v873_v1  ;;  %v875_v9 = vld [vmem:[#allocation3 + $0x2b0] sm:$0xff]  ;;  %v876_v10 = vld [vmem:[#allocation3 + $0x2b8] sm:$0xff]  ;;  %v2240_v12 = vpack.c.bf16 %v201_v8, %v200_v7 }
  0x3c   : > { %2341 = vmatprep.subr.bf16.mxu0 %v2340_v31  ;;  %v2721_v11 = vld [vmem:[%s2702_s6 + $0x51] sm:$0xff]  ;;  %v2724_v13 = vld [vmem:[%s2702_s6 + $0x61] sm:$0xff]  ;;  %v2368_v14 = vpack.c.bf16 %v876_v10, %v875_v9 }
  0x3d   : > { %v202_v15 = vld [vmem:[#allocation3 + $0x40] sm:$0xff]  ;;  %v203_v16 = vld [vmem:[#allocation3 + $0x48] sm:$0xff]  ;;  %v2731_v19 = vld [vmem:[%s2702_s6 + $0x71] sm:$0xff] }
  0x3e   : > { %2215 = vmatpush3.bf16.msra.mxu1 %v2212_v30  ;;  %v877_v17 = vld [vmem:[#allocation3 + $0x2c0] sm:$0xff]  ;;  %v878_v18 = vld [vmem:[#allocation3 + $0x2c8] sm:$0xff]  ;;  %v2244_v20 = vpack.c.bf16 %v203_v16, %v202_v15  ;;  %v204_v23 = vld [vmem:[#allocation3 + $0x50] sm:$0xff] }
  0x3f   : > { %2343 = vmatpush3.bf16.msra.mxu0 %v2340_v31  ;;  %2217 = vmatprep.subr.bf16.mxu1 %v2216_v36  ;;  %v2734_v21 = vld [vmem:[%s2702_s6 + $0x81] sm:$0xff]  ;;  %v2372_v22 = vpack.c.bf16 %v878_v18, %v877_v17  ;;  %v205_v24 = vld [vmem:[#allocation3 + $0x58] sm:$0xff]  ;;  %v879_v25 = vld [vmem:[#allocation3 + $0x2d0] sm:$0xff] }
  0x40   : > { %2345 = vmatprep.subr.bf16.mxu0 %v2344_v37  ;;  %v880_v26 = vld [vmem:[#allocation3 + $0x2d8] sm:$0xff]  ;;  %v186_v27 = vld [vmem:[%s2702_s6] sm:$0xff]  ;;  %v207_v32 = vld [vmem:[#allocation3 + $0x68] sm:$0xff] }
  0x41   : > { %v2742_v28 = vld [vmem:[%s2702_s6 + $0x12] sm:$0xff]  ;;  %v2376_v30 = vpack.c.bf16 %v880_v26, %v879_v25  ;;  %v206_v31 = vld [vmem:[#allocation3 + $0x60] sm:$0xff]  ;;  %v882_v34 = vld [vmem:[#allocation3 + $0x2e8] sm:$0xff] }
  0x42   : > { %2219 = vmatpush3.bf16.msra.mxu1 %v2216_v36  ;;  %v881_v33 = vld [vmem:[#allocation3 + $0x2e0] sm:$0xff]  ;;  %v2252_v35 = vpack.c.bf16 %v207_v32, %v206_v31  ;;  %v209_v38 = vld [vmem:[#allocation3 + $0x78] sm:$0xff]  ;;  %v883_v39 = vld [vmem:[#allocation3 + $0x2f0] sm:$0xff] }
  0x43   : > { %2347 = vmatpush3.bf16.msra.mxu0 %v2344_v37  ;;  %2221 = vmatprep.subr.bf16.mxu1 %v2220_v42  ;;  %v2380_v36 = vpack.c.bf16 %v882_v34, %v881_v33  ;;  %v208_v37 = vld [vmem:[#allocation3 + $0x70] sm:$0xff]  ;;  %v884_v40 = vld [vmem:[#allocation3 + $0x2f8] sm:$0xff]  ;;  %v455_v44 = vld [vmem:[#allocation3 + $0x108] sm:$0xff] }
  0x44   : > { %2349 = vmatprep.subr.bf16.mxu0 %v2348_v43  ;;  %v2256_v41 = vpack.c.bf16 %v209_v38, %v208_v37  ;;  %v1008_v45 = vld [vmem:[#allocation3 + $0x300] sm:$0xff]  ;;  %v1009_v46 = vld [vmem:[#allocation3 + $0x308] sm:$0xff]  ;;  %v457_v50 = vld [vmem:[#allocation3 + $0x118] sm:$0xff] }
  0x45   : > { %v1010_v51 = vld [vmem:[#allocation3 + $0x310] sm:$0xff]  ;;  %v1011_v52 = vld [vmem:[#allocation3 + $0x318] sm:$0xff]  ;;  %v458_v57 = vld [vmem:[#allocation3 + $0x120] sm:$0xff] }
  0x46   : > { %2223 = vmatpush3.bf16.msra.mxu1 %v2220_v42  ;;  %v2384_v42 = vpack.c.bf16 %v884_v40, %v883_v39  ;;  %v2746_v53 = vld [vmem:[%s2702_s6 + $0x10] sm:$0xff]  ;;  %v2392_v56 = vpack.c.bf16 %v1011_v52, %v1010_v51  ;;  %v459_v58 = vld [vmem:[#allocation3 + $0x128] sm:$0xff]  ;;  %v1012_v59 = vld [vmem:[#allocation3 + $0x320] sm:$0xff] }
  0x47   : > { %2351 = vmatpush3.bf16.msra.mxu0 %v2348_v43  ;;  %2225 = vmatprep.subr.bf16.mxu1 %v2224_v48  ;;  %v454_v43 = vld [vmem:[#allocation3 + $0x100] sm:$0xff]  ;;  %v2757_v63 = vld [vmem:[%s2702_s6 + $0x32] sm:$0xff]  ;;  %v2268_v1 = vpack.c.bf16 %v459_v58, %v458_v57  ;;  %v467_v39 = vld [vmem:[#allocation3 + $0x168] sm:$0xff] }
  0x48   : > { %2353 = vmatprep.subr.bf16.mxu0 %v2352_v49  ;;  %v2260_v47 = vpack.c.bf16 %v455_v44, %v454_v43  ;;  %v2760_v0 = vld [vmem:[%s2702_s6 + $0x30] sm:$0xff]  ;;  %v2763_v2 = vld [vmem:[%s2702_s6 + $0x42] sm:$0xff]  ;;  %v461_v7 = vld [vmem:[#allocation3 + $0x138] sm:$0xff] }
  0x49   : > { %v1014_v8 = vld [vmem:[#allocation3 + $0x330] sm:$0xff]  ;;  %v1015_v9 = vld [vmem:[#allocation3 + $0x338] sm:$0xff]  ;;  %v2769_v10 = vld [vmem:[%s2702_s6 + $0x40] sm:$0xff] }
  0x4a   : > { %2227 = vmatpush3.bf16.msra.mxu1 %v2224_v48  ;;  %v2388_v48 = vpack.c.bf16 %v1009_v46, %v1008_v45  ;;  %v2779_v16 = vld [vmem:[%s2702_s6 + $0x62] sm:$0xff]  ;;  %v2400_v17 = vpack.c.bf16 %v1015_v9, %v1014_v8  ;;  %v2789_v25 = vld [vmem:[%s2702_s6 + $0x72] sm:$0xff] }
  0x4b   : > { %2355 = vmatpush3.bf16.msra.mxu0 %v2352_v49  ;;  %2229 = vmatprep.subr.bf16.mxu1 %v2228_v54  ;;  %v456_v49 = vld [vmem:[#allocation3 + $0x110] sm:$0xff]  ;;  %v462_v18 = vld [vmem:[#allocation3 + $0x140] sm:$0xff]  ;;  %v465_v32 = vld [vmem:[#allocation3 + $0x158] sm:$0xff] }
  0x4c   : > { %2357 = vmatprep.subr.bf16.mxu0 %v2356_v55  ;;  %v2792_v26 = vld [vmem:[%s2702_s6 + $0x70] sm:$0xff]  ;;  %v1019_v34 = vld [vmem:[#allocation3 + $0x358] sm:$0xff]  ;;  %v466_v38 = vld [vmem:[#allocation3 + $0x160] sm:$0xff] }
  0x4d   : > { %1833 = vmatmul.mubr.f32.vlgmr.msra.gmra.mrb[0].mxu1 %v1540_v29  ;;  %v2248_v29 = vpack.c.bf16 %v205_v24, %v204_v23  ;;  %v1017_v23 = vld [vmem:[#allocation3 + $0x348] sm:$0xff]  ;;  %v2785_v24 = vld [vmem:[%s2702_s6 + $0x60] sm:$0xff]  ;;  %v464_v31 = vld [vmem:[#allocation3 + $0x150] sm:$0xff] }
  0x4e   : > { %2231 = vmatpush3.bf16.msra.mxu1 %v2228_v54  ;;  %2009 = vmatmul.mubr.f32.vlgmr.msra.gmra.mrb[0].mxu0 %v2707_v60  ;;  %v2749_v54 = vld [vmem:[%s2702_s6 + $0x22] sm:$0xff]  ;;  %v1018_v33 = vld [vmem:[#allocation3 + $0x350] sm:$0xff]  ;;  %v469_v45 = vld [vmem:[#allocation3 + $0x178] sm:$0xff] }
  0x4f   : > { %2359 = vmatpush3.bf16.msra.mxu0 %v2356_v55  ;;  %2233 = vmatprep.subr.bf16.mxu1 %v2232_v61  ;;  %v2264_v55 = vpack.c.bf16 %v457_v50, %v456_v49  ;;  %v2408_v37 = vpack.c.bf16 %v1019_v34, %v1018_v33  ;;  %v1020_v40 = vld [vmem:[#allocation3 + $0x360] sm:$0xff]  ;;  %v468_v44 = vld [vmem:[#allocation3 + $0x170] sm:$0xff]  ;;  %v594_v51 = vld [vmem:[#allocation3 + $0x188] sm:$0xff] }
  0x50   : > { %2361 = vmatprep.subr.bf16.mxu0 %v2360_v62  ;;  %1835 = vmatprep.mubr.f32.mxu1 %v2707_v60  ;;  %v1022_v46 = vld [vmem:[#allocation3 + $0x370] sm:$0xff]  ;;  %v593_v50 = vld [vmem:[#allocation3 + $0x180] sm:$0xff]  ;;  %v598_v8 = vld [vmem:[#allocation3 + $0x1a8] sm:$0xff] }
  0x51   : > { %2011 = vmatprep.mubr.f32.mxu0 %v2711_v3  ;;  %1836 = vmatmul.mubr.f32.gmra.mrb[2].mxu1 %v2711_v3  ;;  %v1146_v52 = vld [vmem:[#allocation3 + $0x380] sm:$0xff]  ;;  %v595_v58 = vld [vmem:[#allocation3 + $0x190] sm:$0xff]  ;;  %v1155_v34 = vld [vmem:[#allocation3 + $0x3c8] sm:$0xff] }
  0x52   : > { %2235 = vmatpush3.bf16.msra.mxu1 %v2232_v61  ;;  %2012 = vmatmul.mubr.f32.gmra.mrb[2].mxu0 %v2714_v5  ;;  %v1013_v61 = vld [vmem:[#allocation3 + $0x328] sm:$0xff]  ;;  %v1150_v9 = vld [vmem:[#allocation3 + $0x3a0] sm:$0xff] }
  0x53   : > { %2363 = vmatpush3.bf16.msra.mxu0 %v2360_v62  ;;  %2237 = vmatprep.subr.bf16.mxu1 %v2236_v4  ;;  %v2753_v62 = vld [vmem:[%s2702_s6 + $0x20] sm:$0xff] }
  0x54   : > { %2365 = vmatprep.subr.bf16.mxu0 %v2364_v6  ;;  %1838 = vmatprep.mubr.f32.mxu1 %v2714_v5  ;;  %v1154_v33 = vld [vmem:[#allocation3 + $0x3c0] sm:$0xff] }
  0x55   : > { %2014 = vmatprep.mubr.f32.mxu0 %v2721_v11  ;;  %1839 = vmatmul.mubr.f32.gmra.mrb[4].mxu1 %v2721_v11 }
  0x56   : > { %2239 = vmatpush3.bf16.msra.mxu1 %v2236_v4  ;;  %2015 = vmatmul.mubr.f32.gmra.mrb[4].mxu0 %v2724_v13  ;;  %v2396_v4 = vpack.c.bf16 %v1013_v61, %v1012_v59  ;;  %v596_v59 = vld [vmem:[#allocation3 + $0x198] sm:$0xff]  ;;  %v1148_v61 = vld [vmem:[#allocation3 + $0x390] sm:$0xff] }
  0x57   : > { %2367 = vmatpush3.bf16.msra.mxu0 %v2364_v6  ;;  %2241 = vmatprep.subr.bf16.mxu1 %v2240_v12  ;;  %v460_v6 = vld [vmem:[#allocation3 + $0x130] sm:$0xff] }
  0x58   : > { %2369 = vmatprep.subr.bf16.mxu0 %v2368_v14  ;;  %1841 = vmatprep.mubr.f32.mxu1 %v2724_v13  ;;  %v2272_v15 = vpack.c.bf16 %v461_v7, %v460_v6  ;;  %v597_v7 = vld [vmem:[#allocation3 + $0x1a0] sm:$0xff] }
  0x59   : > { %2017 = vmatprep.mubr.f32.mxu0 %v2731_v19  ;;  %1842 = vmatmul.mubr.f32.gmra.mrb[6].mxu1 %v2731_v19 }
  0x5a   : > { %2243 = vmatpush3.bf16.msra.mxu1 %v2240_v12  ;;  %2018 = vmatmul.mubr.f32.gmra.mrb[6].mxu0 %v2734_v21  ;;  %v2773_v12 = vld [vmem:[%s2702_s6 + $0x52] sm:$0xff] }
  0x5b   : > { %2371 = vmatpush3.bf16.msra.mxu0 %v2368_v14  ;;  %2245 = vmatprep.subr.bf16.mxu1 %v2244_v20  ;;  %v2776_v14 = vld [vmem:[%s2702_s6 + $0x50] sm:$0xff] }
  0x5c   : > { %2373 = vmatprep.subr.bf16.mxu0 %v2372_v22  ;;  %1876 = vmatprep.mubr.f32.mxu1 %v186_v27 }
  0x5d   : > { %2052 = vmatprep.mubr.f32.mxu0 %v2742_v28 }
  0x5e   : > { %2247 = vmatpush3.bf16.msra.mxu1 %v2244_v20  ;;  %v463_v20 = vld [vmem:[#allocation3 + $0x148] sm:$0xff] }
  0x5f   : > { %2375 = vmatpush3.bf16.msra.mxu0 %v2372_v22  ;;  %2249 = vmatprep.subr.bf16.mxu1 %v2248_v29  ;;  %v1016_v22 = vld [vmem:[#allocation3 + $0x340] sm:$0xff]  ;;  %v2276_v27 = vpack.c.bf16 %v463_v20, %v462_v18  ;;  %v599_v20 = vld [vmem:[#allocation3 + $0x1b0] sm:$0xff] }
  0x60   : > { %2377 = vmatprep.subr.bf16.mxu0 %v2376_v30 }
  0x62   : > { %2251 = vmatpush3.bf16.msra.mxu1 %v2248_v29  ;;  %v2795_v29 = vld [vmem:[%s2702_s6 + $0x82] sm:$0xff] }
  0x63   : > { %2379 = vmatpush3.bf16.msra.mxu0 %v2376_v30  ;;  %2253 = vmatprep.subr.bf16.mxu1 %v2252_v35  ;;  %v2404_v30 = vpack.c.bf16 %v1017_v23, %v1016_v22  ;;  %v600_v22 = vld [vmem:[#allocation3 + $0x1b8] sm:$0xff]  ;;  %v1152_v23 = vld [vmem:[#allocation3 + $0x3b0] sm:$0xff] }
  0x64   : > { %2381 = vmatprep.subr.bf16.mxu0 %v2380_v36 }
  0x66   : > { %2255 = vmatpush3.bf16.msra.mxu1 %v2252_v35  ;;  %v445_v35 = vld [vmem:[%s2702_s6 + $0x2] sm:$0xff] }
  0x67   : > { %2383 = vmatpush3.bf16.msra.mxu0 %v2380_v36  ;;  %2257 = vmatprep.subr.bf16.mxu1 %v2256_v41  ;;  %v2280_v36 = vpack.c.bf16 %v465_v32, %v464_v31  ;;  %v601_v31 = vld [vmem:[#allocation3 + $0x1c0] sm:$0xff]  ;;  %v602_v32 = vld [vmem:[#allocation3 + $0x1c8] sm:$0xff] }
  0x68   : > { %2385 = vmatprep.subr.bf16.mxu0 %v2384_v42 }
  0x6a   : > { %2259 = vmatpush3.bf16.msra.mxu1 %v2256_v41  ;;  %v1021_v41 = vld [vmem:[#allocation3 + $0x368] sm:$0xff] }
  0x6b   : > { %2387 = vmatpush3.bf16.msra.mxu0 %v2384_v42  ;;  %2261 = vmatprep.subr.bf16.mxu1 %v2260_v47  ;;  %v2284_v42 = vpack.c.bf16 %v467_v39, %v466_v38  ;;  %v2412_v43 = vpack.c.bf16 %v1021_v41, %v1020_v40  ;;  %v2436_v38 = vpack.c.bf16 %v1155_v34, %v1154_v33  ;;  %v603_v39 = vld [vmem:[#allocation3 + $0x1d0] sm:$0xff]  ;;  %v604_v40 = vld [vmem:[#allocation3 + $0x1d8] sm:$0xff] }
  0x6c   : > { %2389 = vmatprep.subr.bf16.mxu0 %v2388_v48  ;;  %v1156_v41 = vld [vmem:[#allocation3 + $0x3d0] sm:$0xff] }
  0x6d   : > { %1877 = vmatmul.mubr.f32.vlgmr.msra.gmra.mrb[0].mxu1 %v2746_v53 }
  0x6e   : > { %2263 = vmatpush3.bf16.msra.mxu1 %v2260_v47  ;;  %2053 = vmatmul.mubr.f32.vlgmr.msra.gmra.mrb[0].mxu0 %v2749_v54  ;;  %v1023_v47 = vld [vmem:[#allocation3 + $0x378] sm:$0xff] }
  0x6f   : > { %2391 = vmatpush3.bf16.msra.mxu0 %v2388_v48  ;;  %2265 = vmatprep.subr.bf16.mxu1 %v2264_v55  ;;  %v2288_v48 = vpack.c.bf16 %v469_v45, %v468_v44  ;;  %v2416_v49 = vpack.c.bf16 %v1023_v47, %v1022_v46  ;;  %v605_v45 = vld [vmem:[#allocation3 + $0x1e0] sm:$0xff]  ;;  %v606_v46 = vld [vmem:[#allocation3 + $0x1e8] sm:$0xff] }
  0x70   : > { %2393 = vmatprep.subr.bf16.mxu0 %v2392_v56  ;;  %1879 = vmatprep.mubr.f32.mxu1 %v2753_v62  ;;  %v1158_v47 = vld [vmem:[#allocation3 + $0x3e0] sm:$0xff] }
  0x71   : > { %2055 = vmatprep.mubr.f32.mxu0 %v2757_v63  ;;  %1880 = vmatmul.mubr.f32.gmra.mrb[2].mxu1 %v2760_v0 }
  0x72   : > { %2267 = vmatpush3.bf16.msra.mxu1 %v2264_v55  ;;  %2056 = vmatmul.mubr.f32.gmra.mrb[2].mxu0 %v2763_v2  ;;  %v1147_v55 = vld [vmem:[#allocation3 + $0x388] sm:$0xff] }
  0x73   : > { %2395 = vmatpush3.bf16.msra.mxu0 %v2392_v56  ;;  %2269 = vmatprep.subr.bf16.mxu1 %v2268_v1  ;;  %v2292_v56 = vpack.c.bf16 %v594_v51, %v593_v50  ;;  %v2420_v57 = vpack.c.bf16 %v1147_v55, %v1146_v52  ;;  %v607_v51 = vld [vmem:[#allocation3 + $0x1f0] sm:$0xff]  ;;  %v608_v52 = vld [vmem:[#allocation3 + $0x1f8] sm:$0xff] }
  0x74   : > { %2397 = vmatprep.subr.bf16.mxu0 %v2396_v4  ;;  %1882 = vmatprep.mubr.f32.mxu1 %v2769_v10  ;;  %v1160_v55 = vld [vmem:[#allocation3 + $0x3f0] sm:$0xff] }
  0x75   : > { %2058 = vmatprep.mubr.f32.mxu0 %v2773_v12  ;;  %1883 = vmatmul.mubr.f32.gmra.mrb[4].mxu1 %v2776_v14 }
  0x76   : > { %2271 = vmatpush3.bf16.msra.mxu1 %v2268_v1  ;;  %2059 = vmatmul.mubr.f32.gmra.mrb[4].mxu0 %v2779_v16  ;;  %v1149_v1 = vld [vmem:[#allocation3 + $0x398] sm:$0xff] }
  0x77   : > { %2399 = vmatpush3.bf16.msra.mxu0 %v2396_v4  ;;  %2273 = vmatprep.subr.bf16.mxu1 %v2272_v15  ;;  %v2296_v4 = vpack.c.bf16 %v596_v59, %v595_v58  ;;  %v2424_v6 = vpack.c.bf16 %v1149_v1, %v1148_v61  ;;  %v1284_v58 = vld [vmem:[#allocation3 + $0x400] sm:$0xff]  ;;  %v1285_v59 = vld [vmem:[#allocation3 + $0x408] sm:$0xff]  ;;  %v1286_v61 = vld [vmem:[#allocation3 + $0x410] sm:$0xff] }
  0x78   : > { %2401 = vmatprep.subr.bf16.mxu0 %v2400_v17  ;;  %1885 = vmatprep.mubr.f32.mxu1 %v2785_v24  ;;  %v1287_v1 = vld [vmem:[#allocation3 + $0x418] sm:$0xff] }
  0x79   : > { %2061 = vmatprep.mubr.f32.mxu0 %v2789_v25  ;;  %1886 = vmatmul.mubr.f32.gmra.mrb[6].mxu1 %v2792_v26 }
  0x7a   : > { %2275 = vmatpush3.bf16.msra.mxu1 %v2272_v15  ;;  %2062 = vmatmul.mubr.f32.gmra.mrb[6].mxu0 %v2795_v29  ;;  %v1151_v15 = vld [vmem:[#allocation3 + $0x3a8] sm:$0xff] }
  0x7b   : > { %2403 = vmatpush3.bf16.msra.mxu0 %v2400_v17  ;;  %2277 = vmatprep.subr.bf16.mxu1 %v2276_v27  ;;  %v2300_v17 = vpack.c.bf16 %v598_v8, %v597_v7  ;;  %v2428_v18 = vpack.c.bf16 %v1151_v15, %v1150_v9  ;;  %v1289_v7 = vld [vmem:[#allocation3 + $0x428] sm:$0xff]  ;;  %v1290_v9 = vld [vmem:[#allocation3 + $0x430] sm:$0xff]  ;;  %v1291_v15 = vld [vmem:[#allocation3 + $0x438] sm:$0xff] }
  0x7c   : > { %2405 = vmatprep.subr.bf16.mxu0 %v2404_v30  ;;  %1920 = vmatprep.mubr.f32.mxu1 %v445_v35  ;;  %v2814_v35 = vld [vmem:[%s2702_s6 + $0x80] sm:$0xff] }
  0x7d   : > { %2096 = vmatprep.mubr.f32.mxu0 %v2753_v62 }
  0x7e   : > { %2279 = vmatpush3.bf16.msra.mxu1 %v2276_v27  ;;  %v1153_v27 = vld [vmem:[#allocation3 + $0x3b8] sm:$0xff] }
  0x7f   : > { %2407 = vmatpush3.bf16.msra.mxu0 %v2404_v30  ;;  %2281 = vmatprep.subr.bf16.mxu1 %v2280_v36  ;;  %v2432_v30 = vpack.c.bf16 %v1153_v27, %v1152_v23 }
  0x80   : > { %2409 = vmatprep.subr.bf16.mxu0 %v2408_v37 }
  0x82   : > { %2283 = vmatpush3.bf16.msra.mxu1 %v2280_v36  ;;  %v2308_v36 = vpack.c.bf16 %v602_v32, %v601_v31 }
  0x83   : > { %2411 = vmatpush3.bf16.msra.mxu0 %v2408_v37  ;;  %2285 = vmatprep.subr.bf16.mxu1 %v2284_v42  ;;  %v1563_v37 = vld [vmem:[%s2702_s6 + $0x90] sm:$0xff] }
  0x84   : > { %2413 = vmatprep.subr.bf16.mxu0 %v2412_v43 }
  0x86   : > { %2287 = vmatpush3.bf16.msra.mxu1 %v2284_v42  ;;  %v1157_v42 = vld [vmem:[#allocation3 + $0x3d8] sm:$0xff] }
  0x87   : > { %2415 = vmatpush3.bf16.msra.mxu0 %v2412_v43  ;;  %2289 = vmatprep.subr.bf16.mxu1 %v2288_v48  ;;  %v2312_v43 = vpack.c.bf16 %v604_v40, %v603_v39  ;;  %v2440_v44 = vpack.c.bf16 %v1157_v42, %v1156_v41 }
  0x88   : > { %2417 = vmatprep.subr.bf16.mxu0 %v2416_v49 }
  0x8a   : > { %2291 = vmatpush3.bf16.msra.mxu1 %v2288_v48  ;;  %v1159_v48 = vld [vmem:[#allocation3 + $0x3e8] sm:$0xff] }
  0x8b   : > { %2419 = vmatpush3.bf16.msra.mxu0 %v2416_v49  ;;  %2293 = vmatprep.subr.bf16.mxu1 %v2292_v56  ;;  %v2316_v49 = vpack.c.bf16 %v606_v46, %v605_v45  ;;  %v2444_v50 = vpack.c.bf16 %v1159_v48, %v1158_v47 }
  0x8c   : > { %2421 = vmatprep.subr.bf16.mxu0 %v2420_v57 }
  0x8d   : > { %1921 = vmatmul.mubr.f32.vlgmr.msra.gmra.mrb[0].mxu1 %v2742_v28  ;;  %v2304_v28 = vpack.c.bf16 %v600_v22, %v599_v20 }
  0x8e   : > { %2295 = vmatpush3.bf16.msra.mxu1 %v2292_v56  ;;  %2097 = vmatmul.mubr.f32.vlgmr.msra.gmra.mrb[0].mxu0 %v2760_v0  ;;  %v1161_v56 = vld [vmem:[#allocation3 + $0x3f8] sm:$0xff] }
  0x8f   : > { %2423 = vmatpush3.bf16.msra.mxu0 %v2420_v57  ;;  %2297 = vmatprep.subr.bf16.mxu1 %v2296_v4  ;;  %v2320_v57 = vpack.c.bf16 %v608_v52, %v607_v51 }
  0x90   : > { %2425 = vmatprep.subr.bf16.mxu0 %v2424_v6  ;;  %1923 = vmatprep.mubr.f32.mxu1 %v2749_v54 }
  0x91   : > { %2099 = vmatprep.mubr.f32.mxu0 %v2769_v10  ;;  %1924 = vmatmul.mubr.f32.gmra.mrb[2].mxu1 %v2757_v63 }
  0x92   : > { %2299 = vmatpush3.bf16.msra.mxu1 %v2296_v4  ;;  %2100 = vmatmul.mubr.f32.gmra.mrb[2].mxu0 %v2776_v14  ;;  %v2456_v4 = vpack.c.bf16 %v1287_v1, %v1286_v61 }
  0x93   : > { %2427 = vmatpush3.bf16.msra.mxu0 %v2424_v6  ;;  %2301 = vmatprep.subr.bf16.mxu1 %v2300_v17  ;;  %v1288_v6 = vld [vmem:[#allocation3 + $0x420] sm:$0xff] }
  0x94   : > { %2429 = vmatprep.subr.bf16.mxu0 %v2428_v18  ;;  %1926 = vmatprep.mubr.f32.mxu1 %v2763_v2  ;;  %v2460_v8 = vpack.c.bf16 %v1289_v7, %v1288_v6 }
  0x95   : > { %2102 = vmatprep.mubr.f32.mxu0 %v2785_v24  ;;  %1927 = vmatmul.mubr.f32.gmra.mrb[4].mxu1 %v2773_v12 }
  0x96   : > { %2303 = vmatpush3.bf16.msra.mxu1 %v2300_v17  ;;  %2103 = vmatmul.mubr.f32.gmra.mrb[4].mxu0 %v2792_v26  ;;  %v1299_v17 = vld [vmem:[#allocation3 + $0x478] sm:$0xff] }
  0x97   : > { %2431 = vmatpush3.bf16.msra.mxu0 %v2428_v18  ;;  %2305 = vmatprep.subr.bf16.mxu1 %v2304_v28 }
  0x98   : > { %2433 = vmatprep.subr.bf16.mxu0 %v2432_v30  ;;  %1929 = vmatprep.mubr.f32.mxu1 %v2779_v16 }
  0x99   : > { %2105 = vmatprep.mubr.f32.mxu0 %v2814_v35  ;;  %1930 = vmatmul.mubr.f32.gmra.mrb[6].mxu1 %v2789_v25 }
  0x9a   : > { %2307 = vmatpush3.bf16.msra.mxu1 %v2304_v28  ;;  %2106 = vmatmul.mubr.f32.gmra.mrb[6].mxu0 %v1563_v37 }
  0x9b   : > { %2435 = vmatpush3.bf16.msra.mxu0 %v2432_v30  ;;  %2309 = vmatprep.subr.bf16.mxu1 %v2308_v36 }
  0x9c   : > { %2437 = vmatprep.subr.bf16.mxu0 %v2436_v38  ;;  %1964 = vmatprep.mubr.f32.mxu1 %v2746_v53  ;;  %v2448_v53 = vpack.c.bf16 %v1161_v56, %v1160_v55 }
  0x9d   : > { %2140 = vmatprep.mubr.f32.mxu0 %v2707_v60  ;;  %v2452_v60 = vpack.c.bf16 %v1285_v59, %v1284_v58 }
  0x9e   : > { %2311 = vmatpush3.bf16.msra.mxu1 %v2308_v36 }
  0x9f   : > { %2439 = vmatpush3.bf16.msra.mxu0 %v2436_v38  ;;  %2313 = vmatprep.subr.bf16.mxu1 %v2312_v43 }
  0xa0   : > { %2441 = vmatprep.subr.bf16.mxu0 %v2440_v44 }
  0xa2   : > { %2315 = vmatpush3.bf16.msra.mxu1 %v2312_v43 }
  0xa3   : > { %2443 = vmatpush3.bf16.msra.mxu0 %v2440_v44  ;;  %2317 = vmatprep.subr.bf16.mxu1 %v2316_v49 }
  0xa4   : > { %2445 = vmatprep.subr.bf16.mxu0 %v2444_v50 }
  0xa6   : > { %2319 = vmatpush3.bf16.msra.mxu1 %v2316_v49 }
  0xa7   : > { %2447 = vmatpush3.bf16.msra.mxu0 %v2444_v50  ;;  %2321 = vmatprep.subr.bf16.mxu1 %v2320_v57 }
  0xa8   : > { %2449 = vmatprep.subr.bf16.mxu0 %v2448_v53 }
  0xaa   : > { %2323 = vmatpush3.bf16.msra.mxu1 %v2320_v57 }
  0xab   : > { %2451 = vmatpush3.bf16.msra.mxu0 %v2448_v53  ;;  %2484 = vmatprep.subr.bf16.mxu1 %v2452_v60 }
  0xac   : > { %2453 = vmatprep.subr.bf16.mxu0 %v2452_v60 }
  0xad   : > { %1965 = vmatmul.mubr.f32.vlgmr.msra.gmra.mrb[0].mxu1 %v2753_v62  ;;  %v1292_v62 = vld [vmem:[#allocation3 + $0x440] sm:$0xff] }
  0xae   : > { %2141 = vmatmul.mubr.f32.vlgmr.msra.gmra.mrb[0].mxu0 %v2711_v3  ;;  %2492 = vmatpush3.bf16.msra.mxu1 %v2452_v60  ;;  %v2464_v3 = vpack.c.bf16 %v1291_v15, %v1290_v9 }
  0xaf   : > { %2455 = vmatpush3.bf16.msra.mxu0 %v2452_v60  ;;  %1967 = vmatprep.mubr.f32.mxu1 %v2760_v0 }
  0xb0   : > { %2143 = vmatprep.mubr.f32.mxu0 %v2714_v5  ;;  %2457 = vmatprep.subr.bf16.mxu0 %v2456_v4  ;;  %v1293_v5 = vld [vmem:[#allocation3 + $0x448] sm:$0xff] }
  0xb1   : > { %1968 = vmatmul.mubr.f32.gmra.mrb[2].mxu1 %v2769_v10  ;;  %2485 = vmatprep.subr.bf16.mxu1 %v2456_v4  ;;  %v2468_v0 = vpack.c.bf16 %v1293_v5, %v1292_v62  ;;  %v1294_v10 = vld [vmem:[#allocation3 + $0x450] sm:$0xff] }
  0xb2   : > { %2144 = vmatmul.mubr.f32.gmra.mrb[2].mxu0 %v2721_v11  ;;  %2493 = vmatpush3.bf16.msra.mxu1 %v2456_v4  ;;  %v1571_v11 = vld [vmem:[%s2702_s6 + $0x91] sm:$0xff] }
  0xb3   : > { %2459 = vmatpush3.bf16.msra.mxu0 %v2456_v4  ;;  %1970 = vmatprep.mubr.f32.mxu1 %v2776_v14 }
  0xb4   : > { %2146 = vmatprep.mubr.f32.mxu0 %v2724_v13  ;;  %2461 = vmatprep.subr.bf16.mxu0 %v2460_v8  ;;  %v1295_v13 = vld [vmem:[#allocation3 + $0x458] sm:$0xff] }
  0xb5   : > { %1971 = vmatmul.mubr.f32.gmra.mrb[4].mxu1 %v2785_v24  ;;  %2486 = vmatprep.subr.bf16.mxu1 %v2460_v8  ;;  %v2472_v14 = vpack.c.bf16 %v1295_v13, %v1294_v10  ;;  %v1297_v24 = vld [vmem:[#allocation3 + $0x468] sm:$0xff] }
  0xb6   : > { %2147 = vmatmul.mubr.f32.gmra.mrb[4].mxu0 %v2731_v19  ;;  %2494 = vmatpush3.bf16.msra.mxu1 %v2460_v8  ;;  %v1296_v19 = vld [vmem:[#allocation3 + $0x460] sm:$0xff] }
  0xb7   : > { %2463 = vmatpush3.bf16.msra.mxu0 %v2460_v8  ;;  %1973 = vmatprep.mubr.f32.mxu1 %v2792_v26  ;;  %v1298_v26 = vld [vmem:[#allocation3 + $0x470] sm:$0xff] }
  0xb8   : > { %2149 = vmatprep.mubr.f32.mxu0 %v2734_v21  ;;  %2465 = vmatprep.subr.bf16.mxu0 %v2464_v3  ;;  %v2476_v21 = vpack.c.bf16 %v1297_v24, %v1296_v19  ;;  %v2480_v18 = vpack.c.bf16 %v1299_v17, %v1298_v26 }
  0xb9   : > { %1974 = vmatmul.mubr.f32.gmra.mrb[6].mxu1 %v2814_v35  ;;  %2487 = vmatprep.subr.bf16.mxu1 %v2464_v3 }
  0xba   : > { %2150 = vmatmul.mubr.f32.gmra.mrb[6].mxu0 %v1571_v11  ;;  %2495 = vmatpush3.bf16.msra.mxu1 %v2464_v3 }
  0xbb   : > { %2467 = vmatpush3.bf16.msra.mxu0 %v2464_v3  ;;  %2488 = vmatprep.subr.bf16.mxu1 %v2468_v0 }
  0xbc   : > { %2469 = vmatprep.subr.bf16.mxu0 %v2468_v0  ;;  %2184 = vmatprep.mubr.f32.mxu0 %v2749_v54  ;;  %v1579_v54 = vld [vmem:[%s2702_s6 + $0x92] sm:$0xff] }
  0xbd   : > { %2190 = vmatprep.mubr.f32.mxu1 %v2779_v16 }
  0xbe   : > { %2496 = vmatpush3.bf16.msra.mxu1 %v2468_v0 }
  0xbf   : > { %2471 = vmatpush3.bf16.msra.mxu0 %v2468_v0  ;;  %2489 = vmatprep.subr.bf16.mxu1 %v2472_v14 }
  0xc0   : > { %2473 = vmatprep.subr.bf16.mxu0 %v2472_v14 }
  0xc2   : > { %2497 = vmatpush3.bf16.msra.mxu1 %v2472_v14 }
  0xc3   : > { %2475 = vmatpush3.bf16.msra.mxu0 %v2472_v14  ;;  %2490 = vmatprep.subr.bf16.mxu1 %v2476_v21 }
  0xc4   : > { %2477 = vmatprep.subr.bf16.mxu0 %v2476_v21 }
  0xc6   : > { %2498 = vmatpush3.bf16.msra.mxu1 %v2476_v21 }
  0xc7   : > { %2479 = vmatpush3.bf16.msra.mxu0 %v2476_v21  ;;  %2491 = vmatprep.subr.bf16.mxu1 %v2480_v18 }
  0xc8   : > { %2481 = vmatprep.subr.bf16.mxu0 %v2480_v18 }
  0xca   : > { %2499 = vmatpush3.bf16.msra.mxu1 %v2480_v18 }
  0xcb   : > { %2483 = vmatpush3.bf16.msra.mxu0 %v2480_v18 }
  0xcd   : > { %2191 = vmatmul.mubr.f32.vlgmr.msra.gmra.mrb[8].mxu1 %v2789_v25 }
  0xce   : > { %2185 = vmatmul.mubr.f32.vlgmr.msra.gmra.mrb[0].mxu0 %v2757_v63  ;;  %2193 = vmatprep.mubr.f32.mxu1 %v2795_v29 }
  0xcf   : > { %2187 = vmatprep.mubr.f32.mxu0 %v2763_v2  ;;  %v1580_v2 = vld [vmem:[%s2856_s2] ss:$0 sm:$0xff] }
  0xd1   : > { %2194 = vmatmul.mubr.f32.gmra.mrb[10].mxu1 %v1579_v54 }
  0xd2   : > { %2188 = vmatmul.mubr.f32.gmra.mrb[2].mxu0 %v2773_v12 }
 0x180   : > { %v1966_v16 = vpop.f32.mrb[0].mxu1 }
 0x181   : > { %v675_v20 = vpop.f32.mrb[1].mxu1 }
 0x184   : > { %v1969_v22 = vpop.f32.mrb[2].mxu1 }
 0x185   : > { %v685_v23 = vpop.f32.mrb[3].mxu1 }
 0x188   : > { %v1972_v27 = vpop.f32.mrb[4].mxu1 }
 0x189   : > { %v2148_v28 = vpop.f32.mrb[4].mxu0  ;;  %v695_v30 = vpop.f32.mrb[5].mxu1 }
 0x18a   : > { %v2504_v31 = vadd.f32 %v2148_v28, %v1972_v27  ;;  %v1248_v32 = vpop.f32.mrb[5].mxu0 }
 0x18b   : > { %v2506_v25 = vadd.f32 %v1248_v32, %v695_v30 }
 0x18c   : > { %v1975_v33 = vpop.f32.mrb[6].mxu1 }
 0x18d   : > { %v2151_v63 = vpop.f32.mrb[6].mxu0  ;;  %v705_v34 = vpop.f32.mrb[7].mxu1 }
 0x18e   : > { %v2508_v29 = vadd.f32 %v2151_v63, %v1975_v33  ;;  %v1258_v35 = vpop.f32.mrb[7].mxu0 }
 0x18f   : > { %v2510_v36 = vadd.f32 %v1258_v35, %v705_v34 }
 0x1a0   : > { %v2192_v12 = vpop.f32.mrb[8].mxu1 }
 0x1a1   : > { %v2186_v37 = vpop.f32.mrb[0].mxu0  ;;  %v2505_v38 = vadd.f32 %v2504_v31, %v2192_v12  ;;  %v1386_v39 = vpop.f32.mrb[9].mxu1 }
 0x1a2   : > { %v2500_v40 = vadd.f32 %v2186_v37, %v1966_v16  ;;  %v1366_v41 = vpop.f32.mrb[1].mxu0  ;;  %v2507_v42 = vadd.f32 %v2506_v25, %v1386_v39 }
 0x1a3   : > { %v1425_v43 = vadd.f32 %v2505_v38, %v1580_v2  ;;  %v2501_v44 = vadd.f32 %v1366_v41, %v675_v20 }
 0x1a4   : > { %v1421_v45 = vadd.f32 %v2500_v40, %v1580_v2  ;;  %v1424_v46 = vadd.f32 %v2507_v42, %v1580_v2  ;;  %v2195_v47 = vpop.f32.mrb[10].mxu1 }
 0x1a5   : > { %v1433_v48 = vmax.f32 %v1425_v43, 0.0  ;;  %v1420_v49 = vadd.f32 %v2501_v44, %v1580_v2  ;;  %v2189_v50 = vpop.f32.mrb[2].mxu0  ;;  %v2509_v51 = vadd.f32 %v2508_v29, %v2195_v47  ;;  %v1396_v52 = vpop.f32.mrb[11].mxu1 }
 0x1a6   : > { %v1429_v55 = vmax.f32 %v1421_v45, 0.0  ;;  %v1432_v56 = vmax.f32 %v1424_v46, 0.0  ;;  %v2502_v57 = vadd.f32 %v2189_v50, %v1969_v22  ;;  %v1376_v53 = vpop.f32.mrb[3].mxu0  ;;  %v2511_v58 = vadd.f32 %v2510_v36, %v1396_v52 }
 0x1a7   : > { %v1428_v59 = vmax.f32 %v1420_v49, 0.0  ;;  %v1427_v60 = vadd.f32 %v2509_v51, %v1580_v2  ;;  %v2503_v61 = vadd.f32 %v1376_v53, %v685_v23 }
 0x1a8   : > { %v1438_v1 = vmax.f32 %v1432_v56, %v1433_v48  ;;  %v1423_v4 = vadd.f32 %v2502_v57, %v1580_v2  ;;  %v1426_v6 = vadd.f32 %v2511_v58, %v1580_v2 }
 0x1a9   : > { %v1436_v7 = vmax.f32 %v1428_v59, %v1429_v55  ;;  %v1435_v8 = vmax.f32 %v1427_v60, 0.0  ;;  %v1422_v9 = vadd.f32 %v2503_v61, %v1580_v2 }
 0x1aa   : > { %1442 = vst [vmem:[#allocation2 + $0x10] sm:$0xff] %v1438_v1  ;;  %v1431_v15 = vmax.f32 %v1423_v4, 0.0  ;;  %v1434_v3 = vmax.f32 %v1426_v6, 0.0 }
 0x1ab   : > { %1440 = vst [vmem:[#allocation2] sm:$0xff] %v1436_v7  ;;  %v1430_v62 = vmax.f32 %v1422_v9, 0.0 }
 0x1ac   : > { %v1439_v5 = vmax.f32 %v1434_v3, %v1435_v8 }
 0x1ad   : > { %v1437_v11 = vmax.f32 %v1430_v62, %v1431_v15 }
 0x1ae   : > { %1443 = vst [vmem:[#allocation2 + $0x18] sm:$0xff] %v1439_v5 }
 0x1af   : > { %1441 = vst [vmem:[#allocation2 + $0x8] sm:$0xff] %v1437_v11 }
 0x1b5   : > { %v1446_v0 = vld [vmem:[#allocation2 + $0x10] ss:$2 sm:$0xff]  ;;  %v1450_v10 = vld [vmem:[#allocation2 + $0x11] ss:$2 sm:$0xff] }
 0x1b6   : > { %v1444_v13 = vld [vmem:[#allocation2] ss:$2 sm:$0xff]  ;;  %v1448_v14 = vld [vmem:[#allocation2 + $0x1] ss:$2 sm:$0xff]  ;;  %v1452_v19 = vmax.f32 %v1446_v0, %v1450_v10 }
 0x1b7   : > { %v1451_v24 = vmax.f32 %v1444_v13, %v1448_v14 }
 0x1b8   : > { %1454 = vst [vmem:[%s185_s14 + $0x8] sm:$0xff] %v1452_v19 }
 0x1b9   : > { %1453 = vst [vmem:[%s185_s14] sm:$0xff] %v1451_v24 }
 0x1ba PF: > { %s14_s12 = sadd.s32 1, %s2624_s12  }
 0x1bb   : > { %p11_p3 = scmp.ge.s32.totalorder %s14_s12, 4  }
 0x1bd   :  { %13 = sbr.rel (!%p11_p3) target bundleno = 1 (0x1), region = 80 }
 0x1c4   :  { %1476 = vsyncpa [#allocation4], 1 }
 0x1c5   :  { %1478 = vsyncpa [#allocation4 + $0x1], 1 }

// kernel: forward.3
= control target key start
LH: loop header
LB: loop body
LE: loop exit
PB: predicated region body
PF: predicated region fallthrough
CT: control target
= control target key end

     0   :  { %10 = vsyncpa [#allocation4], 0  ;;  %s6441_s0 = inlined_call_operand.vmem [shape: f32[2,18,18,128], index: 0, kind: input, shape index: {}]   ;;  %s6442_s1 = inlined_call_operand.hbm [shape: f32[9,128,128], index: 1, kind: input, shape index: {}]   ;;  %s6443_s2 = inlined_call_operand.hbm [shape: f32[1,128], index: 2, kind: input, shape index: {}]   ;;  %s6444_s3 = inlined_call_operand.hbm [shape: f32[128,128], index: 3, kind: input, shape index: {}]   ;;  %s6445_s4 = inlined_call_operand.hbm [shape: f32[1,128], index: 4, kind: input, shape index: {}]   ;;  %s6446_s5 = inlined_call_operand.vmem [shape: f32[2,64,128], index: 5, kind: output, shape index: {}]  }
   0x1   :  { %11 = vsyncpa [#allocation6], 0 }
   0x2   :  { %12 = vsyncpa [#allocation9], 0  ;;  %s5622_s18 = smov 0  }
   0x3 LB: > { %s5586_s19 = smov [#allocation5]   ;;  %s5628_s21 = sadd.s32 4294967295, %s5584_s18   ;;  %s5584_s18 = sphi %s5622_s18, %s18_s18  }
   0x4   : > { %s185_s20 = sshll.u32 %s5586_s19, 4  ;;  %p3363_p0 = scmp.ge.s32.totalorder %s5584_s18, 1  ;;  %s5633_s20 = int_to_ptr.vmem [resolvable:$true] %s185_s20 }
   0x5   : > { %p159_p1 = scmp.lt.s32.totalorder %s5584_s18, 3  ;;  %p6447_p2 = scmp.eq.s32.totalorder %s5628_s21, 0 }
   0x6   : > { %s5587_s23 = smov [#allocation3]   ;;  %s5588_s26 = smov [#allocation7]  }
   0x7   : > { %p5635_p3 = pnand %p3363_p0, %p159_p1  ;;  %s171_s24 = sshll.u32 %s5587_s23, 4  ;;  %s5641_s24 = int_to_ptr.vmem [resolvable:$true] %s171_s24 }
   0x8   : > { %s195_s27 = sshll.u32 %s5588_s26, 4  ;;  %s5589_s28 = smov [#allocation8]   ;;  %s5649_s27 = int_to_ptr.vmem [resolvable:$true] %s195_s27 }
   0x9   : > { %s6489_s22 = scalar_select %p5635_p3, 1, 0 }
   0xa   : > { %p5419_p4 = pneg %p5635_p3  ;;  %s5651_s29 = sshll.u32 %s5589_s28, 4  ;;  %s210_s29 = int_to_ptr.vmem [resolvable:$true] %s5651_s29 }
   0xb   : > { %s5454_s7 = scalar_lea.hbm %s6443_s2, 16 }
   0xc   : > { %p5645_p5 = pnand %p6447_p2, %p5419_p4  ;;  %p5455_p6 = scmp.ne.s32.totalorder %s6443_s2, %s5454_s7 }
   0xd   : > { %p5461_p10 = scmp.lt.u32.totalorder %s5454_s7, %s6443_s2 }
   0xe   : > { %p5661_p7 = pneg %p5645_p5 }
  0x10   : > { %p5457_p8 = pnand %p5661_p7, %p5455_p6 }
  0x12   : > { %p5458_p9 = pneg %p5457_p8 }
  0x14   : > { %p5463_p11 = pnand %p5461_p10, %p5458_p9 }
  0x16   : > { %5466 = shalt.err (!%p5463_p11)
}
  0x17   : > { %s5467_s13 = scalar_lea.vmem %s5633_s20, 16  ;;  %s5474_s14 = scalar_lea.vmem %s5633_s20, 32 }
  0x18   : > { %p5468_p12 = scmp.ne.s32.totalorder %s5633_s20, %s5467_s13  ;;  %p5475_p1 = scmp.lt.s32.totalorder %s5633_s20, %s5633_s20 }
  0x19   : > { %p5476_p4 = scmp.lt.s32.totalorder %s5474_s14, %s5467_s13 }
  0x1a   : > { %p5470_p13 = pnand %p5468_p12, %p5661_p7 }
  0x1b   : > { %p5477_p6 = por %p5476_p4, %p5475_p1 }
  0x1c   : > { %p5471_p0 = pneg %p5470_p13 }
  0x1e   : > { %p5478_p8 = pnand %p5477_p6, %p5471_p0 }
  0x20   : > { %5481 = shalt.err (!%p5478_p8)
}
  0x21   : > { %5425 = dma.hbm_to_vmem [thread:$0]  (!%p5645_p5), %s6443_s2, 16, %s5633_s20, [#allocation6]  }
  0x22   : > { %s5482_s23 = scalar_lea.hbm %s6442_s1, 18432 }
  0x23   : > { %p5483_p9 = scmp.ne.s32.totalorder %s6442_s1, %s5482_s23  ;;  %p5489_p12 = scmp.lt.u32.totalorder %s5482_s23, %s6442_s1 }
  0x25   : > { %p5485_p10 = pnand %p5483_p9, %p5661_p7 }
  0x27   : > { %p5486_p11 = pneg %p5485_p10 }
  0x29   : > { %p5491_p13 = pnand %p5489_p12, %p5486_p11 }
  0x2b   : > { %5494 = shalt.err (!%p5491_p13)
}
  0x2c   : > { %s5495_s20 = scalar_lea.vmem %s5641_s24, 18432  ;;  %p5503_p6 = scmp.lt.s32.totalorder %s5641_s24, %s5641_s24 }
  0x2d   : > { %p5496_p0 = scmp.ne.s32.totalorder %s5641_s24, %s5495_s20  ;;  %p5504_p8 = scmp.lt.s32.totalorder %s5495_s20, %s5495_s20 }
  0x2f   : > { %p5498_p1 = pnand %p5496_p0, %p5661_p7  ;;  %p5505_p9 = por %p5504_p8, %p5503_p6 }
  0x31   : > { %p5499_p4 = pneg %p5498_p1 }
  0x33   : > { %p5506_p10 = pnand %p5505_p9, %p5499_p4 }
  0x35   : > { %5509 = shalt.err (!%p5506_p10)
}
  0x36   : > { %s5590_s7 = smov 128   ;;  %s5591_s8 = smov 8  }
  0x37   : > { %5422 = dma.hbm_to_vmem [thread:$0]  (!%p5645_p5), %s6442_s1, 18432, %s5641_s24, [#allocation4], %s5590_s7, %s5590_s7, %s5591_s8  }
  0x38   : > { %s5510_s14 = scalar_lea.hbm %s6444_s3, 2048 }
  0x39   : > { %p5511_p11 = scmp.ne.s32.totalorder %s6444_s3, %s5510_s14  ;;  %p5517_p0 = scmp.lt.u32.totalorder %s5510_s14, %s6444_s3 }
  0x3b   : > { %p5513_p12 = pnand %p5511_p11, %p5661_p7 }
  0x3d   : > { %p5514_p13 = pneg %p5513_p12 }
  0x3f   : > { %p5519_p1 = pnand %p5517_p0, %p5514_p13 }
  0x41   : > { %5522 = shalt.err (!%p5519_p1)
}
  0x42   : > { %s5523_s24 = scalar_lea.vmem %s5649_s27, 2048  ;;  %p5531_p9 = scmp.lt.s32.totalorder %s5649_s27, %s5649_s27 }
  0x43   : > { %p5524_p4 = scmp.ne.s32.totalorder %s5649_s27, %s5523_s24  ;;  %p5532_p10 = scmp.lt.s32.totalorder %s5523_s24, %s5523_s24 }
  0x45   : > { %p5526_p6 = pnand %p5524_p4, %p5661_p7  ;;  %p5533_p11 = por %p5532_p10, %p5531_p9 }
  0x47   : > { %p5527_p8 = pneg %p5526_p6 }
  0x49   : > { %p5534_p12 = pnand %p5533_p11, %p5527_p8 }
  0x4b   : > { %5537 = shalt.err (!%p5534_p12)
}
  0x4c   : > { %5428 = dma.hbm_to_vmem [thread:$0]  (!%p5645_p5), %s6444_s3, 2048, %s5649_s27, [#allocation6], %s5590_s7, %s5590_s7, %s5591_s8  }
  0x4d   : > { %s5538_s6 = scalar_lea.hbm %s6445_s4, 16 }
  0x4e   : > { %p5539_p13 = scmp.ne.s32.totalorder %s6445_s4, %s5538_s6  ;;  %p5545_p4 = scmp.lt.u32.totalorder %s5538_s6, %s6445_s4 }
  0x50   : > { %p5541_p0 = pnand %p5539_p13, %p5661_p7 }
  0x52   : > { %p5542_p1 = pneg %p5541_p0 }
  0x54   : > { %p5547_p6 = pnand %p5545_p4, %p5542_p1 }
  0x56   : > { %5550 = shalt.err (!%p5547_p6)
}
  0x57   : > { %s5551_s13 = scalar_lea.vmem %s210_s29, 16  ;;  %s5558_s27 = scalar_lea.vmem %s210_s29, 32 }
  0x58   : > { %p5552_p8 = scmp.ne.s32.totalorder %s210_s29, %s5551_s13  ;;  %p5559_p11 = scmp.lt.s32.totalorder %s210_s29, %s210_s29 }
  0x59   : > { %p5560_p12 = scmp.lt.s32.totalorder %s5558_s27, %s5551_s13 }
  0x5a   : > { %p5554_p9 = pnand %p5552_p8, %p5661_p7 }
  0x5b   : > { %p5561_p2 = por %p5560_p12, %p5559_p11 }
  0x5c   : > { %p5555_p10 = pneg %p5554_p9 }
  0x5e   : > { %p5562_p3 = pnand %p5561_p2, %p5555_p10 }
  0x60   : > { %5565 = shalt.err (!%p5562_p3)
}
  0x61   : > { %5431 = dma.hbm_to_vmem [thread:$0]  (!%p5645_p5), %s6445_s4, 16, %s210_s29, [#allocation9]  }
  0x62   : > { %p6492_p13 = scmp.ne.s32.totalorder %s6489_s22, 0 }
  0x64   : > { %230 = sbr.rel (%p6492_p13) target bundleno = 887 (0x377), region = 40 }
  0x6b   : > { %p6493_p0 = scmp.eq.s32.totalorder %s5628_s21, 0 }
  0x6d   : > { %5571 = dma.done.wait (%p6493_p0), [#allocation4], 18432   ;;  %p6494_p7 = pmov %p6493_p0 }
  0x6e   : > { %p6495_p1 = pmov %p6493_p0 }
  0x6f   : > { %5573 = vsyncadd (%p6494_p7), [#allocation4], 4294948864 }
  0x70   : > { %5575 = dma.done.wait (%p6495_p1), [#allocation6], 2064   ;;  %p6496_p2 = pmov %p6493_p0 }
  0x71   : > { %p6497_p3 = pmov %p6493_p0 }
  0x72   : > { %5577 = vsyncadd (%p6496_p2), [#allocation6], 4294965232 }
  0x73   : > { %5579 = dma.done.wait (%p6497_p3), [#allocation9], 16   ;;  %p6498_p5 = pmov %p6493_p0 }
  0x74   : > { %p270_p4 = scmp.lt.s32.totalorder %s5628_s21, 1  ;;  %v361_v0 = vld [vmem:[#allocation3 + $0x80] sm:$0xff]  ;;  %v362_v1 = vld [vmem:[#allocation3 + $0x88] sm:$0xff]  ;;  %v363_v5 = vld [vmem:[#allocation3 + $0x90] sm:$0xff] }
  0x75   : > { %5581 = vsyncadd (%p6498_p5), [#allocation9], 4294967280  ;;  %v1473_v2 = vld [vmem:[#allocation3 + $0x200] sm:$0xff]  ;;  %v4794_v3 = vpack.c.bf16 %v362_v1, %v361_v0  ;;  %v1474_v4 = vld [vmem:[#allocation3 + $0x208] sm:$0xff] }
  0x76   : > { %s6566_s21 = smov (!%p270_p4, %s5628_s21), 1  ;;  %v364_v6 = vld [vmem:[#allocation3 + $0x98] sm:$0xff]  ;;  %v5766_v7 = vpack.c.bf16 %v1474_v4, %v1473_v2  ;;  %v1475_v9 = vld [vmem:[#allocation3 + $0x210] sm:$0xff]  ;;  %v365_v11 = vld [vmem:[#allocation3 + $0xa0] sm:$0xff] }
  0x77   : > { %v4798_v8 = vpack.c.bf16 %v364_v6, %v363_v5  ;;  %v1476_v10 = vld [vmem:[#allocation3 + $0x218] sm:$0xff]  ;;  %4795 = vmatprep.subr.bf16.mxu1 %v4794_v3  ;;  %v366_v13 = vld [vmem:[#allocation3 + $0xa8] sm:$0xff]  ;;  %v1477_v14 = vld [vmem:[#allocation3 + $0x220] sm:$0xff]  ;;  %s5402_s22 = smul.u32 432, %s6566_s21  ;;  %s3573_s14 = sshll.u32 %s6566_s21, 6 }
  0x78   : > { %v5768_v12 = vpack.c.bf16 %v1476_v10, %v1475_v9  ;;  %v1478_v15 = vld [vmem:[#allocation3 + $0x228] sm:$0xff]  ;;  %4923 = vmatprep.subr.bf16.mxu0 %v5766_v7  ;;  %4797 = vmatpush3.bf16.msra.mxu1 %v4794_v3  ;;  %v4802_v16 = vpack.c.bf16 %v366_v13, %v365_v11  ;;  %v367_v18 = vld [vmem:[#allocation3 + $0xb0] sm:$0xff]  ;;  %v368_v19 = vld [vmem:[#allocation3 + $0xb8] sm:$0xff]  ;;  %s6423_s17 = scalar_lea.vmem %s6446_s5, %s3573_s14 }
  0x79   : > { %4925 = vmatpush3.bf16.msra.mxu0 %v5766_v7  ;;  %4799 = vmatprep.subr.bf16.mxu1 %v4798_v8  ;;  %v5774_v17 = vpack.c.bf16 %v1478_v15, %v1477_v14  ;;  %v1479_v20 = vld [vmem:[#allocation3 + $0x230] sm:$0xff]  ;;  %v1480_v21 = vld [vmem:[#allocation3 + $0x238] sm:$0xff]  ;;  %s5779_s10 = scalar_lea.vmem %s6441_s0, %s5402_s22  ;;  %v4806_v22 = vpack.c.bf16 %v368_v19, %v367_v18  ;;  %v369_v24 = vld [vmem:[#allocation3 + $0xc0] sm:$0xff] }
  0x7a   : > { %6499 = vst [vmem:[#allocation13_spill] sm:$0xff] %v5768_v12  ;;  %4927 = vmatprep.subr.bf16.mxu0 %v5768_v12  ;;  %v5783_v23 = vpack.c.bf16 %v1480_v21, %v1479_v20  ;;  %v370_v25 = vld [vmem:[#allocation3 + $0xc8] sm:$0xff]  ;;  %v1481_v27 = vld [vmem:[#allocation3 + $0x240] sm:$0xff]  ;;  %v371_v32 = vld [vmem:[#allocation3 + $0xd0] sm:$0xff] }
  0x7b   : > { %6500 = vst [vmem:[#allocation14_spill] sm:$0xff] %v5774_v17  ;;  %v328_v26 = vld [vmem:[%s5779_s10 + $0x1] sm:$0xff]  ;;  %v5787_v29 = vld [vmem:[%s5779_s10 + $0x19] sm:$0xff]  ;;  %v4810_v30 = vpack.c.bf16 %v370_v25, %v369_v24  ;;  %v1483_v34 = vld [vmem:[#allocation3 + $0x250] sm:$0xff] }
  0x7c   : > { %4801 = vmatpush3.bf16.msra.mxu1 %v4798_v8  ;;  %6501 = vst [vmem:[#allocation15_spill] sm:$0xff] %v5783_v23  ;;  %v1482_v28 = vld [vmem:[#allocation3 + $0x248] sm:$0xff]  ;;  %4062 = vmatprep.mubr.f32.mxu1 %v328_v26  ;;  %v372_v33 = vld [vmem:[#allocation3 + $0xd8] sm:$0xff]  ;;  %v373_v38 = vld [vmem:[#allocation3 + $0xe0] sm:$0xff] }
  0x7d   : > { %4929 = vmatpush3.bf16.msra.mxu0 %v5768_v12  ;;  %4803 = vmatprep.subr.bf16.mxu1 %v4802_v16  ;;  %v5792_v31 = vpack.c.bf16 %v1482_v28, %v1481_v27  ;;  %v1484_v35 = vld [vmem:[#allocation3 + $0x258] sm:$0xff]  ;;  %v4814_v36 = vpack.c.bf16 %v372_v33, %v371_v32  ;;  %v374_v39 = vld [vmem:[#allocation3 + $0xe8] sm:$0xff]  ;;  %v1485_v40 = vld [vmem:[#allocation3 + $0x260] sm:$0xff] }
  0x7e   : > { %4931 = vmatprep.subr.bf16.mxu0 %v5774_v17  ;;  %4382 = vmatprep.mubr.f32.mxu0 %v5787_v29  ;;  %v5796_v37 = vpack.c.bf16 %v1484_v35, %v1483_v34  ;;  %v1486_v41 = vld [vmem:[#allocation3 + $0x268] sm:$0xff]  ;;  %v4818_v42 = vpack.c.bf16 %v374_v39, %v373_v38  ;;  %v375_v44 = vld [vmem:[#allocation3 + $0xf0] sm:$0xff]  ;;  %v376_v45 = vld [vmem:[#allocation3 + $0xf8] sm:$0xff] }
  0x7f   : > { %6502 = vst [vmem:[#allocation16_spill] sm:$0xff] %v5792_v31  ;;  %v5800_v43 = vpack.c.bf16 %v1486_v41, %v1485_v40  ;;  %v1487_v46 = vld [vmem:[#allocation3 + $0x270] sm:$0xff]  ;;  %v1488_v47 = vld [vmem:[#allocation3 + $0x278] sm:$0xff]  ;;  %v4822_v48 = vpack.c.bf16 %v376_v45, %v375_v44  ;;  %v312_v50 = vld [vmem:[#allocation3] sm:$0xff] }
  0x80   : > { %4805 = vmatpush3.bf16.msra.mxu1 %v4802_v16  ;;  %6503 = vst [vmem:[#allocation17_spill] sm:$0xff] %v5796_v37  ;;  %v5804_v49 = vpack.c.bf16 %v1488_v47, %v1487_v46  ;;  %v313_v51 = vld [vmem:[#allocation3 + $0x8] sm:$0xff]  ;;  %v1779_v52 = vld [vmem:[#allocation3 + $0x280] sm:$0xff]  ;;  %v1781_v56 = vld [vmem:[#allocation3 + $0x290] sm:$0xff] }
  0x81   : > { %4933 = vmatpush3.bf16.msra.mxu0 %v5774_v17  ;;  %4807 = vmatprep.subr.bf16.mxu1 %v4806_v22  ;;  %6504 = vst [vmem:[#allocation18_spill] sm:$0xff] %v5800_v43  ;;  %v1780_v53 = vld [vmem:[#allocation3 + $0x288] sm:$0xff]  ;;  %v4826_v54 = vpack.c.bf16 %v313_v51, %v312_v50  ;;  %v1782_v57 = vld [vmem:[#allocation3 + $0x298] sm:$0xff]  ;;  %v314_v59 = vld [vmem:[#allocation3 + $0x10] sm:$0xff] }
  0x82   : > { %4935 = vmatprep.subr.bf16.mxu0 %v5783_v23  ;;  %6505 = vst [vmem:[#allocation19_spill] sm:$0xff] %v5804_v49  ;;  %v4954_v55 = vpack.c.bf16 %v1780_v53, %v1779_v52  ;;  %v329_v58 = vld [vmem:[%s5779_s10 + $0x9] sm:$0xff]  ;;  %v315_v60 = vld [vmem:[#allocation3 + $0x18] sm:$0xff]  ;;  %v3410_v61 = vld [vmem:[%s5779_s10 + $0x21] sm:$0xff]  ;;  %v4958_v62 = vpack.c.bf16 %v1782_v57, %v1781_v56 }
  0x83   : > { %v3411_v63 = vld [vmem:[%s5779_s10 + $0x31] sm:$0xff]  ;;  %v4830_v0 = vpack.c.bf16 %v315_v60, %v314_v59  ;;  %v1783_v1 = vld [vmem:[#allocation3 + $0x2a0] sm:$0xff]  ;;  %v1784_v2 = vld [vmem:[#allocation3 + $0x2a8] sm:$0xff] }
  0x84   : > { %4809 = vmatpush3.bf16.msra.mxu1 %v4806_v22  ;;  %v316_v3 = vld [vmem:[#allocation3 + $0x20] sm:$0xff]  ;;  %v317_v4 = vld [vmem:[#allocation3 + $0x28] sm:$0xff]  ;;  %v4962_v8 = vpack.c.bf16 %v1784_v2, %v1783_v1  ;;  %v1785_v9 = vld [vmem:[#allocation3 + $0x2b0] sm:$0xff] }
  0x85   : > { %4937 = vmatpush3.bf16.msra.mxu0 %v5783_v23  ;;  %4811 = vmatprep.subr.bf16.mxu1 %v4810_v30  ;;  %v3412_v5 = vld [vmem:[%s5779_s10 + $0x39] sm:$0xff]  ;;  %v3413_v6 = vld [vmem:[%s5779_s10 + $0x49] sm:$0xff]  ;;  %v4834_v11 = vpack.c.bf16 %v317_v4, %v316_v3  ;;  %v3414_v15 = vld [vmem:[%s5779_s10 + $0x51] sm:$0xff] }
  0x86   : > { %4939 = vmatprep.subr.bf16.mxu0 %v5792_v31  ;;  %v1786_v10 = vld [vmem:[#allocation3 + $0x2b8] sm:$0xff]  ;;  %v318_v13 = vld [vmem:[#allocation3 + $0x30] sm:$0xff]  ;;  %v3415_v16 = vld [vmem:[%s5779_s10 + $0x61] sm:$0xff] }
  0x87   : > { %v319_v14 = vld [vmem:[#allocation3 + $0x38] sm:$0xff]  ;;  %v4966_v18 = vpack.c.bf16 %v1786_v10, %v1785_v9  ;;  %v1787_v19 = vld [vmem:[#allocation3 + $0x2c0] sm:$0xff]  ;;  %v1788_v20 = vld [vmem:[#allocation3 + $0x2c8] sm:$0xff] }
  0x88   : > { %4813 = vmatpush3.bf16.msra.mxu1 %v4810_v30  ;;  %v4838_v21 = vpack.c.bf16 %v319_v14, %v318_v13  ;;  %v320_v22 = vld [vmem:[#allocation3 + $0x40] sm:$0xff]  ;;  %v321_v24 = vld [vmem:[#allocation3 + $0x48] sm:$0xff]  ;;  %v4970_v27 = vpack.c.bf16 %v1788_v20, %v1787_v19  ;;  %v1789_v28 = vld [vmem:[#allocation3 + $0x2d0] sm:$0xff] }
  0x89   : > { %4941 = vmatpush3.bf16.msra.mxu0 %v5792_v31  ;;  %4815 = vmatprep.subr.bf16.mxu1 %v4814_v36  ;;  %v3416_v25 = vld [vmem:[%s5779_s10 + $0x69] sm:$0xff]  ;;  %v3417_v26 = vld [vmem:[%s5779_s10 + $0x79] sm:$0xff]  ;;  %v4842_v30 = vpack.c.bf16 %v321_v24, %v320_v22  ;;  %v3418_v34 = vld [vmem:[%s5779_s10 + $0x81] sm:$0xff] }
  0x8a   : > { %4943 = vmatprep.subr.bf16.mxu0 %v5796_v37  ;;  %v322_v32 = vld [vmem:[#allocation3 + $0x50] sm:$0xff]  ;;  %v323_v33 = vld [vmem:[#allocation3 + $0x58] sm:$0xff]  ;;  %v1791_v38 = vld [vmem:[#allocation3 + $0x2e0] sm:$0xff] }
  0x8b   : > { %v5821_v35 = vld [vmem:[%s5779_s10 + $0x91] sm:$0xff]  ;;  %v1792_v39 = vld [vmem:[#allocation3 + $0x2e8] sm:$0xff]  ;;  %v4846_v40 = vpack.c.bf16 %v323_v33, %v322_v32  ;;  %v324_v41 = vld [vmem:[#allocation3 + $0x60] sm:$0xff] }
  0x8c   : > { %4817 = vmatpush3.bf16.msra.mxu1 %v4814_v36  ;;  %v3420_v44 = vld [vmem:[%s5779_s10 + $0x99] sm:$0xff]  ;;  %v3421_v45 = vld [vmem:[%s5779_s10 + $0xa9] sm:$0xff]  ;;  %v4978_v46 = vpack.c.bf16 %v1792_v39, %v1791_v38  ;;  %v3422_v53 = vld [vmem:[%s5779_s10 + $0xb1] sm:$0xff] }
  0x8d   : > { %4945 = vmatpush3.bf16.msra.mxu0 %v5796_v37  ;;  %4819 = vmatprep.subr.bf16.mxu1 %v4818_v42  ;;  %v1793_v47 = vld [vmem:[#allocation3 + $0x2f0] sm:$0xff]  ;;  %v327_v52 = vld [vmem:[#allocation3 + $0x78] sm:$0xff]  ;;  %v2086_v56 = vld [vmem:[#allocation3 + $0x300] sm:$0xff] }
  0x8e   : > { %4947 = vmatprep.subr.bf16.mxu0 %v5800_v43  ;;  %v326_v51 = vld [vmem:[#allocation3 + $0x70] sm:$0xff]  ;;  %v2087_v57 = vld [vmem:[#allocation3 + $0x308] sm:$0xff]  ;;  %v860_v59 = vld [vmem:[#allocation3 + $0x100] sm:$0xff] }
  0x8f   : > { %v861_v60 = vld [vmem:[#allocation3 + $0x108] sm:$0xff]  ;;  %v2089_v1 = vld [vmem:[#allocation3 + $0x318] sm:$0xff]  ;;  %v2096_v33 = vld [vmem:[#allocation3 + $0x350] sm:$0xff] }
  0x90   : > { %4821 = vmatpush3.bf16.msra.mxu1 %v4818_v42  ;;  %v325_v42 = vld [vmem:[#allocation3 + $0x68] sm:$0xff]  ;;  %v5838_v2 = vpack.c.bf16 %v861_v60, %v860_v59  ;;  %v5847_v4 = vld [vmem:[%s5779_s10 + $0xd9] sm:$0xff]  ;;  %v5864_v13 = vld [vmem:[%s5779_s10 + $0xf1] sm:$0xff] }
  0x91   : > { %4949 = vmatpush3.bf16.msra.mxu0 %v5800_v43  ;;  %4823 = vmatprep.subr.bf16.mxu1 %v4822_v48  ;;  %v4850_v50 = vpack.c.bf16 %v325_v42, %v324_v41  ;;  %v5844_v3 = vld [vmem:[%s5779_s10 + $0x22] sm:$0xff]  ;;  %v5867_v14 = vld [vmem:[%s5779_s10 + $0x4a] sm:$0xff]  ;;  %v5873_v19 = vld [vmem:[%s5779_s10 + $0xf9] sm:$0xff] }
  0x92   : > { %4951 = vmatprep.subr.bf16.mxu0 %v5804_v49  ;;  %v2091_v9 = vld [vmem:[#allocation3 + $0x328] sm:$0xff]  ;;  %6506 = vst [vmem:[#allocation20_spill] sm:$0xff] %v5873_v19  ;;  %v5877_v20 = vld [vmem:[%s5779_s10 + $0x52] sm:$0xff]  ;;  %v2098_v42 = vld [vmem:[#allocation3 + $0x360] sm:$0xff] }
  0x93   : > { %v5857_v10 = vld [vmem:[%s5779_s10 + $0xe1] sm:$0xff]  ;;  %v5912_v39 = vld [vmem:[%s5779_s10 + $0x139] sm:$0xff]  ;;  %v6054_v31 = vld [vmem:[%s5779_s10 + $0x90] sm:$0xff] }
  0x94   : > { %4825 = vmatpush3.bf16.msra.mxu1 %v4822_v48  ;;  %v1794_v48 = vld [vmem:[#allocation3 + $0x2f8] sm:$0xff]  ;;  %v5883_v22 = vld [vmem:[%s5779_s10 + $0x62] sm:$0xff]  ;;  %6511 = vst [vmem:[#allocation25_spill] sm:$0xff] %v5912_v39  ;;  %6525 = vst [vmem:[#allocation39_spill] sm:$0xff] %v6054_v31 }
  0x95   : > { %4953 = vmatpush3.bf16.msra.mxu0 %v5804_v49  ;;  %4827 = vmatprep.subr.bf16.mxu1 %v4826_v54  ;;  %v5909_v38 = vld [vmem:[%s5779_s10 + $0x82] sm:$0xff]  ;;  %v871_v49 = vld [vmem:[#allocation3 + $0x158] sm:$0xff] }
  0x96   : > { %4955 = vmatprep.subr.bf16.mxu0 %v4954_v55  ;;  %v2392_v59 = vld [vmem:[#allocation3 + $0x380] sm:$0xff]  ;;  %v2393_v60 = vld [vmem:[#allocation3 + $0x388] sm:$0xff]  ;;  %v6063_v23 = vld [vmem:[%s5779_s10 + $0x98] sm:$0xff] }
  0x97   : > { %4063 = vmatmul.mubr.f32.vlgmr.msra.gmra.mrb[0].mxu1 %v329_v58  ;;  %v4854_v58 = vpack.c.bf16 %v327_v52, %v326_v51  ;;  %v2100_v51 = vld [vmem:[#allocation3 + $0x370] sm:$0xff]  ;;  %v2101_v52 = vld [vmem:[#allocation3 + $0x378] sm:$0xff]  ;;  %v6031_v43 = vld [vmem:[%s5779_s10 + $0x68] sm:$0xff]  ;;  %6526 = vst [vmem:[#allocation40_spill] sm:$0xff] %v6063_v23 }
  0x98   : > { %4383 = vmatmul.mubr.f32.vlgmr.msra.gmra.mrb[0].mxu0 %v3410_v61  ;;  %4829 = vmatpush3.bf16.msra.mxu1 %v4826_v54  ;;  %v5829_v54 = vld [vmem:[%s5779_s10 + $0xc1] sm:$0xff]  ;;  %6522 = vst [vmem:[#allocation36_spill] sm:$0xff] %v6031_v43 }
  0x99   : > { %4957 = vmatpush3.bf16.msra.mxu0 %v4954_v55  ;;  %4065 = vmatprep.mubr.f32.mxu1 %v5787_v29  ;;  %v1790_v29 = vld [vmem:[#allocation3 + $0x2d8] sm:$0xff]  ;;  %v4982_v55 = vpack.c.bf16 %v1794_v48, %v1793_v47  ;;  %v5931_v48 = vld [vmem:[%s5779_s10 + $0xaa] sm:$0xff]  ;;  %v872_v37 = vld [vmem:[#allocation3 + $0x160] sm:$0xff] }
  0x9a   : > { %4385 = vmatprep.mubr.f32.mxu0 %v3411_v63  ;;  %4959 = vmatprep.subr.bf16.mxu0 %v4958_v62  ;;  %v4974_v36 = vpack.c.bf16 %v1790_v29, %v1789_v28  ;;  %v5893_v28 = vld [vmem:[%s5779_s10 + $0x6a] sm:$0xff]  ;;  %v5896_v29 = vld [vmem:[%s5779_s10 + $0x121] sm:$0xff] }
  0x9b   : > { %4066 = vmatmul.mubr.f32.gmra.mrb[2].mxu1 %v3410_v61  ;;  %4831 = vmatprep.subr.bf16.mxu1 %v4830_v0  ;;  %v5833_v61 = vld [vmem:[%s5779_s10 + $0xc9] sm:$0xff]  ;;  %6509 = vst [vmem:[#allocation23_spill] sm:$0xff] %v5896_v29  ;;  %v5928_v47 = vld [vmem:[%s5779_s10 + $0x151] sm:$0xff]  ;;  %v6081_v12 = vld [vmem:[%s5779_s10 + $0xc0] sm:$0xff] }
  0x9c   : > { %4386 = vmatmul.mubr.f32.gmra.mrb[2].mxu0 %v3412_v5  ;;  %4068 = vmatprep.mubr.f32.mxu1 %v3411_v63  ;;  %v4986_v63 = vpack.c.bf16 %v2087_v57, %v2086_v56  ;;  %6513 = vst [vmem:[#allocation27_spill] sm:$0xff] %v5928_v47  ;;  %v5944_v56 = vld [vmem:[%s5779_s10 + $0x169] sm:$0xff]  ;;  %6529 = vst [vmem:[#allocation43_spill] sm:$0xff] %v6081_v12 }
  0x9d   : > { %4961 = vmatpush3.bf16.msra.mxu0 %v4958_v62  ;;  %4388 = vmatprep.mubr.f32.mxu0 %v3413_v6  ;;  %v5836_v62 = vld [vmem:[%s5779_s10 + $0x1a] sm:$0xff]  ;;  %6515 = vst [vmem:[#allocation29_spill] sm:$0xff] %v5944_v56  ;;  %v5947_v57 = vld [vmem:[%s5779_s10 + $0xc2] sm:$0xff] }
  0x9e   : > { %4963 = vmatprep.subr.bf16.mxu0 %v4962_v8  ;;  %4833 = vmatpush3.bf16.msra.mxu1 %v4830_v0  ;;  %v2088_v0 = vld [vmem:[#allocation3 + $0x310] sm:$0xff]  ;;  %v1168_v17 = vld [vmem:[#allocation3 + $0x188] sm:$0xff] }
  0x9f   : > { %4069 = vmatmul.mubr.f32.gmra.mrb[4].mxu1 %v3412_v5  ;;  %4835 = vmatprep.subr.bf16.mxu1 %v4834_v11  ;;  %v5850_v5 = vld [vmem:[%s5779_s10 + $0x32] sm:$0xff] }
  0xa0   : > { %4389 = vmatmul.mubr.f32.gmra.mrb[4].mxu0 %v3414_v15  ;;  %4071 = vmatprep.mubr.f32.mxu1 %v3413_v6  ;;  %v4990_v6 = vpack.c.bf16 %v2089_v1, %v2088_v0  ;;  %v5957_v0 = vld [vmem:[%s5779_s10 + $0xca] sm:$0xff]  ;;  %v280_v1 = vld [vmem:[%s5779_s10] sm:$0xff] }
  0xa1   : > { %4965 = vmatpush3.bf16.msra.mxu0 %v4962_v8  ;;  %4391 = vmatprep.mubr.f32.mxu0 %v3415_v16  ;;  %v2090_v8 = vld [vmem:[#allocation3 + $0x320] sm:$0xff] }
  0xa2   : > { %4967 = vmatprep.subr.bf16.mxu0 %v4966_v18  ;;  %4837 = vmatpush3.bf16.msra.mxu1 %v4834_v11  ;;  %v5861_v11 = vld [vmem:[%s5779_s10 + $0x3a] sm:$0xff] }
  0xa3   : > { %4072 = vmatmul.mubr.f32.gmra.mrb[6].mxu1 %v3414_v15  ;;  %4839 = vmatprep.subr.bf16.mxu1 %v4838_v21  ;;  %v4994_v15 = vpack.c.bf16 %v2091_v9, %v2090_v8  ;;  %v5963_v8 = vpack.c.bf16 %v2393_v60, %v2392_v59  ;;  %v862_v9 = vld [vmem:[#allocation3 + $0x110] sm:$0xff]  ;;  %v6006_v59 = vld [vmem:[%s5779_s10 + $0x48] sm:$0xff] }
  0xa4   : > { %4392 = vmatmul.mubr.f32.gmra.mrb[6].mxu0 %v3416_v25  ;;  %4074 = vmatprep.mubr.f32.mxu1 %v3415_v16  ;;  %v2092_v16 = vld [vmem:[#allocation3 + $0x330] sm:$0xff]  ;;  %6519 = vst [vmem:[#allocation33_spill] sm:$0xff] %v6006_v59  ;;  %v6009_v60 = vld [vmem:[%s5779_s10 + $0x122] sm:$0xff] }
  0xa5   : > { %4969 = vmatpush3.bf16.msra.mxu0 %v4966_v18  ;;  %4394 = vmatprep.mubr.f32.mxu0 %v3417_v26  ;;  %v2093_v18 = vld [vmem:[#allocation3 + $0x338] sm:$0xff] }
  0xa6   : > { %4971 = vmatprep.subr.bf16.mxu0 %v4970_v27  ;;  %4841 = vmatpush3.bf16.msra.mxu1 %v4838_v21  ;;  %v5880_v21 = vld [vmem:[%s5779_s10 + $0x109] sm:$0xff]  ;;  %v4998_v24 = vpack.c.bf16 %v2093_v18, %v2092_v16 }
  0xa7   : > { %4075 = vmatmul.mubr.f32.gmra.mrb[8].mxu1 %v3416_v25  ;;  %4843 = vmatprep.subr.bf16.mxu1 %v4842_v30  ;;  %6507 = vst [vmem:[#allocation21_spill] sm:$0xff] %v5880_v21  ;;  %v2094_v25 = vld [vmem:[#allocation3 + $0x340] sm:$0xff]  ;;  %v281_v16 = vld [vmem:[%s5779_s10 + $0x8] sm:$0xff] }
  0xa8   : > { %4395 = vmatmul.mubr.f32.gmra.mrb[8].mxu0 %v3418_v34  ;;  %4077 = vmatprep.mubr.f32.mxu1 %v3417_v26  ;;  %v2095_v26 = vld [vmem:[#allocation3 + $0x348] sm:$0xff] }
  0xa9   : > { %4973 = vmatpush3.bf16.msra.mxu0 %v4970_v27  ;;  %4397 = vmatprep.mubr.f32.mxu0 %v5821_v35  ;;  %v5889_v27 = vld [vmem:[%s5779_s10 + $0x111] sm:$0xff]  ;;  %v5002_v32 = vpack.c.bf16 %v2095_v26, %v2094_v25  ;;  %v5970_v18 = vld [vmem:[%s5779_s10 + $0xe2] sm:$0xff] }
  0xaa   : > { %4975 = vmatprep.subr.bf16.mxu0 %v4974_v36  ;;  %4845 = vmatpush3.bf16.msra.mxu1 %v4842_v30  ;;  %6508 = vst [vmem:[#allocation22_spill] sm:$0xff] %v5889_v27  ;;  %v5899_v30 = vld [vmem:[%s5779_s10 + $0x7a] sm:$0xff]  ;;  %v5976_v25 = vld [vmem:[%s5779_s10 + $0xf2] sm:$0xff] }
  0xab   : > { %4078 = vmatmul.mubr.f32.gmra.mrb[10].mxu1 %v3418_v34  ;;  %4847 = vmatprep.subr.bf16.mxu1 %v4846_v40  ;;  %v2097_v34 = vld [vmem:[#allocation3 + $0x358] sm:$0xff] }
  0xac   : > { %4398 = vmatmul.mubr.f32.gmra.mrb[10].mxu0 %v3420_v44  ;;  %4080 = vmatprep.mubr.f32.mxu1 %v5821_v35  ;;  %v5006_v41 = vpack.c.bf16 %v2097_v34, %v2096_v33  ;;  %v865_v33 = vld [vmem:[#allocation3 + $0x128] sm:$0xff]  ;;  %v5982_v34 = vld [vmem:[%s5779_s10 + $0x20] sm:$0xff] }
  0xad   : > { %4977 = vmatpush3.bf16.msra.mxu0 %v4974_v36  ;;  %4400 = vmatprep.mubr.f32.mxu0 %v3421_v45  ;;  %v5905_v36 = vld [vmem:[%s5779_s10 + $0x129] sm:$0xff] }
  0xae   : > { %4979 = vmatprep.subr.bf16.mxu0 %v4978_v46  ;;  %4849 = vmatpush3.bf16.msra.mxu1 %v4846_v40  ;;  %6510 = vst [vmem:[#allocation24_spill] sm:$0xff] %v5905_v36  ;;  %v5915_v40 = vld [vmem:[%s5779_s10 + $0x92] sm:$0xff] }
  0xaf   : > { %4081 = vmatmul.mubr.f32.gmra.mrb[12].mxu1 %v3420_v44  ;;  %4851 = vmatprep.subr.bf16.mxu1 %v4850_v50  ;;  %v2099_v44 = vld [vmem:[#allocation3 + $0x368] sm:$0xff] }
  0xb0   : > { %4401 = vmatmul.mubr.f32.gmra.mrb[12].mxu0 %v3422_v53  ;;  %4083 = vmatprep.mubr.f32.mxu1 %v3421_v45  ;;  %v5921_v45 = vld [vmem:[%s5779_s10 + $0x141] sm:$0xff] }
  0xb1   : > { %4981 = vmatpush3.bf16.msra.mxu0 %v4978_v46  ;;  %4403 = vmatprep.mubr.f32.mxu0 %v5829_v54  ;;  %6512 = vst [vmem:[#allocation26_spill] sm:$0xff] %v5921_v45  ;;  %v5925_v46 = vld [vmem:[%s5779_s10 + $0x9a] sm:$0xff] }
  0xb2   : > { %4983 = vmatprep.subr.bf16.mxu0 %v4982_v55  ;;  %4853 = vmatpush3.bf16.msra.mxu1 %v4850_v50  ;;  %v5010_v50 = vpack.c.bf16 %v2099_v44, %v2098_v42  ;;  %v5990_v42 = vld [vmem:[%s5779_s10 + $0x30] sm:$0xff] }
  0xb3   : > { %4084 = vmatmul.mubr.f32.gmra.mrb[14].mxu1 %v3422_v53  ;;  %4855 = vmatprep.subr.bf16.mxu1 %v4854_v58  ;;  %v5937_v53 = vld [vmem:[%s5779_s10 + $0x159] sm:$0xff]  ;;  %6517 = vst [vmem:[#allocation31_spill] sm:$0xff] %v5990_v42  ;;  %v5993_v44 = vld [vmem:[%s5779_s10 + $0x10a] sm:$0xff] }
  0xb4   : > { %4404 = vmatmul.mubr.f32.gmra.mrb[14].mxu0 %v5833_v61  ;;  %4086 = vmatprep.mubr.f32.mxu1 %v5829_v54  ;;  %6514 = vst [vmem:[#allocation28_spill] sm:$0xff] %v5937_v53 }
  0xb5   : > { %4985 = vmatpush3.bf16.msra.mxu0 %v4982_v55  ;;  %4462 = vmatprep.mubr.f32.mxu0 %v5836_v62  ;;  %v5941_v55 = vld [vmem:[%s5779_s10 + $0xb2] sm:$0xff] }
  0xb6   : > { %4987 = vmatprep.subr.bf16.mxu0 %v4986_v63  ;;  %4857 = vmatpush3.bf16.msra.mxu1 %v4854_v58  ;;  %v5014_v58 = vpack.c.bf16 %v2101_v52, %v2100_v51  ;;  %v867_v51 = vld [vmem:[#allocation3 + $0x138] sm:$0xff] }
  0xb7   : > { %4087 = vmatmul.mubr.f32.gmra.mrb[16].mxu1 %v5833_v61  ;;  %4859 = vmatprep.subr.bf16.mxu1 %v5838_v2  ;;  %v5999_v52 = vld [vmem:[%s5779_s10 + $0x38] sm:$0xff] }
  0xb8   : > { %4463 = vmatmul.mubr.f32.vlgmr.msra.gmra.mrb[0].mxu0 %v5844_v3  ;;  %4089 = vmatprep.mubr.f32.mxu1 %v5847_v4  ;;  %6518 = vst [vmem:[#allocation32_spill] sm:$0xff] %v5999_v52 }
  0xb9   : > { %4989 = vmatpush3.bf16.msra.mxu0 %v4986_v63  ;;  %4465 = vmatprep.mubr.f32.mxu0 %v5850_v5  ;;  %v5953_v63 = vld [vmem:[%s5779_s10 + $0x171] sm:$0xff] }
  0xba   : > { %4991 = vmatprep.subr.bf16.mxu0 %v4990_v6  ;;  %6516 = vst [vmem:[#allocation30_spill] sm:$0xff] %v5953_v63 }
  0xbb   : > { %4090 = vmatmul.mubr.f32.gmra.mrb[18].mxu1 %v5857_v10 }
  0xbc   : > { %4466 = vmatmul.mubr.f32.gmra.mrb[2].mxu0 %v5861_v11  ;;  %4092 = vmatprep.mubr.f32.mxu1 %v5864_v13 }
  0xbd   : > { %4468 = vmatprep.mubr.f32.mxu0 %v5867_v14  ;;  %4993 = vmatpush3.bf16.msra.mxu0 %v4990_v6  ;;  %v5961_v6 = vld [vmem:[%s5779_s10 + $0xda] sm:$0xff] }
  0xbe   : > { %4995 = vmatprep.subr.bf16.mxu0 %v4994_v15 }
  0xbf   : > { %4093 = vmatmul.mubr.f32.gmra.mrb[20].mxu1 %v5873_v19  ;;  %v827_v19 = vld [vmem:[%s5779_s10 + $0x2] sm:$0xff] }
  0xc0   : > { %4469 = vmatmul.mubr.f32.gmra.mrb[4].mxu0 %v5877_v20  ;;  %4095 = vmatprep.mubr.f32.mxu1 %v5880_v21  ;;  %v6088_v21 = vld [vmem:[%s5779_s10 + $0xc8] sm:$0xff] }
  0xc1   : > { %4471 = vmatprep.mubr.f32.mxu0 %v5883_v22  ;;  %4997 = vmatpush3.bf16.msra.mxu0 %v4994_v15  ;;  %v863_v15 = vld [vmem:[#allocation3 + $0x118] sm:$0xff]  ;;  %6530 = vst [vmem:[#allocation44_spill] sm:$0xff] %v6088_v21 }
  0xc2   : > { %4999 = vmatprep.subr.bf16.mxu0 %v4998_v24  ;;  %v4862_v26 = vpack.c.bf16 %v863_v15, %v862_v9  ;;  %v868_v9 = vld [vmem:[#allocation3 + $0x140] sm:$0xff]  ;;  %v869_v15 = vld [vmem:[#allocation3 + $0x148] sm:$0xff] }
  0xc3   : > { %4096 = vmatmul.mubr.f32.gmra.mrb[22].mxu1 %v5889_v27  ;;  %v3472_v27 = vld [vmem:[%s5779_s10 + $0x18a] sm:$0xff] }
  0xc4   : > { %4472 = vmatmul.mubr.f32.gmra.mrb[6].mxu0 %v5893_v28  ;;  %4098 = vmatprep.mubr.f32.mxu1 %v5896_v29  ;;  %v6077_v29 = vld [vmem:[%s5779_s10 + $0xb0] sm:$0xff] }
  0xc5   : > { %4474 = vmatprep.mubr.f32.mxu0 %v5899_v30  ;;  %5001 = vmatpush3.bf16.msra.mxu0 %v4998_v24  ;;  %v5973_v24 = vld [vmem:[%s5779_s10 + $0x18] sm:$0xff]  ;;  %6528 = vst [vmem:[#allocation42_spill] sm:$0xff] %v6077_v29 }
  0xc6   : > { %5003 = vmatprep.subr.bf16.mxu0 %v5002_v32 }
  0xc7   : > { %4099 = vmatmul.mubr.f32.gmra.mrb[24].mxu1 %v5905_v36  ;;  %v1167_v36 = vld [vmem:[#allocation3 + $0x180] sm:$0xff] }
  0xc8   : > { %4475 = vmatmul.mubr.f32.gmra.mrb[8].mxu0 %v5909_v38  ;;  %4101 = vmatprep.mubr.f32.mxu1 %v5912_v39  ;;  %v6070_v39 = vld [vmem:[%s5779_s10 + $0xa8] sm:$0xff] }
  0xc9   : > { %4477 = vmatprep.mubr.f32.mxu0 %v5915_v40  ;;  %5005 = vmatpush3.bf16.msra.mxu0 %v5002_v32  ;;  %v864_v32 = vld [vmem:[#allocation3 + $0x120] sm:$0xff]  ;;  %6527 = vst [vmem:[#allocation41_spill] sm:$0xff] %v6070_v39 }
  0xca   : > { %5007 = vmatprep.subr.bf16.mxu0 %v5006_v41 }
  0xcb   : > { %4102 = vmatmul.mubr.f32.gmra.mrb[26].mxu1 %v5921_v45  ;;  %v875_v45 = vld [vmem:[#allocation3 + $0x178] sm:$0xff] }
  0xcc   : > { %4478 = vmatmul.mubr.f32.gmra.mrb[10].mxu0 %v5925_v46  ;;  %4104 = vmatprep.mubr.f32.mxu1 %v5928_v47  ;;  %v874_v47 = vld [vmem:[#allocation3 + $0x170] sm:$0xff] }
  0xcd   : > { %4480 = vmatprep.mubr.f32.mxu0 %v5931_v48  ;;  %5009 = vmatpush3.bf16.msra.mxu0 %v5006_v41  ;;  %v5987_v41 = vld [vmem:[%s5779_s10 + $0xfa] sm:$0xff] }
  0xce   : > { %5011 = vmatprep.subr.bf16.mxu0 %v5010_v50 }
  0xcf   : > { %4105 = vmatmul.mubr.f32.gmra.mrb[28].mxu1 %v5937_v53  ;;  %v6047_v53 = vld [vmem:[%s5779_s10 + $0x80] sm:$0xff] }
  0xd0   : > { %4481 = vmatmul.mubr.f32.gmra.mrb[12].mxu0 %v5941_v55  ;;  %4107 = vmatprep.mubr.f32.mxu1 %v5944_v56  ;;  %v873_v56 = vld [vmem:[#allocation3 + $0x168] sm:$0xff]  ;;  %6524 = vst [vmem:[#allocation38_spill] sm:$0xff] %v6047_v53 }
  0xd1   : > { %4483 = vmatprep.mubr.f32.mxu0 %v5947_v57  ;;  %5013 = vmatpush3.bf16.msra.mxu0 %v5010_v50  ;;  %v4866_v50 = vpack.c.bf16 %v865_v33, %v864_v32  ;;  %v6022_v32 = vld [vmem:[%s5779_s10 + $0x60] sm:$0xff] }
  0xd2   : > { %5015 = vmatprep.subr.bf16.mxu0 %v5014_v58  ;;  %6521 = vst [vmem:[#allocation35_spill] sm:$0xff] %v6022_v32  ;;  %v6025_v33 = vld [vmem:[%s5779_s10 + $0x13a] sm:$0xff] }
  0xd3   : > { %4108 = vmatmul.mubr.f32.gmra.mrb[30].mxu1 %v5953_v63  ;;  %v6038_v63 = vld [vmem:[%s5779_s10 + $0x78] sm:$0xff] }
  0xd4   : > { %4484 = vmatmul.mubr.f32.gmra.mrb[14].mxu0 %v5957_v0  ;;  %4142 = vmatprep.mubr.f32.mxu1 %v280_v1  ;;  %6523 = vst [vmem:[#allocation37_spill] sm:$0xff] %v6038_v63 }
  0xd5   : > { %4486 = vmatprep.mubr.f32.mxu0 %v5961_v6  ;;  %5017 = vmatpush3.bf16.msra.mxu0 %v5014_v58  ;;  %v6003_v58 = vld [vmem:[%s5779_s10 + $0x112] sm:$0xff] }
  0xd6   : > { %5019 = vmatprep.subr.bf16.mxu0 %v5963_v8 }
  0xd7   : > { %4143 = vmatmul.mubr.f32.vlgmr.msra.gmra.mrb[0].mxu1 %v281_v16  ;;  %v6015_v16 = vld [vmem:[%s5779_s10 + $0x50] sm:$0xff] }
  0xd8   : > { %4487 = vmatmul.mubr.f32.gmra.mrb[16].mxu0 %v5970_v18  ;;  %4861 = vmatpush3.bf16.msra.mxu1 %v5838_v2  ;;  %v866_v2 = vld [vmem:[#allocation3 + $0x130] sm:$0xff]  ;;  %6520 = vst [vmem:[#allocation34_spill] sm:$0xff] %v6015_v16 }
  0xd9   : > { %4145 = vmatprep.mubr.f32.mxu1 %v5973_v24  ;;  %4489 = vmatprep.mubr.f32.mxu0 %v5976_v25  ;;  %v4870_v1 = vpack.c.bf16 %v867_v51, %v866_v2  ;;  %v4874_v2 = vpack.c.bf16 %v869_v15, %v868_v9  ;;  %v870_v51 = vld [vmem:[#allocation3 + $0x150] sm:$0xff] }
  0xda   : > { %4863 = vmatprep.subr.bf16.mxu1 %v4862_v26  ;;  %v6041_v9 = vld [vmem:[%s5779_s10 + $0x152] sm:$0xff]  ;;  %v4878_v15 = vpack.c.bf16 %v871_v49, %v870_v51  ;;  %v6057_v49 = vld [vmem:[%s5779_s10 + $0x16a] sm:$0xff]  ;;  %v4882_v51 = vpack.c.bf16 %v873_v56, %v872_v37  ;;  %v3471_v37 = vld [vmem:[%s5779_s10 + $0x182] sm:$0xff]  ;;  %v4886_v56 = vpack.c.bf16 %v875_v45, %v874_v47 }
  0xdb   : > { %4146 = vmatmul.mubr.f32.gmra.mrb[2].mxu1 %v5982_v34  ;;  %v2394_v45 = vld [vmem:[#allocation3 + $0x390] sm:$0xff]  ;;  %v2395_v47 = vld [vmem:[#allocation3 + $0x398] sm:$0xff] }
  0xdc   : > { %4490 = vmatmul.mubr.f32.gmra.mrb[18].mxu0 %v5987_v41  ;;  %4148 = vmatprep.mubr.f32.mxu1 %v5990_v42 }
  0xdd   : > { %4492 = vmatprep.mubr.f32.mxu0 %v5993_v44  ;;  %4865 = vmatpush3.bf16.msra.mxu1 %v4862_v26  ;;  %v6019_v26 = vld [vmem:[%s5779_s10 + $0x12a] sm:$0xff] }
  0xde   : > { %4867 = vmatprep.subr.bf16.mxu1 %v4866_v50 }
  0xdf   : > { %4149 = vmatmul.mubr.f32.gmra.mrb[4].mxu1 %v5999_v52 }
  0xe0   : > { %4493 = vmatmul.mubr.f32.gmra.mrb[20].mxu0 %v6003_v58  ;;  %4151 = vmatprep.mubr.f32.mxu1 %v6006_v59 }
  0xe1   : > { %4495 = vmatprep.mubr.f32.mxu0 %v6009_v60  ;;  %4869 = vmatpush3.bf16.msra.mxu1 %v4866_v50  ;;  %v6035_v50 = vld [vmem:[%s5779_s10 + $0x142] sm:$0xff] }
  0xe2   : > { %4871 = vmatprep.subr.bf16.mxu1 %v4870_v1 }
  0xe3   : > { %4152 = vmatmul.mubr.f32.gmra.mrb[6].mxu1 %v6015_v16 }
  0xe4   : > { %4496 = vmatmul.mubr.f32.gmra.mrb[22].mxu0 %v6019_v26  ;;  %4154 = vmatprep.mubr.f32.mxu1 %v6022_v32 }
  0xe5   : > { %4498 = vmatprep.mubr.f32.mxu0 %v6025_v33  ;;  %4873 = vmatpush3.bf16.msra.mxu1 %v4870_v1  ;;  %v6051_v1 = vld [vmem:[%s5779_s10 + $0x15a] sm:$0xff] }
  0xe6   : > { %4875 = vmatprep.subr.bf16.mxu1 %v4874_v2 }
  0xe7   : > { %4155 = vmatmul.mubr.f32.gmra.mrb[8].mxu1 %v6031_v43 }
  0xe8   : > { %4499 = vmatmul.mubr.f32.gmra.mrb[24].mxu0 %v6035_v50  ;;  %4157 = vmatprep.mubr.f32.mxu1 %v6038_v63 }
  0xe9   : > { %4501 = vmatprep.mubr.f32.mxu0 %v6041_v9  ;;  %4877 = vmatpush3.bf16.msra.mxu1 %v4874_v2  ;;  %v6067_v2 = vld [vmem:[%s5779_s10 + $0x172] sm:$0xff] }
  0xea   : > { %4879 = vmatprep.subr.bf16.mxu1 %v4878_v15 }
  0xeb   : > { %4158 = vmatmul.mubr.f32.gmra.mrb[10].mxu1 %v6047_v53 }
  0xec   : > { %4502 = vmatmul.mubr.f32.gmra.mrb[26].mxu0 %v6051_v1  ;;  %4160 = vmatprep.mubr.f32.mxu1 %v6054_v31 }
  0xed   : > { %4504 = vmatprep.mubr.f32.mxu0 %v6057_v49  ;;  %4881 = vmatpush3.bf16.msra.mxu1 %v4878_v15  ;;  %v6083_v15 = vpack.c.bf16 %v1168_v17, %v1167_v36  ;;  %v2396_v17 = vld [vmem:[#allocation3 + $0x3a0] sm:$0xff]  ;;  %v2397_v36 = vld [vmem:[#allocation3 + $0x3a8] sm:$0xff] }
  0xee   : > { %4883 = vmatprep.subr.bf16.mxu1 %v4882_v51 }
  0xef   : > { %4161 = vmatmul.mubr.f32.gmra.mrb[12].mxu1 %v6063_v23 }
  0xf0   : > { %4505 = vmatmul.mubr.f32.gmra.mrb[28].mxu0 %v6067_v2  ;;  %4163 = vmatprep.mubr.f32.mxu1 %v6070_v39 }
  0xf1   : > { %4507 = vmatprep.mubr.f32.mxu0 %v3471_v37  ;;  %4885 = vmatpush3.bf16.msra.mxu1 %v4882_v51  ;;  %v6092_v37 = vld [vmem:[%s5779_s10 + $0xd8] sm:$0xff]  ;;  %v5022_v51 = vpack.c.bf16 %v2395_v47, %v2394_v45  ;;  %v5026_v45 = vpack.c.bf16 %v2397_v36, %v2396_v17  ;;  %v2398_v47 = vld [vmem:[#allocation3 + $0x3b0] sm:$0xff]  ;;  %v2400_v17 = vld [vmem:[#allocation3 + $0x3c0] sm:$0xff] }
  0xf2   : > { %4887 = vmatprep.subr.bf16.mxu1 %v4886_v56  ;;  %6531 = vst [vmem:[#allocation45_spill] sm:$0xff] %v6092_v37  ;;  %v2401_v36 = vld [vmem:[#allocation3 + $0x3c8] sm:$0xff] }
  0xf3   : > { %4164 = vmatmul.mubr.f32.gmra.mrb[14].mxu1 %v6077_v29 }
  0xf4   : > { %4508 = vmatmul.mubr.f32.gmra.mrb[30].mxu0 %v3472_v27  ;;  %4166 = vmatprep.mubr.f32.mxu1 %v6081_v12  ;;  %v6099_v27 = vld [vmem:[%s5779_s10 + $0xe0] sm:$0xff] }
  0xf5   : > { %4542 = vmatprep.mubr.f32.mxu0 %v5990_v42  ;;  %4889 = vmatpush3.bf16.msra.mxu1 %v4886_v56  ;;  %v6104_v56 = vld [vmem:[%s5779_s10 + $0xf0] sm:$0xff]  ;;  %v2399_v42 = vld [vmem:[#allocation3 + $0x3b8] sm:$0xff] }
  0xf6   : > { %4891 = vmatprep.subr.bf16.mxu1 %v6083_v15 }
  0xf7   : > { %4167 = vmatmul.mubr.f32.gmra.mrb[16].mxu1 %v6088_v21 }
  0xf8   : > { %4543 = vmatmul.mubr.f32.vlgmr.msra.gmra.mrb[0].mxu0 %v5999_v52  ;;  %4169 = vmatprep.mubr.f32.mxu1 %v6092_v37  ;;  %v6110_v52 = vld [vmem:[%s5779_s10 + $0xf8] sm:$0xff] }
  0xf9   : > { %5021 = vmatpush3.bf16.msra.mxu0 %v5963_v8  ;;  %4545 = vmatprep.mubr.f32.mxu0 %v6006_v59  ;;  %v6114_v8 = vld [vmem:[%s5779_s10 + $0x108] sm:$0xff]  ;;  %v5030_v59 = vpack.c.bf16 %v2399_v42, %v2398_v47  ;;  %v2402_v42 = vld [vmem:[#allocation3 + $0x3d0] sm:$0xff]  ;;  %v2403_v47 = vld [vmem:[#allocation3 + $0x3d8] sm:$0xff] }
  0xfa   : > { %5023 = vmatprep.subr.bf16.mxu0 %v5022_v51 }
  0xfb   : > { %4170 = vmatmul.mubr.f32.gmra.mrb[18].mxu1 %v6099_v27 }
  0xfc   : > { %4546 = vmatmul.mubr.f32.gmra.mrb[2].mxu0 %v6015_v16  ;;  %4172 = vmatprep.mubr.f32.mxu1 %v6104_v56  ;;  %v6120_v16 = vld [vmem:[%s5779_s10 + $0x110] sm:$0xff] }
  0xfd   : > { %4548 = vmatprep.mubr.f32.mxu0 %v6022_v32  ;;  %5025 = vmatpush3.bf16.msra.mxu0 %v5022_v51  ;;  %v6124_v32 = vld [vmem:[%s5779_s10 + $0x120] sm:$0xff]  ;;  %v5034_v51 = vpack.c.bf16 %v2401_v36, %v2400_v17  ;;  %v2405_v36 = vld [vmem:[#allocation3 + $0x3e8] sm:$0xff] }
  0xfe   : > { %5027 = vmatprep.subr.bf16.mxu0 %v5026_v45  ;;  %v2404_v17 = vld [vmem:[#allocation3 + $0x3e0] sm:$0xff] }
  0xff   : > { %4173 = vmatmul.mubr.f32.gmra.mrb[20].mxu1 %v6110_v52 }
 0x100   : > { %4549 = vmatmul.mubr.f32.gmra.mrb[4].mxu0 %v6031_v43  ;;  %4175 = vmatprep.mubr.f32.mxu1 %v6114_v8  ;;  %v6130_v43 = vld [vmem:[%s5779_s10 + $0x128] sm:$0xff] }
 0x101   : > { %4551 = vmatprep.mubr.f32.mxu0 %v6038_v63  ;;  %5029 = vmatpush3.bf16.msra.mxu0 %v5026_v45  ;;  %v6134_v63 = vld [vmem:[%s5779_s10 + $0x138] sm:$0xff]  ;;  %v5038_v45 = vpack.c.bf16 %v2403_v47, %v2402_v42  ;;  %v2406_v42 = vld [vmem:[#allocation3 + $0x3f0] sm:$0xff] }
 0x102   : > { %5031 = vmatprep.subr.bf16.mxu0 %v5030_v59  ;;  %v2407_v47 = vld [vmem:[#allocation3 + $0x3f8] sm:$0xff] }
 0x103   : > { %4176 = vmatmul.mubr.f32.gmra.mrb[22].mxu1 %v6120_v16 }
 0x104   : > { %4552 = vmatmul.mubr.f32.gmra.mrb[6].mxu0 %v6047_v53  ;;  %4178 = vmatprep.mubr.f32.mxu1 %v6124_v32  ;;  %v6140_v53 = vld [vmem:[%s5779_s10 + $0x140] sm:$0xff] }
 0x105   : > { %4554 = vmatprep.mubr.f32.mxu0 %v6054_v31  ;;  %5033 = vmatpush3.bf16.msra.mxu0 %v5030_v59  ;;  %v6144_v31 = vld [vmem:[%s5779_s10 + $0x150] sm:$0xff]  ;;  %v5042_v59 = vpack.c.bf16 %v2405_v36, %v2404_v17  ;;  %v2698_v17 = vld [vmem:[#allocation3 + $0x400] sm:$0xff]  ;;  %v2699_v36 = vld [vmem:[#allocation3 + $0x408] sm:$0xff] }
 0x106   : > { %5035 = vmatprep.subr.bf16.mxu0 %v5034_v51 }
 0x107   : > { %4179 = vmatmul.mubr.f32.gmra.mrb[24].mxu1 %v6130_v43 }
 0x108   : > { %4555 = vmatmul.mubr.f32.gmra.mrb[8].mxu0 %v6063_v23  ;;  %4181 = vmatprep.mubr.f32.mxu1 %v6134_v63  ;;  %v6150_v23 = vld [vmem:[%s5779_s10 + $0x158] sm:$0xff] }
 0x109   : > { %4557 = vmatprep.mubr.f32.mxu0 %v6070_v39  ;;  %5037 = vmatpush3.bf16.msra.mxu0 %v5034_v51  ;;  %v6154_v39 = vld [vmem:[%s5779_s10 + $0x168] sm:$0xff]  ;;  %v5046_v51 = vpack.c.bf16 %v2407_v47, %v2406_v42  ;;  %v1170_v42 = vld [vmem:[#allocation3 + $0x198] sm:$0xff] }
 0x10a   : > { %5039 = vmatprep.subr.bf16.mxu0 %v5038_v45  ;;  %v828_v47 = vld [vmem:[%s5779_s10 + $0xa] sm:$0xff] }
 0x10b   : > { %4182 = vmatmul.mubr.f32.gmra.mrb[26].mxu1 %v6140_v53 }
 0x10c   : > { %4558 = vmatmul.mubr.f32.gmra.mrb[10].mxu0 %v6077_v29  ;;  %4184 = vmatprep.mubr.f32.mxu1 %v6144_v31  ;;  %v6160_v29 = vld [vmem:[%s5779_s10 + $0x170] sm:$0xff] }
 0x10d   : > { %4560 = vmatprep.mubr.f32.mxu0 %v6081_v12  ;;  %5041 = vmatpush3.bf16.msra.mxu0 %v5038_v45  ;;  %v6164_v12 = vpack.c.bf16 %v2699_v36, %v2698_v17  ;;  %v1169_v45 = vld [vmem:[#allocation3 + $0x190] sm:$0xff] }
 0x10e   : > { %5043 = vmatprep.subr.bf16.mxu0 %v5042_v59  ;;  %v1173_v17 = vld [vmem:[#allocation3 + $0x1b0] sm:$0xff] }
 0x10f   : > { %4185 = vmatmul.mubr.f32.gmra.mrb[28].mxu1 %v6150_v23 }
 0x110   : > { %4561 = vmatmul.mubr.f32.gmra.mrb[12].mxu0 %v6088_v21  ;;  %4187 = vmatprep.mubr.f32.mxu1 %v6154_v39  ;;  %v4894_v21 = vpack.c.bf16 %v1170_v42, %v1169_v45  ;;  %v1181_v45 = vld [vmem:[#allocation3 + $0x1f0] sm:$0xff]  ;;  %v3503_v42 = vld [vmem:[%s5779_s10 + $0x198] sm:$0xff] }
 0x111   : > { %4563 = vmatprep.mubr.f32.mxu0 %v6092_v37  ;;  %5045 = vmatpush3.bf16.msra.mxu0 %v5042_v59  ;;  %v1171_v37 = vld [vmem:[#allocation3 + $0x1a0] sm:$0xff]  ;;  %v1172_v59 = vld [vmem:[#allocation3 + $0x1a8] sm:$0xff] }
 0x112   : > { %5047 = vmatprep.subr.bf16.mxu0 %v5046_v51 }
 0x113   : > { %4188 = vmatmul.mubr.f32.gmra.mrb[30].mxu1 %v6160_v29 }
 0x114   : > { %4564 = vmatmul.mubr.f32.gmra.mrb[14].mxu0 %v6099_v27  ;;  %4222 = vmatprep.mubr.f32.mxu1 %v827_v19  ;;  %v4898_v19 = vpack.c.bf16 %v1172_v59, %v1171_v37  ;;  %v1180_v37 = vld [vmem:[#allocation3 + $0x1e8] sm:$0xff]  ;;  %v2700_v59 = vld [vmem:[#allocation3 + $0x410] sm:$0xff] }
 0x115   : > { %4566 = vmatprep.mubr.f32.mxu0 %v6104_v56  ;;  %5049 = vmatpush3.bf16.msra.mxu0 %v5046_v51  ;;  %v1174_v51 = vld [vmem:[#allocation3 + $0x1b8] sm:$0xff] }
 0x116   : > { %5051 = vmatprep.subr.bf16.mxu0 %v6164_v12  ;;  %v4902_v36 = vpack.c.bf16 %v1174_v51, %v1173_v17  ;;  %v3507_v17 = vld [vmem:[%s5779_s10 + $0x49] sm:$0xff] }
 0x117   : > { %4223 = vmatmul.mubr.f32.vlgmr.msra.gmra.mrb[0].mxu1 %v828_v47 }
 0x118   : > { %4567 = vmatmul.mubr.f32.gmra.mrb[16].mxu0 %v6110_v52  ;;  %4893 = vmatpush3.bf16.msra.mxu1 %v6083_v15  ;;  %v1176_v15 = vld [vmem:[#allocation3 + $0x1c8] sm:$0xff] }
 0x119   : > { %4225 = vmatprep.mubr.f32.mxu1 %v5836_v62  ;;  %4569 = vmatprep.mubr.f32.mxu0 %v6114_v8  ;;  %v1175_v62 = vld [vmem:[#allocation3 + $0x1c0] sm:$0xff] }
 0x11a   : > { %4895 = vmatprep.subr.bf16.mxu1 %v4894_v21 }
 0x11b   : > { %4226 = vmatmul.mubr.f32.gmra.mrb[2].mxu1 %v5844_v3  ;;  %v4906_v3 = vpack.c.bf16 %v1176_v15, %v1175_v62  ;;  %v2704_v15 = vld [vmem:[#allocation3 + $0x430] sm:$0xff] }
 0x11c   : > { %4570 = vmatmul.mubr.f32.gmra.mrb[18].mxu0 %v6120_v16  ;;  %4228 = vmatprep.mubr.f32.mxu1 %v5850_v5  ;;  %v1177_v5 = vld [vmem:[#allocation3 + $0x1d0] sm:$0xff] }
 0x11d   : > { %4572 = vmatprep.mubr.f32.mxu0 %v6124_v32  ;;  %4897 = vmatpush3.bf16.msra.mxu1 %v4894_v21  ;;  %v1178_v21 = vld [vmem:[#allocation3 + $0x1d8] sm:$0xff] }
 0x11e   : > { %4899 = vmatprep.subr.bf16.mxu1 %v4898_v19 }
 0x11f   : > { %4229 = vmatmul.mubr.f32.gmra.mrb[4].mxu1 %v5861_v11  ;;  %v4910_v11 = vpack.c.bf16 %v1178_v21, %v1177_v5  ;;  %v3511_v5 = vld [vmem:[%s5779_s10 + $0x79] sm:$0xff]  ;;  %v2707_v21 = vld [vmem:[#allocation3 + $0x448] sm:$0xff] }
 0x120   : > { %4573 = vmatmul.mubr.f32.gmra.mrb[20].mxu0 %v6130_v43  ;;  %4231 = vmatprep.mubr.f32.mxu1 %v5867_v14  ;;  %v1179_v14 = vld [vmem:[#allocation3 + $0x1e0] sm:$0xff] }
 0x121   : > { %4575 = vmatprep.mubr.f32.mxu0 %v6134_v63  ;;  %4901 = vmatpush3.bf16.msra.mxu1 %v4898_v19  ;;  %v2701_v19 = vld [vmem:[#allocation3 + $0x418] sm:$0xff] }
 0x122   : > { %4903 = vmatprep.subr.bf16.mxu1 %v4902_v36  ;;  %v5054_v51 = vpack.c.bf16 %v2701_v19, %v2700_v59  ;;  %v6550_v59 = vld [vmem:[#allocation16_spill] sm:$0xff]  ;;  %v6551_v19 = vld [vmem:[#allocation38_spill] sm:$0xff] }
 0x123   : > { %4232 = vmatmul.mubr.f32.gmra.mrb[6].mxu1 %v5877_v20  ;;  %v6192_v20 = vld [vmem:[%s5779_s10 + $0x180] sm:$0xff] }
 0x124   : > { %4576 = vmatmul.mubr.f32.gmra.mrb[22].mxu0 %v6140_v53  ;;  %4234 = vmatprep.mubr.f32.mxu1 %v5883_v22  ;;  %v4914_v22 = vpack.c.bf16 %v1180_v37, %v1179_v14  ;;  %v2709_v14 = vld [vmem:[#allocation3 + $0x458] sm:$0xff]  ;;  %v3515_v37 = vld [vmem:[%s5779_s10 + $0xa9] sm:$0xff] }
 0x125   : > { %4578 = vmatprep.mubr.f32.mxu0 %v6144_v31  ;;  %4905 = vmatpush3.bf16.msra.mxu1 %v4902_v36  ;;  %v2703_v36 = vld [vmem:[#allocation3 + $0x428] sm:$0xff] }
 0x126   : > { %4907 = vmatprep.subr.bf16.mxu1 %v4906_v3 }
 0x127   : > { %4235 = vmatmul.mubr.f32.gmra.mrb[8].mxu1 %v5893_v28  ;;  %v1182_v28 = vld [vmem:[#allocation3 + $0x1f8] sm:$0xff] }
 0x128   : > { %4579 = vmatmul.mubr.f32.gmra.mrb[24].mxu0 %v6150_v23  ;;  %4237 = vmatprep.mubr.f32.mxu1 %v5899_v30  ;;  %v6199_v30 = vld [vmem:[%s5779_s10 + $0x188] sm:$0xff]  ;;  %v4918_v47 = vpack.c.bf16 %v1182_v28, %v1181_v45 }
 0x129   : > { %4581 = vmatprep.mubr.f32.mxu0 %v6154_v39  ;;  %4909 = vmatpush3.bf16.msra.mxu1 %v4906_v3  ;;  %v2705_v3 = vld [vmem:[#allocation3 + $0x438] sm:$0xff]  ;;  %v2711_v45 = vld [vmem:[#allocation3 + $0x468] sm:$0xff] }
 0x12a   : > { %4911 = vmatprep.subr.bf16.mxu1 %v4910_v11 }
 0x12b   : > { %4238 = vmatmul.mubr.f32.gmra.mrb[10].mxu1 %v5909_v38  ;;  %v3504_v38 = vld [vmem:[%s5779_s10 + $0x1a0] sm:$0xff] }
 0x12c   : > { %4582 = vmatmul.mubr.f32.gmra.mrb[26].mxu0 %v6160_v29  ;;  %4240 = vmatprep.mubr.f32.mxu1 %v5915_v40  ;;  %v3505_v40 = vld [vmem:[%s5779_s10 + $0x31] sm:$0xff] }
 0x12d   : > { %4584 = vmatprep.mubr.f32.mxu0 %v6192_v20  ;;  %4913 = vmatpush3.bf16.msra.mxu1 %v4910_v11  ;;  %v2708_v11 = vld [vmem:[#allocation3 + $0x450] sm:$0xff] }
 0x12e   : > { %4915 = vmatprep.subr.bf16.mxu1 %v4914_v22 }
 0x12f   : > { %4241 = vmatmul.mubr.f32.gmra.mrb[12].mxu1 %v5925_v46  ;;  %v3506_v46 = vld [vmem:[%s5779_s10 + $0x39] sm:$0xff] }
 0x130   : > { %4585 = vmatmul.mubr.f32.gmra.mrb[28].mxu0 %v6199_v30  ;;  %4243 = vmatprep.mubr.f32.mxu1 %v5931_v48  ;;  %v2702_v48 = vld [vmem:[#allocation3 + $0x420] sm:$0xff] }
 0x131   : > { %4587 = vmatprep.mubr.f32.mxu0 %v3503_v42  ;;  %4917 = vmatpush3.bf16.msra.mxu1 %v4914_v22  ;;  %v5058_v62 = vpack.c.bf16 %v2703_v36, %v2702_v48  ;;  %v2710_v22 = vld [vmem:[#allocation3 + $0x460] sm:$0xff] }
 0x132   : > { %4919 = vmatprep.subr.bf16.mxu1 %v4918_v47  ;;  %v5074_v28 = vpack.c.bf16 %v2711_v45, %v2710_v22  ;;  %v6546_v42 = vld [vmem:[#allocation36_spill] sm:$0xff]  ;;  %v6555_v36 = vld [vmem:[#allocation17_spill] sm:$0xff] }
 0x133   : > { %4244 = vmatmul.mubr.f32.gmra.mrb[14].mxu1 %v5941_v55  ;;  %v3508_v55 = vld [vmem:[%s5779_s10 + $0x51] sm:$0xff]  ;;  %v6273_v48 = vld [vmem:[%s5779_s10 + $0x181] sm:$0xff] }
 0x134   : > { %4588 = vmatmul.mubr.f32.gmra.mrb[30].mxu0 %v3504_v38  ;;  %4246 = vmatprep.mubr.f32.mxu1 %v5947_v57  ;;  %v3509_v57 = vld [vmem:[%s5779_s10 + $0x61] sm:$0xff]  ;;  %v3542_v22 = vld [vmem:[%s5779_s10 + $0x6a] sm:$0xff] }
 0x135   : > { %4622 = vmatprep.mubr.f32.mxu0 %v3505_v40  ;;  %4921 = vmatpush3.bf16.msra.mxu1 %v4918_v47  ;;  %v6547_v47 = vld [vmem:[#allocation26_spill] sm:$0xff]  ;;  %v6548_v38 = vld [vmem:[#allocation37_spill] sm:$0xff]  ;;  %v6549_v40 = vld [vmem:[#allocation27_spill] sm:$0xff] }
 0x136   : > { %5114 = vmatprep.subr.bf16.mxu1 %v5766_v7  ;;  %v3543_v45 = vld [vmem:[%s5779_s10 + $0x7a] sm:$0xff] }
 0x137   : > { %4247 = vmatmul.mubr.f32.gmra.mrb[16].mxu1 %v5957_v0  ;;  %v3510_v0 = vld [vmem:[%s5779_s10 + $0x69] sm:$0xff] }
 0x138   : > { %4623 = vmatmul.mubr.f32.vlgmr.msra.gmra.mrb[0].mxu0 %v3506_v46  ;;  %4249 = vmatprep.mubr.f32.mxu1 %v5961_v6  ;;  %v5062_v6 = vpack.c.bf16 %v2705_v3, %v2704_v15  ;;  %v6552_v46 = vld [vmem:[#allocation28_spill] sm:$0xff]  ;;  %v6281_v15 = vld [vmem:[%s5779_s10 + $0x189] sm:$0xff] }
 0x139   : > { %5053 = vmatpush3.bf16.msra.mxu0 %v6164_v12  ;;  %4625 = vmatprep.mubr.f32.mxu0 %v3507_v17  ;;  %v2706_v12 = vld [vmem:[#allocation3 + $0x440] sm:$0xff]  ;;  %v6553_v17 = vld [vmem:[#allocation39_spill] sm:$0xff] }
 0x13a   : > { %5055 = vmatprep.subr.bf16.mxu0 %v5054_v51  ;;  %v3535_v3 = vld [vmem:[%s5779_s10 + $0x199] sm:$0xff] }
 0x13b   : > { %4250 = vmatmul.mubr.f32.gmra.mrb[18].mxu1 %v5970_v18  ;;  %v3512_v18 = vld [vmem:[%s5779_s10 + $0x81] sm:$0xff] }
 0x13c   : > { %4626 = vmatmul.mubr.f32.gmra.mrb[2].mxu0 %v3508_v55  ;;  %4252 = vmatprep.mubr.f32.mxu1 %v5976_v25  ;;  %v5066_v25 = vpack.c.bf16 %v2707_v21, %v2706_v12  ;;  %v6556_v55 = vld [vmem:[#allocation40_spill] sm:$0xff]  ;;  %v3537_v21 = vld [vmem:[%s5779_s10 + $0x32] sm:$0xff] }
 0x13d   : > { %4628 = vmatprep.mubr.f32.mxu0 %v3509_v57  ;;  %5057 = vmatpush3.bf16.msra.mxu0 %v5054_v51  ;;  %v6554_v51 = vld [vmem:[#allocation29_spill] sm:$0xff]  ;;  %v6557_v57 = vld [vmem:[#allocation30_spill] sm:$0xff] }
 0x13e   : > { %5059 = vmatprep.subr.bf16.mxu0 %v5058_v62  ;;  %v3536_v12 = vld [vmem:[%s5779_s10 + $0x1a1] sm:$0xff] }
 0x13f   : > { %4253 = vmatmul.mubr.f32.gmra.mrb[20].mxu1 %v5987_v41  ;;  %v3514_v41 = vld [vmem:[%s5779_s10 + $0x99] sm:$0xff] }
 0x140   : > { %4629 = vmatmul.mubr.f32.gmra.mrb[4].mxu0 %v3510_v0  ;;  %4255 = vmatprep.mubr.f32.mxu1 %v5993_v44  ;;  %v5070_v44 = vpack.c.bf16 %v2709_v14, %v2708_v11  ;;  %v6559_v0 = vld [vmem:[#allocation18_spill] sm:$0xff]  ;;  %v6564_v11 = vld [vmem:[#allocation45_spill] sm:$0xff]  ;;  %v3538_v14 = vld [vmem:[%s5779_s10 + $0x3a] sm:$0xff] }
 0x141   : > { %4631 = vmatprep.mubr.f32.mxu0 %v3511_v5  ;;  %5061 = vmatpush3.bf16.msra.mxu0 %v5058_v62  ;;  %v6558_v62 = vld [vmem:[#allocation41_spill] sm:$0xff]  ;;  %v6560_v5 = vld [vmem:[#allocation42_spill] sm:$0xff] }
 0x142   : > { %5063 = vmatprep.subr.bf16.mxu0 %v5062_v6 }
 0x143   : > { %4256 = vmatmul.mubr.f32.gmra.mrb[22].mxu1 %v6003_v58  ;;  %v3516_v58 = vld [vmem:[%s5779_s10 + $0xb1] sm:$0xff] }
 0x144   : > { %4632 = vmatmul.mubr.f32.gmra.mrb[6].mxu0 %v3512_v18  ;;  %4258 = vmatprep.mubr.f32.mxu1 %v6009_v60  ;;  %v2713_v60 = vld [vmem:[#allocation3 + $0x478] sm:$0xff] }
 0x145   : > { %4634 = vmatprep.mubr.f32.mxu0 %v5821_v35  ;;  %5065 = vmatpush3.bf16.msra.mxu0 %v5062_v6  ;;  %v2712_v35 = vld [vmem:[#allocation3 + $0x470] sm:$0xff] }
 0x146   : > { %5067 = vmatprep.subr.bf16.mxu0 %v5066_v25  ;;  %v6561_v6 = vld [vmem:[#allocation43_spill] sm:$0xff] }
 0x147   : > { %4259 = vmatmul.mubr.f32.gmra.mrb[24].mxu1 %v6019_v26  ;;  %v5078_v26 = vpack.c.bf16 %v2713_v60, %v2712_v35  ;;  %v6562_v18 = vld [vmem:[#allocation19_spill] sm:$0xff]  ;;  %v3557_v60 = vld [vmem:[%s5779_s10 + $0x122] sm:$0xff] }
 0x148   : > { %4635 = vmatmul.mubr.f32.gmra.mrb[8].mxu0 %v3514_v41  ;;  %4261 = vmatprep.mubr.f32.mxu1 %v6025_v33  ;;  %v6535_v33 = vld [vmem:[#allocation13_spill] sm:$0xff]  ;;  %v3556_v35 = vld [vmem:[%s5779_s10 + $0x112] sm:$0xff] }
 0x149   : > { %4637 = vmatprep.mubr.f32.mxu0 %v3515_v37  ;;  %5069 = vmatpush3.bf16.msra.mxu0 %v5066_v25  ;;  %v6563_v25 = vld [vmem:[#allocation44_spill] sm:$0xff]  ;;  %v3539_v41 = vld [vmem:[%s5779_s10 + $0x4a] sm:$0xff]  ;;  %v3540_v37 = vld [vmem:[%s5779_s10 + $0x52] sm:$0xff] }
 0x14a   : > { %5071 = vmatprep.subr.bf16.mxu0 %v5070_v44 }
 0x14b   : > { %4262 = vmatmul.mubr.f32.gmra.mrb[26].mxu1 %v6035_v50  ;;  %v6536_v50 = vld [vmem:[#allocation32_spill] sm:$0xff] }
 0x14c   : > { %4638 = vmatmul.mubr.f32.gmra.mrb[10].mxu0 %v3516_v58  ;;  %4264 = vmatprep.mubr.f32.mxu1 %v6041_v9  ;;  %v6541_v9 = vld [vmem:[#allocation34_spill] sm:$0xff]  ;;  %v3554_v58 = vld [vmem:[%s5779_s10 + $0xfa] sm:$0xff] }
 0x14d   : > { %4640 = vmatprep.mubr.f32.mxu0 %v5829_v54  ;;  %5073 = vmatpush3.bf16.msra.mxu0 %v5070_v44  ;;  %v6532_v54 = vld [vmem:[#allocation20_spill] sm:$0xff] }
 0x14e   : > { %5075 = vmatprep.subr.bf16.mxu0 %v5074_v28  ;;  %v3541_v44 = vld [vmem:[%s5779_s10 + $0x62] sm:$0xff] }
 0x14f   : > { %4265 = vmatmul.mubr.f32.gmra.mrb[28].mxu1 %v6051_v1  ;;  %v6543_v1 = vld [vmem:[#allocation35_spill] sm:$0xff] }
 0x150   : > { %4641 = vmatmul.mubr.f32.gmra.mrb[12].mxu0 %v5833_v61  ;;  %4267 = vmatprep.mubr.f32.mxu1 %v6057_v49  ;;  %v6533_v61 = vld [vmem:[#allocation31_spill] sm:$0xff]  ;;  %v6544_v49 = vld [vmem:[#allocation25_spill] sm:$0xff] }
 0x151   : > { %4643 = vmatprep.mubr.f32.mxu0 %v5847_v4  ;;  %5077 = vmatpush3.bf16.msra.mxu0 %v5074_v28  ;;  %v6534_v4 = vld [vmem:[#allocation21_spill] sm:$0xff]  ;;  %v3428_v28 = vld [vmem:[%s5779_s10 + $0xf9] sm:$0xff] }
 0x152   : > { %5079 = vmatprep.subr.bf16.mxu0 %v5078_v26 }
 0x153   : > { %4268 = vmatmul.mubr.f32.gmra.mrb[30].mxu1 %v6067_v2  ;;  %v6545_v2 = vld [vmem:[#allocation15_spill] sm:$0xff] }
 0x154   : > { %4644 = vmatmul.mubr.f32.gmra.mrb[14].mxu0 %v5857_v10  ;;  %4302 = vmatprep.mubr.f32.mxu1 %v5973_v24  ;;  %v6537_v10 = vld [vmem:[#allocation22_spill] sm:$0xff]  ;;  %v6538_v24 = vld [vmem:[#allocation33_spill] sm:$0xff] }
 0x155   : > { %4646 = vmatprep.mubr.f32.mxu0 %v5864_v13  ;;  %5081 = vmatpush3.bf16.msra.mxu0 %v5078_v26  ;;  %v6539_v13 = vld [vmem:[#allocation23_spill] sm:$0xff] }
 0x156   : > { %v3430_v26 = vld [vmem:[%s5779_s10 + $0x111] sm:$0xff] }
 0x157   : > { %4303 = vmatmul.mubr.f32.vlgmr.msra.gmra.mrb[0].mxu1 %v5982_v34  ;;  %v6540_v34 = vld [vmem:[#allocation14_spill] sm:$0xff] }
 0x158   : > { %4647 = vmatmul.mubr.f32.gmra.mrb[16].mxu0 %v6532_v54  ;;  %5122 = vmatpush3.bf16.msra.mxu1 %v5766_v7  ;;  %v6542_v7 = vld [vmem:[#allocation24_spill] sm:$0xff]  ;;  %v3558_v54 = vld [vmem:[%s5779_s10 + $0x12a] sm:$0xff] }
 0x159   : > { %4305 = vmatprep.mubr.f32.mxu1 %v6533_v61  ;;  %4649 = vmatprep.mubr.f32.mxu0 %v6534_v4  ;;  %v3431_v61 = vld [vmem:[%s5779_s10 + $0x121] sm:$0xff] }
 0x15a   : > { %5115 = vmatprep.subr.bf16.mxu1 %v6535_v33  ;;  %v3559_v4 = vld [vmem:[%s5779_s10 + $0x13a] sm:$0xff] }
 0x15b   : > { %4306 = vmatmul.mubr.f32.gmra.mrb[2].mxu1 %v6536_v50  ;;  %v3560_v50 = vld [vmem:[%s5779_s10 + $0x142] sm:$0xff] }
 0x15c   : > { %4650 = vmatmul.mubr.f32.gmra.mrb[18].mxu0 %v6537_v10  ;;  %4308 = vmatprep.mubr.f32.mxu1 %v6538_v24  ;;  %v3433_v10 = vld [vmem:[%s5779_s10 + $0x139] sm:$0xff] }
 0x15d   : > { %4652 = vmatprep.mubr.f32.mxu0 %v6539_v13  ;;  %5123 = vmatpush3.bf16.msra.mxu1 %v6535_v33  ;;  %v3432_v33 = vld [vmem:[%s5779_s10 + $0x129] sm:$0xff]  ;;  %v3561_v24 = vld [vmem:[%s5779_s10 + $0x152] sm:$0xff]  ;;  %v3434_v13 = vld [vmem:[%s5779_s10 + $0x141] sm:$0xff] }
 0x15e   : > { %5116 = vmatprep.subr.bf16.mxu1 %v6540_v34 }
 0x15f   : > { %4309 = vmatmul.mubr.f32.gmra.mrb[4].mxu1 %v6541_v9  ;;  %v3435_v9 = vld [vmem:[%s5779_s10 + $0x151] sm:$0xff] }
 0x160   : > { %4653 = vmatmul.mubr.f32.gmra.mrb[20].mxu0 %v6542_v7  ;;  %4311 = vmatprep.mubr.f32.mxu1 %v6543_v1  ;;  %v3563_v7 = vld [vmem:[%s5779_s10 + $0x16a] sm:$0xff]  ;;  %v3436_v1 = vld [vmem:[%s5779_s10 + $0x159] sm:$0xff] }
 0x161   : > { %4655 = vmatprep.mubr.f32.mxu0 %v6544_v49  ;;  %5124 = vmatpush3.bf16.msra.mxu1 %v6540_v34  ;;  %v3562_v34 = vld [vmem:[%s5779_s10 + $0x15a] sm:$0xff]  ;;  %v3564_v49 = vld [vmem:[%s5779_s10 + $0x172] sm:$0xff] }
 0x162   : > { %5117 = vmatprep.subr.bf16.mxu1 %v6545_v2 }
 0x163   : > { %4312 = vmatmul.mubr.f32.gmra.mrb[6].mxu1 %v6546_v42  ;;  %v3565_v42 = vld [vmem:[%s5779_s10 + $0x182] sm:$0xff] }
 0x164   : > { %4656 = vmatmul.mubr.f32.gmra.mrb[22].mxu0 %v6547_v47  ;;  %4314 = vmatprep.mubr.f32.mxu1 %v6548_v38  ;;  %v3438_v47 = vld [vmem:[%s5779_s10 + $0x171] sm:$0xff] }
 0x165   : > { %4658 = vmatprep.mubr.f32.mxu0 %v6549_v40  ;;  %5125 = vmatpush3.bf16.msra.mxu1 %v6545_v2  ;;  %v3437_v2 = vld [vmem:[%s5779_s10 + $0x169] sm:$0xff]  ;;  %v3567_v40 = vld [vmem:[%s5779_s10 + $0x19a] sm:$0xff] }
 0x166   : > { %5118 = vmatprep.subr.bf16.mxu1 %v6550_v59  ;;  %v3566_v38 = vld [vmem:[%s5779_s10 + $0x18a] sm:$0xff] }
 0x167   : > { %4315 = vmatmul.mubr.f32.gmra.mrb[8].mxu1 %v6551_v19  ;;  %v3113_v19 = vld [vmem:[#allocation7] sm:$0xff] }
 0x168   : > { %4659 = vmatmul.mubr.f32.gmra.mrb[24].mxu0 %v6552_v46  ;;  %4317 = vmatprep.mubr.f32.mxu1 %v6553_v17  ;;  %v3114_v46 = vld [vmem:[#allocation7 + $0x8] sm:$0xff] }
 0x169   : > { %4661 = vmatprep.mubr.f32.mxu0 %v6554_v51  ;;  %5126 = vmatpush3.bf16.msra.mxu1 %v6550_v59  ;;  %v3568_v59 = vld [vmem:[%s5779_s10 + $0x1a2] sm:$0xff]  ;;  %v5082_v17 = vpack.c.bf16 %v3114_v46, %v3113_v19  ;;  %v3115_v51 = vld [vmem:[#allocation7 + $0x10] sm:$0xff] }
 0x16a   : > { %5119 = vmatprep.subr.bf16.mxu1 %v6555_v36 }
 0x16b   : > { %4318 = vmatmul.mubr.f32.gmra.mrb[10].mxu1 %v6556_v55  ;;  %5083 = vmatprep.subr.bf16.mxu0 %v5082_v17 }
 0x16c   : > { %4662 = vmatmul.mubr.f32.gmra.mrb[26].mxu0 %v6557_v57  ;;  %4320 = vmatprep.mubr.f32.mxu1 %v6558_v62  ;;  %v3117_v57 = vld [vmem:[#allocation7 + $0x20] sm:$0xff] }
 0x16d   : > { %4664 = vmatprep.mubr.f32.mxu0 %v6273_v48  ;;  %5127 = vmatpush3.bf16.msra.mxu1 %v6555_v36  ;;  %v3116_v36 = vld [vmem:[#allocation7 + $0x18] sm:$0xff] }
 0x16e   : > { %5120 = vmatprep.subr.bf16.mxu1 %v6559_v0  ;;  %v5086_v55 = vpack.c.bf16 %v3116_v36, %v3115_v51 }
 0x16f   : > { %4321 = vmatmul.mubr.f32.gmra.mrb[12].mxu1 %v6560_v5  ;;  %v3121_v5 = vld [vmem:[#allocation7 + $0x40] sm:$0xff] }
 0x170   : > { %4665 = vmatmul.mubr.f32.gmra.mrb[28].mxu0 %v6281_v15  ;;  %4323 = vmatprep.mubr.f32.mxu1 %v6561_v6  ;;  %v3122_v6 = vld [vmem:[#allocation7 + $0x48] sm:$0xff] }
 0x171   : > { %4667 = vmatprep.mubr.f32.mxu0 %v3535_v3  ;;  %5128 = vmatpush3.bf16.msra.mxu1 %v6559_v0  ;;  %v3120_v3 = vld [vmem:[#allocation7 + $0x38] sm:$0xff] }
 0x172   : > { %5121 = vmatprep.subr.bf16.mxu1 %v6562_v18 }
 0x173   : > { %4324 = vmatmul.mubr.f32.gmra.mrb[14].mxu1 %v6563_v25 }
 0x174   : > { %4668 = vmatmul.mubr.f32.gmra.mrb[30].mxu0 %v3536_v12  ;;  %4326 = vmatprep.mubr.f32.mxu1 %v6564_v11  ;;  %v5098_v12 = vpack.c.bf16 %v3122_v6, %v3121_v5  ;;  %v3125_v11 = vld [vmem:[#allocation7 + $0x60] sm:$0xff] }
 0x175   : > { %4702 = vmatprep.mubr.f32.mxu0 %v3537_v21  ;;  %5129 = vmatpush3.bf16.msra.mxu1 %v6562_v18  ;;  %v3123_v21 = vld [vmem:[#allocation7 + $0x50] sm:$0xff]  ;;  %v3124_v18 = vld [vmem:[#allocation7 + $0x58] sm:$0xff] }
 0x176   : > { %5130 = vmatprep.subr.bf16.mxu1 %v5082_v17  ;;  %v5102_v25 = vpack.c.bf16 %v3124_v18, %v3123_v21 }
 0x177   : > { %4327 = vmatmul.mubr.f32.gmra.mrb[16].mxu1 %v6099_v27  ;;  %v3544_v27 = vld [vmem:[%s5779_s10 + $0x82] sm:$0xff] }
 0x178   : > { %4703 = vmatmul.mubr.f32.vlgmr.msra.gmra.mrb[0].mxu0 %v3538_v14  ;;  %4329 = vmatprep.mubr.f32.mxu1 %v6104_v56  ;;  %v3545_v56 = vld [vmem:[%s5779_s10 + $0x92] sm:$0xff]  ;;  %v3126_v14 = vld [vmem:[#allocation7 + $0x68] sm:$0xff] }
 0x179   : > { %4705 = vmatprep.mubr.f32.mxu0 %v3539_v41  ;;  %5085 = vmatpush3.bf16.msra.mxu0 %v5082_v17  ;;  %v5106_v41 = vpack.c.bf16 %v3126_v14, %v3125_v11 }
 0x17a   : > { %5087 = vmatprep.subr.bf16.mxu0 %v5086_v55 }
 0x17b   : > { %4330 = vmatmul.mubr.f32.gmra.mrb[18].mxu1 %v6110_v52  ;;  %v3546_v52 = vld [vmem:[%s5779_s10 + $0x9a] sm:$0xff] }
 0x17c   : > { %4706 = vmatmul.mubr.f32.gmra.mrb[2].mxu0 %v3540_v37  ;;  %4332 = vmatprep.mubr.f32.mxu1 %v6114_v8  ;;  %v3547_v8 = vld [vmem:[%s5779_s10 + $0xaa] sm:$0xff]  ;;  %v3127_v37 = vld [vmem:[#allocation7 + $0x70] sm:$0xff] }
 0x17d   : > { %4708 = vmatprep.mubr.f32.mxu0 %v3541_v44  ;;  %5089 = vmatpush3.bf16.msra.mxu0 %v5086_v55  ;;  %v3128_v44 = vld [vmem:[#allocation7 + $0x78] sm:$0xff] }
 0x17f   : > { %4333 = vmatmul.mubr.f32.gmra.mrb[20].mxu1 %v6120_v16  ;;  %v3548_v16 = vld [vmem:[%s5779_s10 + $0xb2] sm:$0xff] }
 0x180   : > { %4709 = vmatmul.mubr.f32.gmra.mrb[4].mxu0 %v3542_v22  ;;  %4335 = vmatprep.mubr.f32.mxu1 %v6124_v32  ;;  %v3549_v32 = vld [vmem:[%s5779_s10 + $0xc2] sm:$0xff]  ;;  %v5110_v22 = vpack.c.bf16 %v3128_v44, %v3127_v37 }
 0x181   : > { %4711 = vmatprep.mubr.f32.mxu0 %v3543_v45 }
 0x183   : > { %4336 = vmatmul.mubr.f32.gmra.mrb[22].mxu1 %v6130_v43  ;;  %v3550_v43 = vld [vmem:[%s5779_s10 + $0xca] sm:$0xff] }
 0x184   : > { %4712 = vmatmul.mubr.f32.gmra.mrb[6].mxu0 %v3544_v27  ;;  %4338 = vmatprep.mubr.f32.mxu1 %v6134_v63  ;;  %v3553_v63 = vld [vmem:[%s5779_s10 + $0xf2] sm:$0xff] }
 0x185   : > { %4714 = vmatprep.mubr.f32.mxu0 %v3545_v56 }
 0x187   : > { %4339 = vmatmul.mubr.f32.gmra.mrb[24].mxu1 %v6140_v53  ;;  %v3551_v53 = vld [vmem:[%s5779_s10 + $0xda] sm:$0xff] }
 0x188   : > { %4715 = vmatmul.mubr.f32.gmra.mrb[8].mxu0 %v3546_v52  ;;  %4341 = vmatprep.mubr.f32.mxu1 %v6144_v31  ;;  %v3552_v31 = vld [vmem:[%s5779_s10 + $0xe2] sm:$0xff] }
 0x189   : > { %4717 = vmatprep.mubr.f32.mxu0 %v3547_v8 }
 0x18b   : > { %4342 = vmatmul.mubr.f32.gmra.mrb[26].mxu1 %v6150_v23  ;;  %v3425_v23 = vld [vmem:[%s5779_s10 + $0xd9] sm:$0xff] }
 0x18c   : > { %4718 = vmatmul.mubr.f32.gmra.mrb[10].mxu0 %v3548_v16  ;;  %4344 = vmatprep.mubr.f32.mxu1 %v6154_v39  ;;  %v3426_v39 = vld [vmem:[%s5779_s10 + $0xe1] sm:$0xff] }
 0x18d   : > { %4720 = vmatprep.mubr.f32.mxu0 %v3549_v32 }
 0x18f   : > { %4345 = vmatmul.mubr.f32.gmra.mrb[28].mxu1 %v6160_v29  ;;  %v3427_v29 = vld [vmem:[%s5779_s10 + $0xf1] sm:$0xff] }
 0x190   : > { %4721 = vmatmul.mubr.f32.gmra.mrb[12].mxu0 %v3550_v43  ;;  %4347 = vmatprep.mubr.f32.mxu1 %v6192_v20  ;;  %v3555_v20 = vld [vmem:[%s5779_s10 + $0x10a] sm:$0xff] }
 0x191   : > { %4723 = vmatprep.mubr.f32.mxu0 %v3551_v53 }
 0x193   : > { %4348 = vmatmul.mubr.f32.gmra.mrb[30].mxu1 %v6199_v30  ;;  %v3429_v30 = vld [vmem:[%s5779_s10 + $0x109] sm:$0xff] }
 0x194   : > { %4724 = vmatmul.mubr.f32.gmra.mrb[14].mxu0 %v3552_v31  ;;  %4406 = vmatprep.mubr.f32.mxu1 %v3425_v23 }
 0x195   : > { %4726 = vmatprep.mubr.f32.mxu0 %v3553_v63 }
 0x197   : > { %4407 = vmatmul.mubr.f32.vlgmr.msra.gmra.mrb[16].mxu1 %v3426_v39 }
 0x198   : > { %4727 = vmatmul.mubr.f32.gmra.mrb[16].mxu0 %v3554_v58  ;;  %4409 = vmatprep.mubr.f32.mxu1 %v3427_v29 }
 0x199   : > { %4729 = vmatprep.mubr.f32.mxu0 %v3555_v20  ;;  %5138 = vmatpush3.bf16.msra.mxu1 %v5082_v17 }
 0x19a   : > { %5131 = vmatprep.subr.bf16.mxu1 %v5086_v55 }
 0x19b   : > { %4410 = vmatmul.mubr.f32.gmra.mrb[18].mxu1 %v3428_v28 }
 0x19c   : > { %4730 = vmatmul.mubr.f32.gmra.mrb[18].mxu0 %v3556_v35  ;;  %4412 = vmatprep.mubr.f32.mxu1 %v3429_v30 }
 0x19d   : > { %4732 = vmatprep.mubr.f32.mxu0 %v3557_v60  ;;  %5139 = vmatpush3.bf16.msra.mxu1 %v5086_v55  ;;  %v6366_v60 = vld [vmem:[#allocation5] ss:$0 sm:$0xff] }
 0x19f   : > { %4413 = vmatmul.mubr.f32.gmra.mrb[20].mxu1 %v3430_v26 }
 0x1a0   : > { %4733 = vmatmul.mubr.f32.gmra.mrb[20].mxu0 %v3558_v54  ;;  %4415 = vmatprep.mubr.f32.mxu1 %v3431_v61 }
 0x1a1   : > { %4735 = vmatprep.mubr.f32.mxu0 %v3559_v4 }
 0x1a3   : > { %4416 = vmatmul.mubr.f32.gmra.mrb[22].mxu1 %v3432_v33 }
 0x1a4   : > { %4736 = vmatmul.mubr.f32.gmra.mrb[22].mxu0 %v3560_v50  ;;  %4418 = vmatprep.mubr.f32.mxu1 %v3433_v10 }
 0x1a5   : > { %4738 = vmatprep.mubr.f32.mxu0 %v3561_v24 }
 0x1a7   : > { %4419 = vmatmul.mubr.f32.gmra.mrb[24].mxu1 %v3434_v13 }
 0x1a8   : > { %4739 = vmatmul.mubr.f32.gmra.mrb[24].mxu0 %v3562_v34  ;;  %4421 = vmatprep.mubr.f32.mxu1 %v3435_v9 }
 0x1a9   : > { %4741 = vmatprep.mubr.f32.mxu0 %v3563_v7 }
 0x1ab   : > { %4422 = vmatmul.mubr.f32.gmra.mrb[26].mxu1 %v3436_v1 }
 0x1ac   : > { %4742 = vmatmul.mubr.f32.gmra.mrb[26].mxu0 %v3564_v49  ;;  %4424 = vmatprep.mubr.f32.mxu1 %v3437_v2 }
 0x1ad   : > { %4744 = vmatprep.mubr.f32.mxu0 %v3565_v42 }
 0x1af   : > { %4425 = vmatmul.mubr.f32.gmra.mrb[28].mxu1 %v3438_v47 }
 0x1b0   : > { %4745 = vmatmul.mubr.f32.gmra.mrb[28].mxu0 %v3566_v38  ;;  %4427 = vmatprep.mubr.f32.mxu1 %v6273_v48  ;;  %v3118_v48 = vld [vmem:[#allocation7 + $0x28] sm:$0xff] }
 0x1b1   : > { %4747 = vmatprep.mubr.f32.mxu0 %v3567_v40  ;;  %v5090_v62 = vpack.c.bf16 %v3118_v48, %v3117_v57 }
 0x1b3   : > { %4428 = vmatmul.mubr.f32.gmra.mrb[30].mxu1 %v6281_v15  ;;  %5091 = vmatprep.subr.bf16.mxu0 %v5090_v62  ;;  %v3119_v15 = vld [vmem:[#allocation7 + $0x30] sm:$0xff] }
 0x1b4   : > { %4748 = vmatmul.mubr.f32.gmra.mrb[30].mxu0 %v3568_v59  ;;  %5132 = vmatprep.subr.bf16.mxu1 %v5090_v62  ;;  %v5094_v0 = vpack.c.bf16 %v3120_v3, %v3119_v15 }
 0x1b5   : > { %5093 = vmatpush3.bf16.msra.mxu0 %v5090_v62  ;;  %5140 = vmatpush3.bf16.msra.mxu1 %v5090_v62 }
 0x1b6   : > { %5095 = vmatprep.subr.bf16.mxu0 %v5094_v0  ;;  %5133 = vmatprep.subr.bf16.mxu1 %v5094_v0 }
 0x1b9   : > { %5097 = vmatpush3.bf16.msra.mxu0 %v5094_v0  ;;  %5141 = vmatpush3.bf16.msra.mxu1 %v5094_v0 }
 0x1ba   : > { %5099 = vmatprep.subr.bf16.mxu0 %v5098_v12  ;;  %5134 = vmatprep.subr.bf16.mxu1 %v5098_v12 }
 0x1bd   : > { %5101 = vmatpush3.bf16.msra.mxu0 %v5098_v12  ;;  %5142 = vmatpush3.bf16.msra.mxu1 %v5098_v12 }
 0x1be   : > { %5103 = vmatprep.subr.bf16.mxu0 %v5102_v25  ;;  %5135 = vmatprep.subr.bf16.mxu1 %v5102_v25 }
 0x1c1   : > { %5105 = vmatpush3.bf16.msra.mxu0 %v5102_v25  ;;  %5143 = vmatpush3.bf16.msra.mxu1 %v5102_v25 }
 0x1c2   : > { %5107 = vmatprep.subr.bf16.mxu0 %v5106_v41  ;;  %5136 = vmatprep.subr.bf16.mxu1 %v5106_v41 }
 0x1c5   : > { %5109 = vmatpush3.bf16.msra.mxu0 %v5106_v41  ;;  %5144 = vmatpush3.bf16.msra.mxu1 %v5106_v41 }
 0x1c6   : > { %5111 = vmatprep.subr.bf16.mxu0 %v5110_v22  ;;  %5137 = vmatprep.subr.bf16.mxu1 %v5110_v22 }
 0x1c9   : > { %5113 = vmatpush3.bf16.msra.mxu0 %v5110_v22  ;;  %5145 = vmatpush3.bf16.msra.mxu1 %v5110_v22 }
 0x22a   : > { %v4304_v45 = vpop.f32.mrb[0].mxu1 }
 0x22b   : > { %v1249_v27 = vpop.f32.mrb[1].mxu1 }
 0x22e   : > { %v4307_v56 = vpop.f32.mrb[2].mxu1 }
 0x22f   : > { %v1259_v52 = vpop.f32.mrb[3].mxu1 }
 0x232   : > { %v4310_v8 = vpop.f32.mrb[4].mxu1 }
 0x233   : > { %v1269_v16 = vpop.f32.mrb[5].mxu1 }
 0x236   : > { %v4313_v32 = vpop.f32.mrb[6].mxu1 }
 0x237   : > { %v1279_v43 = vpop.f32.mrb[7].mxu1 }
 0x23a   : > { %v4316_v53 = vpop.f32.mrb[8].mxu1 }
 0x23b   : > { %v1289_v31 = vpop.f32.mrb[9].mxu1 }
 0x23e   : > { %v4319_v23 = vpop.f32.mrb[10].mxu1 }
 0x23f   : > { %v1299_v63 = vpop.f32.mrb[11].mxu1 }
 0x242   : > { %v6358_v39 = vpop.f32.mrb[12].mxu1 }
 0x243   : > { %v6360_v58 = vpop.f32.mrb[13].mxu1 }
 0x246   : > { %v6362_v29 = vpop.f32.mrb[14].mxu1 }
 0x247   : > { %v6364_v20 = vpop.f32.mrb[15].mxu1 }
 0x24b   : > { %v4704_v28 = vpop.f32.mrb[0].mxu0 }
 0x24c   : > { %v5146_v35 = vadd.f32 %v4704_v28, %v4304_v45  ;;  %v2780_v30 = vpop.f32.mrb[1].mxu0 }
 0x24d   : > { %v5147_v26 = vadd.f32 %v2780_v30, %v1249_v27 }
 0x24e   : > { %v2979_v61 = vadd.f32 %v5146_v35, %v6366_v60 }
 0x24f   : > { %v4707_v54 = vpop.f32.mrb[2].mxu0  ;;  %v2978_v50 = vadd.f32 %v5147_v26, %v6366_v60 }
 0x250   : > { %v5148_v4 = vadd.f32 %v4707_v54, %v4307_v56  ;;  %v2790_v33 = vpop.f32.mrb[3].mxu0  ;;  %v3011_v9 = vmax.f32 %v2979_v61, 0.0 }
 0x251   : > { %v5149_v10 = vadd.f32 %v2790_v33, %v1259_v52  ;;  %v3010_v2 = vmax.f32 %v2978_v50, 0.0 }
 0x252   : > { %v2981_v24 = vadd.f32 %v5148_v4, %v6366_v60 }
 0x253   : > { %v2980_v13 = vadd.f32 %v5149_v10, %v6366_v60  ;;  %v4710_v34 = vpop.f32.mrb[4].mxu0 }
 0x254   : > { %v3013_v7 = vmax.f32 %v2981_v24, 0.0  ;;  %v5150_v1 = vadd.f32 %v4710_v34, %v4310_v8  ;;  %v2800_v49 = vpop.f32.mrb[5].mxu0 }
 0x255   : > { %v3012_v42 = vmax.f32 %v2980_v13, 0.0  ;;  %v5151_v47 = vadd.f32 %v2800_v49, %v1269_v16 }
 0x256   : > { %v3043_v38 = vmax.f32 %v3011_v9, %v3013_v7  ;;  %v2983_v19 = vadd.f32 %v5150_v1, %v6366_v60 }
 0x257   : > { %v3042_v40 = vmax.f32 %v3010_v2, %v3012_v42  ;;  %v4713_v59 = vpop.f32.mrb[6].mxu0  ;;  %v2982_v51 = vadd.f32 %v5151_v47, %v6366_v60 }
 0x258   : > { %3059 = vst [vmem:[#allocation2 + $0x8] sm:$0xff] %v3043_v38  ;;  %v5152_v46 = vadd.f32 %v4713_v59, %v4313_v32  ;;  %v2810_v17 = vpop.f32.mrb[7].mxu0  ;;  %v3015_v62 = vmax.f32 %v2983_v19, 0.0 }
 0x259   : > { %3058 = vst [vmem:[#allocation2] sm:$0xff] %v3042_v40  ;;  %v5153_v36 = vadd.f32 %v2810_v17, %v1279_v43  ;;  %v3014_v5 = vmax.f32 %v2982_v51, 0.0 }
 0x25a   : > { %v2985_v55 = vadd.f32 %v5152_v46, %v6366_v60 }
 0x25b   : > { %v2984_v57 = vadd.f32 %v5153_v36, %v6366_v60  ;;  %v4716_v48 = vpop.f32.mrb[8].mxu0 }
 0x25c   : > { %v3017_v15 = vmax.f32 %v2985_v55, 0.0  ;;  %v5154_v3 = vadd.f32 %v4716_v48, %v4316_v53  ;;  %v2820_v0 = vpop.f32.mrb[9].mxu0 }
 0x25d   : > { %v3016_v6 = vmax.f32 %v2984_v57, 0.0  ;;  %v5155_v12 = vadd.f32 %v2820_v0, %v1289_v31 }
 0x25e   : > { %v3045_v21 = vmax.f32 %v3015_v62, %v3017_v15  ;;  %v2987_v11 = vadd.f32 %v5154_v3, %v6366_v60 }
 0x25f   : > { %v3044_v18 = vmax.f32 %v3014_v5, %v3016_v6  ;;  %v4719_v25 = vpop.f32.mrb[10].mxu0  ;;  %v2986_v22 = vadd.f32 %v5155_v12, %v6366_v60 }
 0x260   : > { %3061 = vst [vmem:[#allocation2 + $0x18] sm:$0xff] %v3045_v21  ;;  %v5156_v14 = vadd.f32 %v4719_v25, %v4319_v23  ;;  %v2830_v41 = vpop.f32.mrb[11].mxu0  ;;  %v3074_v37 = vld [vmem:[#allocation2] ss:$2 sm:$0xff]  ;;  %v3090_v44 = vld [vmem:[#allocation2 + $0x1] ss:$2 sm:$0xff] }
 0x261   : > { %3060 = vst [vmem:[#allocation2 + $0x10] sm:$0xff] %v3044_v18  ;;  %v5157_v45 = vadd.f32 %v2830_v41, %v1299_v63  ;;  %v6378_v27 = vmax.f32 %v3074_v37, %v3090_v44  ;;  %v3019_v16 = vmax.f32 %v2987_v11, 0.0  ;;  %v3018_v31 = vmax.f32 %v2986_v22, 0.0 }
 0x262   : > { %v2989_v56 = vadd.f32 %v5156_v14, %v6366_v60 }
 0x263   : > { %v2988_v52 = vadd.f32 %v5157_v45, %v6366_v60  ;;  %v4722_v8 = vpop.f32.mrb[12].mxu0  ;;  %4782 = vmatprep.mubr.f32.mxu0 %v6378_v27 }
 0x264   : > { %v3021_v32 = vmax.f32 %v2989_v56, 0.0  ;;  %v5158_v43 = vadd.f32 %v4722_v8, %v6358_v39  ;;  %v2840_v53 = vpop.f32.mrb[13].mxu0 }
 0x265   : > { %v3020_v23 = vmax.f32 %v2988_v52, 0.0  ;;  %v5159_v28 = vadd.f32 %v2840_v53, %v6360_v58 }
 0x266   : > { %v3047_v35 = vmax.f32 %v3019_v16, %v3021_v32  ;;  %v2991_v26 = vadd.f32 %v5158_v43, %v6366_v60 }
 0x267   : > { %v3046_v63 = vmax.f32 %v3018_v31, %v3020_v23  ;;  %v4725_v30 = vpop.f32.mrb[14].mxu0  ;;  %v2990_v50 = vadd.f32 %v5159_v28, %v6366_v60 }
 0x268   : > { %3063 = vst [vmem:[#allocation2 + $0x28] sm:$0xff] %v3047_v35  ;;  %v5160_v54 = vadd.f32 %v4725_v30, %v6362_v29  ;;  %v2850_v61 = vpop.f32.mrb[15].mxu0  ;;  %v3076_v4 = vld [vmem:[#allocation2 + $0x10] ss:$2 sm:$0xff]  ;;  %v3092_v33 = vld [vmem:[#allocation2 + $0x11] ss:$2 sm:$0xff] }
 0x269   : > { %3062 = vst [vmem:[#allocation2 + $0x20] sm:$0xff] %v3046_v63  ;;  %v5161_v39 = vadd.f32 %v2850_v61, %v6364_v20  ;;  %v6389_v10 = vmax.f32 %v3076_v4, %v3092_v33  ;;  %v3023_v29 = vmax.f32 %v2991_v26, 0.0  ;;  %v3022_v2 = vmax.f32 %v2990_v50, 0.0 }
 0x26a   : > { %v2993_v58 = vadd.f32 %v5160_v54, %v6366_v60  ;;  %v4408_v24 = vpop.f32.mrb[16].mxu1 }
 0x26b   : > { %v2992_v13 = vadd.f32 %v5161_v39, %v6366_v60  ;;  %v4728_v34 = vpop.f32.mrb[16].mxu0  ;;  %4783 = vmatmul.mubr.f32.vlgmr.msra.gmra.mrb[32].mxu0 %v6389_v10  ;;  %v1635_v9 = vpop.f32.mrb[17].mxu1 }
 0x26c   : > { %v3025_v7 = vmax.f32 %v2993_v58, 0.0  ;;  %v5162_v1 = vadd.f32 %v4728_v34, %v4408_v24  ;;  %v2860_v49 = vpop.f32.mrb[17].mxu0 }
 0x26d   : > { %v3024_v42 = vmax.f32 %v2992_v13, 0.0  ;;  %v5163_v47 = vadd.f32 %v2860_v49, %v1635_v9 }
 0x26e   : > { %v3049_v38 = vmax.f32 %v3023_v29, %v3025_v7  ;;  %v4411_v20 = vpop.f32.mrb[18].mxu1  ;;  %v2995_v46 = vadd.f32 %v5162_v1, %v6366_v60 }
 0x26f   : > { %v3048_v40 = vmax.f32 %v3022_v2, %v3024_v42  ;;  %v4731_v59 = vpop.f32.mrb[18].mxu0  ;;  %v1645_v19 = vpop.f32.mrb[19].mxu1  ;;  %v2994_v57 = vadd.f32 %v5163_v47, %v6366_v60 }
 0x270   : > { %3065 = vst [vmem:[#allocation2 + $0x38] sm:$0xff] %v3049_v38  ;;  %v5164_v17 = vadd.f32 %v4731_v59, %v4411_v20  ;;  %v2870_v51 = vpop.f32.mrb[19].mxu0  ;;  %v3078_v36 = vld [vmem:[#allocation2 + $0x20] ss:$2 sm:$0xff]  ;;  %v3094_v55 = vld [vmem:[#allocation2 + $0x21] ss:$2 sm:$0xff] }
 0x271   : > { %3064 = vst [vmem:[#allocation2 + $0x30] sm:$0xff] %v3048_v40  ;;  %v5165_v48 = vadd.f32 %v2870_v51, %v1645_v19  ;;  %v6396_v62 = vmax.f32 %v3078_v36, %v3094_v55  ;;  %v3027_v12 = vmax.f32 %v2995_v46, 0.0  ;;  %v3026_v11 = vmax.f32 %v2994_v57, 0.0 }
 0x272   : > { %v2997_v15 = vadd.f32 %v5164_v17, %v6366_v60  ;;  %v4414_v3 = vpop.f32.mrb[20].mxu1 }
 0x273   : > { %v2996_v0 = vadd.f32 %v5165_v48, %v6366_v60  ;;  %v4734_v5 = vpop.f32.mrb[20].mxu0  ;;  %4785 = vmatprep.mubr.f32.mxu0 %v6396_v62  ;;  %v1655_v6 = vpop.f32.mrb[21].mxu1 }
 0x274   : > { %v3029_v21 = vmax.f32 %v2997_v15, 0.0  ;;  %v5166_v18 = vadd.f32 %v4734_v5, %v4414_v3  ;;  %v2880_v25 = vpop.f32.mrb[21].mxu0 }
 0x275   : > { %v3028_v14 = vmax.f32 %v2996_v0, 0.0  ;;  %v5167_v41 = vadd.f32 %v2880_v25, %v1655_v6 }
 0x276   : > { %v3051_v37 = vmax.f32 %v3027_v12, %v3029_v21  ;;  %v4417_v44 = vpop.f32.mrb[22].mxu1  ;;  %v2999_v52 = vadd.f32 %v5166_v18, %v6366_v60 }
 0x277   : > { %v3050_v22 = vmax.f32 %v3026_v11, %v3028_v14  ;;  %v4737_v45 = vpop.f32.mrb[22].mxu0  ;;  %v1665_v56 = vpop.f32.mrb[23].mxu1  ;;  %v2998_v53 = vadd.f32 %v5167_v41, %v6366_v60 }
 0x278   : > { %3067 = vst [vmem:[#allocation2 + $0x48] sm:$0xff] %v3051_v37  ;;  %v5168_v8 = vadd.f32 %v4737_v45, %v4417_v44  ;;  %v2890_v16 = vpop.f32.mrb[23].mxu0  ;;  %v3080_v32 = vld [vmem:[#allocation2 + $0x30] ss:$2 sm:$0xff]  ;;  %v3096_v43 = vld [vmem:[#allocation2 + $0x31] ss:$2 sm:$0xff] }
 0x279   : > { %3066 = vst [vmem:[#allocation2 + $0x40] sm:$0xff] %v3050_v22  ;;  %v5169_v31 = vadd.f32 %v2890_v16, %v1665_v56  ;;  %v6403_v23 = vmax.f32 %v3080_v32, %v3096_v43  ;;  %v3031_v54 = vmax.f32 %v2999_v52, 0.0  ;;  %v3030_v50 = vmax.f32 %v2998_v53, 0.0 }
 0x27a   : > { %v3001_v28 = vadd.f32 %v5168_v8, %v6366_v60  ;;  %v4420_v35 = vpop.f32.mrb[24].mxu1 }
 0x27b   : > { %v3000_v63 = vadd.f32 %v5169_v31, %v6366_v60  ;;  %v4740_v30 = vpop.f32.mrb[24].mxu0  ;;  %4786 = vmatmul.mubr.f32.gmra.mrb[34].mxu0 %v6403_v23  ;;  %v1675_v26 = vpop.f32.mrb[25].mxu1 }
 0x27c   : > { %v3033_v61 = vmax.f32 %v3001_v28, 0.0  ;;  %v5170_v4 = vadd.f32 %v4740_v30, %v4420_v35  ;;  %v2900_v33 = vpop.f32.mrb[25].mxu0 }
 0x27d   : > { %v3032_v39 = vmax.f32 %v3000_v63, 0.0  ;;  %v5171_v58 = vadd.f32 %v2900_v33, %v1675_v26 }
 0x27e   : > { %v3053_v24 = vmax.f32 %v3031_v54, %v3033_v61  ;;  %v4423_v13 = vpop.f32.mrb[26].mxu1  ;;  %v3003_v7 = vadd.f32 %v5170_v4, %v6366_v60  ;;  %v3570_v54 = vld [vmem:[#allocation8] ss:$0 sm:$0xff] }
 0x27f   : > { %v3052_v34 = vmax.f32 %v3030_v50, %v3032_v39  ;;  %v4743_v9 = vpop.f32.mrb[26].mxu0  ;;  %v1685_v29 = vpop.f32.mrb[27].mxu1  ;;  %v3002_v47 = vadd.f32 %v5171_v58, %v6366_v60 }
 0x280   : > { %3069 = vst [vmem:[#allocation2 + $0x58] sm:$0xff] %v3053_v24  ;;  %v5172_v1 = vadd.f32 %v4743_v9, %v4423_v13  ;;  %v2910_v49 = vpop.f32.mrb[27].mxu0  ;;  %v3082_v2 = vld [vmem:[#allocation2 + $0x40] ss:$2 sm:$0xff]  ;;  %v3098_v42 = vld [vmem:[#allocation2 + $0x41] ss:$2 sm:$0xff] }
 0x281   : > { %3068 = vst [vmem:[#allocation2 + $0x50] sm:$0xff] %v3052_v34  ;;  %v5173_v38 = vadd.f32 %v2910_v49, %v1685_v29  ;;  %v6410_v20 = vmax.f32 %v3082_v2, %v3098_v42  ;;  %v3035_v51 = vmax.f32 %v3003_v7, 0.0  ;;  %v3034_v48 = vmax.f32 %v3002_v47, 0.0 }
 0x282   : > { %v3005_v40 = vadd.f32 %v5172_v1, %v6366_v60  ;;  %v4426_v59 = vpop.f32.mrb[28].mxu1 }
 0x283   : > { %v3004_v19 = vadd.f32 %v5173_v38, %v6366_v60  ;;  %v4746_v46 = vpop.f32.mrb[28].mxu0  ;;  %4788 = vmatprep.mubr.f32.mxu1 %v6410_v20  ;;  %v1695_v17 = vpop.f32.mrb[29].mxu1 }
 0x284   : > { %v3037_v36 = vmax.f32 %v3005_v40, 0.0  ;;  %v5174_v55 = vadd.f32 %v4746_v46, %v4426_v59  ;;  %v2920_v57 = vpop.f32.mrb[29].mxu0 }
 0x285   : > { %v3036_v15 = vmax.f32 %v3004_v19, 0.0  ;;  %v5175_v3 = vadd.f32 %v2920_v57, %v1695_v17 }
 0x286   : > { %v3055_v0 = vmax.f32 %v3035_v51, %v3037_v36  ;;  %v4429_v5 = vpop.f32.mrb[30].mxu1  ;;  %v3007_v18 = vadd.f32 %v5174_v55, %v6366_v60 }
 0x287   : > { %v3054_v6 = vmax.f32 %v3034_v48, %v3036_v15  ;;  %v4749_v12 = vpop.f32.mrb[30].mxu0  ;;  %v1705_v21 = vpop.f32.mrb[31].mxu1  ;;  %v3006_v37 = vadd.f32 %v5175_v3, %v6366_v60 }
 0x288   : > { %3071 = vst [vmem:[#allocation2 + $0x68] sm:$0xff] %v3055_v0  ;;  %v5176_v25 = vadd.f32 %v4749_v12, %v4429_v5  ;;  %v2930_v11 = vpop.f32.mrb[31].mxu0  ;;  %v3084_v14 = vld [vmem:[#allocation2 + $0x50] ss:$2 sm:$0xff]  ;;  %v3100_v41 = vld [vmem:[#allocation2 + $0x51] ss:$2 sm:$0xff] }
 0x289   : > { %3070 = vst [vmem:[#allocation2 + $0x60] sm:$0xff] %v3054_v6  ;;  %v5177_v44 = vadd.f32 %v2930_v11, %v1705_v21  ;;  %v3110_v22 = vmax.f32 %v3084_v14, %v3100_v41  ;;  %v3039_v52 = vmax.f32 %v3007_v18, 0.0  ;;  %v3038_v16 = vmax.f32 %v3006_v37, 0.0 }
 0x28a   : > { %v3009_v45 = vadd.f32 %v5176_v25, %v6366_v60 }
 0x28b   : > { %v3008_v56 = vadd.f32 %v5177_v44, %v6366_v60  ;;  %4789 = vmatmul.mubr.f32.vlgmr.msra.gmra.mrb[32].mxu1 %v3110_v22 }
 0x28c   : > { %v3041_v8 = vmax.f32 %v3009_v45, 0.0 }
 0x28d   : > { %v3040_v32 = vmax.f32 %v3008_v56, 0.0 }
 0x28e   : > { %v3057_v43 = vmax.f32 %v3039_v52, %v3041_v8 }
 0x28f   : > { %v3056_v53 = vmax.f32 %v3038_v16, %v3040_v32 }
 0x290   : > { %3073 = vst [vmem:[#allocation2 + $0x78] sm:$0xff] %v3057_v43  ;;  %v3086_v31 = vld [vmem:[#allocation2 + $0x60] ss:$2 sm:$0xff]  ;;  %v3102_v28 = vld [vmem:[#allocation2 + $0x61] ss:$2 sm:$0xff] }
 0x291   : > { %3072 = vst [vmem:[#allocation2 + $0x70] sm:$0xff] %v3056_v53  ;;  %v3111_v35 = vmax.f32 %v3086_v31, %v3102_v28 }
 0x293   : > { %4791 = vmatprep.mubr.f32.mxu1 %v3111_v35 }
 0x298   : > { %v3088_v63 = vld [vmem:[#allocation2 + $0x70] ss:$2 sm:$0xff]  ;;  %v3104_v30 = vld [vmem:[#allocation2 + $0x71] ss:$2 sm:$0xff] }
 0x299   : > { %v3112_v26 = vmax.f32 %v3088_v63, %v3104_v30 }
 0x29b   : > { %4792 = vmatmul.mubr.f32.gmra.mrb[34].mxu1 %v3112_v26 }
 0x33e   : > { %v4784_v60 = vpop.f32.mrb[32].mxu0 }
 0x33f   : > { %v3208_v61 = vadd.f32 %v4784_v60, %v3570_v54  ;;  %v3202_v4 = vpop.f32.mrb[33].mxu0 }
 0x340   : > { %v3203_v33 = vadd.f32 %v3570_v54, %v3202_v4 }
 0x341   : > { %v3242_v50 = vmax.f32 %v3208_v61, 0.0 }
 0x342   : > { %v3241_v39 = vmax.f32 %v3203_v33, 0.0 }
 0x343   : > { %v3250_v58 = vadd.f32 %v3242_v50, %v6389_v10 }
 0x344   : > { %v3249_v24 = vadd.f32 %v3241_v39, %v6378_v27 }
 0x345   : > { %3258 = vst [vmem:[%s6423_s17 + $0x8] sm:$0xff] %v3250_v58 }
 0x346   : > { %3257 = vst [vmem:[%s6423_s17] sm:$0xff] %v3249_v24 }
 0x34e   : > { %v4787_v13 = vpop.f32.mrb[34].mxu0 }
 0x34f   : > { %v3218_v34 = vadd.f32 %v4787_v13, %v3570_v54  ;;  %v3212_v9 = vpop.f32.mrb[35].mxu0 }
 0x350   : > { %v3213_v29 = vadd.f32 %v3570_v54, %v3212_v9 }
 0x351   : > { %v3244_v7 = vmax.f32 %v3218_v34, 0.0 }
 0x352   : > { %v3243_v1 = vmax.f32 %v3213_v29, 0.0 }
 0x353   : > { %v3252_v49 = vadd.f32 %v3244_v7, %v6403_v23 }
 0x354   : > { %v3251_v2 = vadd.f32 %v3243_v1, %v6396_v62 }
 0x355   : > { %3260 = vst [vmem:[%s6423_s17 + $0x18] sm:$0xff] %v3252_v49 }
 0x356   : > { %3259 = vst [vmem:[%s6423_s17 + $0x10] sm:$0xff] %v3251_v2 }
 0x35e   : > { %v4790_v42 = vpop.f32.mrb[32].mxu1 }
 0x35f   : > { %v3228_v10 = vadd.f32 %v4790_v42, %v3570_v54  ;;  %v3222_v47 = vpop.f32.mrb[33].mxu1 }
 0x360   : > { %v3223_v27 = vadd.f32 %v3570_v54, %v3222_v47 }
 0x361   : > { %v3246_v38 = vmax.f32 %v3228_v10, 0.0 }
 0x362   : > { %v3245_v40 = vmax.f32 %v3223_v27, 0.0 }
 0x363   : > { %v3254_v59 = vadd.f32 %v3246_v38, %v3110_v22 }
 0x364   : > { %v3253_v19 = vadd.f32 %v3245_v40, %v6410_v20 }
 0x365   : > { %3262 = vst [vmem:[%s6423_s17 + $0x28] sm:$0xff] %v3254_v59 }
 0x366   : > { %3261 = vst [vmem:[%s6423_s17 + $0x20] sm:$0xff] %v3253_v19 }
 0x36e   : > { %v4793_v46 = vpop.f32.mrb[34].mxu1 }
 0x36f   : > { %v3238_v17 = vadd.f32 %v4793_v46, %v3570_v54  ;;  %v3232_v23 = vpop.f32.mrb[35].mxu1 }
 0x370   : > { %v3233_v51 = vadd.f32 %v3570_v54, %v3232_v23 }
 0x371   : > { %v3248_v62 = vmax.f32 %v3238_v17, 0.0 }
 0x372   : > { %v3247_v36 = vmax.f32 %v3233_v51, 0.0 }
 0x373   : > { %v3256_v55 = vadd.f32 %v3248_v62, %v3112_v26 }
 0x374   : > { %v3255_v57 = vadd.f32 %v3247_v36, %v3111_v35 }
 0x375   : > { %3264 = vst [vmem:[%s6423_s17 + $0x38] sm:$0xff] %v3256_v55 }
 0x376   : > { %3263 = vst [vmem:[%s6423_s17 + $0x30] sm:$0xff] %v3255_v57 }
 0x377 PF: > { %s18_s18 = sadd.s32 1, %s5584_s18  }
 0x378   : > { %p15_p6 = scmp.ge.s32.totalorder %s18_s18, 4  }
 0x37a   :  { %17 = sbr.rel (!%p15_p6) target bundleno = 3 (0x3), region = 112 }
 0x381   :  { %3286 = vsyncpa [#allocation4], 1 }
 0x382   :  { %3288 = vsyncpa [#allocation4 + $0x1], 1 }
 0x383   :  { %3289 = vsyncpa [#allocation6], 1 }
 0x384   :  { %3290 = vsyncpa [#allocation9], 1 }

// kernel: forward.5
= control target key start
LH: loop header
LB: loop body
LE: loop exit
PB: predicated region body
PF: predicated region fallthrough
CT: control target
= control target key end

     0   :  { %18 = vsyncpa [#allocation3], 0  ;;  %s6591_s0 = inlined_call_operand.vmem [shape: f32[2,2048], index: 0, kind: input, shape index: {}]   ;;  %s6592_s1 = inlined_call_operand.vmem [shape: f32[2048,128], index: 1, kind: input, shape index: {}]   ;;  %s6593_s2 = inlined_call_operand.vmem [shape: f32[1,128], index: 2, kind: input, shape index: {}]   ;;  %s6594_s3 = inlined_call_operand.vmem [shape: f32[2048,256], index: 3, kind: input, shape index: {}]   ;;  %s6595_s4 = inlined_call_operand.vmem [shape: f32[1,256], index: 4, kind: input, shape index: {}]   ;;  %s6596_s5 = inlined_call_operand.hbm [shape: f32[256,128], index: 5, kind: input, shape index: {}]   ;;  %s6597_s6 = inlined_call_operand.vmem [shape: f32[1,128], index: 6, kind: input, shape index: {}]   ;;  %s6598_s7 = inlined_call_operand.hbm [shape: f32[128,128], index: 7, kind: input, shape index: {}]   ;;  %s6599_s8 = inlined_call_operand.vmem [shape: f32[1,128], index: 8, kind: input, shape index: {}]   ;;  %s6600_s9 = inlined_call_operand.hbm [shape: f32[128,128], index: 9, kind: input, shape index: {}]   ;;  %s6601_s10 = inlined_call_operand.vmem [shape: f32[1,128], index: 10, kind: input, shape index: {}]   ;;  %s6602_s11 = inlined_call_operand.vmem [shape: f32[128,128], index: 11, kind: input, shape index: {}]   ;;  %s6603_s12 = inlined_call_operand.vmem [shape: f32[1,128], index: 12, kind: input, shape index: {}]   ;;  %s6604_s13 = inlined_call_operand.vmem [shape: f32[2,128], index: 13, kind: output, shape index: {}]  }
   0x1   :  { %19 = vsyncpa [#allocation5], 0  ;;  %s3941_s25 = smov [#allocation4]   ;;  %s3942_s27 = smov [#allocation2]  }
   0x2   :  { %s49_s26 = sshll.u32 %s3941_s25, 4  ;;  %s35_s28 = sshll.u32 %s3942_s27, 4  ;;  %s50_s26 = int_to_ptr.vmem [resolvable:$true] %s49_s26  ;;  %s4020_s28 = int_to_ptr.vmem [resolvable:$true] %s35_s28 }
   0x3   :  { %s3871_s14 = scalar_lea.hbm %s6598_s7, 2048 }
   0x4   :  { %p3872_p0 = scmp.ne.s32.totalorder %s6598_s7, %s3871_s14  ;;  %p3875_p1 = scmp.lt.u32.totalorder %s3871_s14, %s6598_s7 }
   0x6   :  { %p3877_p2 = pnand %p3875_p1, %p3872_p0 }
   0x8   :  { %3880 = shalt.err (!%p3877_p2)
}
   0x9   :  { %s3881_s19 = scalar_lea.vmem %s50_s26, 2048  ;;  %p3886_p4 = scmp.lt.s32.totalorder %s50_s26, %s50_s26 }
   0xa   :  { %p3882_p3 = scmp.ne.s32.totalorder %s50_s26, %s3881_s19  ;;  %p3887_p5 = scmp.lt.s32.totalorder %s3881_s19, %s3881_s19 }
   0xc   :  { %p3888_p6 = por %p3887_p5, %p3886_p4 }
   0xe   :  { %p3889_p7 = pnand %p3888_p6, %p3882_p3 }
  0x10   :  { %3892 = shalt.err (!%p3889_p7)
}
  0x11   :  { %s3943_s20 = smov 128   ;;  %s3944_s21 = smov 8  }
  0x12   :  { %55 = dma.hbm_to_vmem [thread:$0]  %s6598_s7, 2048, %s50_s26, [#allocation5], %s3943_s20, %s3943_s20, %s3944_s21  }
  0x13   :  { %s3893_s27 = scalar_lea.hbm %s6596_s5, 4096 }
  0x14   :  { %p3894_p8 = scmp.ne.s32.totalorder %s6596_s5, %s3893_s27  ;;  %p3897_p9 = scmp.lt.u32.totalorder %s3893_s27, %s6596_s5 }
  0x16   :  { %p3899_p10 = pnand %p3897_p9, %p3894_p8 }
  0x18   :  { %3902 = shalt.err (!%p3899_p10)
}
  0x19   :  { %s3903_s16 = scalar_lea.vmem %s4020_s28, 4096  ;;  %p3908_p12 = scmp.lt.s32.totalorder %s4020_s28, %s4020_s28 }
  0x1a   :  { %p3904_p11 = scmp.ne.s32.totalorder %s4020_s28, %s3903_s16  ;;  %p3909_p13 = scmp.lt.s32.totalorder %s3903_s16, %s3903_s16 }
  0x1c   :  { %p3910_p0 = por %p3909_p13, %p3908_p12 }
  0x1e   :  { %p3911_p1 = pnand %p3910_p0, %p3904_p11 }
  0x20   :  { %3914 = shalt.err (!%p3911_p1)
}
  0x21   :  { %41 = dma.hbm_to_vmem [thread:$0]  %s6596_s5, 4096, %s4020_s28, [#allocation3], %s3943_s20, %s3943_s20, %s3944_s21  }
  0x22   :  { %s3945_s17 = smov [#allocation6]   ;;  %s3915_s23 = scalar_lea.hbm %s6600_s9, 2048 }
  0x23   :  { %s63_s18 = sshll.u32 %s3945_s17, 4  ;;  %p3916_p2 = scmp.ne.s32.totalorder %s6600_s9, %s3915_s23  ;;  %s64_s18 = int_to_ptr.vmem [resolvable:$true] %s63_s18 }
  0x24   :  { %p3919_p3 = scmp.lt.u32.totalorder %s3915_s23, %s6600_s9 }
  0x26   :  { %p3921_p4 = pnand %p3919_p3, %p3916_p2 }
  0x28   :  { %3924 = shalt.err (!%p3921_p4)
}
  0x29   :  { %s3925_s30 = scalar_lea.vmem %s64_s18, 2048  ;;  %p3930_p6 = scmp.lt.s32.totalorder %s64_s18, %s64_s18 }
  0x2a   :  { %p3926_p5 = scmp.ne.s32.totalorder %s64_s18, %s3925_s30  ;;  %p3931_p7 = scmp.lt.s32.totalorder %s3925_s30, %s3925_s30 }
  0x2c   :  { %p3932_p8 = por %p3931_p7, %p3930_p6 }
  0x2e   :  { %p3933_p9 = pnand %p3932_p8, %p3926_p5 }
  0x30   :  { %3936 = shalt.err (!%p3933_p9)
}
  0x31   :  { %69 = dma.hbm_to_vmem [thread:$0]  %s6600_s9, 2048, %s64_s18, [#allocation5], %s3943_s20, %s3943_s20, %s3944_s21  }
  0x32   :  { %3937 = dma.done.wait [#allocation3], 4096  }
  0x33   :  { %3938 = vsyncadd [#allocation3], 4294963200 }
  0x34   :  { %3939 = dma.done.wait [#allocation5], 4096  }
  0x35   :  { %3940 = vsyncadd [#allocation5], 4294963200  ;;  %v105_v0 = vld [vmem:[%s6592_s1 + $0x80] sm:$0xff]  ;;  %v106_v1 = vld [vmem:[%s6592_s1 + $0x88] sm:$0xff]  ;;  %v3946_v47 = vmov 1983009808   ;;  %v360_v49 = vlaneseq }
  0x36   :  { %v137_v2 = vld [vmem:[%s6592_s1 + $0x180] sm:$0xff]  ;;  %v2970_v3 = vpack.c.bf16 %v106_v1, %v105_v0  ;;  %v138_v4 = vld [vmem:[%s6592_s1 + $0x188] sm:$0xff]  ;;  %v107_v11 = vld [vmem:[%s6592_s1 + $0x90] sm:$0xff]  ;;  %v358_v48 = vunpack.c.l.s4 %v3946_v47  ;;  %vm3948_vm0 = vmmov 0  }
  0x37   :  { %v89_v5 = vld [vmem:[%s6592_s1] sm:$0xff]  ;;  %v90_v6 = vld [vmem:[%s6592_s1 + $0x8] sm:$0xff]  ;;  %v3002_v7 = vpack.c.bf16 %v138_v4, %v137_v2  ;;  %v108_v13 = vld [vmem:[%s6592_s1 + $0x98] sm:$0xff]  ;;  %v4198_v0 = vshrl.u32 %v360_v49, 7 }
  0x38   :  { %v2972_v8 = vpack.c.bf16 %v90_v6, %v89_v5  ;;  %v121_v9 = vld [vmem:[%s6592_s1 + $0x100] sm:$0xff]  ;;  %v122_v10 = vld [vmem:[%s6592_s1 + $0x108] sm:$0xff]  ;;  %2971 = vmatprep.subr.bf16.mxu0 %v2970_v3  ;;  %v139_v14 = vld [vmem:[%s6592_s1 + $0x190] sm:$0xff]  ;;  %v2974_v16 = vpack.c.bf16 %v108_v13, %v107_v11  ;;  %v359_v63 = vunpack.c.0.s8 %v358_v48 }
  0x39   :  { %v3004_v12 = vpack.c.bf16 %v122_v10, %v121_v9  ;;  %v140_v15 = vld [vmem:[%s6592_s1 + $0x198] sm:$0xff]  ;;  %3003 = vmatprep.subr.bf16.mxu1 %v3002_v7  ;;  %v91_v18 = vld [vmem:[%s6592_s1 + $0x10] sm:$0xff]  ;;  %v109_v23 = vld [vmem:[%s6592_s1 + $0xa0] sm:$0xff] }
  0x3a   :  { %2973 = vmatpush3.bf16.msra.mxu0 %v2972_v8  ;;  %v3006_v17 = vpack.c.bf16 %v140_v15, %v139_v14  ;;  %v92_v19 = vld [vmem:[%s6592_s1 + $0x18] sm:$0xff]  ;;  %v123_v20 = vld [vmem:[%s6592_s1 + $0x110] sm:$0xff]  ;;  %v110_v24 = vld [vmem:[%s6592_s1 + $0xa8] sm:$0xff]  ;;  %v4225_v13 = vsub.s32 %v359_v63, %v4198_v0 }
  0x3b   :  { %3005 = vmatpush3.bf16.msra.mxu1 %v3004_v12  ;;  %v2976_v21 = vpack.c.bf16 %v92_v19, %v91_v18  ;;  %v124_v22 = vld [vmem:[%s6592_s1 + $0x118] sm:$0xff]  ;;  %2975 = vmatprep.subr.bf16.mxu0 %v2974_v16  ;;  %v2978_v26 = vpack.c.bf16 %v110_v24, %v109_v23  ;;  %v141_v27 = vld [vmem:[%s6592_s1 + $0x1a0] sm:$0xff]  ;;  %v142_v28 = vld [vmem:[%s6592_s1 + $0x1a8] sm:$0xff] }
  0x3c   :  { %3007 = vmatprep.subr.bf16.mxu1 %v3006_v17  ;;  %v3008_v25 = vpack.c.bf16 %v124_v22, %v123_v20  ;;  %v93_v29 = vld [vmem:[%s6592_s1 + $0x20] sm:$0xff]  ;;  %v3010_v30 = vpack.c.bf16 %v142_v28, %v141_v27  ;;  %v94_v31 = vld [vmem:[%s6592_s1 + $0x28] sm:$0xff]  ;;  %v111_v35 = vld [vmem:[%s6592_s1 + $0xb0] sm:$0xff] }
  0x3d   :  { %v125_v32 = vld [vmem:[%s6592_s1 + $0x120] sm:$0xff]  ;;  %v126_v33 = vld [vmem:[%s6592_s1 + $0x128] sm:$0xff]  ;;  %v2980_v34 = vpack.c.bf16 %v94_v31, %v93_v29  ;;  %v112_v36 = vld [vmem:[%s6592_s1 + $0xb8] sm:$0xff] }
  0x3e   :  { %2977 = vmatpush3.bf16.msra.mxu0 %v2976_v21  ;;  %v143_v37 = vld [vmem:[%s6592_s1 + $0x1b0] sm:$0xff]  ;;  %v3012_v38 = vpack.c.bf16 %v126_v33, %v125_v32  ;;  %v2982_v39 = vpack.c.bf16 %v112_v36, %v111_v35  ;;  %v144_v40 = vld [vmem:[%s6592_s1 + $0x1b8] sm:$0xff]  ;;  %v113_v46 = vld [vmem:[%s6592_s1 + $0xc0] sm:$0xff] }
  0x3f   :  { %3009 = vmatpush3.bf16.msra.mxu1 %v3008_v25  ;;  %2979 = vmatprep.subr.bf16.mxu0 %v2978_v26  ;;  %v95_v41 = vld [vmem:[%s6592_s1 + $0x30] sm:$0xff]  ;;  %v96_v42 = vld [vmem:[%s6592_s1 + $0x38] sm:$0xff]  ;;  %v3014_v43 = vpack.c.bf16 %v144_v40, %v143_v37  ;;  %v114_v50 = vld [vmem:[%s6592_s1 + $0xc8] sm:$0xff] }
  0x40   :  { %3011 = vmatprep.subr.bf16.mxu1 %v3010_v30  ;;  %v127_v44 = vld [vmem:[%s6592_s1 + $0x130] sm:$0xff]  ;;  %v128_v45 = vld [vmem:[%s6592_s1 + $0x138] sm:$0xff]  ;;  %v145_v51 = vld [vmem:[%s6592_s1 + $0x1c0] sm:$0xff]  ;;  %v2984_v53 = vpack.c.bf16 %v96_v42, %v95_v41  ;;  %v2986_v55 = vpack.c.bf16 %v114_v50, %v113_v46 }
  0x41   :  { %v146_v52 = vld [vmem:[%s6592_s1 + $0x1c8] sm:$0xff]  ;;  %v3016_v54 = vpack.c.bf16 %v128_v45, %v127_v44  ;;  %v97_v56 = vld [vmem:[%s6592_s1 + $0x40] sm:$0xff]  ;;  %v115_v61 = vld [vmem:[%s6592_s1 + $0xd0] sm:$0xff] }
  0x42   :  { %2981 = vmatpush3.bf16.msra.mxu0 %v2980_v34  ;;  %v98_v57 = vld [vmem:[%s6592_s1 + $0x48] sm:$0xff]  ;;  %v129_v58 = vld [vmem:[%s6592_s1 + $0x140] sm:$0xff]  ;;  %v3018_v59 = vpack.c.bf16 %v146_v52, %v145_v51  ;;  %v116_v62 = vld [vmem:[%s6592_s1 + $0xd8] sm:$0xff] }
  0x43   :  { %3013 = vmatpush3.bf16.msra.mxu1 %v3012_v38  ;;  %2983 = vmatprep.subr.bf16.mxu0 %v2982_v39  ;;  %v130_v60 = vld [vmem:[%s6592_s1 + $0x148] sm:$0xff]  ;;  %v147_v1 = vld [vmem:[%s6592_s1 + $0x1d0] sm:$0xff]  ;;  %v148_v2 = vld [vmem:[%s6592_s1 + $0x1d8] sm:$0xff]  ;;  %v2988_v3 = vpack.c.bf16 %v98_v57, %v97_v56  ;;  %v2990_v5 = vpack.c.bf16 %v116_v62, %v115_v61 }
  0x44   :  { %3015 = vmatprep.subr.bf16.mxu1 %v3014_v43  ;;  %v3020_v4 = vpack.c.bf16 %v130_v60, %v129_v58  ;;  %v99_v6 = vld [vmem:[%s6592_s1 + $0x50] sm:$0xff]  ;;  %v100_v7 = vld [vmem:[%s6592_s1 + $0x58] sm:$0xff]  ;;  %v3022_v9 = vpack.c.bf16 %v148_v2, %v147_v1  ;;  %v117_v11 = vld [vmem:[%s6592_s1 + $0xe0] sm:$0xff] }
  0x45   :  { %v131_v8 = vld [vmem:[%s6592_s1 + $0x150] sm:$0xff]  ;;  %v132_v10 = vld [vmem:[%s6592_s1 + $0x158] sm:$0xff]  ;;  %v118_v12 = vld [vmem:[%s6592_s1 + $0xe8] sm:$0xff]  ;;  %v2992_v16 = vpack.c.bf16 %v100_v7, %v99_v6 }
  0x46   :  { %2985 = vmatpush3.bf16.msra.mxu0 %v2984_v53  ;;  %v149_v14 = vld [vmem:[%s6592_s1 + $0x1e0] sm:$0xff]  ;;  %v150_v15 = vld [vmem:[%s6592_s1 + $0x1e8] sm:$0xff]  ;;  %v3024_v18 = vpack.c.bf16 %v132_v10, %v131_v8  ;;  %v2994_v19 = vpack.c.bf16 %v118_v12, %v117_v11  ;;  %v119_v25 = vld [vmem:[%s6592_s1 + $0xf0] sm:$0xff] }
  0x47   :  { %3017 = vmatpush3.bf16.msra.mxu1 %v3016_v54  ;;  %2987 = vmatprep.subr.bf16.mxu0 %v2986_v55  ;;  %v101_v17 = vld [vmem:[%s6592_s1 + $0x60] sm:$0xff]  ;;  %v102_v20 = vld [vmem:[%s6592_s1 + $0x68] sm:$0xff]  ;;  %v3026_v23 = vpack.c.bf16 %v150_v15, %v149_v14  ;;  %v120_v26 = vld [vmem:[%s6592_s1 + $0xf8] sm:$0xff] }
  0x48   :  { %3019 = vmatprep.subr.bf16.mxu1 %v3018_v59  ;;  %v133_v21 = vld [vmem:[%s6592_s1 + $0x160] sm:$0xff]  ;;  %v134_v24 = vld [vmem:[%s6592_s1 + $0x168] sm:$0xff]  ;;  %v151_v29 = vld [vmem:[%s6592_s1 + $0x1f0] sm:$0xff]  ;;  %v2996_v31 = vpack.c.bf16 %v102_v20, %v101_v17  ;;  %v2998_v35 = vpack.c.bf16 %v120_v26, %v119_v25 }
  0x49   :  { %v85_v22 = vld [vmem:[%s6591_s0] sm:$0xff]  ;;  %v152_v30 = vld [vmem:[%s6592_s1 + $0x1f8] sm:$0xff]  ;;  %v3028_v34 = vpack.c.bf16 %v134_v24, %v133_v21  ;;  %v103_v36 = vld [vmem:[%s6592_s1 + $0x70] sm:$0xff] }
  0x4a   :  { %2989 = vmatpush3.bf16.msra.mxu0 %v2988_v3  ;;  %v4255_v27 = vrot.slane %v85_v22, %v4225_v13  ;;  %v356_v28 = vcombine.high %v85_v22, %v85_v22  ;;  %v104_v37 = vld [vmem:[%s6592_s1 + $0x78] sm:$0xff]  ;;  %v135_v38 = vld [vmem:[%s6592_s1 + $0x170] sm:$0xff]  ;;  %v3030_v39 = vpack.c.bf16 %v152_v30, %v151_v29  ;;  %v169_v42 = vld [vmem:[%s6592_s1 + $0x280] sm:$0xff] }
  0x4b   :  { %3021 = vmatpush3.bf16.msra.mxu1 %v3020_v4  ;;  %2991 = vmatprep.subr.bf16.mxu0 %v2990_v5  ;;  %v136_v40 = vld [vmem:[%s6592_s1 + $0x178] sm:$0xff]  ;;  %v170_v43 = vld [vmem:[%s6592_s1 + $0x288] sm:$0xff]  ;;  %v201_v44 = vld [vmem:[%s6592_s1 + $0x380] sm:$0xff]  ;;  %v3000_v46 = vpack.c.bf16 %v104_v37, %v103_v36 }
  0x4c   :  { %3023 = vmatprep.subr.bf16.mxu1 %v3022_v9  ;;  %v4265_v32 = vcombine.high %v4255_v27, %v4255_v27  ;;  %v4268_v33 = vrot.slane %v356_v28, %v4225_v13  ;;  %v202_v45 = vld [vmem:[%s6592_s1 + $0x388] sm:$0xff]  ;;  %v3032_v47 = vpack.c.bf16 %v136_v40, %v135_v38  ;;  %v3034_v48 = vpack.c.bf16 %v170_v43, %v169_v42  ;;  %v153_v49 = vld [vmem:[%s6592_s1 + $0x200] sm:$0xff]  ;;  %v171_v54 = vld [vmem:[%s6592_s1 + $0x290] sm:$0xff] }
  0x4d   :  { %v154_v50 = vld [vmem:[%s6592_s1 + $0x208] sm:$0xff]  ;;  %v185_v51 = vld [vmem:[%s6592_s1 + $0x300] sm:$0xff]  ;;  %v3066_v52 = vpack.c.bf16 %v202_v45, %v201_v44  ;;  %v172_v55 = vld [vmem:[%s6592_s1 + $0x298] sm:$0xff] }
  0x4e   :  { %2993 = vmatpush3.bf16.msra.mxu0 %v2992_v16  ;;  %504 = vmatprep.mubr.f32.mxu0 %v4265_v32  ;;  %v4285_v41 = vcombine.high %v4268_v33, %v4268_v33  ;;  %v186_v53 = vld [vmem:[%s6592_s1 + $0x308] sm:$0xff]  ;;  %v203_v56 = vld [vmem:[%s6592_s1 + $0x390] sm:$0xff]  ;;  %v204_v57 = vld [vmem:[%s6592_s1 + $0x398] sm:$0xff]  ;;  %v3036_v58 = vpack.c.bf16 %v154_v50, %v153_v49  ;;  %v3038_v60 = vpack.c.bf16 %v172_v55, %v171_v54 }
  0x4f   :  { %3025 = vmatpush3.bf16.msra.mxu1 %v3024_v18  ;;  %2995 = vmatprep.subr.bf16.mxu0 %v2994_v19  ;;  %v3068_v59 = vpack.c.bf16 %v186_v53, %v185_v51  ;;  %v155_v61 = vld [vmem:[%s6592_s1 + $0x210] sm:$0xff]  ;;  %v156_v62 = vld [vmem:[%s6592_s1 + $0x218] sm:$0xff]  ;;  %v3070_v1 = vpack.c.bf16 %v204_v57, %v203_v56  ;;  %v173_v3 = vld [vmem:[%s6592_s1 + $0x2a0] sm:$0xff] }
  0x50   :  { %3027 = vmatprep.subr.bf16.mxu1 %v3026_v23  ;;  %574 = vmatprep.mubr.f32.mxu1 %v4285_v41  ;;  %v187_v63 = vld [vmem:[%s6592_s1 + $0x310] sm:$0xff]  ;;  %v188_v2 = vld [vmem:[%s6592_s1 + $0x318] sm:$0xff]  ;;  %v174_v4 = vld [vmem:[%s6592_s1 + $0x2a8] sm:$0xff]  ;;  %v3040_v7 = vpack.c.bf16 %v156_v62, %v155_v61 }
  0x51   :  { %v205_v5 = vld [vmem:[%s6592_s1 + $0x3a0] sm:$0xff]  ;;  %v206_v6 = vld [vmem:[%s6592_s1 + $0x3a8] sm:$0xff]  ;;  %v3072_v8 = vpack.c.bf16 %v188_v2, %v187_v63  ;;  %v3042_v9 = vpack.c.bf16 %v174_v4, %v173_v3  ;;  %v175_v16 = vld [vmem:[%s6592_s1 + $0x2b0] sm:$0xff] }
  0x52   :  { %2997 = vmatpush3.bf16.msra.mxu0 %v2996_v31  ;;  %v157_v10 = vld [vmem:[%s6592_s1 + $0x220] sm:$0xff]  ;;  %v158_v11 = vld [vmem:[%s6592_s1 + $0x228] sm:$0xff]  ;;  %v3074_v14 = vpack.c.bf16 %v206_v6, %v205_v5  ;;  %v176_v17 = vld [vmem:[%s6592_s1 + $0x2b8] sm:$0xff] }
  0x53   :  { %3029 = vmatpush3.bf16.msra.mxu1 %v3028_v34  ;;  %2999 = vmatprep.subr.bf16.mxu0 %v2998_v35  ;;  %v189_v12 = vld [vmem:[%s6592_s1 + $0x320] sm:$0xff]  ;;  %v190_v15 = vld [vmem:[%s6592_s1 + $0x328] sm:$0xff]  ;;  %v207_v18 = vld [vmem:[%s6592_s1 + $0x3b0] sm:$0xff]  ;;  %v3044_v20 = vpack.c.bf16 %v158_v11, %v157_v10  ;;  %v3046_v22 = vpack.c.bf16 %v176_v17, %v175_v16 }
  0x54   :  { %3031 = vmatprep.subr.bf16.mxu1 %v3030_v39  ;;  %v208_v19 = vld [vmem:[%s6592_s1 + $0x3b8] sm:$0xff]  ;;  %v3076_v21 = vpack.c.bf16 %v190_v15, %v189_v12  ;;  %v159_v23 = vld [vmem:[%s6592_s1 + $0x230] sm:$0xff]  ;;  %v177_v29 = vld [vmem:[%s6592_s1 + $0x2c0] sm:$0xff] }
  0x55   :  { %v160_v24 = vld [vmem:[%s6592_s1 + $0x238] sm:$0xff]  ;;  %v191_v25 = vld [vmem:[%s6592_s1 + $0x330] sm:$0xff]  ;;  %v3078_v26 = vpack.c.bf16 %v208_v19, %v207_v18  ;;  %v178_v30 = vld [vmem:[%s6592_s1 + $0x2c8] sm:$0xff] }
  0x56   :  { %3001 = vmatpush3.bf16.msra.mxu0 %v3000_v46  ;;  %v192_v28 = vld [vmem:[%s6592_s1 + $0x338] sm:$0xff]  ;;  %v209_v31 = vld [vmem:[%s6592_s1 + $0x3c0] sm:$0xff]  ;;  %v210_v34 = vld [vmem:[%s6592_s1 + $0x3c8] sm:$0xff]  ;;  %v3048_v36 = vpack.c.bf16 %v160_v24, %v159_v23  ;;  %v3050_v40 = vpack.c.bf16 %v178_v30, %v177_v29 }
  0x57   :  { %3033 = vmatpush3.bf16.msra.mxu1 %v3032_v47  ;;  %3035 = vmatprep.subr.bf16.mxu0 %v3034_v48  ;;  %v86_v35 = vld [vmem:[%s6591_s0 + $0x8] sm:$0xff]  ;;  %v3080_v39 = vpack.c.bf16 %v192_v28, %v191_v25  ;;  %v161_v42 = vld [vmem:[%s6592_s1 + $0x240] sm:$0xff]  ;;  %v3082_v45 = vpack.c.bf16 %v210_v34, %v209_v31  ;;  %v179_v47 = vld [vmem:[%s6592_s1 + $0x2d0] sm:$0xff] }
  0x58   :  { %3067 = vmatprep.subr.bf16.mxu1 %v3066_v52  ;;  %v4402_v37 = vrot.slane %v86_v35, %v4225_v13  ;;  %v373_v38 = vcombine.high %v86_v35, %v86_v35  ;;  %v162_v43 = vld [vmem:[%s6592_s1 + $0x248] sm:$0xff]  ;;  %v193_v44 = vld [vmem:[%s6592_s1 + $0x340] sm:$0xff]  ;;  %v180_v48 = vld [vmem:[%s6592_s1 + $0x2d8] sm:$0xff] }
  0x59   :  { %505 = vmatmul.mubr.f32.vlgmr.msra.gmra.mrb[0].mxu0 %v4255_v27  ;;  %v194_v46 = vld [vmem:[%s6592_s1 + $0x348] sm:$0xff]  ;;  %v211_v51 = vld [vmem:[%s6592_s1 + $0x3d0] sm:$0xff]  ;;  %v212_v52 = vld [vmem:[%s6592_s1 + $0x3d8] sm:$0xff]  ;;  %v3052_v53 = vpack.c.bf16 %v162_v43, %v161_v42  ;;  %v3054_v56 = vpack.c.bf16 %v180_v48, %v179_v47 }
  0x5a   :  { %575 = vmatmul.mubr.f32.vlgmr.msra.gmra.mrb[0].mxu1 %v4268_v33  ;;  %3037 = vmatpush3.bf16.msra.mxu0 %v3036_v58  ;;  %v4424_v49 = vcombine.high %v4402_v37, %v4402_v37  ;;  %v4427_v50 = vrot.slane %v373_v38, %v4225_v13  ;;  %v3084_v55 = vpack.c.bf16 %v194_v46, %v193_v44  ;;  %v163_v57 = vld [vmem:[%s6592_s1 + $0x250] sm:$0xff]  ;;  %v164_v58 = vld [vmem:[%s6592_s1 + $0x258] sm:$0xff]  ;;  %v181_v62 = vld [vmem:[%s6592_s1 + $0x2e0] sm:$0xff] }
  0x5b   :  { %3069 = vmatpush3.bf16.msra.mxu1 %v3068_v59  ;;  %3039 = vmatprep.subr.bf16.mxu0 %v3038_v60  ;;  %v195_v59 = vld [vmem:[%s6592_s1 + $0x350] sm:$0xff]  ;;  %v3086_v60 = vpack.c.bf16 %v212_v52, %v211_v51  ;;  %v196_v61 = vld [vmem:[%s6592_s1 + $0x358] sm:$0xff]  ;;  %v182_v63 = vld [vmem:[%s6592_s1 + $0x2e8] sm:$0xff]  ;;  %v3056_v3 = vpack.c.bf16 %v164_v58, %v163_v57 }
  0x5c   :  { %3071 = vmatprep.subr.bf16.mxu1 %v3070_v1  ;;  %644 = vmatprep.mubr.f32.mxu0 %v4424_v49  ;;  %v4438_v54 = vcombine.high %v4427_v50, %v4427_v50  ;;  %v213_v1 = vld [vmem:[%s6592_s1 + $0x3e0] sm:$0xff]  ;;  %v214_v2 = vld [vmem:[%s6592_s1 + $0x3e8] sm:$0xff]  ;;  %v3088_v4 = vpack.c.bf16 %v196_v61, %v195_v59  ;;  %v3058_v5 = vpack.c.bf16 %v182_v63, %v181_v62  ;;  %v183_v11 = vld [vmem:[%s6592_s1 + $0x2f0] sm:$0xff] }
  0x5d   :  { %v165_v6 = vld [vmem:[%s6592_s1 + $0x260] sm:$0xff]  ;;  %v198_v10 = vld [vmem:[%s6592_s1 + $0x368] sm:$0xff]  ;;  %v184_v12 = vld [vmem:[%s6592_s1 + $0x2f8] sm:$0xff] }
  0x5e   :  { %3041 = vmatpush3.bf16.msra.mxu0 %v3040_v7  ;;  %714 = vmatprep.mubr.f32.mxu1 %v4438_v54  ;;  %v166_v7 = vld [vmem:[%s6592_s1 + $0x268] sm:$0xff]  ;;  %v216_v15 = vld [vmem:[%s6592_s1 + $0x3f8] sm:$0xff]  ;;  %v3062_v18 = vpack.c.bf16 %v184_v12, %v183_v11  ;;  %v167_v19 = vld [vmem:[%s6592_s1 + $0x270] sm:$0xff] }
  0x5f   :  { %3073 = vmatpush3.bf16.msra.mxu1 %v3072_v8  ;;  %3043 = vmatprep.subr.bf16.mxu0 %v3042_v9  ;;  %v197_v8 = vld [vmem:[%s6592_s1 + $0x360] sm:$0xff]  ;;  %v3090_v9 = vpack.c.bf16 %v214_v2, %v213_v1  ;;  %v3060_v16 = vpack.c.bf16 %v166_v7, %v165_v6  ;;  %v200_v23 = vld [vmem:[%s6592_s1 + $0x378] sm:$0xff]  ;;  %v234_v25 = vld [vmem:[%s6592_s1 + $0x488] sm:$0xff] }
  0x60   :  { %3075 = vmatprep.subr.bf16.mxu1 %v3074_v14  ;;  %v215_v14 = vld [vmem:[%s6592_s1 + $0x3f0] sm:$0xff]  ;;  %v3092_v17 = vpack.c.bf16 %v198_v10, %v197_v8  ;;  %v233_v24 = vld [vmem:[%s6592_s1 + $0x480] sm:$0xff]  ;;  %v266_v28 = vld [vmem:[%s6592_s1 + $0x588] sm:$0xff] }
  0x61   :  { %v217_v30 = vld [vmem:[%s6592_s1 + $0x400] sm:$0xff]  ;;  %v3098_v34 = vpack.c.bf16 %v234_v25, %v233_v24  ;;  %v218_v35 = vld [vmem:[%s6592_s1 + $0x408] sm:$0xff]  ;;  %v236_v42 = vld [vmem:[%s6592_s1 + $0x498] sm:$0xff] }
  0x62   :  { %3045 = vmatpush3.bf16.msra.mxu0 %v3044_v20  ;;  %v168_v20 = vld [vmem:[%s6592_s1 + $0x278] sm:$0xff]  ;;  %v250_v38 = vld [vmem:[%s6592_s1 + $0x508] sm:$0xff]  ;;  %v267_v43 = vld [vmem:[%s6592_s1 + $0x590] sm:$0xff] }
  0x63   :  { %3077 = vmatpush3.bf16.msra.mxu1 %v3076_v21  ;;  %3047 = vmatprep.subr.bf16.mxu0 %v3046_v22  ;;  %v199_v21 = vld [vmem:[%s6592_s1 + $0x370] sm:$0xff]  ;;  %v3094_v22 = vpack.c.bf16 %v216_v15, %v215_v14  ;;  %v3064_v29 = vpack.c.bf16 %v168_v20, %v167_v19  ;;  %v268_v44 = vld [vmem:[%s6592_s1 + $0x598] sm:$0xff]  ;;  %v237_v59 = vld [vmem:[%s6592_s1 + $0x4a0] sm:$0xff] }
  0x64   :  { %3079 = vmatprep.subr.bf16.mxu1 %v3078_v26  ;;  %v265_v26 = vld [vmem:[%s6592_s1 + $0x580] sm:$0xff]  ;;  %v3096_v31 = vpack.c.bf16 %v200_v23, %v199_v21  ;;  %v87_v47 = vld [vmem:[%s6591_s0 + $0x10] sm:$0xff]  ;;  %v220_v52 = vld [vmem:[%s6592_s1 + $0x418] sm:$0xff]  ;;  %v3134_v57 = vpack.c.bf16 %v268_v44, %v267_v43 }
  0x65   :  { %v219_v51 = vld [vmem:[%s6592_s1 + $0x410] sm:$0xff]  ;;  %v252_v58 = vld [vmem:[%s6592_s1 + $0x518] sm:$0xff]  ;;  %v269_v61 = vld [vmem:[%s6592_s1 + $0x5a0] sm:$0xff] }
  0x66   :  { %3049 = vmatpush3.bf16.msra.mxu0 %v3048_v36  ;;  %v249_v36 = vld [vmem:[%s6592_s1 + $0x500] sm:$0xff]  ;;  %v270_v62 = vld [vmem:[%s6592_s1 + $0x5a8] sm:$0xff]  ;;  %v3104_v2 = vpack.c.bf16 %v220_v52, %v219_v51  ;;  %v239_v11 = vld [vmem:[%s6592_s1 + $0x4b0] sm:$0xff] }
  0x67   :  { %3081 = vmatpush3.bf16.msra.mxu1 %v3080_v39  ;;  %3051 = vmatprep.subr.bf16.mxu0 %v3050_v40  ;;  %v3130_v39 = vpack.c.bf16 %v266_v28, %v265_v26  ;;  %v235_v40 = vld [vmem:[%s6592_s1 + $0x490] sm:$0xff]  ;;  %v3132_v46 = vpack.c.bf16 %v250_v38, %v249_v36  ;;  %v222_v6 = vld [vmem:[%s6592_s1 + $0x428] sm:$0xff]  ;;  %v253_v7 = vld [vmem:[%s6592_s1 + $0x520] sm:$0xff] }
  0x68   :  { %3083 = vmatprep.subr.bf16.mxu1 %v3082_v45  ;;  %v3100_v45 = vpack.c.bf16 %v218_v35, %v217_v30  ;;  %v3102_v48 = vpack.c.bf16 %v236_v42, %v235_v40  ;;  %v254_v10 = vld [vmem:[%s6592_s1 + $0x528] sm:$0xff]  ;;  %v240_v12 = vld [vmem:[%s6592_s1 + $0x4b8] sm:$0xff]  ;;  %v271_v14 = vld [vmem:[%s6592_s1 + $0x5b0] sm:$0xff] }
  0x69   :  { %v272_v15 = vld [vmem:[%s6592_s1 + $0x5b8] sm:$0xff]  ;;  %v223_v19 = vld [vmem:[%s6592_s1 + $0x430] sm:$0xff]  ;;  %v241_v24 = vld [vmem:[%s6592_s1 + $0x4c0] sm:$0xff] }
  0x6a   :  { %3053 = vmatpush3.bf16.msra.mxu0 %v3052_v53  ;;  %v251_v53 = vld [vmem:[%s6592_s1 + $0x510] sm:$0xff]  ;;  %v224_v20 = vld [vmem:[%s6592_s1 + $0x438] sm:$0xff]  ;;  %v242_v25 = vld [vmem:[%s6592_s1 + $0x4c8] sm:$0xff] }
  0x6b   :  { %3085 = vmatpush3.bf16.msra.mxu1 %v3084_v55  ;;  %3055 = vmatprep.subr.bf16.mxu0 %v3054_v56  ;;  %v4550_v55 = vrot.slane %v87_v47, %v4225_v13  ;;  %v390_v56 = vcombine.high %v87_v47, %v87_v47  ;;  %v255_v21 = vld [vmem:[%s6592_s1 + $0x530] sm:$0xff]  ;;  %v256_v23 = vld [vmem:[%s6592_s1 + $0x538] sm:$0xff]  ;;  %v273_v26 = vld [vmem:[%s6592_s1 + $0x5c0] sm:$0xff] }
  0x6c   :  { %3087 = vmatprep.subr.bf16.mxu1 %v3086_v60  ;;  %v238_v60 = vld [vmem:[%s6592_s1 + $0x4a8] sm:$0xff]  ;;  %v3144_v30 = vpack.c.bf16 %v256_v23, %v255_v21  ;;  %v257_v36 = vld [vmem:[%s6592_s1 + $0x540] sm:$0xff]  ;;  %v243_v40 = vld [vmem:[%s6592_s1 + $0x4d0] sm:$0xff] }
  0x6d   :  { %v4570_v63 = vcombine.high %v4550_v55, %v4550_v55  ;;  %v4573_v1 = vrot.slane %v390_v56, %v4225_v13  ;;  %v274_v28 = vld [vmem:[%s6592_s1 + $0x5c8] sm:$0xff]  ;;  %v244_v42 = vld [vmem:[%s6592_s1 + $0x4d8] sm:$0xff]  ;;  %v275_v43 = vld [vmem:[%s6592_s1 + $0x5d0] sm:$0xff] }
  0x6e   :  { %3057 = vmatpush3.bf16.msra.mxu0 %v3056_v3  ;;  %v3136_v3 = vpack.c.bf16 %v252_v58, %v251_v53  ;;  %v226_v35 = vld [vmem:[%s6592_s1 + $0x448] sm:$0xff]  ;;  %v3146_v38 = vpack.c.bf16 %v274_v28, %v273_v26  ;;  %v276_v44 = vld [vmem:[%s6592_s1 + $0x5d8] sm:$0xff]  ;;  %v3118_v47 = vpack.c.bf16 %v244_v42, %v243_v40  ;;  %v259_v52 = vld [vmem:[%s6592_s1 + $0x550] sm:$0xff] }
  0x6f   :  { %3089 = vmatpush3.bf16.msra.mxu1 %v3088_v4  ;;  %3059 = vmatprep.subr.bf16.mxu0 %v3058_v5  ;;  %v3106_v4 = vpack.c.bf16 %v238_v60, %v237_v59  ;;  %v221_v5 = vld [vmem:[%s6592_s1 + $0x420] sm:$0xff]  ;;  %v4587_v8 = vcombine.high %v4573_v1, %v4573_v1  ;;  %v228_v51 = vld [vmem:[%s6592_s1 + $0x458] sm:$0xff]  ;;  %v3150_v53 = vpack.c.bf16 %v276_v44, %v275_v43  ;;  %v246_v58 = vld [vmem:[%s6592_s1 + $0x4e8] sm:$0xff] }
  0x70   :  { %3091 = vmatprep.subr.bf16.mxu1 %v3090_v9  ;;  %v3138_v9 = vpack.c.bf16 %v270_v62, %v269_v61  ;;  %v260_v56 = vld [vmem:[%s6592_s1 + $0x558] sm:$0xff]  ;;  %v277_v59 = vld [vmem:[%s6592_s1 + $0x5e0] sm:$0xff]  ;;  %v278_v60 = vld [vmem:[%s6592_s1 + $0x5e8] sm:$0xff] }
  0x71   :  { %v3152_v62 = vpack.c.bf16 %v260_v56, %v259_v52  ;;  %v297_v23 = vld [vmem:[%s6592_s1 + $0x680] sm:$0xff]  ;;  %v330_v26 = vld [vmem:[%s6592_s1 + $0x788] sm:$0xff]  ;;  %v299_v40 = vld [vmem:[%s6592_s1 + $0x690] sm:$0xff] }
  0x72   :  { %3061 = vmatpush3.bf16.msra.mxu0 %v3060_v16  ;;  %v3108_v16 = vpack.c.bf16 %v222_v6, %v221_v5  ;;  %v261_v5 = vld [vmem:[%s6592_s1 + $0x560] sm:$0xff]  ;;  %v3154_v6 = vpack.c.bf16 %v278_v60, %v277_v59  ;;  %v300_v42 = vld [vmem:[%s6592_s1 + $0x698] sm:$0xff]  ;;  %v331_v44 = vld [vmem:[%s6592_s1 + $0x790] sm:$0xff] }
  0x73   :  { %3093 = vmatpush3.bf16.msra.mxu1 %v3092_v17  ;;  %3063 = vmatprep.subr.bf16.mxu0 %v3062_v18  ;;  %v3140_v17 = vpack.c.bf16 %v254_v10, %v253_v7  ;;  %v3110_v18 = vpack.c.bf16 %v240_v12, %v239_v11  ;;  %v262_v7 = vld [vmem:[%s6592_s1 + $0x568] sm:$0xff]  ;;  %v248_v10 = vld [vmem:[%s6592_s1 + $0x4f8] sm:$0xff]  ;;  %v279_v11 = vld [vmem:[%s6592_s1 + $0x5f0] sm:$0xff] }
  0x74   :  { %3095 = vmatprep.subr.bf16.mxu1 %v3094_v22  ;;  %v3142_v22 = vpack.c.bf16 %v272_v15, %v271_v14  ;;  %v280_v12 = vld [vmem:[%s6592_s1 + $0x5f8] sm:$0xff]  ;;  %v283_v52 = vld [vmem:[%s6592_s1 + $0x610] sm:$0xff]  ;;  %v302_v59 = vld [vmem:[%s6592_s1 + $0x6a8] sm:$0xff] }
  0x75   :  { %v88_v15 = vld [vmem:[%s6591_s0 + $0x18] sm:$0xff]  ;;  %v3158_v21 = vpack.c.bf16 %v280_v12, %v279_v11  ;;  %v315_v56 = vld [vmem:[%s6592_s1 + $0x710] sm:$0xff]  ;;  %v318_v11 = vld [vmem:[%s6592_s1 + $0x728] sm:$0xff] }
  0x76   :  { %3065 = vmatpush3.bf16.msra.mxu0 %v3064_v29  ;;  %v3112_v29 = vpack.c.bf16 %v224_v20, %v223_v19  ;;  %v232_v19 = vld [vmem:[%s6592_s1 + $0x478] sm:$0xff]  ;;  %v263_v20 = vld [vmem:[%s6592_s1 + $0x570] sm:$0xff]  ;;  %v407_v28 = vcombine.high %v88_v15, %v88_v15  ;;  %v4748_v43 = vrot.slane %v88_v15, %v4225_v13 }
  0x77   :  { %3097 = vmatpush3.bf16.msra.mxu1 %v3096_v31  ;;  %3099 = vmatprep.subr.bf16.mxu0 %v3098_v34  ;;  %v3114_v31 = vpack.c.bf16 %v242_v25, %v241_v24  ;;  %v225_v34 = vld [vmem:[%s6592_s1 + $0x440] sm:$0xff]  ;;  %v298_v24 = vld [vmem:[%s6592_s1 + $0x688] sm:$0xff]  ;;  %v303_v12 = vld [vmem:[%s6592_s1 + $0x6b0] sm:$0xff] }
  0x78   :  { %3131 = vmatprep.subr.bf16.mxu1 %v3130_v39  ;;  %v258_v39 = vld [vmem:[%s6592_s1 + $0x548] sm:$0xff]  ;;  %v329_v25 = vld [vmem:[%s6592_s1 + $0x780] sm:$0xff]  ;;  %v4779_v60 = vcombine.high %v4748_v43, %v4748_v43  ;;  %v335_v15 = vld [vmem:[%s6592_s1 + $0x7b0] sm:$0xff] }
  0x79   :  { %645 = vmatmul.mubr.f32.vlgmr.msra.gmra.mrb[2].mxu0 %v4402_v37 }
  0x7a   :  { %715 = vmatmul.mubr.f32.vlgmr.msra.gmra.mrb[2].mxu1 %v4427_v50  ;;  %3101 = vmatpush3.bf16.msra.mxu0 %v3100_v45  ;;  %v3116_v45 = vpack.c.bf16 %v226_v35, %v225_v34  ;;  %v281_v34 = vld [vmem:[%s6592_s1 + $0x600] sm:$0xff]  ;;  %v282_v35 = vld [vmem:[%s6592_s1 + $0x608] sm:$0xff] }
  0x7b   :  { %3133 = vmatpush3.bf16.msra.mxu1 %v3132_v46  ;;  %3103 = vmatprep.subr.bf16.mxu0 %v3102_v48  ;;  %v3148_v46 = vpack.c.bf16 %v258_v39, %v257_v36  ;;  %v227_v48 = vld [vmem:[%s6592_s1 + $0x450] sm:$0xff]  ;;  %v313_v36 = vld [vmem:[%s6592_s1 + $0x700] sm:$0xff]  ;;  %v314_v39 = vld [vmem:[%s6592_s1 + $0x708] sm:$0xff] }
  0x7c   :  { %3135 = vmatprep.subr.bf16.mxu1 %v3134_v57  ;;  %784 = vmatprep.mubr.f32.mxu0 %v4570_v63  ;;  %v245_v57 = vld [vmem:[%s6592_s1 + $0x4e0] sm:$0xff]  ;;  %v3120_v61 = vpack.c.bf16 %v228_v51, %v227_v48  ;;  %v3196_v48 = vpack.c.bf16 %v314_v39, %v313_v36  ;;  %v3166_v51 = vpack.c.bf16 %v300_v42, %v299_v40  ;;  %v290_v36 = vld [vmem:[%s6592_s1 + $0x648] sm:$0xff]  ;;  %v307_v42 = vld [vmem:[%s6592_s1 + $0x6d0] sm:$0xff] }
  0x7d   :  { %854 = vmatprep.mubr.f32.mxu1 %v4587_v8  ;;  %v322_v40 = vld [vmem:[%s6592_s1 + $0x748] sm:$0xff] }
  0x7e   :  { %3105 = vmatpush3.bf16.msra.mxu0 %v3104_v2  ;;  %v3122_v2 = vpack.c.bf16 %v246_v58, %v245_v57  ;;  %v316_v57 = vld [vmem:[%s6592_s1 + $0x718] sm:$0xff]  ;;  %v301_v58 = vld [vmem:[%s6592_s1 + $0x6a0] sm:$0xff] }
  0x7f   :  { %3137 = vmatpush3.bf16.msra.mxu1 %v3136_v3  ;;  %3107 = vmatprep.subr.bf16.mxu0 %v3106_v4  ;;  %v229_v3 = vld [vmem:[%s6592_s1 + $0x460] sm:$0xff]  ;;  %v230_v4 = vld [vmem:[%s6592_s1 + $0x468] sm:$0xff] }
  0x80   :  { %3139 = vmatprep.subr.bf16.mxu1 %v3138_v9  ;;  %v247_v9 = vld [vmem:[%s6592_s1 + $0x4f0] sm:$0xff]  ;;  %v3124_v14 = vpack.c.bf16 %v230_v4, %v229_v3  ;;  %v3200_v4 = vpack.c.bf16 %v316_v57, %v315_v56  ;;  %v292_v56 = vld [vmem:[%s6592_s1 + $0x658] sm:$0xff] }
  0x82   :  { %3109 = vmatpush3.bf16.msra.mxu0 %v3108_v16  ;;  %v3156_v16 = vpack.c.bf16 %v262_v7, %v261_v5  ;;  %v3170_v5 = vpack.c.bf16 %v302_v59, %v301_v58  ;;  %v286_v7 = vld [vmem:[%s6592_s1 + $0x628] sm:$0xff]  ;;  %v324_v58 = vld [vmem:[%s6592_s1 + $0x758] sm:$0xff]  ;;  %v309_v59 = vld [vmem:[%s6592_s1 + $0x6e0] sm:$0xff] }
  0x83   :  { %3141 = vmatpush3.bf16.msra.mxu1 %v3140_v17  ;;  %3111 = vmatprep.subr.bf16.mxu0 %v3110_v18  ;;  %v3126_v17 = vpack.c.bf16 %v248_v10, %v247_v9  ;;  %v231_v18 = vld [vmem:[%s6592_s1 + $0x470] sm:$0xff]  ;;  %v317_v9 = vld [vmem:[%s6592_s1 + $0x720] sm:$0xff] }
  0x84   :  { %3143 = vmatprep.subr.bf16.mxu1 %v3142_v22  ;;  %v264_v22 = vld [vmem:[%s6592_s1 + $0x578] sm:$0xff] }
  0x86   :  { %3113 = vmatpush3.bf16.msra.mxu0 %v3112_v29  ;;  %v3128_v29 = vpack.c.bf16 %v232_v19, %v231_v18  ;;  %v3204_v18 = vpack.c.bf16 %v318_v11, %v317_v9  ;;  %v294_v9 = vld [vmem:[%s6592_s1 + $0x668] sm:$0xff] }
  0x87   :  { %3145 = vmatpush3.bf16.msra.mxu1 %v3144_v30  ;;  %3115 = vmatprep.subr.bf16.mxu0 %v3114_v31  ;;  %v3160_v30 = vpack.c.bf16 %v264_v22, %v263_v20  ;;  %v3162_v31 = vpack.c.bf16 %v298_v24, %v297_v23  ;;  %v287_v20 = vld [vmem:[%s6592_s1 + $0x630] sm:$0xff]  ;;  %v320_v24 = vld [vmem:[%s6592_s1 + $0x738] sm:$0xff] }
  0x88   :  { %3147 = vmatprep.subr.bf16.mxu1 %v3146_v38  ;;  %v3194_v38 = vpack.c.bf16 %v330_v26, %v329_v25  ;;  %v319_v22 = vld [vmem:[%s6592_s1 + $0x730] sm:$0xff]  ;;  %v305_v25 = vld [vmem:[%s6592_s1 + $0x6c0] sm:$0xff]  ;;  %v306_v26 = vld [vmem:[%s6592_s1 + $0x6c8] sm:$0xff] }
  0x8a   :  { %3117 = vmatpush3.bf16.msra.mxu0 %v3116_v45  ;;  %v332_v45 = vld [vmem:[%s6592_s1 + $0x798] sm:$0xff] }
  0x8b   :  { %3149 = vmatpush3.bf16.msra.mxu1 %v3148_v46  ;;  %3119 = vmatprep.subr.bf16.mxu0 %v3118_v47  ;;  %v4757_v46 = vrot.slane %v407_v28, %v4225_v13  ;;  %v3164_v47 = vpack.c.bf16 %v282_v35, %v281_v34  ;;  %v3198_v13 = vpack.c.bf16 %v332_v45, %v331_v44  ;;  %v337_v28 = vld [vmem:[%s6592_s1 + $0x7c0] sm:$0xff]  ;;  %v308_v44 = vld [vmem:[%s6592_s1 + $0x6d8] sm:$0xff]  ;;  %v339_v45 = vld [vmem:[%s6592_s1 + $0x7d0] sm:$0xff] }
  0x8c   :  { %3151 = vmatprep.subr.bf16.mxu1 %v3150_v53  ;;  %v284_v53 = vld [vmem:[%s6592_s1 + $0x618] sm:$0xff]  ;;  %v3178_v34 = vpack.c.bf16 %v306_v26, %v305_v25  ;;  %v289_v35 = vld [vmem:[%s6592_s1 + $0x640] sm:$0xff]  ;;  %v1193_v26 = vld [vmem:[%s6594_s3 + $0x608] sm:$0xff] }
  0x8d   :  { %v3168_v3 = vpack.c.bf16 %v284_v53, %v283_v52  ;;  %v3182_v52 = vpack.c.bf16 %v308_v44, %v307_v42  ;;  %v291_v53 = vld [vmem:[%s6592_s1 + $0x650] sm:$0xff]  ;;  %v328_v25 = vld [vmem:[%s6592_s1 + $0x778] sm:$0xff]  ;;  %v1197_v44 = vld [vmem:[%s6594_s3 + $0x628] sm:$0xff] }
  0x8e   :  { %3121 = vmatpush3.bf16.msra.mxu0 %v3120_v61  ;;  %v333_v61 = vld [vmem:[%s6592_s1 + $0x7a0] sm:$0xff]  ;;  %v1002_v42 = vld [vmem:[%s6594_s3 + $0x10] sm:$0xff] }
  0x8f   :  { %3153 = vmatpush3.bf16.msra.mxu1 %v3152_v62  ;;  %3123 = vmatprep.subr.bf16.mxu0 %v3122_v2  ;;  %v334_v62 = vld [vmem:[%s6592_s1 + $0x7a8] sm:$0xff]  ;;  %v4790_v2 = vcombine.high %v4757_v46, %v4757_v46 }
  0x90   :  { %3155 = vmatprep.subr.bf16.mxu1 %v3154_v6  ;;  %v285_v6 = vld [vmem:[%s6592_s1 + $0x620] sm:$0xff]  ;;  %v3202_v10 = vpack.c.bf16 %v334_v62, %v333_v61  ;;  %v310_v61 = vld [vmem:[%s6592_s1 + $0x6e8] sm:$0xff] }
  0x91   :  { %v341_v62 = vld [vmem:[%s6592_s1 + $0x7e0] sm:$0xff] }
  0x92   :  { %3125 = vmatpush3.bf16.msra.mxu0 %v3124_v14  ;;  %v304_v14 = vld [vmem:[%s6592_s1 + $0x6b8] sm:$0xff] }
  0x93   :  { %3157 = vmatpush3.bf16.msra.mxu1 %v3156_v16  ;;  %3127 = vmatprep.subr.bf16.mxu0 %v3126_v17  ;;  %v336_v16 = vld [vmem:[%s6592_s1 + $0x7b8] sm:$0xff]  ;;  %v3172_v17 = vpack.c.bf16 %v286_v7, %v285_v6  ;;  %v3174_v19 = vpack.c.bf16 %v304_v14, %v303_v12  ;;  %v3186_v6 = vpack.c.bf16 %v310_v61, %v309_v59  ;;  %v293_v7 = vld [vmem:[%s6592_s1 + $0x660] sm:$0xff]  ;;  %v326_v12 = vld [vmem:[%s6592_s1 + $0x768] sm:$0xff] }
  0x94   :  { %3159 = vmatprep.subr.bf16.mxu1 %v3158_v21  ;;  %v288_v21 = vld [vmem:[%s6592_s1 + $0x638] sm:$0xff]  ;;  %v3206_v23 = vpack.c.bf16 %v336_v16, %v335_v15  ;;  %v311_v14 = vld [vmem:[%s6592_s1 + $0x6f0] sm:$0xff]  ;;  %v1201_v61 = vld [vmem:[%s6594_s3 + $0x648] sm:$0xff] }
  0x95   :  { %v312_v15 = vld [vmem:[%s6592_s1 + $0x6f8] sm:$0xff]  ;;  %v343_v16 = vld [vmem:[%s6592_s1 + $0x7f0] sm:$0xff] }
  0x96   :  { %3129 = vmatpush3.bf16.msra.mxu0 %v3128_v29  ;;  %v338_v29 = vld [vmem:[%s6592_s1 + $0x7c8] sm:$0xff]  ;;  %v1006_v59 = vld [vmem:[%s6594_s3 + $0x30] sm:$0xff] }
  0x97   :  { %3161 = vmatpush3.bf16.msra.mxu1 %v3160_v30  ;;  %3163 = vmatprep.subr.bf16.mxu0 %v3162_v31  ;;  %v3176_v30 = vpack.c.bf16 %v288_v21, %v287_v20  ;;  %v3208_v31 = vpack.c.bf16 %v320_v24, %v319_v22  ;;  %v3210_v39 = vpack.c.bf16 %v338_v29, %v337_v28  ;;  %v295_v21 = vld [vmem:[%s6592_s1 + $0x670] sm:$0xff]  ;;  %v296_v22 = vld [vmem:[%s6592_s1 + $0x678] sm:$0xff]  ;;  %v1001_v29 = vld [vmem:[%s6594_s3 + $0x8] sm:$0xff] }
  0x98   :  { %3195 = vmatprep.subr.bf16.mxu1 %v3194_v38  ;;  %v321_v38 = vld [vmem:[%s6592_s1 + $0x740] sm:$0xff]  ;;  %v3190_v20 = vpack.c.bf16 %v312_v15, %v311_v14  ;;  %v1195_v28 = vld [vmem:[%s6594_s3 + $0x618] sm:$0xff]  ;;  %v1010_v14 = vld [vmem:[%s6594_s3 + $0x50] sm:$0xff] }
  0x99   :  { %785 = vmatmul.mubr.f32.vlgmr.msra.gmra.mrb[4].mxu0 %v4550_v55  ;;  %v1205_v15 = vld [vmem:[%s6594_s3 + $0x668] sm:$0xff] }
  0x9a   :  { %855 = vmatmul.mubr.f32.vlgmr.msra.gmra.mrb[4].mxu1 %v4573_v1  ;;  %3165 = vmatpush3.bf16.msra.mxu0 %v3164_v47  ;;  %v340_v47 = vld [vmem:[%s6592_s1 + $0x7d8] sm:$0xff] }
  0x9b   :  { %3197 = vmatpush3.bf16.msra.mxu1 %v3196_v48  ;;  %3167 = vmatprep.subr.bf16.mxu0 %v3166_v51  ;;  %v3180_v48 = vpack.c.bf16 %v290_v36, %v289_v35  ;;  %v3212_v51 = vpack.c.bf16 %v322_v40, %v321_v38  ;;  %v3214_v57 = vpack.c.bf16 %v340_v47, %v339_v45  ;;  %v1000_v36 = vld [vmem:[%s6594_s3] sm:$0xff]  ;;  %v1199_v45 = vld [vmem:[%s6594_s3 + $0x638] sm:$0xff]  ;;  %v1005_v47 = vld [vmem:[%s6594_s3 + $0x28] sm:$0xff] }
  0x9c   :  { %3199 = vmatprep.subr.bf16.mxu1 %v3198_v13  ;;  %924 = vmatprep.mubr.f32.mxu0 %v4779_v60  ;;  %v323_v13 = vld [vmem:[%s6592_s1 + $0x750] sm:$0xff]  ;;  %v3418_v35 = vpack.c.bf16 %v1195_v28, %v1193_v26  ;;  %v1192_v38 = vld [vmem:[%s6594_s3 + $0x600] sm:$0xff]  ;;  %v1211_v26 = vld [vmem:[%s6594_s3 + $0x698] sm:$0xff] }
  0x9d   :  { %994 = vmatprep.mubr.f32.mxu1 %v4790_v2  ;;  %v1017_v28 = vld [vmem:[%s6594_s3 + $0x88] sm:$0xff] }
  0x9e   :  { %3169 = vmatpush3.bf16.msra.mxu0 %v3168_v3  ;;  %v342_v3 = vld [vmem:[%s6592_s1 + $0x7e8] sm:$0xff] }
  0x9f   :  { %3201 = vmatpush3.bf16.msra.mxu1 %v3200_v4  ;;  %3171 = vmatprep.subr.bf16.mxu0 %v3170_v5  ;;  %v3184_v4 = vpack.c.bf16 %v292_v56, %v291_v53  ;;  %v3216_v5 = vpack.c.bf16 %v324_v58, %v323_v13  ;;  %v3218_v11 = vpack.c.bf16 %v342_v3, %v341_v62  ;;  %v1004_v56 = vld [vmem:[%s6594_s3 + $0x20] sm:$0xff]  ;;  %v1203_v62 = vld [vmem:[%s6594_s3 + $0x658] sm:$0xff]  ;;  %v1009_v3 = vld [vmem:[%s6594_s3 + $0x48] sm:$0xff] }
  0xa0   :  { %3203 = vmatprep.subr.bf16.mxu1 %v3202_v10  ;;  %v325_v10 = vld [vmem:[%s6592_s1 + $0x760] sm:$0xff]  ;;  %v3422_v53 = vpack.c.bf16 %v1199_v45, %v1197_v44  ;;  %v1215_v44 = vld [vmem:[%s6594_s3 + $0x6b8] sm:$0xff]  ;;  %v1021_v45 = vld [vmem:[%s6594_s3 + $0xa8] sm:$0xff] }
  0xa1   :  { %v1196_v13 = vld [vmem:[%s6594_s3 + $0x620] sm:$0xff] }
  0xa2   :  { %3173 = vmatpush3.bf16.msra.mxu0 %v3172_v17  ;;  %v344_v17 = vld [vmem:[%s6592_s1 + $0x7f8] sm:$0xff] }
  0xa3   :  { %3205 = vmatpush3.bf16.msra.mxu1 %v3204_v18  ;;  %3175 = vmatprep.subr.bf16.mxu0 %v3174_v19  ;;  %v3188_v18 = vpack.c.bf16 %v294_v9, %v293_v7  ;;  %v3220_v19 = vpack.c.bf16 %v326_v12, %v325_v10  ;;  %v3222_v24 = vpack.c.bf16 %v344_v17, %v343_v16  ;;  %v1008_v9 = vld [vmem:[%s6594_s3 + $0x40] sm:$0xff]  ;;  %v1207_v16 = vld [vmem:[%s6594_s3 + $0x678] sm:$0xff]  ;;  %v1013_v17 = vld [vmem:[%s6594_s3 + $0x68] sm:$0xff] }
  0xa4   :  { %3207 = vmatprep.subr.bf16.mxu1 %v3206_v23  ;;  %v327_v23 = vld [vmem:[%s6592_s1 + $0x770] sm:$0xff]  ;;  %v3426_v7 = vpack.c.bf16 %v1203_v62, %v1201_v61  ;;  %v1200_v10 = vld [vmem:[%s6594_s3 + $0x640] sm:$0xff]  ;;  %v1219_v61 = vld [vmem:[%s6594_s3 + $0x6d8] sm:$0xff] }
  0xa5   :  { %v1025_v62 = vld [vmem:[%s6594_s3 + $0xc8] sm:$0xff] }
  0xa6   :  { %3177 = vmatpush3.bf16.msra.mxu0 %v3176_v30  ;;  %v1003_v30 = vld [vmem:[%s6594_s3 + $0x18] sm:$0xff] }
  0xa7   :  { %3209 = vmatpush3.bf16.msra.mxu1 %v3208_v31  ;;  %3179 = vmatprep.subr.bf16.mxu0 %v3178_v34  ;;  %v3192_v31 = vpack.c.bf16 %v296_v22, %v295_v21  ;;  %v3224_v34 = vpack.c.bf16 %v328_v25, %v327_v23  ;;  %v3226_v40 = vpack.c.bf16 %v1003_v30, %v1001_v29  ;;  %v1204_v22 = vld [vmem:[%s6594_s3 + $0x660] sm:$0xff]  ;;  %v1206_v23 = vld [vmem:[%s6594_s3 + $0x670] sm:$0xff]  ;;  %v1209_v25 = vld [vmem:[%s6594_s3 + $0x688] sm:$0xff] }
  0xa8   :  { %3211 = vmatprep.subr.bf16.mxu1 %v3210_v39  ;;  %v1194_v39 = vld [vmem:[%s6594_s3 + $0x610] sm:$0xff]  ;;  %v3430_v21 = vpack.c.bf16 %v1207_v16, %v1205_v15  ;;  %v1019_v29 = vld [vmem:[%s6594_s3 + $0x98] sm:$0xff]  ;;  %v3432_v30 = vpack.c.bf16 %v1206_v23, %v1204_v22  ;;  %v1029_v16 = vld [vmem:[%s6594_s3 + $0xe8] sm:$0xff] }
  0xa9   :  { %v1223_v15 = vld [vmem:[%s6594_s3 + $0x6f8] sm:$0xff]  ;;  %v1222_v22 = vld [vmem:[%s6594_s3 + $0x6f0] sm:$0xff] }
  0xaa   :  { %3181 = vmatpush3.bf16.msra.mxu0 %v3180_v48  ;;  %v1007_v48 = vld [vmem:[%s6594_s3 + $0x38] sm:$0xff] }
  0xab   :  { %3213 = vmatpush3.bf16.msra.mxu1 %v3212_v51  ;;  %3183 = vmatprep.subr.bf16.mxu0 %v3182_v52  ;;  %v3420_v51 = vpack.c.bf16 %v1194_v39, %v1192_v38  ;;  %v3228_v52 = vpack.c.bf16 %v1002_v42, %v1000_v36  ;;  %v3230_v58 = vpack.c.bf16 %v1007_v48, %v1005_v47  ;;  %v1208_v36 = vld [vmem:[%s6594_s3 + $0x680] sm:$0xff]  ;;  %v1210_v38 = vld [vmem:[%s6594_s3 + $0x690] sm:$0xff]  ;;  %v1213_v42 = vld [vmem:[%s6594_s3 + $0x6a8] sm:$0xff] }
  0xac   :  { %3215 = vmatprep.subr.bf16.mxu1 %v3214_v57  ;;  %v1198_v57 = vld [vmem:[%s6594_s3 + $0x630] sm:$0xff]  ;;  %v3242_v39 = vpack.c.bf16 %v1019_v29, %v1017_v28  ;;  %v1023_v47 = vld [vmem:[%s6594_s3 + $0xb8] sm:$0xff]  ;;  %v3436_v48 = vpack.c.bf16 %v1210_v38, %v1208_v36 }
  0xad   :  { %v1035_v28 = vld [vmem:[%s6594_s3 + $0x118] sm:$0xff]  ;;  %v1226_v36 = vld [vmem:[%s6594_s3 + $0x710] sm:$0xff] }
  0xae   :  { %3185 = vmatpush3.bf16.msra.mxu0 %v3184_v4  ;;  %v1011_v4 = vld [vmem:[%s6594_s3 + $0x58] sm:$0xff] }
  0xaf   :  { %3217 = vmatpush3.bf16.msra.mxu1 %v3216_v5  ;;  %3187 = vmatprep.subr.bf16.mxu0 %v3186_v6  ;;  %v3424_v5 = vpack.c.bf16 %v1198_v57, %v1196_v13  ;;  %v3232_v6 = vpack.c.bf16 %v1006_v59, %v1004_v56  ;;  %v3234_v12 = vpack.c.bf16 %v1011_v4, %v1009_v3  ;;  %v1212_v56 = vld [vmem:[%s6594_s3 + $0x6a0] sm:$0xff]  ;;  %v1214_v13 = vld [vmem:[%s6594_s3 + $0x6b0] sm:$0xff]  ;;  %v1217_v59 = vld [vmem:[%s6594_s3 + $0x6c8] sm:$0xff] }
  0xb0   :  { %3219 = vmatprep.subr.bf16.mxu1 %v3218_v11  ;;  %v1202_v11 = vld [vmem:[%s6594_s3 + $0x650] sm:$0xff]  ;;  %v3246_v57 = vpack.c.bf16 %v1023_v47, %v1021_v45  ;;  %v1027_v3 = vld [vmem:[%s6594_s3 + $0xd8] sm:$0xff]  ;;  %v3440_v4 = vpack.c.bf16 %v1214_v13, %v1212_v56 }
  0xb1   :  { %v1039_v45 = vld [vmem:[%s6594_s3 + $0x138] sm:$0xff]  ;;  %v1230_v56 = vld [vmem:[%s6594_s3 + $0x730] sm:$0xff] }
  0xb2   :  { %3189 = vmatpush3.bf16.msra.mxu0 %v3188_v18  ;;  %v1015_v18 = vld [vmem:[%s6594_s3 + $0x78] sm:$0xff] }
  0xb3   :  { %3221 = vmatpush3.bf16.msra.mxu1 %v3220_v19  ;;  %3191 = vmatprep.subr.bf16.mxu0 %v3190_v20  ;;  %v3428_v19 = vpack.c.bf16 %v1202_v11, %v1200_v10  ;;  %v3236_v20 = vpack.c.bf16 %v1010_v14, %v1008_v9  ;;  %v1216_v9 = vld [vmem:[%s6594_s3 + $0x6c0] sm:$0xff]  ;;  %v1218_v10 = vld [vmem:[%s6594_s3 + $0x6d0] sm:$0xff]  ;;  %v3250_v11 = vpack.c.bf16 %v1027_v3, %v1025_v62  ;;  %v1221_v14 = vld [vmem:[%s6594_s3 + $0x6e8] sm:$0xff] }
  0xb4   :  { %3223 = vmatprep.subr.bf16.mxu1 %v3222_v24  ;;  %v1014_v24 = vld [vmem:[%s6594_s3 + $0x70] sm:$0xff]  ;;  %v1043_v62 = vld [vmem:[%s6594_s3 + $0x158] sm:$0xff] }
  0xb6   :  { %3193 = vmatpush3.bf16.msra.mxu0 %v3192_v31 }
  0xb7   :  { %3225 = vmatpush3.bf16.msra.mxu1 %v3224_v34  ;;  %3419 = vmatprep.subr.bf16.mxu0 %v3418_v35  ;;  %v3434_v34 = vpack.c.bf16 %v1211_v26, %v1209_v25  ;;  %v1016_v35 = vld [vmem:[%s6594_s3 + $0x80] sm:$0xff]  ;;  %v1227_v25 = vld [vmem:[%s6594_s3 + $0x718] sm:$0xff]  ;;  %v1033_v26 = vld [vmem:[%s6594_s3 + $0x108] sm:$0xff] }
  0xb8   :  { %3227 = vmatprep.subr.bf16.mxu1 %v3226_v40  ;;  %v1018_v40 = vld [vmem:[%s6594_s3 + $0x90] sm:$0xff]  ;;  %v3258_v38 = vpack.c.bf16 %v1035_v28, %v1033_v26  ;;  %v1051_v26 = vld [vmem:[%s6594_s3 + $0x198] sm:$0xff] }
  0xb9   :  { %925 = vmatmul.mubr.f32.vlgmr.msra.gmra.mrb[6].mxu0 %v4748_v43 }
  0xba   :  { %995 = vmatmul.mubr.f32.vlgmr.msra.gmra.mrb[6].mxu1 %v4757_v46  ;;  %3421 = vmatpush1.bf16.msra.mxu0 %v3420_v51  ;;  %v3244_v51 = vpack.c.bf16 %v1018_v40, %v1016_v35  ;;  %v1224_v35 = vld [vmem:[%s6594_s3 + $0x700] sm:$0xff]  ;;  %v1229_v40 = vld [vmem:[%s6594_s3 + $0x728] sm:$0xff] }
  0xbb   :  { %3229 = vmatpush1.bf16.msra.mxu1 %v3228_v52  ;;  %3423 = vmatprep.subr.bf16.mxu0 %v3422_v53  ;;  %v3438_v52 = vpack.c.bf16 %v1215_v44, %v1213_v42  ;;  %v1020_v53 = vld [vmem:[%s6594_s3 + $0xa0] sm:$0xff]  ;;  %v1231_v42 = vld [vmem:[%s6594_s3 + $0x738] sm:$0xff]  ;;  %v1037_v44 = vld [vmem:[%s6594_s3 + $0x128] sm:$0xff]  ;;  %v3452_v47 = vpack.c.bf16 %v1226_v36, %v1224_v35 }
  0xbc   :  { %3231 = vmatprep.subr.bf16.mxu1 %v3230_v58  ;;  %1588 = vmatprep.mubr.f32.mxu1 %v4265_v32  ;;  %v1012_v32 = vld [vmem:[%s6594_s3 + $0x60] sm:$0xff]  ;;  %v1022_v58 = vld [vmem:[%s6594_s3 + $0xb0] sm:$0xff]  ;;  %v3262_v13 = vpack.c.bf16 %v1039_v45, %v1037_v44  ;;  %v1055_v44 = vld [vmem:[%s6594_s3 + $0x1b8] sm:$0xff] }
  0xbd   :  { %1801 = vmatprep.mubr.f32.mxu0 %v4438_v54  ;;  %v3238_v54 = vpack.c.bf16 %v1015_v18, %v1013_v17  ;;  %v3240_v31 = vpack.c.bf16 %v1014_v24, %v1012_v32  ;;  %v1031_v17 = vld [vmem:[%s6594_s3 + $0xf8] sm:$0xff]  ;;  %v3444_v18 = vpack.c.bf16 %v1218_v10, %v1216_v9  ;;  %v1220_v32 = vld [vmem:[%s6594_s3 + $0x6e0] sm:$0xff]  ;;  %v1225_v24 = vld [vmem:[%s6594_s3 + $0x708] sm:$0xff] }
  0xbe   :  { %3425 = vmatpush1.bf16.msra.mxu0 %v3424_v5  ;;  %v3248_v5 = vpack.c.bf16 %v1022_v58, %v1020_v53  ;;  %v3254_v23 = vpack.c.bf16 %v1031_v17, %v1029_v16  ;;  %v3448_v29 = vpack.c.bf16 %v1222_v22, %v1220_v32  ;;  %v1228_v53 = vld [vmem:[%s6594_s3 + $0x720] sm:$0xff]  ;;  %v1233_v58 = vld [vmem:[%s6594_s3 + $0x748] sm:$0xff]  ;;  %v1234_v9 = vld [vmem:[%s6594_s3 + $0x750] sm:$0xff] }
  0xbf   :  { %3233 = vmatpush1.bf16.msra.mxu1 %v3232_v6  ;;  %3427 = vmatprep.subr.bf16.mxu0 %v3426_v7  ;;  %v3442_v6 = vpack.c.bf16 %v1219_v61, %v1217_v59  ;;  %v1024_v7 = vld [vmem:[%s6594_s3 + $0xc0] sm:$0xff]  ;;  %v1235_v59 = vld [vmem:[%s6594_s3 + $0x758] sm:$0xff]  ;;  %v1041_v61 = vld [vmem:[%s6594_s3 + $0x148] sm:$0xff]  ;;  %v3456_v3 = vpack.c.bf16 %v1230_v56, %v1228_v53 }
  0xc0   :  { %3235 = vmatprep.subr.bf16.mxu1 %v3234_v12  ;;  %v1026_v12 = vld [vmem:[%s6594_s3 + $0xd0] sm:$0xff]  ;;  %v3266_v10 = vpack.c.bf16 %v1043_v62, %v1041_v61  ;;  %v1047_v16 = vld [vmem:[%s6594_s3 + $0x178] sm:$0xff] }
  0xc1   :  { %v1238_v32 = vld [vmem:[%s6594_s3 + $0x770] sm:$0xff]  ;;  %v1059_v61 = vld [vmem:[%s6594_s3 + $0x1d8] sm:$0xff] }
  0xc2   :  { %3429 = vmatpush1.bf16.msra.mxu0 %v3428_v19  ;;  %v3252_v19 = vpack.c.bf16 %v1026_v12, %v1024_v7  ;;  %v1232_v7 = vld [vmem:[%s6594_s3 + $0x740] sm:$0xff]  ;;  %v1237_v12 = vld [vmem:[%s6594_s3 + $0x768] sm:$0xff]  ;;  %v1242_v35 = vld [vmem:[%s6594_s3 + $0x790] sm:$0xff] }
  0xc3   :  { %3237 = vmatpush1.bf16.msra.mxu1 %v3236_v20  ;;  %3431 = vmatprep.subr.bf16.mxu0 %v3430_v21  ;;  %v3446_v20 = vpack.c.bf16 %v1223_v15, %v1221_v14  ;;  %v1028_v21 = vld [vmem:[%s6594_s3 + $0xe0] sm:$0xff]  ;;  %v1239_v14 = vld [vmem:[%s6594_s3 + $0x778] sm:$0xff]  ;;  %v1045_v15 = vld [vmem:[%s6594_s3 + $0x168] sm:$0xff]  ;;  %v3460_v17 = vpack.c.bf16 %v1234_v9, %v1232_v7 }
  0xc4   :  { %3239 = vmatprep.subr.bf16.mxu1 %v3238_v54  ;;  %v1030_v54 = vld [vmem:[%s6594_s3 + $0xf0] sm:$0xff]  ;;  %v3270_v22 = vpack.c.bf16 %v1047_v16, %v1045_v15  ;;  %v1063_v15 = vld [vmem:[%s6594_s3 + $0x1f8] sm:$0xff] }
  0xc5   :  { %v1246_v53 = vld [vmem:[%s6594_s3 + $0x7b0] sm:$0xff] }
  0xc6   :  { %3433 = vmatpush1.bf16.msra.mxu0 %v3432_v30  ;;  %v3256_v30 = vpack.c.bf16 %v1030_v54, %v1028_v21  ;;  %v1236_v21 = vld [vmem:[%s6594_s3 + $0x760] sm:$0xff]  ;;  %v1241_v54 = vld [vmem:[%s6594_s3 + $0x788] sm:$0xff]  ;;  %v1250_v7 = vld [vmem:[%s6594_s3 + $0x7d0] sm:$0xff] }
  0xc7   :  { %3241 = vmatpush1.bf16.msra.mxu1 %v3240_v31  ;;  %3435 = vmatprep.subr.bf16.mxu0 %v3434_v34  ;;  %v3450_v31 = vpack.c.bf16 %v1227_v25, %v1225_v24  ;;  %v1032_v34 = vld [vmem:[%s6594_s3 + $0x100] sm:$0xff]  ;;  %v1243_v24 = vld [vmem:[%s6594_s3 + $0x798] sm:$0xff]  ;;  %v1049_v25 = vld [vmem:[%s6594_s3 + $0x188] sm:$0xff]  ;;  %v3464_v28 = vpack.c.bf16 %v1238_v32, %v1236_v21 }
  0xc8   :  { %3243 = vmatprep.subr.bf16.mxu1 %v3242_v39  ;;  %v1034_v39 = vld [vmem:[%s6594_s3 + $0x110] sm:$0xff]  ;;  %v3274_v36 = vpack.c.bf16 %v1051_v26, %v1049_v25  ;;  %v1067_v25 = vld [vmem:[%s6594_s3 + $0x218] sm:$0xff] }
  0xc9   :  { %v1254_v21 = vld [vmem:[%s6594_s3 + $0x7f0] sm:$0xff] }
  0xca   :  { %3437 = vmatpush1.bf16.msra.mxu0 %v3436_v48  ;;  %v3260_v48 = vpack.c.bf16 %v1034_v39, %v1032_v34  ;;  %v1240_v34 = vld [vmem:[%s6594_s3 + $0x780] sm:$0xff]  ;;  %v1245_v39 = vld [vmem:[%s6594_s3 + $0x7a8] sm:$0xff] }
  0xcb   :  { %3245 = vmatpush1.bf16.msra.mxu1 %v3244_v51  ;;  %3439 = vmatprep.subr.bf16.mxu0 %v3438_v52  ;;  %v3454_v51 = vpack.c.bf16 %v1231_v42, %v1229_v40  ;;  %v1036_v52 = vld [vmem:[%s6594_s3 + $0x120] sm:$0xff]  ;;  %v1247_v40 = vld [vmem:[%s6594_s3 + $0x7b8] sm:$0xff]  ;;  %v1053_v42 = vld [vmem:[%s6594_s3 + $0x1a8] sm:$0xff]  ;;  %v3468_v45 = vpack.c.bf16 %v1242_v35, %v1240_v34 }
  0xcc   :  { %3247 = vmatprep.subr.bf16.mxu1 %v3246_v57  ;;  %v1038_v57 = vld [vmem:[%s6594_s3 + $0x130] sm:$0xff]  ;;  %v3278_v56 = vpack.c.bf16 %v1055_v44, %v1053_v42  ;;  %v1071_v42 = vld [vmem:[%s6594_s3 + $0x238] sm:$0xff] }
  0xcd   :  { %v1258_v34 = vld [vmem:[%s6594_s3 + $0x810] sm:$0xff] }
  0xce   :  { %3441 = vmatpush1.bf16.msra.mxu0 %v3440_v4  ;;  %v3264_v4 = vpack.c.bf16 %v1038_v57, %v1036_v52  ;;  %v1244_v52 = vld [vmem:[%s6594_s3 + $0x7a0] sm:$0xff]  ;;  %v1249_v57 = vld [vmem:[%s6594_s3 + $0x7c8] sm:$0xff] }
  0xcf   :  { %3249 = vmatpush1.bf16.msra.mxu1 %v3248_v5  ;;  %3443 = vmatprep.subr.bf16.mxu0 %v3442_v6  ;;  %v3458_v5 = vpack.c.bf16 %v1235_v59, %v1233_v58  ;;  %v1040_v6 = vld [vmem:[%s6594_s3 + $0x140] sm:$0xff]  ;;  %v1251_v58 = vld [vmem:[%s6594_s3 + $0x7d8] sm:$0xff]  ;;  %v1057_v59 = vld [vmem:[%s6594_s3 + $0x1c8] sm:$0xff]  ;;  %v3472_v62 = vpack.c.bf16 %v1246_v53, %v1244_v52 }
  0xd0   :  { %3251 = vmatprep.subr.bf16.mxu1 %v3250_v11  ;;  %v1042_v11 = vld [vmem:[%s6594_s3 + $0x150] sm:$0xff]  ;;  %v3282_v9 = vpack.c.bf16 %v1059_v61, %v1057_v59  ;;  %v1075_v59 = vld [vmem:[%s6594_s3 + $0x258] sm:$0xff] }
  0xd1   :  { %v1262_v52 = vld [vmem:[%s6594_s3 + $0x830] sm:$0xff] }
  0xd2   :  { %3445 = vmatpush1.bf16.msra.mxu0 %v3444_v18  ;;  %v3268_v18 = vpack.c.bf16 %v1042_v11, %v1040_v6  ;;  %v1248_v6 = vld [vmem:[%s6594_s3 + $0x7c0] sm:$0xff]  ;;  %v1253_v11 = vld [vmem:[%s6594_s3 + $0x7e8] sm:$0xff] }
  0xd3   :  { %3253 = vmatpush1.bf16.msra.mxu1 %v3252_v19  ;;  %3447 = vmatprep.subr.bf16.mxu0 %v3446_v20  ;;  %v3462_v19 = vpack.c.bf16 %v1239_v14, %v1237_v12  ;;  %v1044_v20 = vld [vmem:[%s6594_s3 + $0x160] sm:$0xff]  ;;  %v1255_v12 = vld [vmem:[%s6594_s3 + $0x7f8] sm:$0xff]  ;;  %v1061_v14 = vld [vmem:[%s6594_s3 + $0x1e8] sm:$0xff]  ;;  %v3476_v16 = vpack.c.bf16 %v1250_v7, %v1248_v6 }
  0xd4   :  { %3255 = vmatprep.subr.bf16.mxu1 %v3254_v23  ;;  %v1046_v23 = vld [vmem:[%s6594_s3 + $0x170] sm:$0xff]  ;;  %v3286_v32 = vpack.c.bf16 %v1063_v15, %v1061_v14  ;;  %v1269_v7 = vld [vmem:[%s6594_s3 + $0x868] sm:$0xff] }
  0xd5   :  { %v1074_v6 = vld [vmem:[%s6594_s3 + $0x250] sm:$0xff] }
  0xd6   :  { %3449 = vmatpush1.bf16.msra.mxu0 %v3448_v29  ;;  %v3272_v29 = vpack.c.bf16 %v1046_v23, %v1044_v20  ;;  %v1252_v20 = vld [vmem:[%s6594_s3 + $0x7e0] sm:$0xff]  ;;  %v1257_v23 = vld [vmem:[%s6594_s3 + $0x808] sm:$0xff] }
  0xd7   :  { %3257 = vmatpush1.bf16.msra.mxu1 %v3256_v30  ;;  %3451 = vmatprep.subr.bf16.mxu0 %v3450_v31  ;;  %v3466_v30 = vpack.c.bf16 %v1243_v24, %v1241_v54  ;;  %v1048_v31 = vld [vmem:[%s6594_s3 + $0x180] sm:$0xff]  ;;  %v1259_v54 = vld [vmem:[%s6594_s3 + $0x818] sm:$0xff]  ;;  %v1065_v24 = vld [vmem:[%s6594_s3 + $0x208] sm:$0xff]  ;;  %v3480_v26 = vpack.c.bf16 %v1254_v21, %v1252_v20 }
  0xd8   :  { %3259 = vmatprep.subr.bf16.mxu1 %v3258_v38  ;;  %v1050_v38 = vld [vmem:[%s6594_s3 + $0x190] sm:$0xff]  ;;  %v3290_v35 = vpack.c.bf16 %v1067_v25, %v1065_v24  ;;  %v1275_v20 = vld [vmem:[%s6594_s3 + $0x898] sm:$0xff]  ;;  %v1081_v21 = vld [vmem:[%s6594_s3 + $0x288] sm:$0xff] }
  0xd9   :  { %v1080_v24 = vld [vmem:[%s6594_s3 + $0x280] sm:$0xff] }
  0xda   :  { %3453 = vmatpush1.bf16.msra.mxu0 %v3452_v47  ;;  %v3276_v47 = vpack.c.bf16 %v1050_v38, %v1048_v31  ;;  %v1256_v31 = vld [vmem:[%s6594_s3 + $0x800] sm:$0xff]  ;;  %v1261_v38 = vld [vmem:[%s6594_s3 + $0x828] sm:$0xff] }
  0xdb   :  { %3261 = vmatpush1.bf16.msra.mxu1 %v3260_v48  ;;  %3455 = vmatprep.subr.bf16.mxu0 %v3454_v51  ;;  %v3470_v48 = vpack.c.bf16 %v1247_v40, %v1245_v39  ;;  %v1052_v51 = vld [vmem:[%s6594_s3 + $0x1a0] sm:$0xff]  ;;  %v1263_v39 = vld [vmem:[%s6594_s3 + $0x838] sm:$0xff]  ;;  %v1069_v40 = vld [vmem:[%s6594_s3 + $0x228] sm:$0xff]  ;;  %v3484_v44 = vpack.c.bf16 %v1258_v34, %v1256_v31 }
  0xdc   :  { %3263 = vmatprep.subr.bf16.mxu1 %v3262_v13  ;;  %v1054_v13 = vld [vmem:[%s6594_s3 + $0x1b0] sm:$0xff]  ;;  %v3294_v53 = vpack.c.bf16 %v1071_v42, %v1069_v40  ;;  %v1272_v25 = vld [vmem:[%s6594_s3 + $0x880] sm:$0xff]  ;;  %v1279_v31 = vld [vmem:[%s6594_s3 + $0x8b8] sm:$0xff] }
  0xdd   :  { %v1085_v34 = vld [vmem:[%s6594_s3 + $0x2a8] sm:$0xff]  ;;  %v1084_v40 = vld [vmem:[%s6594_s3 + $0x2a0] sm:$0xff] }
  0xde   :  { %3457 = vmatpush1.bf16.msra.mxu0 %v3456_v3  ;;  %v3280_v3 = vpack.c.bf16 %v1054_v13, %v1052_v51  ;;  %v1260_v51 = vld [vmem:[%s6594_s3 + $0x820] sm:$0xff]  ;;  %v1265_v13 = vld [vmem:[%s6594_s3 + $0x848] sm:$0xff] }
  0xdf   :  { %3265 = vmatpush1.bf16.msra.mxu1 %v3264_v4  ;;  %3459 = vmatprep.subr.bf16.mxu0 %v3458_v5  ;;  %v3474_v4 = vpack.c.bf16 %v1251_v58, %v1249_v57  ;;  %v1056_v5 = vld [vmem:[%s6594_s3 + $0x1c0] sm:$0xff]  ;;  %v1267_v57 = vld [vmem:[%s6594_s3 + $0x858] sm:$0xff]  ;;  %v1073_v58 = vld [vmem:[%s6594_s3 + $0x248] sm:$0xff]  ;;  %v3488_v61 = vpack.c.bf16 %v1262_v52, %v1260_v51 }
  0xe0   :  { %3267 = vmatprep.subr.bf16.mxu1 %v3266_v10  ;;  %v1058_v10 = vld [vmem:[%s6594_s3 + $0x1d0] sm:$0xff]  ;;  %v1276_v42 = vld [vmem:[%s6594_s3 + $0x8a0] sm:$0xff]  ;;  %v1283_v51 = vld [vmem:[%s6594_s3 + $0x8d8] sm:$0xff] }
  0xe1   :  { %v1089_v52 = vld [vmem:[%s6594_s3 + $0x2c8] sm:$0xff] }
  0xe2   :  { %3461 = vmatpush1.bf16.msra.mxu0 %v3460_v17  ;;  %v3284_v17 = vpack.c.bf16 %v1058_v10, %v1056_v5  ;;  %v1266_v5 = vld [vmem:[%s6594_s3 + $0x850] sm:$0xff]  ;;  %v1077_v10 = vld [vmem:[%s6594_s3 + $0x268] sm:$0xff] }
  0xe3   :  { %3269 = vmatpush1.bf16.msra.mxu1 %v3268_v18  ;;  %3463 = vmatprep.subr.bf16.mxu0 %v3462_v19  ;;  %v3478_v18 = vpack.c.bf16 %v1255_v12, %v1253_v11  ;;  %v1060_v19 = vld [vmem:[%s6594_s3 + $0x1e0] sm:$0xff]  ;;  %v1079_v11 = vld [vmem:[%s6594_s3 + $0x278] sm:$0xff] }
  0xe4   :  { %3271 = vmatprep.subr.bf16.mxu1 %v3270_v22  ;;  %v1062_v22 = vld [vmem:[%s6594_s3 + $0x1f0] sm:$0xff] }
  0xe6   :  { %3465 = vmatpush1.bf16.msra.mxu0 %v3464_v28  ;;  %v3288_v28 = vpack.c.bf16 %v1062_v22, %v1060_v19  ;;  %v1273_v19 = vld [vmem:[%s6594_s3 + $0x888] sm:$0xff] }
  0xe7   :  { %3273 = vmatpush1.bf16.msra.mxu1 %v3272_v29  ;;  %3467 = vmatprep.subr.bf16.mxu0 %v3466_v30  ;;  %v3482_v29 = vpack.c.bf16 %v1259_v54, %v1257_v23  ;;  %v1064_v30 = vld [vmem:[%s6594_s3 + $0x200] sm:$0xff]  ;;  %v3498_v54 = vpack.c.bf16 %v1275_v20, %v1273_v19 }
  0xe8   :  { %3275 = vmatprep.subr.bf16.mxu1 %v3274_v36  ;;  %v1066_v36 = vld [vmem:[%s6594_s3 + $0x210] sm:$0xff] }
  0xea   :  { %3469 = vmatpush1.bf16.msra.mxu0 %v3468_v45  ;;  %v3292_v45 = vpack.c.bf16 %v1066_v36, %v1064_v30  ;;  %v1277_v30 = vld [vmem:[%s6594_s3 + $0x8a8] sm:$0xff] }
  0xeb   :  { %3277 = vmatpush1.bf16.msra.mxu1 %v3276_v47  ;;  %3471 = vmatprep.subr.bf16.mxu0 %v3470_v48  ;;  %v3486_v47 = vpack.c.bf16 %v1263_v39, %v1261_v38  ;;  %v1068_v48 = vld [vmem:[%s6594_s3 + $0x220] sm:$0xff]  ;;  %v3502_v39 = vpack.c.bf16 %v1279_v31, %v1277_v30 }
  0xec   :  { %3279 = vmatprep.subr.bf16.mxu1 %v3278_v56  ;;  %v1070_v56 = vld [vmem:[%s6594_s3 + $0x230] sm:$0xff] }
  0xee   :  { %3473 = vmatpush1.bf16.msra.mxu0 %v3472_v62  ;;  %v3296_v62 = vpack.c.bf16 %v1070_v56, %v1068_v48  ;;  %v1281_v48 = vld [vmem:[%s6594_s3 + $0x8c8] sm:$0xff] }
  0xef   :  { %3281 = vmatpush1.bf16.msra.mxu1 %v3280_v3  ;;  %3475 = vmatprep.subr.bf16.mxu0 %v3474_v4  ;;  %v3490_v3 = vpack.c.bf16 %v1267_v57, %v1265_v13  ;;  %v1264_v4 = vld [vmem:[%s6594_s3 + $0x840] sm:$0xff]  ;;  %v3506_v57 = vpack.c.bf16 %v1283_v51, %v1281_v48 }
  0xf0   :  { %3283 = vmatprep.subr.bf16.mxu1 %v3282_v9  ;;  %v1271_v9 = vld [vmem:[%s6594_s3 + $0x878] sm:$0xff]  ;;  %v3492_v12 = vpack.c.bf16 %v1266_v5, %v1264_v4  ;;  %v1093_v5 = vld [vmem:[%s6594_s3 + $0x2e8] sm:$0xff] }
  0xf1   :  { %v3494_v15 = vpack.c.bf16 %v1271_v9, %v1269_v7  ;;  %v1287_v4 = vld [vmem:[%s6594_s3 + $0x8f8] sm:$0xff] }
  0xf2   :  { %3477 = vmatpush1.bf16.msra.mxu0 %v3476_v16  ;;  %v1268_v16 = vld [vmem:[%s6594_s3 + $0x860] sm:$0xff] }
  0xf3   :  { %3285 = vmatpush1.bf16.msra.mxu1 %v3284_v17  ;;  %3479 = vmatprep.subr.bf16.mxu0 %v3478_v18  ;;  %v1270_v17 = vld [vmem:[%s6594_s3 + $0x870] sm:$0xff] }
  0xf4   :  { %3287 = vmatprep.subr.bf16.mxu1 %v3286_v32  ;;  %v1078_v18 = vld [vmem:[%s6594_s3 + $0x270] sm:$0xff]  ;;  %v1083_v32 = vld [vmem:[%s6594_s3 + $0x298] sm:$0xff]  ;;  %v3496_v22 = vpack.c.bf16 %v1270_v17, %v1268_v16  ;;  %v1097_v17 = vld [vmem:[%s6594_s3 + $0x308] sm:$0xff] }
  0xf5   :  { %v1291_v16 = vld [vmem:[%s6594_s3 + $0x918] sm:$0xff] }
  0xf6   :  { %3481 = vmatpush1.bf16.msra.mxu0 %v3480_v26  ;;  %v1274_v26 = vld [vmem:[%s6594_s3 + $0x890] sm:$0xff] }
  0xf7   :  { %3289 = vmatpush1.bf16.msra.mxu1 %v3288_v28  ;;  %3483 = vmatprep.subr.bf16.mxu0 %v3482_v29  ;;  %v3306_v28 = vpack.c.bf16 %v1083_v32, %v1081_v21  ;;  %v1082_v29 = vld [vmem:[%s6594_s3 + $0x290] sm:$0xff]  ;;  %v3500_v36 = vpack.c.bf16 %v1274_v26, %v1272_v25  ;;  %v1096_v21 = vld [vmem:[%s6594_s3 + $0x300] sm:$0xff]  ;;  %v1295_v25 = vld [vmem:[%s6594_s3 + $0x938] sm:$0xff] }
  0xf8   :  { %3291 = vmatprep.subr.bf16.mxu1 %v3290_v35  ;;  %v1087_v35 = vld [vmem:[%s6594_s3 + $0x2b8] sm:$0xff]  ;;  %v3308_v38 = vpack.c.bf16 %v1082_v29, %v1080_v24  ;;  %v1288_v32 = vld [vmem:[%s6594_s3 + $0x900] sm:$0xff]  ;;  %v1293_v24 = vld [vmem:[%s6594_s3 + $0x928] sm:$0xff] }
  0xf9   :  { %1802 = vmatmul.mubr.f32.vlgmr.msra.gmra.mrb[8].mxu0 %v4427_v50  ;;  %v1072_v50 = vld [vmem:[%s6594_s3 + $0x240] sm:$0xff]  ;;  %v1101_v26 = vld [vmem:[%s6594_s3 + $0x328] sm:$0xff]  ;;  %v3518_v31 = vpack.c.bf16 %v1295_v25, %v1293_v24 }
  0xfa   :  { %1589 = vmatmul.mubr.f32.vlgmr.msra.gmra.mrb[8].mxu1 %v4255_v27  ;;  %3485 = vmatpush1.bf16.msra.mxu0 %v3484_v44  ;;  %v3298_v27 = vpack.c.bf16 %v1075_v59, %v1073_v58  ;;  %v3300_v14 = vpack.c.bf16 %v1074_v6, %v1072_v50  ;;  %v1278_v44 = vld [vmem:[%s6594_s3 + $0x8b0] sm:$0xff]  ;;  %v1088_v58 = vld [vmem:[%s6594_s3 + $0x2c0] sm:$0xff]  ;;  %v1285_v50 = vld [vmem:[%s6594_s3 + $0x8e8] sm:$0xff] }
  0xfb   :  { %3293 = vmatpush1.bf16.msra.mxu1 %v3292_v45  ;;  %3487 = vmatprep.subr.bf16.mxu0 %v3486_v47  ;;  %v3310_v45 = vpack.c.bf16 %v1087_v35, %v1085_v34  ;;  %v1086_v47 = vld [vmem:[%s6594_s3 + $0x2b0] sm:$0xff]  ;;  %v3504_v56 = vpack.c.bf16 %v1278_v44, %v1276_v42  ;;  %v1280_v59 = vld [vmem:[%s6594_s3 + $0x8c0] sm:$0xff]  ;;  %v3510_v9 = vpack.c.bf16 %v1287_v4, %v1285_v50  ;;  %v1299_v42 = vld [vmem:[%s6594_s3 + $0x958] sm:$0xff] }
  0xfc   :  { %3295 = vmatprep.subr.bf16.mxu1 %v3294_v53  ;;  %1659 = vmatprep.mubr.f32.mxu1 %v4285_v41  ;;  %v1076_v41 = vld [vmem:[%s6594_s3 + $0x260] sm:$0xff]  ;;  %v1091_v53 = vld [vmem:[%s6594_s3 + $0x2d8] sm:$0xff]  ;;  %v3312_v13 = vpack.c.bf16 %v1086_v47, %v1084_v40  ;;  %v1297_v40 = vld [vmem:[%s6594_s3 + $0x948] sm:$0xff] }
  0xfd   :  { %1872 = vmatprep.mubr.f32.mxu0 %v4570_v63  ;;  %v3302_v63 = vpack.c.bf16 %v1079_v11, %v1077_v10  ;;  %v3304_v23 = vpack.c.bf16 %v1078_v18, %v1076_v41  ;;  %v1092_v10 = vld [vmem:[%s6594_s3 + $0x2e0] sm:$0xff]  ;;  %v1289_v41 = vld [vmem:[%s6594_s3 + $0x908] sm:$0xff]  ;;  %v3522_v51 = vpack.c.bf16 %v1299_v42, %v1297_v40 }
  0xfe   :  { %3489 = vmatpush1.bf16.msra.mxu0 %v3488_v61  ;;  %v1282_v61 = vld [vmem:[%s6594_s3 + $0x8d0] sm:$0xff]  ;;  %v1284_v11 = vld [vmem:[%s6594_s3 + $0x8e0] sm:$0xff]  ;;  %v3514_v20 = vpack.c.bf16 %v1291_v16, %v1289_v41  ;;  %v1105_v44 = vld [vmem:[%s6594_s3 + $0x348] sm:$0xff] }
  0xff   :  { %3297 = vmatpush1.bf16.msra.mxu1 %v3296_v62  ;;  %3491 = vmatprep.subr.bf16.mxu0 %v3490_v3  ;;  %v3314_v62 = vpack.c.bf16 %v1091_v53, %v1089_v52  ;;  %v1090_v3 = vld [vmem:[%s6594_s3 + $0x2d0] sm:$0xff]  ;;  %v3508_v6 = vpack.c.bf16 %v1282_v61, %v1280_v59  ;;  %v1100_v34 = vld [vmem:[%s6594_s3 + $0x320] sm:$0xff]  ;;  %v1303_v59 = vld [vmem:[%s6594_s3 + $0x978] sm:$0xff] }
 0x100   :  { %3299 = vmatprep.subr.bf16.mxu1 %v3298_v27  ;;  %v1095_v27 = vld [vmem:[%s6594_s3 + $0x2f8] sm:$0xff]  ;;  %v3316_v7 = vpack.c.bf16 %v1090_v3, %v1088_v58  ;;  %v1292_v35 = vld [vmem:[%s6594_s3 + $0x920] sm:$0xff]  ;;  %v1301_v58 = vld [vmem:[%s6594_s3 + $0x968] sm:$0xff] }
 0x101   :  { %v1104_v52 = vld [vmem:[%s6594_s3 + $0x340] sm:$0xff]  ;;  %v1109_v61 = vld [vmem:[%s6594_s3 + $0x368] sm:$0xff]  ;;  %v3526_v4 = vpack.c.bf16 %v1303_v59, %v1301_v58 }
 0x102   :  { %3493 = vmatpush1.bf16.msra.mxu0 %v3492_v12  ;;  %v1286_v12 = vld [vmem:[%s6594_s3 + $0x8f0] sm:$0xff]  ;;  %v1296_v53 = vld [vmem:[%s6594_s3 + $0x940] sm:$0xff]  ;;  %v1125_v59 = vld [vmem:[%s6594_s3 + $0x3e8] sm:$0xff] }
 0x103   :  { %3301 = vmatpush1.bf16.msra.mxu1 %v3300_v14  ;;  %3495 = vmatprep.subr.bf16.mxu0 %v3494_v15  ;;  %v3318_v14 = vpack.c.bf16 %v1095_v27, %v1093_v5  ;;  %v1094_v15 = vld [vmem:[%s6594_s3 + $0x2f0] sm:$0xff]  ;;  %v3512_v18 = vpack.c.bf16 %v1286_v12, %v1284_v11  ;;  %v1108_v5 = vld [vmem:[%s6594_s3 + $0x360] sm:$0xff]  ;;  %v1307_v11 = vld [vmem:[%s6594_s3 + $0x998] sm:$0xff] }
 0x104   :  { %3303 = vmatprep.subr.bf16.mxu1 %v3302_v63  ;;  %v1099_v63 = vld [vmem:[%s6594_s3 + $0x318] sm:$0xff]  ;;  %v3320_v19 = vpack.c.bf16 %v1094_v15, %v1092_v10  ;;  %v1300_v27 = vld [vmem:[%s6594_s3 + $0x960] sm:$0xff]  ;;  %v1305_v10 = vld [vmem:[%s6594_s3 + $0x988] sm:$0xff] }
 0x105   :  { %v1113_v12 = vld [vmem:[%s6594_s3 + $0x388] sm:$0xff]  ;;  %v3530_v16 = vpack.c.bf16 %v1307_v11, %v1305_v10 }
 0x106   :  { %3497 = vmatpush1.bf16.msra.mxu0 %v3496_v22  ;;  %v1290_v22 = vld [vmem:[%s6594_s3 + $0x910] sm:$0xff] }
 0x107   :  { %3305 = vmatpush1.bf16.msra.mxu1 %v3304_v23  ;;  %3499 = vmatprep.subr.bf16.mxu0 %v3498_v54  ;;  %v3322_v23 = vpack.c.bf16 %v1099_v63, %v1097_v17  ;;  %v1098_v54 = vld [vmem:[%s6594_s3 + $0x310] sm:$0xff]  ;;  %v3516_v29 = vpack.c.bf16 %v1290_v22, %v1288_v32  ;;  %v1112_v17 = vld [vmem:[%s6594_s3 + $0x380] sm:$0xff]  ;;  %v1311_v32 = vld [vmem:[%s6594_s3 + $0x9b8] sm:$0xff] }
 0x108   :  { %3307 = vmatprep.subr.bf16.mxu1 %v3306_v28  ;;  %v1103_v28 = vld [vmem:[%s6594_s3 + $0x338] sm:$0xff]  ;;  %v3324_v30 = vpack.c.bf16 %v1098_v54, %v1096_v21  ;;  %v1304_v63 = vld [vmem:[%s6594_s3 + $0x980] sm:$0xff]  ;;  %v1309_v21 = vld [vmem:[%s6594_s3 + $0x9a8] sm:$0xff] }
 0x109   :  { %v1117_v22 = vld [vmem:[%s6594_s3 + $0x3a8] sm:$0xff]  ;;  %v3534_v25 = vpack.c.bf16 %v1311_v32, %v1309_v21  ;;  %v1320_v21 = vld [vmem:[%s6594_s3 + $0xa00] sm:$0xff]  ;;  %v1322_v32 = vld [vmem:[%s6594_s3 + $0xa10] sm:$0xff] }
 0x10a   :  { %3501 = vmatpush1.bf16.msra.mxu0 %v3500_v36  ;;  %v1294_v36 = vld [vmem:[%s6594_s3 + $0x930] sm:$0xff] }
 0x10b   :  { %3309 = vmatpush1.bf16.msra.mxu1 %v3308_v38  ;;  %3503 = vmatprep.subr.bf16.mxu0 %v3502_v39  ;;  %v3326_v38 = vpack.c.bf16 %v1103_v28, %v1101_v26  ;;  %v1102_v39 = vld [vmem:[%s6594_s3 + $0x330] sm:$0xff]  ;;  %v3520_v47 = vpack.c.bf16 %v1294_v36, %v1292_v35  ;;  %v1116_v26 = vld [vmem:[%s6594_s3 + $0x3a0] sm:$0xff]  ;;  %v1315_v35 = vld [vmem:[%s6594_s3 + $0x9d8] sm:$0xff] }
 0x10c   :  { %3311 = vmatprep.subr.bf16.mxu1 %v3310_v45  ;;  %v1107_v45 = vld [vmem:[%s6594_s3 + $0x358] sm:$0xff]  ;;  %v3328_v48 = vpack.c.bf16 %v1102_v39, %v1100_v34  ;;  %v1308_v28 = vld [vmem:[%s6594_s3 + $0x9a0] sm:$0xff]  ;;  %v1313_v34 = vld [vmem:[%s6594_s3 + $0x9c8] sm:$0xff] }
 0x10d   :  { %v1121_v36 = vld [vmem:[%s6594_s3 + $0x3c8] sm:$0xff]  ;;  %v3538_v42 = vpack.c.bf16 %v1315_v35, %v1313_v34  ;;  %v1324_v34 = vld [vmem:[%s6594_s3 + $0xa20] sm:$0xff]  ;;  %v1326_v35 = vld [vmem:[%s6594_s3 + $0xa30] sm:$0xff] }
 0x10e   :  { %3505 = vmatpush1.bf16.msra.mxu0 %v3504_v56  ;;  %v1298_v56 = vld [vmem:[%s6594_s3 + $0x950] sm:$0xff] }
 0x10f   :  { %3313 = vmatpush1.bf16.msra.mxu1 %v3312_v13  ;;  %3507 = vmatprep.subr.bf16.mxu0 %v3506_v57  ;;  %v3330_v13 = vpack.c.bf16 %v1107_v45, %v1105_v44  ;;  %v1106_v57 = vld [vmem:[%s6594_s3 + $0x350] sm:$0xff]  ;;  %v3524_v3 = vpack.c.bf16 %v1298_v56, %v1296_v53  ;;  %v1120_v44 = vld [vmem:[%s6594_s3 + $0x3c0] sm:$0xff]  ;;  %v1317_v53 = vld [vmem:[%s6594_s3 + $0x9e8] sm:$0xff] }
 0x110   :  { %3315 = vmatprep.subr.bf16.mxu1 %v3314_v62  ;;  %v1111_v62 = vld [vmem:[%s6594_s3 + $0x378] sm:$0xff]  ;;  %v3332_v50 = vpack.c.bf16 %v1106_v57, %v1104_v52  ;;  %v1312_v45 = vld [vmem:[%s6594_s3 + $0x9c0] sm:$0xff]  ;;  %v1122_v52 = vld [vmem:[%s6594_s3 + $0x3d0] sm:$0xff] }
 0x111   :  { %v1319_v56 = vld [vmem:[%s6594_s3 + $0x9f8] sm:$0xff] }
 0x112   :  { %3509 = vmatpush1.bf16.msra.mxu0 %v3508_v6  ;;  %v1302_v6 = vld [vmem:[%s6594_s3 + $0x970] sm:$0xff] }
 0x113   :  { %3317 = vmatpush1.bf16.msra.mxu1 %v3316_v7  ;;  %3511 = vmatprep.subr.bf16.mxu0 %v3510_v9  ;;  %v3334_v7 = vpack.c.bf16 %v1111_v62, %v1109_v61  ;;  %v1110_v9 = vld [vmem:[%s6594_s3 + $0x370] sm:$0xff]  ;;  %v3528_v15 = vpack.c.bf16 %v1302_v6, %v1300_v27  ;;  %v1127_v61 = vld [vmem:[%s6594_s3 + $0x3f8] sm:$0xff]  ;;  %v3542_v27 = vpack.c.bf16 %v1319_v56, %v1317_v53  ;;  %v1124_v6 = vld [vmem:[%s6594_s3 + $0x3e0] sm:$0xff] }
 0x114   :  { %3319 = vmatprep.subr.bf16.mxu1 %v3318_v14  ;;  %v1115_v14 = vld [vmem:[%s6594_s3 + $0x398] sm:$0xff]  ;;  %v3336_v41 = vpack.c.bf16 %v1110_v9, %v1108_v5  ;;  %v3348_v5 = vpack.c.bf16 %v1122_v52, %v1120_v44  ;;  %v1318_v9 = vld [vmem:[%s6594_s3 + $0x9f0] sm:$0xff]  ;;  %v3350_v11 = vpack.c.bf16 %v1127_v61, %v1125_v59  ;;  %v1333_v56 = vld [vmem:[%s6594_s3 + $0xa68] sm:$0xff] }
 0x115   :  { %v1139_v44 = vld [vmem:[%s6594_s3 + $0x458] sm:$0xff]  ;;  %v1330_v52 = vld [vmem:[%s6594_s3 + $0xa50] sm:$0xff] }
 0x116   :  { %3513 = vmatpush1.bf16.msra.mxu0 %v3512_v18  ;;  %v1306_v18 = vld [vmem:[%s6594_s3 + $0x990] sm:$0xff] }
 0x117   :  { %3321 = vmatpush1.bf16.msra.mxu1 %v3320_v19  ;;  %3515 = vmatprep.subr.bf16.mxu0 %v3514_v20  ;;  %v3338_v19 = vpack.c.bf16 %v1115_v14, %v1113_v12  ;;  %v1114_v20 = vld [vmem:[%s6594_s3 + $0x390] sm:$0xff]  ;;  %v3532_v54 = vpack.c.bf16 %v1306_v18, %v1304_v63  ;;  %v1321_v14 = vld [vmem:[%s6594_s3 + $0xa08] sm:$0xff] }
 0x118   :  { %3323 = vmatprep.subr.bf16.mxu1 %v3322_v23  ;;  %v1119_v23 = vld [vmem:[%s6594_s3 + $0x3b8] sm:$0xff]  ;;  %v3340_v24 = vpack.c.bf16 %v1114_v20, %v1112_v17  ;;  %v1126_v12 = vld [vmem:[%s6594_s3 + $0x3f0] sm:$0xff]  ;;  %v1128_v20 = vld [vmem:[%s6594_s3 + $0x400] sm:$0xff] }
 0x119   :  { %v3352_v18 = vpack.c.bf16 %v1126_v12, %v1124_v6  ;;  %v1138_v53 = vld [vmem:[%s6594_s3 + $0x450] sm:$0xff]  ;;  %v1145_v6 = vld [vmem:[%s6594_s3 + $0x488] sm:$0xff]  ;;  %v1144_v12 = vld [vmem:[%s6594_s3 + $0x480] sm:$0xff] }
 0x11a   :  { %3517 = vmatpush1.bf16.msra.mxu0 %v3516_v29  ;;  %v1310_v29 = vld [vmem:[%s6594_s3 + $0x9b0] sm:$0xff] }
 0x11b   :  { %3325 = vmatpush1.bf16.msra.mxu1 %v3324_v30  ;;  %3519 = vmatprep.subr.bf16.mxu0 %v3518_v31  ;;  %v3342_v30 = vpack.c.bf16 %v1119_v23, %v1117_v22  ;;  %v1118_v31 = vld [vmem:[%s6594_s3 + $0x3b0] sm:$0xff]  ;;  %v3536_v39 = vpack.c.bf16 %v1310_v29, %v1308_v28  ;;  %v3548_v28 = vpack.c.bf16 %v1322_v32, %v1320_v21 }
 0x11c   :  { %3327 = vmatprep.subr.bf16.mxu1 %v3326_v38  ;;  %v1123_v38 = vld [vmem:[%s6594_s3 + $0x3d8] sm:$0xff]  ;;  %v3344_v40 = vpack.c.bf16 %v1118_v31, %v1116_v26  ;;  %v1130_v23 = vld [vmem:[%s6594_s3 + $0x410] sm:$0xff]  ;;  %v1132_v31 = vld [vmem:[%s6594_s3 + $0x420] sm:$0xff] }
 0x11d   :  { %v1135_v26 = vld [vmem:[%s6594_s3 + $0x438] sm:$0xff]  ;;  %v3356_v29 = vpack.c.bf16 %v1130_v23, %v1128_v20  ;;  %v1148_v23 = vld [vmem:[%s6594_s3 + $0x4a0] sm:$0xff] }
 0x11e   :  { %3521 = vmatpush1.bf16.msra.mxu0 %v3520_v47  ;;  %v1314_v47 = vld [vmem:[%s6594_s3 + $0x9d0] sm:$0xff]  ;;  %v1151_v20 = vld [vmem:[%s6594_s3 + $0x4b8] sm:$0xff] }
 0x11f   :  { %3329 = vmatpush1.bf16.msra.mxu1 %v3328_v48  ;;  %3523 = vmatprep.subr.bf16.mxu0 %v3522_v51  ;;  %v3346_v51 = vpack.c.bf16 %v1123_v38, %v1121_v36  ;;  %v1134_v38 = vld [vmem:[%s6594_s3 + $0x430] sm:$0xff] }
 0x120   :  { %3331 = vmatprep.subr.bf16.mxu1 %v3330_v13  ;;  %v2494_v13 = vld [vmem:[%s6593_s2] ss:$0 sm:$0xff] }
 0x122   :  { %3525 = vmatpush1.bf16.msra.mxu0 %v3524_v3 }
 0x123   :  { %3333 = vmatpush1.bf16.msra.mxu1 %v3332_v50  ;;  %3527 = vmatprep.subr.bf16.mxu0 %v3526_v4  ;;  %v3540_v50 = vpack.c.bf16 %v1314_v47, %v1312_v45  ;;  %v3552_v45 = vpack.c.bf16 %v1326_v35, %v1324_v34  ;;  %v3360_v47 = vpack.c.bf16 %v1134_v38, %v1132_v31  ;;  %v1155_v31 = vld [vmem:[%s6594_s3 + $0x4d8] sm:$0xff]  ;;  %v1152_v38 = vld [vmem:[%s6594_s3 + $0x4c0] sm:$0xff] }
 0x124   :  { %3335 = vmatprep.subr.bf16.mxu1 %v3334_v7  ;;  %v1316_v7 = vld [vmem:[%s6594_s3 + $0x9e0] sm:$0xff] }
 0x125   :  { %v3544_v63 = vpack.c.bf16 %v1318_v9, %v1316_v7  ;;  %v1147_v7 = vld [vmem:[%s6594_s3 + $0x498] sm:$0xff] }
 0x126   :  { %3529 = vmatpush1.bf16.msra.mxu0 %v3528_v15  ;;  %v1323_v15 = vld [vmem:[%s6594_s3 + $0xa18] sm:$0xff] }
 0x127   :  { %3337 = vmatpush1.bf16.msra.mxu1 %v3336_v41  ;;  %3531 = vmatprep.subr.bf16.mxu0 %v3530_v16  ;;  %v1129_v41 = vld [vmem:[%s6594_s3 + $0x408] sm:$0xff]  ;;  %v1131_v16 = vld [vmem:[%s6594_s3 + $0x418] sm:$0xff] }
 0x128   :  { %3339 = vmatprep.subr.bf16.mxu1 %v3338_v19  ;;  %v3546_v19 = vpack.c.bf16 %v1323_v15, %v1321_v14  ;;  %v3354_v22 = vpack.c.bf16 %v1131_v16, %v1129_v41  ;;  %v1336_v14 = vld [vmem:[%s6594_s3 + $0xa80] sm:$0xff]  ;;  %v1338_v15 = vld [vmem:[%s6594_s3 + $0xa90] sm:$0xff]  ;;  %v3370_v41 = vpack.c.bf16 %v1147_v7, %v1145_v6 }
 0x129   :  { %v1146_v16 = vld [vmem:[%s6594_s3 + $0x490] sm:$0xff]  ;;  %v3564_v21 = vpack.c.bf16 %v1338_v15, %v1336_v14 }
 0x12a   :  { %3533 = vmatpush1.bf16.msra.mxu0 %v3532_v54  ;;  %v1325_v54 = vld [vmem:[%s6594_s3 + $0xa28] sm:$0xff]  ;;  %v3372_v32 = vpack.c.bf16 %v1146_v16, %v1144_v12  ;;  %v1352_v12 = vld [vmem:[%s6594_s3 + $0xb00] sm:$0xff]  ;;  %v1354_v14 = vld [vmem:[%s6594_s3 + $0xb10] sm:$0xff] }
 0x12b   :  { %3341 = vmatpush1.bf16.msra.mxu1 %v3340_v24  ;;  %3535 = vmatprep.subr.bf16.mxu0 %v3534_v25  ;;  %v1327_v24 = vld [vmem:[%s6594_s3 + $0xa38] sm:$0xff]  ;;  %v1133_v25 = vld [vmem:[%s6594_s3 + $0x428] sm:$0xff] }
 0x12c   :  { %v2531_v48 = vpop.f32.mrb[0].mxu0  ;;  %3343 = vmatprep.subr.bf16.mxu1 %v3342_v30  ;;  %v3550_v30 = vpack.c.bf16 %v1327_v24, %v1325_v54  ;;  %v3358_v36 = vpack.c.bf16 %v1135_v26, %v1133_v25  ;;  %v1340_v54 = vld [vmem:[%s6594_s3 + $0xaa0] sm:$0xff]  ;;  %v1342_v24 = vld [vmem:[%s6594_s3 + $0xab0] sm:$0xff]  ;;  %v1357_v16 = vld [vmem:[%s6594_s3 + $0xb28] sm:$0xff] }
 0x12d   :  { %v2532_v57 = vpop.f32.mrb[1].mxu0  ;;  %v2566_v58 = vpop.f32.mrb[0].mxu1  ;;  %v1150_v26 = vld [vmem:[%s6594_s3 + $0x4b0] sm:$0xff]  ;;  %v3568_v34 = vpack.c.bf16 %v1342_v24, %v1340_v54 }
 0x12e   :  { %v2533_v62 = vadd.f32 %v2532_v57, %v2531_v48  ;;  %3537 = vmatpush1.bf16.msra.mxu0 %v3536_v39  ;;  %v2567_v3 = vpop.f32.mrb[1].mxu1  ;;  %v1329_v39 = vld [vmem:[%s6594_s3 + $0xa48] sm:$0xff]  ;;  %v3376_v35 = vpack.c.bf16 %v1150_v26, %v1148_v23  ;;  %v1356_v23 = vld [vmem:[%s6594_s3 + $0xb20] sm:$0xff]  ;;  %v1358_v54 = vld [vmem:[%s6594_s3 + $0xb30] sm:$0xff] }
 0x12f   :  { %3345 = vmatpush1.bf16.msra.mxu1 %v3344_v40  ;;  %v2568_v4 = vadd.f32 %v2567_v3, %v2566_v58  ;;  %3539 = vmatprep.subr.bf16.mxu0 %v3538_v42  ;;  %v1331_v40 = vld [vmem:[%s6594_s3 + $0xa58] sm:$0xff]  ;;  %v1137_v42 = vld [vmem:[%s6594_s3 + $0x448] sm:$0xff]  ;;  %v1332_v3 = vld [vmem:[%s6594_s3 + $0xa60] sm:$0xff] }
 0x130   :  { %v507_v10 = vadd.f32 %v2533_v62, %v2494_v13  ;;  %3347 = vmatprep.subr.bf16.mxu1 %v3346_v51  ;;  %v3554_v48 = vpack.c.bf16 %v1331_v40, %v1329_v39  ;;  %v1328_v51 = vld [vmem:[%s6594_s3 + $0xa40] sm:$0xff]  ;;  %v1335_v13 = vld [vmem:[%s6594_s3 + $0xa78] sm:$0xff]  ;;  %v1141_v57 = vld [vmem:[%s6594_s3 + $0x468] sm:$0xff] }
 0x131   :  { %v1143_v58 = vld [vmem:[%s6594_s3 + $0x478] sm:$0xff]  ;;  %v3556_v59 = vpack.c.bf16 %v1330_v52, %v1328_v51  ;;  %v3558_v62 = vpack.c.bf16 %v1335_v13, %v1333_v56  ;;  %v1344_v39 = vld [vmem:[%s6594_s3 + $0xac0] sm:$0xff]  ;;  %v1346_v40 = vld [vmem:[%s6594_s3 + $0xad0] sm:$0xff] }
 0x132   :  { %v5718_v17 = vadd.f32 %v2568_v4, %v507_v10  ;;  %3541 = vmatpush1.bf16.msra.mxu0 %v3540_v50  ;;  %v1334_v50 = vld [vmem:[%s6594_s3 + $0xa70] sm:$0xff]  ;;  %v1157_v52 = vld [vmem:[%s6594_s3 + $0x4e8] sm:$0xff]  ;;  %v3572_v13 = vpack.c.bf16 %v1346_v40, %v1344_v39 }
 0x133   :  { %3349 = vmatpush1.bf16.msra.mxu1 %v3348_v5  ;;  %3543 = vmatprep.subr.bf16.mxu0 %v3542_v27  ;;  %v1142_v4 = vld [vmem:[%s6594_s3 + $0x470] sm:$0xff]  ;;  %v1337_v5 = vld [vmem:[%s6594_s3 + $0xa88] sm:$0xff]  ;;  %v1339_v27 = vld [vmem:[%s6594_s3 + $0xa98] sm:$0xff]  ;;  %v3560_v9 = vpack.c.bf16 %v1334_v50, %v1332_v3 }
 0x134   :  { %3351 = vmatprep.subr.bf16.mxu1 %v3350_v11  ;;  %v3562_v11 = vpack.c.bf16 %v1339_v27, %v1337_v5  ;;  %v1355_v5 = vld [vmem:[%s6594_s3 + $0xb18] sm:$0xff]  ;;  %v1161_v27 = vld [vmem:[%s6594_s3 + $0x508] sm:$0xff]  ;;  %v1362_v39 = vld [vmem:[%s6594_s3 + $0xb50] sm:$0xff] }
 0x135   :  { %v1361_v26 = vld [vmem:[%s6594_s3 + $0xb48] sm:$0xff] }
 0x136   :  { %3545 = vmatpush1.bf16.msra.mxu0 %v3544_v63  ;;  %v1341_v63 = vld [vmem:[%s6594_s3 + $0xaa8] sm:$0xff] }
 0x137   :  { %3353 = vmatpush1.bf16.msra.mxu1 %v3352_v18  ;;  %3547 = vmatprep.subr.bf16.mxu0 %v3546_v19  ;;  %v1343_v18 = vld [vmem:[%s6594_s3 + $0xab8] sm:$0xff]  ;;  %v1149_v19 = vld [vmem:[%s6594_s3 + $0x4a8] sm:$0xff] }
 0x138   :  { %3355 = vmatprep.subr.bf16.mxu1 %v3354_v22  ;;  %v3566_v22 = vpack.c.bf16 %v1343_v18, %v1341_v63  ;;  %v3374_v25 = vpack.c.bf16 %v1151_v20, %v1149_v19  ;;  %v1359_v63 = vld [vmem:[%s6594_s3 + $0xb38] sm:$0xff]  ;;  %v1165_v18 = vld [vmem:[%s6594_s3 + $0x528] sm:$0xff]  ;;  %v3580_v20 = vpack.c.bf16 %v1354_v14, %v1352_v12 }
 0x139   :  { %1873 = vmatmul.mubr.f32.vlgmr.msra.gmra.mrb[8].mxu0 %v4550_v55  ;;  %v1136_v55 = vld [vmem:[%s6594_s3 + $0x440] sm:$0xff]  ;;  %v1167_v19 = vld [vmem:[%s6594_s3 + $0x538] sm:$0xff] }
 0x13a   :  { %1660 = vmatmul.mubr.f32.vlgmr.msra.gmra.mrb[8].mxu1 %v4268_v33  ;;  %3549 = vmatpush1.bf16.msra.mxu0 %v3548_v28  ;;  %v3362_v33 = vpack.c.bf16 %v1139_v44, %v1137_v42  ;;  %v3364_v61 = vpack.c.bf16 %v1138_v53, %v1136_v55  ;;  %v1345_v28 = vld [vmem:[%s6594_s3 + $0xac8] sm:$0xff]  ;;  %v3390_v24 = vpack.c.bf16 %v1167_v19, %v1165_v18  ;;  %v1182_v19 = vld [vmem:[%s6594_s3 + $0x5b0] sm:$0xff] }
 0x13b   :  { %3357 = vmatpush1.bf16.msra.mxu1 %v3356_v29  ;;  %3551 = vmatprep.subr.bf16.mxu0 %v3550_v30  ;;  %v1347_v29 = vld [vmem:[%s6594_s3 + $0xad8] sm:$0xff]  ;;  %v1153_v30 = vld [vmem:[%s6594_s3 + $0x4c8] sm:$0xff] }
 0x13c   :  { %3359 = vmatprep.subr.bf16.mxu1 %v3358_v36  ;;  %1730 = vmatprep.mubr.f32.mxu1 %v4424_v49  ;;  %v1140_v49 = vld [vmem:[%s6594_s3 + $0x460] sm:$0xff]  ;;  %v3570_v36 = vpack.c.bf16 %v1347_v29, %v1345_v28  ;;  %v3378_v44 = vpack.c.bf16 %v1155_v31, %v1153_v30  ;;  %v1363_v28 = vld [vmem:[%s6594_s3 + $0xb58] sm:$0xff]  ;;  %v1169_v29 = vld [vmem:[%s6594_s3 + $0x548] sm:$0xff]  ;;  %v3584_v31 = vpack.c.bf16 %v1358_v54, %v1356_v23 }
 0x13d   :  { %1943 = vmatprep.mubr.f32.mxu0 %v4587_v8  ;;  %v3366_v8 = vpack.c.bf16 %v1143_v58, %v1141_v57  ;;  %v3368_v10 = vpack.c.bf16 %v1142_v4, %v1140_v49  ;;  %v1350_v49 = vld [vmem:[%s6594_s3 + $0xaf0] sm:$0xff]  ;;  %v1353_v4 = vld [vmem:[%s6594_s3 + $0xb08] sm:$0xff]  ;;  %v1171_v30 = vld [vmem:[%s6594_s3 + $0x558] sm:$0xff] }
 0x13e   :  { %3553 = vmatpush1.bf16.msra.mxu0 %v3552_v45  ;;  %v1154_v45 = vld [vmem:[%s6594_s3 + $0x4d0] sm:$0xff]  ;;  %v3394_v40 = vpack.c.bf16 %v1171_v30, %v1169_v29 }
 0x13f   :  { %3361 = vmatpush1.bf16.msra.mxu1 %v3360_v47  ;;  %3555 = vmatprep.subr.bf16.mxu0 %v3554_v48  ;;  %v1349_v47 = vld [vmem:[%s6594_s3 + $0xae8] sm:$0xff]  ;;  %v1351_v48 = vld [vmem:[%s6594_s3 + $0xaf8] sm:$0xff]  ;;  %v3380_v58 = vpack.c.bf16 %v1154_v45, %v1152_v38  ;;  %v1360_v38 = vld [vmem:[%s6594_s3 + $0xb40] sm:$0xff] }
 0x140   :  { %3363 = vmatprep.subr.bf16.mxu1 %v3362_v33  ;;  %v1159_v33 = vld [vmem:[%s6594_s3 + $0x4f8] sm:$0xff] }
 0x141   :  { %v3382_v50 = vpack.c.bf16 %v1159_v33, %v1157_v52  ;;  %v1367_v45 = vld [vmem:[%s6594_s3 + $0xb78] sm:$0xff]  ;;  %v1172_v33 = vld [vmem:[%s6594_s3 + $0x560] sm:$0xff] }
 0x142   :  { %3557 = vmatpush1.bf16.msra.mxu0 %v3556_v59  ;;  %v3574_v59 = vpack.c.bf16 %v1351_v48, %v1349_v47  ;;  %v1173_v47 = vld [vmem:[%s6594_s3 + $0x568] sm:$0xff]  ;;  %v1175_v48 = vld [vmem:[%s6594_s3 + $0x578] sm:$0xff] }
 0x143   :  { %3365 = vmatpush1.bf16.msra.mxu1 %v3364_v61  ;;  %3559 = vmatprep.subr.bf16.mxu0 %v3558_v62  ;;  %v1156_v61 = vld [vmem:[%s6594_s3 + $0x4e0] sm:$0xff] }
 0x144   :  { %3367 = vmatprep.subr.bf16.mxu1 %v3366_v8  ;;  %v1348_v62 = vld [vmem:[%s6594_s3 + $0xae0] sm:$0xff]  ;;  %v1158_v8 = vld [vmem:[%s6594_s3 + $0x4f0] sm:$0xff] }
 0x145   :  { %v3576_v7 = vpack.c.bf16 %v1350_v49, %v1348_v62  ;;  %v1179_v62 = vld [vmem:[%s6594_s3 + $0x598] sm:$0xff] }
 0x146   :  { %3561 = vmatpush1.bf16.msra.mxu0 %v3560_v9  ;;  %v3384_v9 = vpack.c.bf16 %v1158_v8, %v1156_v61  ;;  %v1177_v61 = vld [vmem:[%s6594_s3 + $0x588] sm:$0xff]  ;;  %v1176_v8 = vld [vmem:[%s6594_s3 + $0x580] sm:$0xff] }
 0x147   :  { %3369 = vmatpush1.bf16.msra.mxu1 %v3368_v10  ;;  %3563 = vmatprep.subr.bf16.mxu0 %v3562_v11  ;;  %v3578_v10 = vpack.c.bf16 %v1355_v5, %v1353_v4  ;;  %v1160_v11 = vld [vmem:[%s6594_s3 + $0x500] sm:$0xff]  ;;  %v1370_v5 = vld [vmem:[%s6594_s3 + $0xb90] sm:$0xff] }
 0x148   :  { %3371 = vmatprep.subr.bf16.mxu1 %v3370_v41  ;;  %v1162_v41 = vld [vmem:[%s6594_s3 + $0x510] sm:$0xff]  ;;  %v1368_v4 = vld [vmem:[%s6594_s3 + $0xb80] sm:$0xff] }
 0x149   :  { %v3596_v12 = vpack.c.bf16 %v1370_v5, %v1368_v4 }
 0x14a   :  { %3565 = vmatpush1.bf16.msra.mxu0 %v3564_v21  ;;  %v3388_v21 = vpack.c.bf16 %v1162_v41, %v1160_v11  ;;  %v1183_v11 = vld [vmem:[%s6594_s3 + $0x5b8] sm:$0xff]  ;;  %v1180_v41 = vld [vmem:[%s6594_s3 + $0x5a0] sm:$0xff] }
 0x14b   :  { %3373 = vmatpush1.bf16.msra.mxu1 %v3372_v32  ;;  %3567 = vmatprep.subr.bf16.mxu0 %v3566_v22  ;;  %v3582_v32 = vpack.c.bf16 %v1359_v63, %v1357_v16  ;;  %v1164_v22 = vld [vmem:[%s6594_s3 + $0x520] sm:$0xff]  ;;  %v1374_v63 = vld [vmem:[%s6594_s3 + $0xbb0] sm:$0xff]  ;;  %v3408_v54 = vpack.c.bf16 %v1182_v19, %v1180_v41 }
 0x14c   :  { %v2601_v42 = vpop.f32.mrb[2].mxu0  ;;  %3375 = vmatprep.subr.bf16.mxu1 %v3374_v25  ;;  %v1166_v25 = vld [vmem:[%s6594_s3 + $0x530] sm:$0xff]  ;;  %v1372_v16 = vld [vmem:[%s6594_s3 + $0xba0] sm:$0xff] }
 0x14d   :  { %v2602_v55 = vpop.f32.mrb[3].mxu0  ;;  %v2636_v51 = vpop.f32.mrb[2].mxu1  ;;  %v3600_v23 = vpack.c.bf16 %v1374_v63, %v1372_v16  ;;  %v1396_v16 = vld [vmem:[%s6594_s3 + $0xc60] sm:$0xff]  ;;  %v1401_v63 = vld [vmem:[%s6594_s3 + $0xc88] sm:$0xff] }
 0x14e   :  { %v2603_v53 = vadd.f32 %v2602_v55, %v2601_v42  ;;  %3569 = vmatpush1.bf16.msra.mxu0 %v3568_v34  ;;  %v2637_v56 = vpop.f32.mrb[3].mxu1  ;;  %v3392_v34 = vpack.c.bf16 %v1166_v25, %v1164_v22  ;;  %v1170_v42 = vld [vmem:[%s6594_s3 + $0x550] sm:$0xff]  ;;  %v3588_v55 = vpack.c.bf16 %v1362_v39, %v1360_v38  ;;  %v1187_v22 = vld [vmem:[%s6594_s3 + $0x5d8] sm:$0xff]  ;;  %v1184_v25 = vld [vmem:[%s6594_s3 + $0x5c0] sm:$0xff] }
 0x14f   :  { %3377 = vmatpush1.bf16.msra.mxu1 %v3376_v35  ;;  %v2638_v57 = vadd.f32 %v2637_v56, %v2636_v51  ;;  %3571 = vmatprep.subr.bf16.mxu0 %v3570_v36  ;;  %v3586_v35 = vpack.c.bf16 %v1363_v28, %v1361_v26  ;;  %v1168_v36 = vld [vmem:[%s6594_s3 + $0x540] sm:$0xff]  ;;  %v1366_v56 = vld [vmem:[%s6594_s3 + $0xb70] sm:$0xff]  ;;  %v1189_v39 = vld [vmem:[%s6594_s3 + $0x5e8] sm:$0xff] }
 0x150   :  { %v647_v3 = vadd.f32 %v2603_v53, %v5718_v17  ;;  %3379 = vmatprep.subr.bf16.mxu1 %v3378_v44  ;;  %v1163_v17 = vld [vmem:[%s6594_s3 + $0x518] sm:$0xff]  ;;  %v1365_v44 = vld [vmem:[%s6594_s3 + $0xb68] sm:$0xff]  ;;  %v3396_v51 = vpack.c.bf16 %v1170_v42, %v1168_v36  ;;  %v1364_v53 = vld [vmem:[%s6594_s3 + $0xb60] sm:$0xff] }
 0x151   :  { %v3386_v15 = vpack.c.bf16 %v1163_v17, %v1161_v27  ;;  %v3590_v52 = vpack.c.bf16 %v1367_v45, %v1365_v44  ;;  %v3592_v49 = vpack.c.bf16 %v1366_v56, %v1364_v53  ;;  %v3402_v27 = vpack.c.bf16 %v1179_v62, %v1177_v61  ;;  %v1178_v17 = vld [vmem:[%s6594_s3 + $0x590] sm:$0xff]  ;;  %v1376_v26 = vld [vmem:[%s6594_s3 + $0xbc0] sm:$0xff] }
 0x152   :  { %v5917_v6 = vadd.f32 %v2638_v57, %v647_v3  ;;  %3573 = vmatpush1.bf16.msra.mxu0 %v3572_v13  ;;  %v3398_v13 = vpack.c.bf16 %v1175_v48, %v1173_v47  ;;  %v1174_v57 = vld [vmem:[%s6594_s3 + $0x570] sm:$0xff]  ;;  %v3404_v14 = vpack.c.bf16 %v1178_v17, %v1176_v8  ;;  %v1391_v8 = vld [vmem:[%s6594_s3 + $0xc38] sm:$0xff] }
 0x153   :  { %3381 = vmatpush1.bf16.msra.mxu1 %v3380_v58  ;;  %3575 = vmatprep.subr.bf16.mxu0 %v3574_v59  ;;  %v1369_v58 = vld [vmem:[%s6594_s3 + $0xb88] sm:$0xff]  ;;  %v1371_v59 = vld [vmem:[%s6594_s3 + $0xb98] sm:$0xff]  ;;  %v3400_v3 = vpack.c.bf16 %v1174_v57, %v1172_v33  ;;  %v1378_v28 = vld [vmem:[%s6594_s3 + $0xbd0] sm:$0xff] }
 0x154   :  { %3383 = vmatprep.subr.bf16.mxu1 %v3382_v50  ;;  %v3594_v50 = vpack.c.bf16 %v1371_v59, %v1369_v58  ;;  %v3604_v45 = vpack.c.bf16 %v1378_v28, %v1376_v26  ;;  %v1382_v33 = vld [vmem:[%s6594_s3 + $0xbf0] sm:$0xff]  ;;  %v1385_v57 = vld [vmem:[%s6594_s3 + $0xc08] sm:$0xff]  ;;  %v1387_v58 = vld [vmem:[%s6594_s3 + $0xc18] sm:$0xff] }
 0x155   :  { %v3610_v62 = vpack.c.bf16 %v1387_v58, %v1385_v57  ;;  %v1390_v17 = vld [vmem:[%s6594_s3 + $0xc30] sm:$0xff]  ;;  %v1409_v28 = vld [vmem:[%s6594_s3 + $0xcc8] sm:$0xff] }
 0x156   :  { %3577 = vmatpush1.bf16.msra.mxu0 %v3576_v7  ;;  %v1373_v7 = vld [vmem:[%s6594_s3 + $0xba8] sm:$0xff]  ;;  %v1406_v26 = vld [vmem:[%s6594_s3 + $0xcb0] sm:$0xff] }
 0x157   :  { %3385 = vmatpush1.bf16.msra.mxu1 %v3384_v9  ;;  %3579 = vmatprep.subr.bf16.mxu0 %v3578_v10  ;;  %v1375_v9 = vld [vmem:[%s6594_s3 + $0xbb8] sm:$0xff]  ;;  %v1181_v10 = vld [vmem:[%s6594_s3 + $0x5a8] sm:$0xff] }
 0x158   :  { %3387 = vmatprep.subr.bf16.mxu1 %v3386_v15  ;;  %v3598_v15 = vpack.c.bf16 %v1375_v9, %v1373_v7  ;;  %v3406_v18 = vpack.c.bf16 %v1183_v11, %v1181_v10  ;;  %v1393_v7 = vld [vmem:[%s6594_s3 + $0xc48] sm:$0xff]  ;;  %v1395_v9 = vld [vmem:[%s6594_s3 + $0xc58] sm:$0xff] }
 0x159   :  { %v3618_v11 = vpack.c.bf16 %v1395_v9, %v1393_v7  ;;  %v1424_v7 = vld [vmem:[%s6594_s3 + $0xd40] sm:$0xff]  ;;  %v1426_v9 = vld [vmem:[%s6594_s3 + $0xd50] sm:$0xff] }
 0x15a   :  { %3581 = vmatpush1.bf16.msra.mxu0 %v3580_v20  ;;  %v1377_v20 = vld [vmem:[%s6594_s3 + $0xbc8] sm:$0xff] }
 0x15b   :  { %3389 = vmatpush1.bf16.msra.mxu1 %v3388_v21  ;;  %3583 = vmatprep.subr.bf16.mxu0 %v3582_v32  ;;  %v1379_v21 = vld [vmem:[%s6594_s3 + $0xbd8] sm:$0xff]  ;;  %v1185_v32 = vld [vmem:[%s6594_s3 + $0x5c8] sm:$0xff] }
 0x15c   :  { %3391 = vmatprep.subr.bf16.mxu1 %v3390_v24  ;;  %v3602_v24 = vpack.c.bf16 %v1379_v21, %v1377_v20  ;;  %v3410_v30 = vpack.c.bf16 %v1187_v22, %v1185_v32  ;;  %v1400_v21 = vld [vmem:[%s6594_s3 + $0xc80] sm:$0xff]  ;;  %v1402_v32 = vld [vmem:[%s6594_s3 + $0xc90] sm:$0xff]  ;;  %v1405_v22 = vld [vmem:[%s6594_s3 + $0xca8] sm:$0xff] }
 0x15e   :  { %3585 = vmatpush1.bf16.msra.mxu0 %v3584_v31  ;;  %v1186_v31 = vld [vmem:[%s6594_s3 + $0x5d0] sm:$0xff] }
 0x15f   :  { %3393 = vmatpush1.bf16.msra.mxu1 %v3392_v34  ;;  %3587 = vmatprep.subr.bf16.mxu0 %v3586_v35  ;;  %v1381_v34 = vld [vmem:[%s6594_s3 + $0xbe8] sm:$0xff]  ;;  %v1383_v35 = vld [vmem:[%s6594_s3 + $0xbf8] sm:$0xff]  ;;  %v3412_v48 = vpack.c.bf16 %v1186_v31, %v1184_v25  ;;  %v1404_v25 = vld [vmem:[%s6594_s3 + $0xca0] sm:$0xff] }
 0x160   :  { %3395 = vmatprep.subr.bf16.mxu1 %v3394_v40  ;;  %v1191_v40 = vld [vmem:[%s6594_s3 + $0x5f8] sm:$0xff] }
 0x161   :  { %v3414_v56 = vpack.c.bf16 %v1191_v40, %v1189_v39  ;;  %v1415_v39 = vld [vmem:[%s6594_s3 + $0xcf8] sm:$0xff] }
 0x162   :  { %3589 = vmatpush1.bf16.msra.mxu0 %v3588_v55  ;;  %v3606_v55 = vpack.c.bf16 %v1383_v35, %v1381_v34  ;;  %v1408_v34 = vld [vmem:[%s6594_s3 + $0xcc0] sm:$0xff]  ;;  %v1410_v35 = vld [vmem:[%s6594_s3 + $0xcd0] sm:$0xff] }
 0x163   :  { %3397 = vmatpush1.bf16.msra.mxu1 %v3396_v51  ;;  %3591 = vmatprep.subr.bf16.mxu0 %v3590_v52  ;;  %v1188_v51 = vld [vmem:[%s6594_s3 + $0x5e0] sm:$0xff] }
 0x164   :  { %3399 = vmatprep.subr.bf16.mxu1 %v3398_v13  ;;  %v1380_v52 = vld [vmem:[%s6594_s3 + $0xbe0] sm:$0xff]  ;;  %v1190_v13 = vld [vmem:[%s6594_s3 + $0x5f0] sm:$0xff] }
 0x165   :  { %v3608_v61 = vpack.c.bf16 %v1382_v33, %v1380_v52  ;;  %v1414_v52 = vld [vmem:[%s6594_s3 + $0xcf0] sm:$0xff] }
 0x166   :  { %3593 = vmatpush1.bf16.msra.mxu0 %v3592_v49  ;;  %v1384_v49 = vld [vmem:[%s6594_s3 + $0xc00] sm:$0xff] }
 0x167   :  { %3401 = vmatpush1.bf16.msra.mxu1 %v3400_v3  ;;  %3595 = vmatprep.subr.bf16.mxu0 %v3594_v50  ;;  %v1386_v3 = vld [vmem:[%s6594_s3 + $0xc10] sm:$0xff]  ;;  %v1389_v50 = vld [vmem:[%s6594_s3 + $0xc28] sm:$0xff] }
 0x168   :  { %3403 = vmatprep.subr.bf16.mxu1 %v3402_v27  ;;  %v3612_v4 = vpack.c.bf16 %v1386_v3, %v1384_v49  ;;  %v3614_v5 = vpack.c.bf16 %v1391_v8, %v1389_v50  ;;  %v1388_v27 = vld [vmem:[%s6594_s3 + $0xc20] sm:$0xff]  ;;  %v1422_v8 = vld [vmem:[%s6594_s3 + $0xd30] sm:$0xff] }
 0x169   :  { %v3616_v10 = vpack.c.bf16 %v1390_v17, %v1388_v27  ;;  %v1420_v50 = vld [vmem:[%s6594_s3 + $0xd20] sm:$0xff] }
 0x16a   :  { %3597 = vmatpush1.bf16.msra.mxu0 %v3596_v12  ;;  %v1392_v12 = vld [vmem:[%s6594_s3 + $0xc40] sm:$0xff]  ;;  %v3648_v27 = vpack.c.bf16 %v1422_v8, %v1420_v50  ;;  %v1462_v50 = vld [vmem:[%s6594_s3 + $0xe70] sm:$0xff]  ;;  %v1465_v8 = vld [vmem:[%s6594_s3 + $0xe88] sm:$0xff] }
 0x16b   :  { %3405 = vmatpush1.bf16.msra.mxu1 %v3404_v14  ;;  %3599 = vmatprep.subr.bf16.mxu0 %v3598_v15  ;;  %v1394_v14 = vld [vmem:[%s6594_s3 + $0xc50] sm:$0xff] }
 0x16c   :  { %v2671_v29 = vpop.f32.mrb[4].mxu0  ;;  %3407 = vmatprep.subr.bf16.mxu1 %v3406_v18  ;;  %v3620_v15 = vpack.c.bf16 %v1394_v14, %v1392_v12  ;;  %v1403_v18 = vld [vmem:[%s6594_s3 + $0xc98] sm:$0xff]  ;;  %v3652_v12 = vpack.c.bf16 %v1426_v9, %v1424_v7  ;;  %v1466_v7 = vld [vmem:[%s6594_s3 + $0xe90] sm:$0xff]  ;;  %v1469_v9 = vld [vmem:[%s6594_s3 + $0xea8] sm:$0xff] }
 0x16d   :  { %v2672_v36 = vpop.f32.mrb[5].mxu0  ;;  %v2706_v38 = vpop.f32.mrb[4].mxu1  ;;  %v3626_v20 = vpack.c.bf16 %v1403_v18, %v1401_v63  ;;  %v1432_v63 = vld [vmem:[%s6594_s3 + $0xd80] sm:$0xff]  ;;  %v1434_v18 = vld [vmem:[%s6594_s3 + $0xd90] sm:$0xff] }
 0x16e   :  { %v2673_v42 = vadd.f32 %v2672_v36, %v2671_v29  ;;  %3601 = vmatpush1.bf16.msra.mxu0 %v3600_v23  ;;  %v2707_v44 = vpop.f32.mrb[5].mxu1  ;;  %v1407_v23 = vld [vmem:[%s6594_s3 + $0xcb8] sm:$0xff] }
 0x16f   :  { %3409 = vmatpush1.bf16.msra.mxu1 %v3408_v54  ;;  %v2708_v47 = vadd.f32 %v2707_v44, %v2706_v38  ;;  %3603 = vmatprep.subr.bf16.mxu0 %v3602_v24  ;;  %v3628_v54 = vpack.c.bf16 %v1402_v32, %v1400_v21  ;;  %v3630_v24 = vpack.c.bf16 %v1407_v23, %v1405_v22  ;;  %v1411_v29 = vld [vmem:[%s6594_s3 + $0xcd8] sm:$0xff]  ;;  %v1413_v38 = vld [vmem:[%s6594_s3 + $0xce8] sm:$0xff]  ;;  %v1436_v22 = vld [vmem:[%s6594_s3 + $0xda0] sm:$0xff] }
 0x170   :  { %v787_v53 = vadd.f32 %v2673_v42, %v5917_v6  ;;  %3411 = vmatprep.subr.bf16.mxu1 %v3410_v30  ;;  %v3416_v6 = vpack.c.bf16 %v1190_v13, %v1188_v51  ;;  %v3632_v30 = vpack.c.bf16 %v1406_v26, %v1404_v25  ;;  %v3634_v31 = vpack.c.bf16 %v1411_v29, %v1409_v28  ;;  %v1412_v51 = vld [vmem:[%s6594_s3 + $0xce0] sm:$0xff]  ;;  %v1438_v23 = vld [vmem:[%s6594_s3 + $0xdb0] sm:$0xff] }
 0x171   :  { %v3640_v57 = vpack.c.bf16 %v1414_v52, %v1412_v51  ;;  %v3660_v21 = vpack.c.bf16 %v1434_v18, %v1432_v63  ;;  %v3664_v25 = vpack.c.bf16 %v1438_v23, %v1436_v22  ;;  %v1440_v28 = vld [vmem:[%s6594_s3 + $0xdc0] sm:$0xff]  ;;  %v1442_v29 = vld [vmem:[%s6594_s3 + $0xdd0] sm:$0xff]  ;;  %v1477_v18 = vld [vmem:[%s6594_s3 + $0xee8] sm:$0xff] }
 0x172   :  { %v6106_v59 = vadd.f32 %v2708_v47, %v787_v53  ;;  %3605 = vmatpush1.bf16.msra.mxu0 %v3604_v45  ;;  %v3636_v47 = vpack.c.bf16 %v1410_v35, %v1408_v34  ;;  %v1417_v53 = vld [vmem:[%s6594_s3 + $0xd08] sm:$0xff]  ;;  %v3668_v34 = vpack.c.bf16 %v1442_v29, %v1440_v28  ;;  %v1474_v63 = vld [vmem:[%s6594_s3 + $0xed0] sm:$0xff]  ;;  %v1483_v23 = vld [vmem:[%s6594_s3 + $0xf18] sm:$0xff] }
 0x173   :  { %3413 = vmatpush1.bf16.msra.mxu1 %v3412_v48  ;;  %3607 = vmatprep.subr.bf16.mxu0 %v3606_v55  ;;  %v3638_v55 = vpack.c.bf16 %v1415_v39, %v1413_v38  ;;  %v1446_v38 = vld [vmem:[%s6594_s3 + $0xdf0] sm:$0xff]  ;;  %v1449_v39 = vld [vmem:[%s6594_s3 + $0xe08] sm:$0xff] }
 0x174   :  { %3415 = vmatprep.subr.bf16.mxu1 %v3414_v56  ;;  %v1419_v56 = vld [vmem:[%s6594_s3 + $0xd18] sm:$0xff]  ;;  %v1481_v22 = vld [vmem:[%s6594_s3 + $0xf08] sm:$0xff] }
 0x175   :  { %v3642_v58 = vpack.c.bf16 %v1419_v56, %v1417_v53  ;;  %v1454_v53 = vld [vmem:[%s6594_s3 + $0xe30] sm:$0xff]  ;;  %v1457_v56 = vld [vmem:[%s6594_s3 + $0xe48] sm:$0xff] }
 0x176   :  { %3609 = vmatpush1.bf16.msra.mxu0 %v3608_v61  ;;  %v1416_v61 = vld [vmem:[%s6594_s3 + $0xd00] sm:$0xff]  ;;  %v2095_v29 = vld [vmem:[#allocation2 + $0x8] sm:$0xff] }
 0x177   :  { %3417 = vmatpush1.bf16.msra.mxu1 %v3416_v6  ;;  %3611 = vmatprep.subr.bf16.mxu0 %v3610_v62  ;;  %v1421_v6 = vld [vmem:[%s6594_s3 + $0xd28] sm:$0xff]  ;;  %v1423_v62 = vld [vmem:[%s6594_s3 + $0xd38] sm:$0xff] }
 0x178   :  { %v3646_v3 = vpack.c.bf16 %v1423_v62, %v1421_v6  ;;  %v1458_v6 = vld [vmem:[%s6594_s3 + $0xe50] sm:$0xff]  ;;  %v1461_v62 = vld [vmem:[%s6594_s3 + $0xe68] sm:$0xff] }
 0x179   :  { %1944 = vmatmul.mubr.f32.vlgmr.msra.gmra.mrb[8].mxu0 %v4573_v1  ;;  %v1397_v1 = vld [vmem:[%s6594_s3 + $0xc68] sm:$0xff] }
 0x17a   :  { %1731 = vmatmul.mubr.f32.vlgmr.msra.gmra.mrb[8].mxu1 %v4402_v37  ;;  %3613 = vmatpush1.bf16.msra.mxu0 %v3612_v4  ;;  %v1399_v37 = vld [vmem:[%s6594_s3 + $0xc78] sm:$0xff]  ;;  %v1425_v4 = vld [vmem:[%s6594_s3 + $0xd48] sm:$0xff] }
 0x17b   :  { %3615 = vmatprep.subr.bf16.mxu0 %v3614_v5  ;;  %2014 = vmatprep.mubr.f32.mxu0 %v4779_v60  ;;  %v3622_v41 = vpack.c.bf16 %v1399_v37, %v1397_v1  ;;  %v1398_v60 = vld [vmem:[%s6594_s3 + $0xc70] sm:$0xff]  ;;  %v1427_v5 = vld [vmem:[%s6594_s3 + $0xd58] sm:$0xff]  ;;  %v1428_v1 = vld [vmem:[%s6594_s3 + $0xd60] sm:$0xff] }
 0x17c   :  { %v3624_v19 = vpack.c.bf16 %v1398_v60, %v1396_v16  ;;  %v3650_v17 = vpack.c.bf16 %v1427_v5, %v1425_v4  ;;  %v1430_v37 = vld [vmem:[%s6594_s3 + $0xd70] sm:$0xff]  ;;  %v1467_v4 = vld [vmem:[%s6594_s3 + $0xe98] sm:$0xff] }
 0x17d   :  { %v3656_v16 = vpack.c.bf16 %v1430_v37, %v1428_v1  ;;  %v1470_v1 = vld [vmem:[%s6594_s3 + $0xeb0] sm:$0xff]  ;;  %v1473_v37 = vld [vmem:[%s6594_s3 + $0xec8] sm:$0xff] }
 0x17e   :  { %3617 = vmatpush1.bf16.msra.mxu0 %v3616_v10  ;;  %v1429_v10 = vld [vmem:[%s6594_s3 + $0xd68] sm:$0xff] }
 0x17f   :  { %3619 = vmatprep.subr.bf16.mxu0 %v3618_v11  ;;  %v1431_v11 = vld [vmem:[%s6594_s3 + $0xd78] sm:$0xff] }
 0x180   :  { %v3654_v14 = vpack.c.bf16 %v1431_v11, %v1429_v10  ;;  %v1471_v10 = vld [vmem:[%s6594_s3 + $0xeb8] sm:$0xff] }
 0x182   :  { %3621 = vmatpush1.bf16.msra.mxu0 %v3620_v15  ;;  %v1433_v15 = vld [vmem:[%s6594_s3 + $0xd88] sm:$0xff] }
 0x183   :  { %3623 = vmatprep.subr.bf16.mxu0 %v3622_v41  ;;  %v1435_v41 = vld [vmem:[%s6594_s3 + $0xd98] sm:$0xff] }
 0x184   :  { %v3658_v60 = vpack.c.bf16 %v1435_v41, %v1433_v15  ;;  %v1475_v15 = vld [vmem:[%s6594_s3 + $0xed8] sm:$0xff] }
 0x186   :  { %3625 = vmatpush1.bf16.msra.mxu0 %v3624_v19  ;;  %v1437_v19 = vld [vmem:[%s6594_s3 + $0xda8] sm:$0xff] }
 0x187   :  { %3627 = vmatprep.subr.bf16.mxu0 %v3626_v20  ;;  %v1439_v20 = vld [vmem:[%s6594_s3 + $0xdb8] sm:$0xff] }
 0x188   :  { %v3662_v32 = vpack.c.bf16 %v1439_v20, %v1437_v19  ;;  %v1479_v19 = vld [vmem:[%s6594_s3 + $0xef8] sm:$0xff]  ;;  %v1476_v20 = vld [vmem:[%s6594_s3 + $0xee0] sm:$0xff] }
 0x18a   :  { %3629 = vmatpush1.bf16.msra.mxu0 %v3628_v54  ;;  %v1441_v54 = vld [vmem:[%s6594_s3 + $0xdc8] sm:$0xff] }
 0x18b   :  { %3631 = vmatprep.subr.bf16.mxu0 %v3630_v24  ;;  %v1443_v24 = vld [vmem:[%s6594_s3 + $0xdd8] sm:$0xff] }
 0x18c   :  { %v2741_v36 = vpop.f32.mrb[6].mxu0  ;;  %v3666_v26 = vpack.c.bf16 %v1443_v24, %v1441_v54  ;;  %v3702_v54 = vpack.c.bf16 %v1479_v19, %v1477_v18  ;;  %v2110_v24 = vld [vmem:[#allocation2 + $0x80] sm:$0xff]  ;;  %v1497_v18 = vld [vmem:[%s6594_s3 + $0xf88] sm:$0xff] }
 0x18d   :  { %v2742_v40 = vpop.f32.mrb[7].mxu0  ;;  %v2776_v42 = vpop.f32.mrb[6].mxu1 }
 0x18e   :  { %v2743_v44 = vadd.f32 %v2742_v40, %v2741_v36  ;;  %3633 = vmatpush1.bf16.msra.mxu0 %v3632_v30  ;;  %v2777_v45 = vpop.f32.mrb[7].mxu1  ;;  %v1445_v30 = vld [vmem:[%s6594_s3 + $0xde8] sm:$0xff]  ;;  %v1444_v36 = vld [vmem:[%s6594_s3 + $0xde0] sm:$0xff]  ;;  %v1451_v40 = vld [vmem:[%s6594_s3 + $0xe18] sm:$0xff] }
 0x18f   :  { %v2778_v48 = vadd.f32 %v2777_v45, %v2776_v42  ;;  %3635 = vmatprep.subr.bf16.mxu0 %v3634_v31  ;;  %v1447_v31 = vld [vmem:[%s6594_s3 + $0xdf8] sm:$0xff]  ;;  %v3672_v42 = vpack.c.bf16 %v1446_v38, %v1444_v36  ;;  %v1448_v45 = vld [vmem:[%s6594_s3 + $0xe00] sm:$0xff]  ;;  %v2096_v36 = vld [vmem:[#allocation2 + $0x10] sm:$0xff] }
 0x190   :  { %v927_v33 = vadd.f32 %v2743_v44, %v6106_v59  ;;  %v1418_v59 = vld [vmem:[%s6594_s3 + $0xd10] sm:$0xff]  ;;  %v3670_v35 = vpack.c.bf16 %v1447_v31, %v1445_v30  ;;  %v3674_v44 = vpack.c.bf16 %v1451_v40, %v1449_v39  ;;  %v2113_v31 = vld [vmem:[#allocation2 + $0x98] sm:$0xff]  ;;  %v2114_v39 = vld [vmem:[#allocation2 + $0xa0] sm:$0xff] }
 0x191   :  { %v3644_v49 = vpack.c.bf16 %v1418_v59, %v1416_v61  ;;  %v1456_v59 = vld [vmem:[%s6594_s3 + $0xe40] sm:$0xff]  ;;  %v2112_v30 = vld [vmem:[#allocation2 + $0x90] sm:$0xff]  ;;  %v2097_v38 = vld [vmem:[#allocation2 + $0x18] sm:$0xff] }
 0x192   :  { %v6208_v13 = vadd.f32 %v2778_v48, %v927_v33  ;;  %3637 = vmatpush1.bf16.msra.mxu0 %v3636_v47  ;;  %v1450_v47 = vld [vmem:[%s6594_s3 + $0xe10] sm:$0xff]  ;;  %v1453_v48 = vld [vmem:[%s6594_s3 + $0xe28] sm:$0xff]  ;;  %v1452_v33 = vld [vmem:[%s6594_s3 + $0xe20] sm:$0xff] }
 0x193   :  { %3639 = vmatprep.subr.bf16.mxu0 %v3638_v55  ;;  %v1455_v55 = vld [vmem:[%s6594_s3 + $0xe38] sm:$0xff]  ;;  %v3676_v51 = vpack.c.bf16 %v1450_v47, %v1448_v45  ;;  %v1480_v45 = vld [vmem:[%s6594_s3 + $0xf00] sm:$0xff]  ;;  %v1482_v47 = vld [vmem:[%s6594_s3 + $0xf10] sm:$0xff] }
 0x194   :  { %v3678_v52 = vpack.c.bf16 %v1455_v55, %v1453_v48  ;;  %v1485_v48 = vld [vmem:[%s6594_s3 + $0xf28] sm:$0xff]  ;;  %v3744_v55 = vpack.c.bf16 %v2097_v38, %v2096_v36  ;;  %v1500_v38 = vld [vmem:[%s6594_s3 + $0xfa0] sm:$0xff] }
 0x196   :  { %3641 = vmatpush1.bf16.msra.mxu0 %v3640_v57  ;;  %v1459_v57 = vld [vmem:[%s6594_s3 + $0xe58] sm:$0xff] }
 0x197   :  { %3643 = vmatprep.subr.bf16.mxu0 %v3642_v58  ;;  %v3680_v58 = vpack.c.bf16 %v1454_v53, %v1452_v33  ;;  %v3682_v61 = vpack.c.bf16 %v1459_v57, %v1457_v56  ;;  %v2098_v33 = vld [vmem:[#allocation2 + $0x20] sm:$0xff]  ;;  %v2099_v53 = vld [vmem:[#allocation2 + $0x28] sm:$0xff]  ;;  %v2116_v56 = vld [vmem:[#allocation2 + $0xb0] sm:$0xff] }
 0x198   :  { %v2117_v57 = vld [vmem:[#allocation2 + $0xb8] sm:$0xff] }
 0x19a   :  { %3645 = vmatpush1.bf16.msra.mxu0 %v3644_v49 }
 0x19b   :  { %3647 = vmatprep.subr.bf16.mxu0 %v3646_v3  ;;  %v1460_v3 = vld [vmem:[%s6594_s3 + $0xe60] sm:$0xff] }
 0x19c   :  { %v3688_v5 = vpack.c.bf16 %v1462_v50, %v1460_v3  ;;  %v2100_v3 = vld [vmem:[#allocation2 + $0x30] sm:$0xff]  ;;  %v2101_v50 = vld [vmem:[#allocation2 + $0x38] sm:$0xff] }
 0x19e   :  { %3649 = vmatpush1.bf16.msra.mxu0 %v3648_v27  ;;  %v3690_v27 = vpack.c.bf16 %v1467_v4, %v1465_v8  ;;  %v2118_v8 = vld [vmem:[#allocation2 + $0xc0] sm:$0xff]  ;;  %v2119_v4 = vld [vmem:[#allocation2 + $0xc8] sm:$0xff] }
 0x19f   :  { %3651 = vmatprep.subr.bf16.mxu0 %v3650_v17  ;;  %v1464_v17 = vld [vmem:[%s6594_s3 + $0xe80] sm:$0xff] }
 0x1a0   :  { %v3692_v11 = vpack.c.bf16 %v1466_v7, %v1464_v17  ;;  %v1488_v17 = vld [vmem:[%s6594_s3 + $0xf40] sm:$0xff]  ;;  %v1490_v7 = vld [vmem:[%s6594_s3 + $0xf50] sm:$0xff] }
 0x1a2   :  { %3653 = vmatpush1.bf16.msra.mxu0 %v3652_v12  ;;  %v3694_v12 = vpack.c.bf16 %v1471_v10, %v1469_v9  ;;  %v1493_v9 = vld [vmem:[%s6594_s3 + $0xf68] sm:$0xff]  ;;  %v3752_v10 = vpack.c.bf16 %v2101_v50, %v2100_v3  ;;  %v2108_v3 = vld [vmem:[#allocation2 + $0x70] sm:$0xff]  ;;  %v2109_v50 = vld [vmem:[#allocation2 + $0x78] sm:$0xff] }
 0x1a3   :  { %3655 = vmatprep.subr.bf16.mxu0 %v3654_v14  ;;  %v1468_v14 = vld [vmem:[%s6594_s3 + $0xea0] sm:$0xff] }
 0x1a4   :  { %v3696_v41 = vpack.c.bf16 %v1470_v1, %v1468_v14  ;;  %v2102_v14 = vld [vmem:[#allocation2 + $0x40] sm:$0xff]  ;;  %v2103_v1 = vld [vmem:[#allocation2 + $0x48] sm:$0xff] }
 0x1a5   :  { %v3756_v19 = vpack.c.bf16 %v2103_v1, %v2102_v14  ;;  %v2206_v1 = vld [vmem:[#allocation4] sm:$0xff] }
 0x1a6   :  { %3657 = vmatpush1.bf16.msra.mxu0 %v3656_v16  ;;  %v3698_v16 = vpack.c.bf16 %v1475_v15, %v1473_v37  ;;  %v2120_v37 = vld [vmem:[#allocation2 + $0xd0] sm:$0xff]  ;;  %v2121_v15 = vld [vmem:[#allocation2 + $0xd8] sm:$0xff] }
 0x1a7   :  { %3659 = vmatprep.subr.bf16.mxu0 %v3658_v60  ;;  %v1472_v60 = vld [vmem:[%s6594_s3 + $0xec0] sm:$0xff] }
 0x1aa   :  { %3661 = vmatpush1.bf16.msra.mxu0 %v3660_v21  ;;  %v3700_v21 = vpack.c.bf16 %v1474_v63, %v1472_v60  ;;  %v1492_v60 = vld [vmem:[%s6594_s3 + $0xf60] sm:$0xff]  ;;  %v1494_v63 = vld [vmem:[%s6594_s3 + $0xf70] sm:$0xff] }
 0x1ab   :  { %3663 = vmatprep.subr.bf16.mxu0 %v3662_v32  ;;  %v1478_v32 = vld [vmem:[%s6594_s3 + $0xef0] sm:$0xff] }
 0x1ac   :  { %v3704_v40 = vpack.c.bf16 %v1478_v32, %v1476_v20  ;;  %v1499_v20 = vld [vmem:[%s6594_s3 + $0xf98] sm:$0xff]  ;;  %v2104_v32 = vld [vmem:[#allocation2 + $0x50] sm:$0xff] }
 0x1ae   :  { %3665 = vmatpush1.bf16.msra.mxu0 %v3664_v25  ;;  %v2111_v25 = vld [vmem:[#allocation2 + $0x88] sm:$0xff] }
 0x1af   :  { %3667 = vmatprep.subr.bf16.mxu0 %v3666_v26  ;;  %v2094_v26 = vld [vmem:[#allocation2] sm:$0xff]  ;;  %v3738_v28 = vpack.c.bf16 %v2111_v25, %v2110_v24  ;;  %v3720_v24 = vpack.c.bf16 %v1494_v63, %v1492_v60  ;;  %v3722_v25 = vpack.c.bf16 %v1499_v20, %v1497_v18  ;;  %v2208_v63 = vld [vmem:[#allocation4 + $0x10] sm:$0xff]  ;;  %v2209_v18 = vld [vmem:[#allocation4 + $0x18] sm:$0xff] }
 0x1b0   :  { %v2211_v20 = vld [vmem:[#allocation4 + $0x28] sm:$0xff] }
 0x1b1   :  { %3739 = vmatprep.subr.bf16.mxu1 %v3738_v28  ;;  %v1498_v28 = vld [vmem:[%s6594_s3 + $0xf90] sm:$0xff] }
 0x1b2   :  { %3669 = vmatpush1.bf16.msra.mxu0 %v3668_v34  ;;  %v3740_v34 = vpack.c.bf16 %v2095_v29, %v2094_v26  ;;  %v1496_v26 = vld [vmem:[%s6594_s3 + $0xf80] sm:$0xff] }
 0x1b3   :  { %3671 = vmatprep.subr.bf16.mxu0 %v3670_v35  ;;  %v3742_v35 = vpack.c.bf16 %v2113_v31, %v2112_v30  ;;  %v1501_v30 = vld [vmem:[%s6594_s3 + $0xfa8] sm:$0xff]  ;;  %v1503_v31 = vld [vmem:[%s6594_s3 + $0xfb8] sm:$0xff] }
 0x1b4   :  { %3741 = vmatpush3.bf16.msra.mxu1 %v3740_v34  ;;  %v3726_v36 = vpack.c.bf16 %v1503_v31, %v1501_v30  ;;  %v2218_v30 = vld [vmem:[#allocation4 + $0x60] sm:$0xff]  ;;  %v2219_v31 = vld [vmem:[#allocation4 + $0x68] sm:$0xff] }
 0x1b5   :  { %3743 = vmatprep.subr.bf16.mxu1 %v3742_v35  ;;  %v3724_v35 = vpack.c.bf16 %v1498_v28, %v1496_v26  ;;  %v2216_v26 = vld [vmem:[#allocation4 + $0x50] sm:$0xff]  ;;  %v2217_v28 = vld [vmem:[#allocation4 + $0x58] sm:$0xff] }
 0x1b6   :  { %3673 = vmatpush1.bf16.msra.mxu0 %v3672_v42  ;;  %v2115_v42 = vld [vmem:[#allocation2 + $0xa8] sm:$0xff] }
 0x1b7   :  { %3675 = vmatprep.subr.bf16.mxu0 %v3674_v44  ;;  %v3706_v44 = vpack.c.bf16 %v1483_v23, %v1481_v22  ;;  %v2105_v22 = vld [vmem:[#allocation2 + $0x58] sm:$0xff]  ;;  %v2122_v23 = vld [vmem:[#allocation2 + $0xe0] sm:$0xff] }
 0x1b8   :  { %3745 = vmatpush3.bf16.msra.mxu1 %v3744_v55  ;;  %v3760_v29 = vpack.c.bf16 %v2105_v22, %v2104_v32  ;;  %v1509_v55 = vld [vmem:[%s6594_s3 + $0xfe8] sm:$0xff]  ;;  %v2212_v32 = vld [vmem:[#allocation4 + $0x30] sm:$0xff]  ;;  %v2213_v22 = vld [vmem:[#allocation4 + $0x38] sm:$0xff] }
 0x1b9   :  { %2015 = vmatmul.mubr.f32.vlgmr.msra.gmra.mrb[8].mxu0 %v4748_v43  ;;  %v1463_v43 = vld [vmem:[%s6594_s3 + $0xe78] sm:$0xff] }
 0x1ba   :  { %3677 = vmatpush1.bf16.msra.mxu0 %v3676_v51  ;;  %2085 = vmatprep.mubr.f32.mxu0 %v4790_v2  ;;  %v3684_v2 = vpack.c.bf16 %v1458_v6, %v1456_v59  ;;  %v3686_v49 = vpack.c.bf16 %v1463_v43, %v1461_v62  ;;  %v1487_v51 = vld [vmem:[%s6594_s3 + $0xf38] sm:$0xff]  ;;  %v1484_v59 = vld [vmem:[%s6594_s3 + $0xf20] sm:$0xff]  ;;  %v1486_v6 = vld [vmem:[%s6594_s3 + $0xf30] sm:$0xff]  ;;  %v3748_v43 = vpack.c.bf16 %v2099_v53, %v2098_v33 }
 0x1bb   :  { %3679 = vmatprep.subr.bf16.mxu0 %v3678_v52  ;;  %v3746_v52 = vpack.c.bf16 %v2115_v42, %v2114_v39  ;;  %v1489_v62 = vld [vmem:[%s6594_s3 + $0xf48] sm:$0xff]  ;;  %v1502_v39 = vld [vmem:[%s6594_s3 + $0xfb0] sm:$0xff]  ;;  %v1507_v42 = vld [vmem:[%s6594_s3 + $0xfd8] sm:$0xff] }
 0x1bc   :  { %v1508_v53 = vld [vmem:[%s6594_s3 + $0xfe0] sm:$0xff] }
 0x1bd   :  { %3747 = vmatprep.subr.bf16.mxu1 %v3746_v52 }
 0x1be   :  { %3681 = vmatpush1.bf16.msra.mxu0 %v3680_v58  ;;  %v3708_v58 = vpack.c.bf16 %v1482_v47, %v1480_v45  ;;  %3749 = vmatpush3.bf16.msra.mxu1 %v3748_v43  ;;  %v1504_v47 = vld [vmem:[%s6594_s3 + $0xfc0] sm:$0xff]  ;;  %v2125_v43 = vld [vmem:[#allocation2 + $0xf8] sm:$0xff] }
 0x1bf   :  { %3683 = vmatprep.subr.bf16.mxu0 %v3682_v61  ;;  %v3710_v61 = vpack.c.bf16 %v1487_v51, %v1485_v48  ;;  %v1506_v48 = vld [vmem:[%s6594_s3 + $0xfd0] sm:$0xff]  ;;  %v1511_v51 = vld [vmem:[%s6594_s3 + $0xff8] sm:$0xff] }
 0x1c0   :  { %v3732_v52 = vpack.c.bf16 %v1506_v48, %v1504_v47  ;;  %v3734_v33 = vpack.c.bf16 %v1511_v51, %v1509_v55  ;;  %v2299_v48 = vld [vmem:[#allocation6] sm:$0xff]  ;;  %v2300_v55 = vld [vmem:[#allocation6 + $0x8] sm:$0xff] }
 0x1c2   :  { %3685 = vmatpush1.bf16.msra.mxu0 %v3684_v2  ;;  %v1491_v2 = vld [vmem:[%s6594_s3 + $0xf58] sm:$0xff] }
 0x1c3   :  { %3687 = vmatprep.subr.bf16.mxu0 %v3686_v49  ;;  %v3750_v49 = vpack.c.bf16 %v2117_v57, %v2116_v56  ;;  %v1510_v56 = vld [vmem:[%s6594_s3 + $0xff0] sm:$0xff] }
 0x1c4   :  { %v3736_v57 = vpack.c.bf16 %v1510_v56, %v1508_v53  ;;  %v2301_v53 = vld [vmem:[#allocation6 + $0x10] sm:$0xff]  ;;  %v2302_v56 = vld [vmem:[#allocation6 + $0x18] sm:$0xff] }
 0x1c5   :  { %3751 = vmatprep.subr.bf16.mxu1 %v3750_v49 }
 0x1c6   :  { %3689 = vmatpush1.bf16.msra.mxu0 %v3688_v5  ;;  %v3712_v5 = vpack.c.bf16 %v1486_v6, %v1484_v59  ;;  %3753 = vmatpush3.bf16.msra.mxu1 %v3752_v10 }
 0x1c7   :  { %3691 = vmatprep.subr.bf16.mxu0 %v3690_v27  ;;  %v3714_v27 = vpack.c.bf16 %v1491_v2, %v1489_v62  ;;  %v2124_v62 = vld [vmem:[#allocation2 + $0xf0] sm:$0xff] }
 0x1c8   :  { %v3766_v49 = vpack.c.bf16 %v2125_v43, %v2124_v62  ;;  %v2307_v43 = vld [vmem:[#allocation6 + $0x40] sm:$0xff] }
 0x1ca   :  { %3693 = vmatpush1.bf16.msra.mxu0 %v3692_v11  ;;  %v1495_v11 = vld [vmem:[%s6594_s3 + $0xf78] sm:$0xff] }
 0x1cb   :  { %3695 = vmatprep.subr.bf16.mxu0 %v3694_v12  ;;  %v3754_v12 = vpack.c.bf16 %v2119_v4, %v2118_v8  ;;  %v3768_v8 = vpack.c.bf16 %v2109_v50, %v2108_v3  ;;  %v3947_v4 = vmov 0.0|0.0   ;;  %v2309_v3 = vld [vmem:[#allocation6 + $0x50] sm:$0xff]  ;;  %v2310_v50 = vld [vmem:[#allocation6 + $0x58] sm:$0xff] }
 0x1cd   :  { %3755 = vmatprep.subr.bf16.mxu1 %v3754_v12 }
 0x1ce   :  { %3697 = vmatpush1.bf16.msra.mxu0 %v3696_v41  ;;  %v3716_v41 = vpack.c.bf16 %v1490_v7, %v1488_v17  ;;  %3757 = vmatpush3.bf16.msra.mxu1 %v3756_v19  ;;  %v3774_v19 = vpack.c.bf16 %v2209_v18, %v2208_v63  ;;  %v2399_v63 = vld [vmem:[%s6602_s11 + $0x38] sm:$0xff] }
 0x1cf   :  { %3699 = vmatprep.subr.bf16.mxu0 %v3698_v16  ;;  %v3718_v16 = vpack.c.bf16 %v1495_v11, %v1493_v9 }
 0x1d2   :  { %3701 = vmatpush1.bf16.msra.mxu0 %v3700_v21  ;;  %v3758_v21 = vpack.c.bf16 %v2121_v15, %v2120_v37  ;;  %v2207_v37 = vld [vmem:[#allocation4 + $0x8] sm:$0xff] }
 0x1d3   :  { %3703 = vmatprep.subr.bf16.mxu0 %v3702_v54  ;;  %v2123_v54 = vld [vmem:[#allocation2 + $0xe8] sm:$0xff] }
 0x1d4   :  { %3759 = vmatprep.subr.bf16.mxu1 %v3758_v21  ;;  %v3762_v34 = vpack.c.bf16 %v2123_v54, %v2122_v23  ;;  %v3780_v23 = vpack.c.bf16 %v2213_v22, %v2212_v32  ;;  %v2214_v54 = vld [vmem:[#allocation4 + $0x40] sm:$0xff]  ;;  %v2403_v32 = vld [vmem:[%s6602_s11 + $0x58] sm:$0xff] }
 0x1d5   :  { %3761 = vmatpush3.bf16.msra.mxu1 %v3760_v29  ;;  %v3786_v29 = vpack.c.bf16 %v2217_v28, %v2216_v26  ;;  %v2407_v26 = vld [vmem:[%s6602_s11 + $0x78] sm:$0xff] }
 0x1d6   :  { %3705 = vmatpush1.bf16.msra.mxu0 %v3704_v40  ;;  %v1505_v40 = vld [vmem:[%s6594_s3 + $0xfc8] sm:$0xff]  ;;  %3763 = vmatprep.subr.bf16.mxu1 %v3762_v34  ;;  %v3789_v34 = vpack.c.bf16 %v2219_v31, %v2218_v30  ;;  %v2497_v31 = vld [vmem:[%s6601_s10] ss:$0 sm:$0xff] }
 0x1d7   :  { %3707 = vmatprep.subr.bf16.mxu0 %v3706_v44  ;;  %v3728_v44 = vpack.c.bf16 %v1502_v39, %v1500_v38  ;;  %v3730_v45 = vpack.c.bf16 %v1507_v42, %v1505_v40  ;;  %v3949_v39 = vmov 0.0  }
 0x1da   :  { %3709 = vmatpush1.bf16.msra.mxu0 %v3708_v58  ;;  %v2106_v58 = vld [vmem:[#allocation2 + $0x60] sm:$0xff] }
 0x1db   :  { %3711 = vmatprep.subr.bf16.mxu0 %v3710_v61  ;;  %v2107_v61 = vld [vmem:[#allocation2 + $0x68] sm:$0xff] }
 0x1dc   :  { %v3764_v59 = vpack.c.bf16 %v2107_v61, %v2106_v58  ;;  %v2303_v58 = vld [vmem:[#allocation6 + $0x20] sm:$0xff]  ;;  %v2304_v61 = vld [vmem:[#allocation6 + $0x28] sm:$0xff] }
 0x1de   :  { %3713 = vmatpush1.bf16.msra.mxu0 %v3712_v5  ;;  %3765 = vmatpush3.bf16.msra.mxu1 %v3764_v59  ;;  %v1516_v5 = vsub.s32 0, %v4198_v0  ;;  %v3801_v59 = vpack.c.bf16 %v2304_v61, %v2303_v58 }
 0x1df   :  { %3715 = vmatprep.subr.bf16.mxu0 %v3714_v27  ;;  %3767 = vmatprep.subr.bf16.mxu1 %v3766_v49  ;;  %v1520_v27 = vsub.s32 1, %v4198_v0  ;;  %v2210_v0 = vld [vmem:[#allocation4 + $0x20] sm:$0xff] }
 0x1e0   :  { %v3777_v21 = vpack.c.bf16 %v2211_v20, %v2210_v0  ;;  %v2401_v0 = vld [vmem:[%s6602_s11 + $0x48] sm:$0xff] }
 0x1e2   :  { %3717 = vmatpush1.bf16.msra.mxu0 %v3716_v41  ;;  %3769 = vmatpush3.bf16.msra.mxu1 %v3768_v8  ;;  %v3810_v8 = vpack.c.bf16 %v2310_v50, %v2309_v3 }
 0x1e3   :  { %3719 = vmatprep.subr.bf16.mxu0 %v3718_v16  ;;  %3770 = vmatprep.subr.bf16.mxu1 %v3947_v4  ;;  %v3771_v16 = vpack.c.bf16 %v2207_v37, %v2206_v1  ;;  %v2395_v1 = vld [vmem:[%s6602_s11 + $0x18] sm:$0xff] }
 0x1e6   :  { %3721 = vmatpush1.bf16.msra.mxu0 %v3720_v24  ;;  %v2215_v24 = vld [vmem:[#allocation4 + $0x48] sm:$0xff] }
 0x1e7   :  { %3723 = vmatprep.subr.bf16.mxu0 %v3722_v25  ;;  %v3783_v25 = vpack.c.bf16 %v2215_v24, %v2214_v54  ;;  %v2405_v54 = vld [vmem:[%s6602_s11 + $0x68] sm:$0xff] }
 0x1ea   :  { %3725 = vmatpush1.bf16.msra.mxu0 %v3724_v35  ;;  %v2220_v35 = vld [vmem:[#allocation4 + $0x70] sm:$0xff] }
 0x1eb   :  { %3727 = vmatprep.subr.bf16.mxu0 %v3726_v36  ;;  %v2221_v36 = vld [vmem:[#allocation4 + $0x78] sm:$0xff] }
 0x1ec   :  { %v3792_v38 = vpack.c.bf16 %v2221_v36, %v2220_v35 }
 0x1ee   :  { %3729 = vmatpush1.bf16.msra.mxu0 %v3728_v44 }
 0x1ef   :  { %3731 = vmatprep.subr.bf16.mxu0 %v3730_v45  ;;  %v2495_v45 = vld [vmem:[%s6597_s6] ss:$0 sm:$0xff] }
 0x1f2   :  { %3733 = vmatpush1.bf16.msra.mxu0 %v3732_v52  ;;  %v3795_v52 = vpack.c.bf16 %v2300_v55, %v2299_v48 }
 0x1f3   :  { %3735 = vmatprep.subr.bf16.mxu0 %v3734_v33 }
 0x1f6   :  { %3737 = vmatpush1.bf16.msra.mxu0 %v3736_v57  ;;  %v3798_v57 = vpack.c.bf16 %v2302_v56, %v2301_v53 }
 0x1f9   :  { %2086 = vmatmul.mubr.f32.vlgmr.msra.gmra.mrb[8].mxu0 %v4757_v46  ;;  %v1512_v46 = vld [vmem:[%s6595_s4] sm:$0x3] }
 0x1fa   :  { %v1517_v17 = vrot.slane %v1512_v46, %v1516_v5  ;;  %v1521_v7 = vrot.slane %v1512_v46, %v1520_v27  ;;  %v2311_v5 = vld [vmem:[#allocation6 + $0x60] sm:$0xff]  ;;  %v2312_v46 = vld [vmem:[#allocation6 + $0x68] sm:$0xff] }
 0x1fb   :  { %v3813_v27 = vpack.c.bf16 %v2312_v46, %v2311_v5 }
 0x24d   :  { %v1732_v6 = vpop.f32.mrb[8].mxu1 }
 0x24e   :  { %v1734_v2 = vpop.f32.mrb[9].mxu1  ;;  %v3842_v9 = vadd.f32 %v1732_v6, %v1517_v17  ;;  %v2306_v6 = vld [vmem:[#allocation6 + $0x38] sm:$0xff]  ;;  %v2313_v17 = vld [vmem:[#allocation6 + $0x70] sm:$0xff] }
 0x24f   :  { %v3844_v10 = vadd.f32 %v1734_v2, %v1521_v7  ;;  %v2308_v2 = vld [vmem:[#allocation6 + $0x48] sm:$0xff]  ;;  %v2314_v7 = vld [vmem:[#allocation6 + $0x78] sm:$0xff] }
 0x250   :  { %v3807_v49 = vpack.c.bf16 %v2308_v2, %v2307_v43 }
 0x2cc   :  { %v2087_v11 = vpop.f32.mrb[8].mxu0 }
 0x2cd   :  { %v3843_v12 = vadd.f32 %v3842_v9, %v2087_v11  ;;  %v2089_v14 = vpop.f32.mrb[9].mxu0  ;;  %v3816_v9 = vpack.c.bf16 %v2314_v7, %v2313_v17  ;;  %v2393_v11 = vld [vmem:[%s6602_s11 + $0x8] sm:$0xff] }
 0x2ce   :  { %v3845_v15 = vadd.f32 %v3844_v10, %v2089_v14  ;;  %v2392_v10 = vld [vmem:[%s6602_s11] sm:$0xff] }
 0x2cf   :  { %v2092_v60 = vmax.f32 %v3843_v12, 0.0  ;;  %v2394_v12 = vld [vmem:[%s6602_s11 + $0x10] sm:$0xff]  ;;  %v3819_v14 = vpack.c.bf16 %v2393_v11, %v2392_v10 }
 0x2d0   :  { %v2093_v41 = vmax.f32 %v3845_v15, 0.0  ;;  %v3822_v37 = vpack.c.bf16 %v2395_v1, %v2394_v12  ;;  %v2396_v15 = vld [vmem:[%s6602_s11 + $0x20] sm:$0xff] }
 0x2d2   :  { %2190 = vmatprep.mubr.f32.mxu1 %v2093_v41  ;;  %v2397_v41 = vld [vmem:[%s6602_s11 + $0x28] sm:$0xff] }
 0x2d3   :  { %2191 = vmatmul.mubr.f32.vlgmr.msra.gmra.mrb[10].mxu1 %v2092_v60  ;;  %v2398_v60 = vld [vmem:[%s6602_s11 + $0x30] sm:$0xff] }
 0x2d4   :  { %3772 = vmatpush3.bf16.msra.mxu1 %v3771_v16  ;;  %2897 = vmatprep.mubr.msk.f32.mxu1 %vm3948_vm0, %v3949_v39  ;;  %v3825_v16 = vpack.c.bf16 %v2397_v41, %v2396_v15  ;;  %v3828_v18 = vpack.c.bf16 %v2399_v63, %v2398_v60 }
 0x2d5   :  { %3773 = vmatprep.subr.bf16.mxu1 %v3947_v4 }
 0x2d8   :  { %3775 = vmatpush3.bf16.msra.mxu1 %v3774_v19  ;;  %v2400_v19 = vld [vmem:[%s6602_s11 + $0x40] sm:$0xff] }
 0x2d9   :  { %3776 = vmatprep.subr.bf16.mxu1 %v3947_v4  ;;  %v3831_v20 = vpack.c.bf16 %v2401_v0, %v2400_v19 }
 0x2dc   :  { %3778 = vmatpush3.bf16.msra.mxu1 %v3777_v21  ;;  %v2402_v21 = vld [vmem:[%s6602_s11 + $0x50] sm:$0xff] }
 0x2dd   :  { %3779 = vmatprep.subr.bf16.mxu1 %v3947_v4  ;;  %v3834_v22 = vpack.c.bf16 %v2403_v32, %v2402_v21 }
 0x2e0   :  { %3781 = vmatpush3.bf16.msra.mxu1 %v3780_v23  ;;  %v2404_v23 = vld [vmem:[%s6602_s11 + $0x60] sm:$0xff] }
 0x2e1   :  { %3782 = vmatprep.subr.bf16.mxu1 %v3947_v4  ;;  %v3837_v24 = vpack.c.bf16 %v2405_v54, %v2404_v23 }
 0x2e4   :  { %3784 = vmatpush3.bf16.msra.mxu1 %v3783_v25  ;;  %v2406_v25 = vld [vmem:[%s6602_s11 + $0x70] sm:$0xff] }
 0x2e5   :  { %3785 = vmatprep.subr.bf16.mxu1 %v3947_v4  ;;  %v3840_v28 = vpack.c.bf16 %v2407_v26, %v2406_v25 }
 0x2e8   :  { %3787 = vmatpush3.bf16.msra.mxu1 %v3786_v29 }
 0x2e9   :  { %3788 = vmatprep.subr.bf16.mxu1 %v3947_v4 }
 0x2ec   :  { %3790 = vmatpush3.bf16.msra.mxu1 %v3789_v34 }
 0x2ed   :  { %3791 = vmatprep.subr.bf16.mxu1 %v3947_v4 }
 0x2f0   :  { %3793 = vmatpush3.bf16.msra.mxu1 %v3792_v38 }
 0x2f1   :  { %3794 = vmatprep.subr.bf16.mxu1 %v3947_v4 }
 0x3a6   :  { %v2811_v40 = vpop.f32.mrb[10].mxu1 }
 0x3a7   :  { %v2812_v42 = vpop.f32.mrb[11].mxu1 }
 0x3a8   :  { %v2813_v44 = vadd.f32 %v2812_v42, %v2811_v40  ;;  %v2498_v40 = vld [vmem:[%s6603_s12] ss:$0 sm:$0xff] }
 0x3aa   :  { %v2196_v47 = vadd.f32 %v2813_v44, %v6208_v13  ;;  %v2305_v13 = vld [vmem:[#allocation6 + $0x30] sm:$0xff] }
 0x3ab   :  { %v3804_v62 = vpack.c.bf16 %v2306_v6, %v2305_v13 }
 0x3ac   :  { %v2204_v51 = vadd.f32 %v2495_v45, %v2196_v47 }
 0x3ae   :  { %v2205_v33 = vmax.f32 %v2204_v51, 0.0 }
 0x3b0   :  { %2898 = vmatmul.mubr.f32.vlgmr.msra.gmra.mrb[12].mxu1 %v2205_v33 }
 0x3b1   :  { %3796 = vmatpush3.bf16.msra.mxu1 %v3795_v52  ;;  %2932 = vmatprep.mubr.msk.f32.mxu1 %vm3948_vm0, %v3949_v39 }
 0x3b2   :  { %3797 = vmatprep.subr.bf16.mxu1 %v3947_v4 }
 0x3b5   :  { %3799 = vmatpush3.bf16.msra.mxu1 %v3798_v57 }
 0x3b6   :  { %3800 = vmatprep.subr.bf16.mxu1 %v3947_v4 }
 0x3b9   :  { %3802 = vmatpush3.bf16.msra.mxu1 %v3801_v59 }
 0x3ba   :  { %3803 = vmatprep.subr.bf16.mxu1 %v3947_v4 }
 0x3bd   :  { %3805 = vmatpush3.bf16.msra.mxu1 %v3804_v62 }
 0x3be   :  { %3806 = vmatprep.subr.bf16.mxu1 %v3947_v4 }
 0x3c1   :  { %3808 = vmatpush3.bf16.msra.mxu1 %v3807_v49 }
 0x3c2   :  { %3809 = vmatprep.subr.bf16.mxu1 %v3947_v4 }
 0x3c5   :  { %3811 = vmatpush3.bf16.msra.mxu1 %v3810_v8 }
 0x3c6   :  { %3812 = vmatprep.subr.bf16.mxu1 %v3947_v4 }
 0x3c9   :  { %3814 = vmatpush3.bf16.msra.mxu1 %v3813_v27 }
 0x3ca   :  { %3815 = vmatprep.subr.bf16.mxu1 %v3947_v4 }
 0x3cd   :  { %3817 = vmatpush3.bf16.msra.mxu1 %v3816_v9 }
 0x3ce   :  { %3818 = vmatprep.subr.bf16.mxu1 %v3947_v4 }
 0x3d0   :  { %2933 = vmatmul.mubr.f32.vlgmr.msra.gmra.mrb[14].mxu1 %v2205_v33 }
 0x3d1   :  { %2967 = vmatprep.mubr.msk.f32.mxu1 %vm3948_vm0, %v3949_v39  ;;  %3820 = vmatpush3.bf16.msra.mxu1 %v3819_v14 }
 0x3d2   :  { %3821 = vmatprep.subr.bf16.mxu1 %v3947_v4 }
 0x3d5   :  { %3823 = vmatpush3.bf16.msra.mxu1 %v3822_v37 }
 0x3d6   :  { %3824 = vmatprep.subr.bf16.mxu1 %v3947_v4 }
 0x3d9   :  { %3826 = vmatpush3.bf16.msra.mxu1 %v3825_v16 }
 0x3da   :  { %3827 = vmatprep.subr.bf16.mxu1 %v3947_v4 }
 0x3dd   :  { %3829 = vmatpush3.bf16.msra.mxu1 %v3828_v18 }
 0x3de   :  { %3830 = vmatprep.subr.bf16.mxu1 %v3947_v4 }
 0x3e1   :  { %3832 = vmatpush3.bf16.msra.mxu1 %v3831_v20 }
 0x3e2   :  { %3833 = vmatprep.subr.bf16.mxu1 %v3947_v4 }
 0x3e5   :  { %3835 = vmatpush3.bf16.msra.mxu1 %v3834_v22 }
 0x3e6   :  { %3836 = vmatprep.subr.bf16.mxu1 %v3947_v4 }
 0x3e9   :  { %3838 = vmatpush3.bf16.msra.mxu1 %v3837_v24 }
 0x3ea   :  { %3839 = vmatprep.subr.bf16.mxu1 %v3947_v4  ;;  %v2496_v4 = vld [vmem:[%s6599_s8] ss:$0 sm:$0xff] }
 0x3ed   :  { %3841 = vmatpush3.bf16.msra.mxu1 %v3840_v28 }
 0x483   :  { %v2295_v29 = vpop.f32.mrb[12].mxu1 }
 0x484   :  { %v2899_v30 = vpop.f32.mrb[13].mxu1  ;;  %v2296_v38 = vadd.f32 %v2496_v4, %v2295_v29 }
 0x4a3   :  { %v2388_v34 = vpop.f32.mrb[14].mxu1 }
 0x4a4   :  { %v2389_v35 = vadd.f32 %v2497_v31, %v2388_v34  ;;  %v2934_v36 = vpop.f32.mrb[15].mxu1 }
 0x4a6   :  { %2968 = vmatmul.mubr.f32.vlgmr.msra.gmra.mrb[16].mxu1 %v2389_v35 }
 0x579   :  { %v2474_v39 = vpop.f32.mrb[16].mxu1 }
 0x57a   :  { %v2478_v42 = vadd.f32 %v2474_v39, %v2296_v38  ;;  %v2969_v44 = vpop.f32.mrb[17].mxu1 }
 0x57c   :  { %v2486_v45 = vadd.f32 %v2498_v40, %v2478_v42 }
 0x57e   :  { %2487 = vst [vmem:[%s6604_s13] sm:$0x3] %v2486_v45 }
 0x57f   :  { %2492 = vsyncpa [#allocation3], 1 }
 0x580   :  { %2493 = vsyncpa [#allocation5], 1 }

</bundles_post_ra>
